<compile_context>
chip_gen: v6e
topology: v6e:2x2x1
jax: 0.10.0
libtpu: 0.0.40
codegen_flags: <defaults>
</compile_context>

<pallas_src>
import functools

import jax
import jax.numpy as jnp
import numpy as np
from jax.experimental import pallas as pl
from jax.experimental.pallas import tpu as pltpu

# ----------------------------- configuration -------------------------------
LAST_PLANES = 16
IN_PLANES = 8
OUT_PLANES = 8
DENSE_DEPTH = 4
FEATURE_SIZE = 8          # H == W == feature_size (reflect pad needs >= PAD + 2)
BATCH = 2
EPS = 1e-5

K_MAX = 7                 # largest depthwise kernel; 3x3 / 5x5 are zero-padded into 7x7
PAD = (K_MAX - 1) // 2
NUM_BRANCHES = 12                                   # 3 RiRs x 4 SEBs
C_UNIFY = 2 * OUT_PLANES + DENSE_DEPTH              # 20
C_MID = NUM_BRANCHES * IN_PLANES                    # 96  (stacked bottleneck width)
OC_PER_RIR = (OUT_PLANES + DENSE_DEPTH, OUT_PLANES, OUT_PLANES, OUT_PLANES + DENSE_DEPTH)
C_STACK = 3 * sum(OC_PER_RIR)                       # 120 (stacked SEB output width)
C_OUT = 2 * OUT_PLANES + 4 * DENSE_DEPTH            # 32
CP = 128                                            # lane-padded width for every stage
_INV_SQRT2 = 0.7071067811865476

# packed weight-slab row offsets (all multiples of 8 for aligned static slices)
ROWS_WU, ROWS_W1, ROWS_WD, ROWS_W2, ROWS_S1, ROWS_S2 = 16, CP, 56, CP, CP, CP
OFF_WU = 0
OFF_W1 = OFF_WU + ROWS_WU        # 16
OFF_WD = OFF_W1 + ROWS_W1        # 144
OFF_W2 = OFF_WD + ROWS_WD        # 200
OFF_S1 = OFF_W2 + ROWS_W2        # 328
OFF_S2 = OFF_S1 + ROWS_S1        # 456
WMAT_ROWS = OFF_S2 + ROWS_S2     # 584

# vector-slab row indices
(V_BU, V_GU, V_BEU,
 V_B1, V_G1, V_BE1,
 V_BDW, V_G2, V_BE2,
 V_B2, V_G3, V_BE3,
 V_SB1, V_SB2) = range(14)
VVEC_ROWS = 16


# ------------------------------- kernel helpers -----------------------------
def _erf_poly(z):
    # Abramowitz & Stegun 7.1.26, |err| <= 1.5e-7  (exact-GELU accurate at f32)
    a = jnp.abs(z)
    t = 1.0 / (1.0 + 0.3275911 * a)
    poly = t * (0.254829592 + t * (-0.284496736 + t * (1.421413741
               + t * (-1.453152027 + t * 1.061405429))))
    y = 1.0 - poly * jnp.exp(-a * a)
    return jnp.where(z < 0.0, -y, y)


def _gelu(v):
    # exact GELU (PyTorch nn.GELU default), erf via polynomial (exp is on the EUP)
    return 0.5 * v * (1.0 + _erf_poly(v * _INV_SQRT2))


def _instance_norm(y, gamma, beta):
    # y: (N, HW, CP); per-instance, per-channel stats over HW; centered two-pass variance
    mu = jnp.mean(y, axis=1, keepdims=True)
    yc = y - mu
    var = jnp.mean(yc * yc, axis=1, keepdims=True)
    return yc * jax.lax.rsqrt(var + EPS) * gamma + beta


# --------------------------------- kernel -----------------------------------
def fused_basic_block_kernel(x_ref, w_ref, v_ref, r_ref, o_ref, *, H, W):
    n = x_ref.shape[0]
    hw = H * W
    rows = n * hw
    V = v_ref[...]                                                    # (16, 128)

    def pw(y, w, b):
        # lane-dense pointwise conv: (N*HW, 128) @ (128, 128) on the MXU
        z = jnp.dot(y.reshape(rows, CP), w, preferred_element_type=jnp.float32) + b
        return z.reshape(n, hw, CP)

    # ---- NCHW -> pixel rows (wrapper transpose folded into two tiny 2D transposes) ---
    xs = [jnp.transpose(x_ref[i], (1, 0)) for i in range(n)]          # n x (HW, Cin)
    x = jnp.concatenate(xs, axis=0)                                   # (N*HW, Cin)

    # ---- unify: 1x1 conv + IN ---------------------------------------------------------
    xu = jnp.dot(x, w_ref[OFF_WU:OFF_WU + ROWS_WU, :],
                 preferred_element_type=jnp.float32) + V[V_BU]
    xu = _instance_norm(xu.reshape(n, hw, CP), V[V_GU], V[V_BEU])     # (N, HW, 128)

    # ---- pw1 (12 branches stacked along Cout) + IN + GELU -------------------------------
    h = _gelu(_instance_norm(pw(xu, w_ref[OFF_W1:OFF_W1 + ROWS_W1, :], V[V_B1]),
                             V[V_G1], V[V_BE1]))                      # (N, HW, 128)

    # ---- depthwise 7x7 (3/5 zero-padded), reflect halo built in-kernel ------------------
    t = h.reshape(n, H, W, CP)
    tv = jnp.concatenate(
        [t[:, PAD - i:PAD - i + 1] for i in range(PAD)] + [t] +
        [t[:, H - 2 - i:H - 1 - i] for i in range(PAD)], axis=1)      # (N, H+2p, W, 128)
    xp = jnp.concatenate(
        [tv[:, :, PAD - i:PAD - i + 1] for i in range(PAD)] + [tv] +
        [tv[:, :, W - 2 - i:W - 1 - i] for i in range(PAD)], axis=2)  # (N, H+2p, W+2p, 128)

    # hoist the misaligned W-window extraction out of the tap loop (6 relayouts, not 42);
    # dy slices below are leading-dim offsets only.
    cols = [xp[:, :, dx:dx + W, :] for dx in range(K_MAX)]            # 7 x (N, H+2p, W, 128)
    acc = jnp.zeros((n, H, W, CP), jnp.float32)
    for dx in range(K_MAX):
        col = cols[dx]
        for dy in range(K_MAX):
            acc = acc + col[:, dy:dy + H] * w_ref[OFF_WD + dy * K_MAX + dx, :]
    h = acc.reshape(n, hw, CP) + V[V_BDW]
    h = _gelu(_instance_norm(h, V[V_G2], V[V_BE2]))                   # (N, HW, 128)

    # ---- pw2 (block-diagonal stack over branches) + IN ----------------------------------
    h3 = _instance_norm(pw(h, w_ref[OFF_W2:OFF_W2 + ROWS_W2, :], V[V_B2]),
                        V[V_G3], V[V_BE3])                            # (N, HW, 128)

    # ---- squeeze-excitation gates for all 12 branches / both instances ------------------
    s = jnp.mean(h3, axis=1)                                          # (N, 128) global avg
    e = _gelu(jnp.dot(s, w_ref[OFF_S1:OFF_S1 + ROWS_S1, :],
                      preferred_element_type=jnp.float32) + V[V_SB1])
    z = jnp.dot(e, w_ref[OFF_S2:OFF_S2 + ROWS_S2, :],
                preferred_element_type=jnp.float32) + V[V_SB2]
    gate = 1.0 / (1.0 + jnp.exp(-z))                                  # sigmoid
    seb = h3 * gate[:, None, :]                                       # (N, HW, 128)

    # ---- RiR recombination + BasicBlock concat as two precomputed 0/1 matmuls -----------
    out = (jnp.dot(seb.reshape(rows, CP), r_ref[0:CP, :],
                   preferred_element_type=jnp.float32) +
           jnp.dot(xu.reshape(rows, CP), r_ref[CP:2 * CP, :],
                   preferred_element_type=jnp.float32))               # (N*HW, 32)

    # channel-major store: (N, C_OUT, HW) -> wrapper only reshapes (no transpose kernel)
    out3 = out.reshape(n, hw, C_OUT)
    for i in range(n):
        o_ref[i] = jnp.transpose(out3[i], (1, 0))                     # (C_OUT, HW)


# ----------------------------- pallas wrapper --------------------------------
def basic_block_forward(x_nchw, pk):
    n, cin, h, w = x_nchw.shape
    assert h >= PAD + 2 and w >= PAD + 2, "reflect pad needs H, W >= PAD + 2"
    x3 = x_nchw.reshape(n, cin, h * w)            # contiguous reshape; no data movement
    vspec = pl.BlockSpec(memory_space=pltpu.MemorySpace.VMEM)
    out = pl.pallas_call(
        functools.partial(fused_basic_block_kernel, H=h, W=w),
        out_shape=jax.ShapeDtypeStruct((n, C_OUT, h * w), jnp.float32),
        in_specs=[vspec] * 4,
        out_specs=vspec,
        compiler_params=pltpu.CompilerParams(vmem_limit_bytes=32 * 1024 * 1024),
    )(x3, pk["wmat"], pk["vvec"], pk["rmat"])
    return out.reshape(n, C_OUT, h, w)            # contiguous reshape; no data movement


# ----------------------------- parameter init --------------------------------
def _normal(key, shape, scale):
    return (scale * jax.random.normal(key, shape, dtype=jnp.float32)).astype(jnp.float32)


def init_seb(key, lp, ip, oc, k):
    ks = jax.random.split(key, 8)
    return dict(
        pw1_w=_normal(ks[0], (lp, ip), 1.0 / np.sqrt(lp)),
        pw1_b=_normal(ks[1], (1, ip), 0.02),
        in1_g=jnp.ones((1, ip), jnp.float32), in1_b=jnp.zeros((1, ip), jnp.float32),
        dw_w=_normal(ks[2], (k * k, ip), 1.0 / np.sqrt(k * k)),
        dw_b=_normal(ks[3], (1, ip), 0.02),
        in2_g=jnp.ones((1, ip), jnp.float32), in2_b=jnp.zeros((1, ip), jnp.float32),
        pw2_w=_normal(ks[4], (ip, oc), 1.0 / np.sqrt(ip)),
        pw2_b=_normal(ks[5], (1, oc), 0.02),
        in3_g=jnp.ones((1, oc), jnp.float32), in3_b=jnp.zeros((1, oc), jnp.float32),
        se_w1=_normal(ks[6], (oc, ip), 1.0 / np.sqrt(oc)),
        se_b1=jnp.zeros((1, ip), jnp.float32),
        se_w2=_normal(ks[7], (ip, oc), 1.0 / np.sqrt(ip)),
        se_b2=jnp.zeros((1, oc), jnp.float32),
    )


def init_resnet_init(key, lp, ip, op, dd, k):
    ks = jax.random.split(key, 4)
    return dict(
        residual=init_seb(ks[0], lp, ip, op + dd, k),
        transient=init_seb(ks[1], lp, ip, op, k),
        residual_across=init_seb(ks[2], lp, ip, op, k),
        transient_across=init_seb(ks[3], lp, ip, op + dd, k),
    )


def init_basic_block(key):
    ks = jax.random.split(key, 4)
    uc = C_UNIFY
    rir_lp = OUT_PLANES + DENSE_DEPTH      # is_unify=True branch
    return dict(
        unify=dict(
            w=_normal(ks[0], (LAST_PLANES, uc), 1.0 / np.sqrt(LAST_PLANES)),
            b=jnp.zeros((1, uc), jnp.float32),
            g=jnp.ones((1, uc), jnp.float32),
            be=jnp.zeros((1, uc), jnp.float32),
        ),
        rir_3=init_resnet_init(ks[1], rir_lp, IN_PLANES, OUT_PLANES, DENSE_DEPTH, 3),
        rir_5=init_resnet_init(ks[2], rir_lp, IN_PLANES, OUT_PLANES, DENSE_DEPTH, 5),
        rir_7=init_resnet_init(ks[3], rir_lp, IN_PLANES, OUT_PLANES, DENSE_DEPTH, 7),
    )


# --------------------------- weight packing (once, outside jit) --------------
def pack_params(p):
    """Pack all weights into 3 lane-dense slabs:
       wmat (584,128) matrices, vvec (16,128) bias/affine rows, rmat (256,32) recombination."""
    d, dd, ip, op = OUT_PLANES, DENSE_DEPTH, IN_PLANES, OUT_PLANES
    # xu channels feeding x_residual = cat(xu[:, :d], xu[:, 2d:]) / x_transient = xu[:, d:]
    res_idx = np.array(list(range(d)) + list(range(2 * d, 2 * d + dd)))
    tr_idx = np.array(list(range(d, 2 * d + dd)))

    branches = []
    for kk in (3, 5, 7):
        rp = p[f"rir_{kk}"]
        for name in ("residual", "residual_across", "transient", "transient_across"):
            branches.append((rp[name], kk))

    ocs = [int(br["pw2_w"].shape[1]) for br, _ in branches]
    off = np.concatenate([[0], np.cumsum(ocs)]).astype(int)          # stacked SEB offsets

    Wu = np.zeros((ROWS_WU, CP), np.float32)
    W1 = np.zeros((ROWS_W1, CP), np.float32)
    WD = np.zeros((ROWS_WD, CP), np.float32)
    W2 = np.zeros((ROWS_W2, CP), np.float32)
    S1 = np.zeros((ROWS_S1, CP), np.float32)
    S2 = np.zeros((ROWS_S2, CP), np.float32)
    V = np.zeros((VVEC_ROWS, CP), np.float32)
    R = np.zeros((CP, C_OUT), np.float32)
    Ru = np.zeros((CP, C_OUT), np.float32)

    u = p["unify"]
    Wu[:LAST_PLANES, :C_UNIFY] = np.asarray(u["w"])
    V[V_BU, :C_UNIFY] = np.asarray(u["b"])[0]
    V[V_GU, :C_UNIFY] = np.asarray(u["g"])[0]
    V[V_BEU, :C_UNIFY] = np.asarray(u["be"])[0]

    for b, (br, k) in enumerate(branches):
        ci = slice(b * ip, (b + 1) * ip)
        co = slice(int(off[b]), int(off[b + 1]))
        src = res_idx if b % 4 < 2 else tr_idx   # residual/residual_across eat x_residual

        W1[src, ci] = np.asarray(br["pw1_w"])
        V[V_B1, ci] = np.asarray(br["pw1_b"])[0]
        V[V_G1, ci] = np.asarray(br["in1_g"])[0]
        V[V_BE1, ci] = np.asarray(br["in1_b"])[0]

        o = (K_MAX - k) // 2                     # center the kxk kernel inside 7x7
        w7 = np.zeros((K_MAX, K_MAX, ip), np.float32)
        w7[o:o + k, o:o + k, :] = np.asarray(br["dw_w"]).reshape(k, k, ip)
        WD[:K_MAX * K_MAX, ci] = w7.reshape(K_MAX * K_MAX, ip)
        V[V_BDW, ci] = np.asarray(br["dw_b"])[0]
        V[V_G2, ci] = np.asarray(br["in2_g"])[0]
        V[V_BE2, ci] = np.asarray(br["in2_b"])[0]

        W2[ci, co] = np.asarray(br["pw2_w"])
        V[V_B2, co] = np.asarray(br["pw2_b"])[0]
        V[V_G3, co] = np.asarray(br["in3_g"])[0]
        V[V_BE3, co] = np.asarray(br["in3_b"])[0]

        S1[co, ci] = np.asarray(br["se_w1"])
        V[V_SB1, ci] = np.asarray(br["se_b1"])[0]
        S2[ci, co] = np.asarray(br["se_w2"])
        V[V_SB2, co] = np.asarray(br["se_b2"])[0]

    # recombination 0/1 matmuls:  out(N*HW,32) = seb @ R + xu @ Ru
    for ki in range(3):
        b_res, b_ra, b_tt, b_ta = (int(off[4 * ki + j]) for j in range(4))
        for c in range(op):
            R[b_res + c, c] += 1.0               # residual         -> out[:, :op]
            R[b_ta + c, c] += 1.0                # transient_across -> out[:, :op]
            R[b_ra + c, op + c] += 1.0           # residual_across  -> out[:, op:2op]
            R[b_tt + c, op + c] += 1.0           # transient        -> out[:, op:2op]
        for j in range(dd):
            R[b_res + op + j, 2 * op + dd + ki * dd + j] += 1.0
            R[b_ta + op + j, 2 * op + dd + ki * dd + j] += 1.0
    for c in range(op):
        Ru[c, c] = 1.0                           # xu[:, :op]          -> out[:, :op]
    for j in range(dd):
        Ru[2 * op + j, 2 * op + j] = 1.0         # xu[:, 2op:2op+dd]   -> out[:, 2op:2op+dd]

    j_ = jnp.asarray
    return dict(
        wmat=j_(np.concatenate([Wu, W1, WD, W2, S1, S2], axis=0)),   # (584, 128)
        vvec=j_(V),                                                  # (16, 128)
        rmat=j_(np.concatenate([R, Ru], axis=0)),                    # (256, 32)
    )


# -------------------- pure-JAX reference (per-branch, unfused) ----------------
def _ref_in(y, g, b):
    m = jnp.mean(y, axis=1, keepdims=True)
    v = jnp.mean((y - m) ** 2, axis=1, keepdims=True)
    return (y - m) / jnp.sqrt(v + EPS) * g + b


def _ref_gelu(v):
    return 0.5 * v * (1.0 + jax.lax.erf(v * _INV_SQRT2))


def _ref_seb(x, p, k, Hs, Ws):
    N_ = x.shape[0]
    h = _ref_gelu(_ref_in(x @ p["pw1_w"] + p["pw1_b"], p["in1_g"], p["in1_b"]))
    ip = h.shape[-1]
    pad = (k - 1) // 2
    hs = jnp.pad(h.reshape(N_, Hs, Ws, ip),
                 ((0, 0), (pad, pad), (pad, pad), (0, 0)), mode="reflect")
    acc = jnp.zeros((N_, Hs, Ws, ip), jnp.float32)
    for dy in range(k):
        for dx in range(k):
            acc = acc + hs[:, dy:dy + Hs, dx:dx + Ws, :] * p["dw_w"][dy * k + dx]
    h = acc.reshape(N_, Hs * Ws, ip) + p["dw_b"]
    h = _ref_gelu(_ref_in(h, p["in2_g"], p["in2_b"]))
    h = _ref_in(h @ p["pw2_w"] + p["pw2_b"], p["in3_g"], p["in3_b"])
    s = jnp.mean(h, axis=1)
    e = _ref_gelu(s @ p["se_w1"] + p["se_b1"])
    gt = jax.nn.sigmoid(e @ p["se_w2"] + p["se_b2"])
    return h * gt[:, None, :]


def _ref_rir(xr, xt, p, k, Hs, Ws):
    rr = _ref_seb(xr, p["residual"], k, Hs, Ws)
    rt = _ref_seb(xr, p["residual_across"], k, Hs, Ws)
    tt = _ref_seb(xt, p["transient"], k, Hs, Ws)
    tr = _ref_seb(xt, p["transient_across"], k, Hs, Ws)
    return rr + tr, rt + tt


def ref_forward(x_nchw, params):
    x = jnp.transpose(x_nchw, (0, 2, 3, 1))
    N_, Hs, Ws, C_ = x.shape
    d = OUT_PLANES
    x2 = x.reshape(N_, Hs * Ws, C_)
    u = params["unify"]
    x2 = _ref_in(x2 @ u["w"] + u["b"], u["g"], u["be"])
    xr = jnp.concatenate([x2[..., :d], x2[..., 2 * d:]], -1)
    xt = x2[..., d:]
    r3, t3 = _ref_rir(xr, xt, params["rir_3"], 3, Hs, Ws)
    r5, t5 = _ref_rir(xr, xt, params["rir_5"], 5, Hs, Ws)
    r7, t7 = _ref_rir(xr, xt, params["rir_7"], 7, Hs, Ws)
    out = jnp.concatenate([
        x2[..., :d] + r3[..., :d] + r5[..., :d] + r7[..., :d],
        t3 + t5 + t7,
        x2[..., 2 * d:],
        r3[..., d:], r5[..., d:], r7[..., d:]], -1)
    return jnp.transpose(out.reshape(N_, Hs, Ws, out.shape[-1]), (0, 3, 1, 2))


# --------------------------------- main --------------------------------------
if __name__ == "__main__":
    root_key = jax.random.PRNGKey(0)
    pkey, xkey = jax.random.split(root_key)

    params = init_basic_block(pkey)
    packed = pack_params(params)                  # one-time weight packing (outside jit)
    x = jax.random.normal(
        xkey, (BATCH, LAST_PLANES, FEATURE_SIZE, FEATURE_SIZE), dtype=jnp.float32)

    fwd = jax.jit(basic_block_forward)
    out = jax.block_until_ready(fwd(x, packed))

    assert out.shape == (BATCH, C_OUT, FEATURE_SIZE, FEATURE_SIZE), out.shape
    assert bool(jnp.all(jnp.isfinite(out)))

    # correctness check against an unfused pure-JAX reference of the original module
    with jax.default_matmul_precision("highest"):
        ref = jax.block_until_ready(jax.jit(ref_forward)(x, params))
    rel_err = float(jnp.max(jnp.abs(out - ref)) / (jnp.max(jnp.abs(ref)) + 1e-6))
    assert rel_err < 2e-2, f"mismatch vs reference: rel-max-err={rel_err:.3e}"

    print("KERNEL_OK")
</pallas_src>

<mosaic_0001>
module attributes {stable_mosaic.version = 11 : i64} {
  func.func @fused_basic_block_kernel(%arg0: memref<2x16x64xf32, #tpu.memory_space<vmem>>, %arg1: memref<584x128xf32, #tpu.memory_space<vmem>>, %arg2: memref<16x128xf32, #tpu.memory_space<vmem>>, %arg3: memref<256x32xf32, #tpu.memory_space<vmem>>, %arg4: memref<2x32x64xf32, #tpu.memory_space<vmem>>) attributes {dimension_semantics = [], scalar_prefetch = 0 : i64, scratch_operands = 0 : i64, tpu.core_type = #tpu.core_type<tc>} {
    %c0 = arith.constant 0 : index
    %c0_0 = arith.constant 0 : index
    %0 = vector.load %arg2[%c0, %c0_0] : memref<16x128xf32, #tpu.memory_space<vmem>>, vector<16x128xf32>
    %c0_1 = arith.constant 0 : index
    %c0_2 = arith.constant 0 : index
    %c0_3 = arith.constant 0 : index
    %1 = vector.load %arg0[%c0_1, %c0_2, %c0_3] : memref<2x16x64xf32, #tpu.memory_space<vmem>>, vector<1x16x64xf32>
    %2 = vector.shape_cast %1 : vector<1x16x64xf32> to vector<16x64xf32>
    %3 = tpu.transpose %2, [1, 0] : vector<16x64xf32> -> vector<64x16xf32>
    %c1 = arith.constant 1 : index
    %c0_4 = arith.constant 0 : index
    %c0_5 = arith.constant 0 : index
    %4 = vector.load %arg0[%c1, %c0_4, %c0_5] : memref<2x16x64xf32, #tpu.memory_space<vmem>>, vector<1x16x64xf32>
    %5 = vector.shape_cast %4 : vector<1x16x64xf32> to vector<16x64xf32>
    %6 = tpu.transpose %5, [1, 0] : vector<16x64xf32> -> vector<64x16xf32>
    %7 = tpu.concatenate %3, %6 in 0 : vector<64x16xf32>, vector<64x16xf32> -> vector<128x16xf32>
    %c0_6 = arith.constant 0 : index
    %c0_7 = arith.constant 0 : index
    %8 = vector.load %arg1[%c0_6, %c0_7] : memref<584x128xf32, #tpu.memory_space<vmem>>, vector<16x128xf32>
    %cst = arith.constant dense<0.000000e+00> : vector<128x128xf32>
    %9 = tpu.matmul %7, %8, %cst {dimension_numbers = #tpu.dot_dimension_numbers<[1], [0], [0], [1], [0, 0, 1, 1], [], []>} : vector<128x16xf32>, vector<16x128xf32>, vector<128x128xf32> -> vector<128x128xf32>
    %10 = vector.extract_strided_slice %0 {offsets = [0, 0], sizes = [1, 128], strides = [1, 1]} : vector<16x128xf32> to vector<1x128xf32>
    %11 = vector.shape_cast %10 : vector<1x128xf32> to vector<128xf32>
    %12 = vector.shape_cast %11 : vector<128xf32> to vector<1x128xf32>
    %13 = vector.broadcast %12 : vector<1x128xf32> to vector<128x128xf32>
    %14 = arith.addf %9, %13 : vector<128x128xf32>
    %15 = vector.shape_cast %14 : vector<128x128xf32> to vector<2x64x128xf32>
    %16 = vector.extract_strided_slice %0 {offsets = [1, 0], sizes = [1, 128], strides = [1, 1]} : vector<16x128xf32> to vector<1x128xf32>
    %17 = vector.shape_cast %16 : vector<1x128xf32> to vector<128xf32>
    %18 = vector.extract_strided_slice %0 {offsets = [2, 0], sizes = [1, 128], strides = [1, 1]} : vector<16x128xf32> to vector<1x128xf32>
    %19 = vector.shape_cast %18 : vector<1x128xf32> to vector<128xf32>
    %cst_8 = arith.constant dense<0.000000e+00> : vector<2x128xf32>
    %20 = vector.multi_reduction <add>, %15, %cst_8 [1] : vector<2x64x128xf32> to vector<2x128xf32>
    %21 = vector.shape_cast %20 : vector<2x128xf32> to vector<2x1x128xf32>
    %cst_9 = arith.constant 6.400000e+01 : f32
    %22 = vector.broadcast %cst_9 : f32 to vector<2x1x128xf32>
    %23 = arith.divf %21, %22 : vector<2x1x128xf32>
    %24 = vector.broadcast %23 : vector<2x1x128xf32> to vector<2x64x128xf32>
    %25 = arith.subf %15, %24 : vector<2x64x128xf32>
    %26 = arith.mulf %25, %25 : vector<2x64x128xf32>
    %cst_10 = arith.constant dense<0.000000e+00> : vector<2x128xf32>
    %27 = vector.multi_reduction <add>, %26, %cst_10 [1] : vector<2x64x128xf32> to vector<2x128xf32>
    %28 = vector.shape_cast %27 : vector<2x128xf32> to vector<2x1x128xf32>
    %cst_11 = arith.constant 6.400000e+01 : f32
    %29 = vector.broadcast %cst_11 : f32 to vector<2x1x128xf32>
    %30 = arith.divf %28, %29 : vector<2x1x128xf32>
    %cst_12 = arith.constant 9.99999974E-6 : f32
    %31 = vector.broadcast %cst_12 : f32 to vector<2x1x128xf32>
    %32 = arith.addf %30, %31 : vector<2x1x128xf32>
    %33 = math.rsqrt %32 : vector<2x1x128xf32>
    %34 = vector.broadcast %33 : vector<2x1x128xf32> to vector<2x64x128xf32>
    %35 = arith.mulf %25, %34 : vector<2x64x128xf32>
    %36 = vector.shape_cast %17 : vector<128xf32> to vector<1x1x128xf32>
    %37 = vector.broadcast %36 : vector<1x1x128xf32> to vector<2x64x128xf32>
    %38 = arith.mulf %35, %37 : vector<2x64x128xf32>
    %39 = vector.shape_cast %19 : vector<128xf32> to vector<1x1x128xf32>
    %40 = vector.broadcast %39 : vector<1x1x128xf32> to vector<2x64x128xf32>
    %41 = arith.addf %38, %40 : vector<2x64x128xf32>
    %c16 = arith.constant 16 : index
    %c0_13 = arith.constant 0 : index
    %42 = vector.load %arg1[%c16, %c0_13] : memref<584x128xf32, #tpu.memory_space<vmem>>, vector<128x128xf32>
    %43 = vector.extract_strided_slice %0 {offsets = [3, 0], sizes = [1, 128], strides = [1, 1]} : vector<16x128xf32> to vector<1x128xf32>
    %44 = vector.shape_cast %43 : vector<1x128xf32> to vector<128xf32>
    %45 = vector.shape_cast %41 : vector<2x64x128xf32> to vector<128x128xf32>
    %cst_14 = arith.constant dense<0.000000e+00> : vector<128x128xf32>
    %46 = tpu.matmul %45, %42, %cst_14 {dimension_numbers = #tpu.dot_dimension_numbers<[1], [0], [0], [1], [0, 0, 1, 1], [], []>} : vector<128x128xf32>, vector<128x128xf32>, vector<128x128xf32> -> vector<128x128xf32>
    %47 = vector.shape_cast %44 : vector<128xf32> to vector<1x128xf32>
    %48 = vector.broadcast %47 : vector<1x128xf32> to vector<128x128xf32>
    %49 = arith.addf %46, %48 : vector<128x128xf32>
    %50 = vector.shape_cast %49 : vector<128x128xf32> to vector<2x64x128xf32>
    %51 = vector.extract_strided_slice %0 {offsets = [4, 0], sizes = [1, 128], strides = [1, 1]} : vector<16x128xf32> to vector<1x128xf32>
    %52 = vector.shape_cast %51 : vector<1x128xf32> to vector<128xf32>
    %53 = vector.extract_strided_slice %0 {offsets = [5, 0], sizes = [1, 128], strides = [1, 1]} : vector<16x128xf32> to vector<1x128xf32>
    %54 = vector.shape_cast %53 : vector<1x128xf32> to vector<128xf32>
    %cst_15 = arith.constant dense<0.000000e+00> : vector<2x128xf32>
    %55 = vector.multi_reduction <add>, %50, %cst_15 [1] : vector<2x64x128xf32> to vector<2x128xf32>
    %56 = vector.shape_cast %55 : vector<2x128xf32> to vector<2x1x128xf32>
    %cst_16 = arith.constant 6.400000e+01 : f32
    %57 = vector.broadcast %cst_16 : f32 to vector<2x1x128xf32>
    %58 = arith.divf %56, %57 : vector<2x1x128xf32>
    %59 = vector.broadcast %58 : vector<2x1x128xf32> to vector<2x64x128xf32>
    %60 = arith.subf %50, %59 : vector<2x64x128xf32>
    %61 = arith.mulf %60, %60 : vector<2x64x128xf32>
    %cst_17 = arith.constant dense<0.000000e+00> : vector<2x128xf32>
    %62 = vector.multi_reduction <add>, %61, %cst_17 [1] : vector<2x64x128xf32> to vector<2x128xf32>
    %63 = vector.shape_cast %62 : vector<2x128xf32> to vector<2x1x128xf32>
    %cst_18 = arith.constant 6.400000e+01 : f32
    %64 = vector.broadcast %cst_18 : f32 to vector<2x1x128xf32>
    %65 = arith.divf %63, %64 : vector<2x1x128xf32>
    %cst_19 = arith.constant 9.99999974E-6 : f32
    %66 = vector.broadcast %cst_19 : f32 to vector<2x1x128xf32>
    %67 = arith.addf %65, %66 : vector<2x1x128xf32>
    %68 = math.rsqrt %67 : vector<2x1x128xf32>
    %69 = vector.broadcast %68 : vector<2x1x128xf32> to vector<2x64x128xf32>
    %70 = arith.mulf %60, %69 : vector<2x64x128xf32>
    %71 = vector.shape_cast %52 : vector<128xf32> to vector<1x1x128xf32>
    %72 = vector.broadcast %71 : vector<1x1x128xf32> to vector<2x64x128xf32>
    %73 = arith.mulf %70, %72 : vector<2x64x128xf32>
    %74 = vector.shape_cast %54 : vector<128xf32> to vector<1x1x128xf32>
    %75 = vector.broadcast %74 : vector<1x1x128xf32> to vector<2x64x128xf32>
    %76 = arith.addf %73, %75 : vector<2x64x128xf32>
    %cst_20 = arith.constant 5.000000e-01 : f32
    %77 = vector.broadcast %cst_20 : f32 to vector<2x64x128xf32>
    %78 = arith.mulf %77, %76 : vector<2x64x128xf32>
    %cst_21 = arith.constant 0.707106769 : f32
    %79 = vector.broadcast %cst_21 : f32 to vector<2x64x128xf32>
    %80 = arith.mulf %76, %79 : vector<2x64x128xf32>
    %81 = math.absf %80 : vector<2x64x128xf32>
    %cst_22 = arith.constant 0.327591091 : f32
    %82 = vector.broadcast %cst_22 : f32 to vector<2x64x128xf32>
    %83 = arith.mulf %82, %81 : vector<2x64x128xf32>
    %cst_23 = arith.constant 1.000000e+00 : f32
    %84 = vector.broadcast %cst_23 : f32 to vector<2x64x128xf32>
    %85 = arith.addf %84, %83 : vector<2x64x128xf32>
    %cst_24 = arith.constant 1.000000e+00 : f32
    %86 = vector.broadcast %cst_24 : f32 to vector<2x64x128xf32>
    %87 = arith.divf %86, %85 : vector<2x64x128xf32>
    %cst_25 = arith.constant 1.06140542 : f32
    %88 = vector.broadcast %cst_25 : f32 to vector<2x64x128xf32>
    %89 = arith.mulf %87, %88 : vector<2x64x128xf32>
    %cst_26 = arith.constant -1.45315206 : f32
    %90 = vector.broadcast %cst_26 : f32 to vector<2x64x128xf32>
    %91 = arith.addf %90, %89 : vector<2x64x128xf32>
    %92 = arith.mulf %87, %91 : vector<2x64x128xf32>
    %cst_27 = arith.constant 1.42141378 : f32
    %93 = vector.broadcast %cst_27 : f32 to vector<2x64x128xf32>
    %94 = arith.addf %93, %92 : vector<2x64x128xf32>
    %95 = arith.mulf %87, %94 : vector<2x64x128xf32>
    %cst_28 = arith.constant -0.284496725 : f32
    %96 = vector.broadcast %cst_28 : f32 to vector<2x64x128xf32>
    %97 = arith.addf %96, %95 : vector<2x64x128xf32>
    %98 = arith.mulf %87, %97 : vector<2x64x128xf32>
    %cst_29 = arith.constant 0.254829586 : f32
    %99 = vector.broadcast %cst_29 : f32 to vector<2x64x128xf32>
    %100 = arith.addf %99, %98 : vector<2x64x128xf32>
    %101 = arith.mulf %87, %100 : vector<2x64x128xf32>
    %cst_30 = arith.constant 0.000000e+00 : f32
    %102 = vector.broadcast %cst_30 : f32 to vector<2x64x128xf32>
    %103 = arith.subf %102, %81 : vector<2x64x128xf32>
    %104 = arith.mulf %103, %81 : vector<2x64x128xf32>
    %105 = math.exp %104 : vector<2x64x128xf32>
    %106 = arith.mulf %101, %105 : vector<2x64x128xf32>
    %cst_31 = arith.constant 1.000000e+00 : f32
    %107 = vector.broadcast %cst_31 : f32 to vector<2x64x128xf32>
    %108 = arith.subf %107, %106 : vector<2x64x128xf32>
    %cst_32 = arith.constant 0.000000e+00 : f32
    %109 = vector.broadcast %cst_32 : f32 to vector<2x64x128xf32>
    %110 = arith.cmpf olt, %80, %109 : vector<2x64x128xf32>
    %cst_33 = arith.constant 0.000000e+00 : f32
    %111 = vector.broadcast %cst_33 : f32 to vector<2x64x128xf32>
    %112 = arith.subf %111, %108 : vector<2x64x128xf32>
    %113 = arith.select %110, %112, %108 : vector<2x64x128xi1>, vector<2x64x128xf32>
    %cst_34 = arith.constant 1.000000e+00 : f32
    %114 = vector.broadcast %cst_34 : f32 to vector<2x64x128xf32>
    %115 = arith.addf %114, %113 : vector<2x64x128xf32>
    %116 = arith.mulf %78, %115 : vector<2x64x128xf32>
    %117 = vector.shape_cast %116 : vector<2x64x128xf32> to vector<2x8x8x128xf32>
    %118 = vector.extract_strided_slice %117 {offsets = [0, 3, 0, 0], sizes = [2, 1, 8, 128], strides = [1, 1, 1, 1]} : vector<2x8x8x128xf32> to vector<2x1x8x128xf32>
    %119 = vector.extract_strided_slice %117 {offsets = [0, 2, 0, 0], sizes = [2, 1, 8, 128], strides = [1, 1, 1, 1]} : vector<2x8x8x128xf32> to vector<2x1x8x128xf32>
    %120 = vector.extract_strided_slice %117 {offsets = [0, 1, 0, 0], sizes = [2, 1, 8, 128], strides = [1, 1, 1, 1]} : vector<2x8x8x128xf32> to vector<2x1x8x128xf32>
    %121 = vector.extract_strided_slice %117 {offsets = [0, 6, 0, 0], sizes = [2, 1, 8, 128], strides = [1, 1, 1, 1]} : vector<2x8x8x128xf32> to vector<2x1x8x128xf32>
    %122 = vector.extract_strided_slice %117 {offsets = [0, 5, 0, 0], sizes = [2, 1, 8, 128], strides = [1, 1, 1, 1]} : vector<2x8x8x128xf32> to vector<2x1x8x128xf32>
    %123 = vector.extract_strided_slice %117 {offsets = [0, 4, 0, 0], sizes = [2, 1, 8, 128], strides = [1, 1, 1, 1]} : vector<2x8x8x128xf32> to vector<2x1x8x128xf32>
    %124 = tpu.concatenate %118, %119, %120, %117, %121, %122, %123 in 1 : vector<2x1x8x128xf32>, vector<2x1x8x128xf32>, vector<2x1x8x128xf32>, vector<2x8x8x128xf32>, vector<2x1x8x128xf32>, vector<2x1x8x128xf32>, vector<2x1x8x128xf32> -> vector<2x14x8x128xf32>
    %125 = vector.extract_strided_slice %124 {offsets = [0, 0, 3, 0], sizes = [2, 14, 1, 128], strides = [1, 1, 1, 1]} : vector<2x14x8x128xf32> to vector<2x14x1x128xf32>
    %126 = vector.extract_strided_slice %124 {offsets = [0, 0, 2, 0], sizes = [2, 14, 1, 128], strides = [1, 1, 1, 1]} : vector<2x14x8x128xf32> to vector<2x14x1x128xf32>
    %127 = vector.extract_strided_slice %124 {offsets = [0, 0, 1, 0], sizes = [2, 14, 1, 128], strides = [1, 1, 1, 1]} : vector<2x14x8x128xf32> to vector<2x14x1x128xf32>
    %128 = vector.extract_strided_slice %124 {offsets = [0, 0, 6, 0], sizes = [2, 14, 1, 128], strides = [1, 1, 1, 1]} : vector<2x14x8x128xf32> to vector<2x14x1x128xf32>
    %129 = vector.extract_strided_slice %124 {offsets = [0, 0, 5, 0], sizes = [2, 14, 1, 128], strides = [1, 1, 1, 1]} : vector<2x14x8x128xf32> to vector<2x14x1x128xf32>
    %130 = vector.extract_strided_slice %124 {offsets = [0, 0, 4, 0], sizes = [2, 14, 1, 128], strides = [1, 1, 1, 1]} : vector<2x14x8x128xf32> to vector<2x14x1x128xf32>
    %131 = tpu.concatenate %125, %126, %127, %124, %128, %129, %130 in 2 : vector<2x14x1x128xf32>, vector<2x14x1x128xf32>, vector<2x14x1x128xf32>, vector<2x14x8x128xf32>, vector<2x14x1x128xf32>, vector<2x14x1x128xf32>, vector<2x14x1x128xf32> -> vector<2x14x14x128xf32>
    %132 = vector.extract_strided_slice %131 {offsets = [0, 0, 0, 0], sizes = [2, 14, 8, 128], strides = [1, 1, 1, 1]} : vector<2x14x14x128xf32> to vector<2x14x8x128xf32>
    %133 = vector.extract_strided_slice %131 {offsets = [0, 0, 1, 0], sizes = [2, 14, 8, 128], strides = [1, 1, 1, 1]} : vector<2x14x14x128xf32> to vector<2x14x8x128xf32>
    %134 = vector.extract_strided_slice %131 {offsets = [0, 0, 2, 0], sizes = [2, 14, 8, 128], strides = [1, 1, 1, 1]} : vector<2x14x14x128xf32> to vector<2x14x8x128xf32>
    %135 = vector.extract_strided_slice %131 {offsets = [0, 0, 3, 0], sizes = [2, 14, 8, 128], strides = [1, 1, 1, 1]} : vector<2x14x14x128xf32> to vector<2x14x8x128xf32>
    %136 = vector.extract_strided_slice %131 {offsets = [0, 0, 4, 0], sizes = [2, 14, 8, 128], strides = [1, 1, 1, 1]} : vector<2x14x14x128xf32> to vector<2x14x8x128xf32>
    %137 = vector.extract_strided_slice %131 {offsets = [0, 0, 5, 0], sizes = [2, 14, 8, 128], strides = [1, 1, 1, 1]} : vector<2x14x14x128xf32> to vector<2x14x8x128xf32>
    %138 = vector.extract_strided_slice %131 {offsets = [0, 0, 6, 0], sizes = [2, 14, 8, 128], strides = [1, 1, 1, 1]} : vector<2x14x14x128xf32> to vector<2x14x8x128xf32>
    %cst_35 = arith.constant 0.000000e+00 : f32
    %139 = vector.broadcast %cst_35 : f32 to vector<2x8x8x128xf32>
    %140 = vector.extract_strided_slice %132 {offsets = [0, 0, 0, 0], sizes = [2, 8, 8, 128], strides = [1, 1, 1, 1]} : vector<2x14x8x128xf32> to vector<2x8x8x128xf32>
    %c144 = arith.constant 144 : index
    %c0_36 = arith.constant 0 : index
    %141 = vector.load %arg1[%c144, %c0_36] : memref<584x128xf32, #tpu.memory_space<vmem>>, vector<1x128xf32>
    %142 = vector.shape_cast %141 : vector<1x128xf32> to vector<128xf32>
    %143 = vector.shape_cast %142 : vector<128xf32> to vector<1x1x1x128xf32>
    %144 = vector.broadcast %143 : vector<1x1x1x128xf32> to vector<2x8x8x128xf32>
    %145 = arith.mulf %140, %144 : vector<2x8x8x128xf32>
    %146 = arith.addf %139, %145 : vector<2x8x8x128xf32>
    %147 = vector.extract_strided_slice %132 {offsets = [0, 1, 0, 0], sizes = [2, 8, 8, 128], strides = [1, 1, 1, 1]} : vector<2x14x8x128xf32> to vector<2x8x8x128xf32>
    %c151 = arith.constant 151 : index
    %c0_37 = arith.constant 0 : index
    %148 = vector.load %arg1[%c151, %c0_37] : memref<584x128xf32, #tpu.memory_space<vmem>>, vector<1x128xf32>
    %149 = vector.shape_cast %148 : vector<1x128xf32> to vector<128xf32>
    %150 = vector.shape_cast %149 : vector<128xf32> to vector<1x1x1x128xf32>
    %151 = vector.broadcast %150 : vector<1x1x1x128xf32> to vector<2x8x8x128xf32>
    %152 = arith.mulf %147, %151 : vector<2x8x8x128xf32>
    %153 = arith.addf %146, %152 : vector<2x8x8x128xf32>
    %154 = vector.extract_strided_slice %132 {offsets = [0, 2, 0, 0], sizes = [2, 8, 8, 128], strides = [1, 1, 1, 1]} : vector<2x14x8x128xf32> to vector<2x8x8x128xf32>
    %c158 = arith.constant 158 : index
    %c0_38 = arith.constant 0 : index
    %155 = vector.load %arg1[%c158, %c0_38] : memref<584x128xf32, #tpu.memory_space<vmem>>, vector<1x128xf32>
    %156 = vector.shape_cast %155 : vector<1x128xf32> to vector<128xf32>
    %157 = vector.shape_cast %156 : vector<128xf32> to vector<1x1x1x128xf32>
    %158 = vector.broadcast %157 : vector<1x1x1x128xf32> to vector<2x8x8x128xf32>
    %159 = arith.mulf %154, %158 : vector<2x8x8x128xf32>
    %160 = arith.addf %153, %159 : vector<2x8x8x128xf32>
    %161 = vector.extract_strided_slice %132 {offsets = [0, 3, 0, 0], sizes = [2, 8, 8, 128], strides = [1, 1, 1, 1]} : vector<2x14x8x128xf32> to vector<2x8x8x128xf32>
    %c165 = arith.constant 165 : index
    %c0_39 = arith.constant 0 : index
    %162 = vector.load %arg1[%c165, %c0_39] : memref<584x128xf32, #tpu.memory_space<vmem>>, vector<1x128xf32>
    %163 = vector.shape_cast %162 : vector<1x128xf32> to vector<128xf32>
    %164 = vector.shape_cast %163 : vector<128xf32> to vector<1x1x1x128xf32>
    %165 = vector.broadcast %164 : vector<1x1x1x128xf32> to vector<2x8x8x128xf32>
    %166 = arith.mulf %161, %165 : vector<2x8x8x128xf32>
    %167 = arith.addf %160, %166 : vector<2x8x8x128xf32>
    %168 = vector.extract_strided_slice %132 {offsets = [0, 4, 0, 0], sizes = [2, 8, 8, 128], strides = [1, 1, 1, 1]} : vector<2x14x8x128xf32> to vector<2x8x8x128xf32>
    %c172 = arith.constant 172 : index
    %c0_40 = arith.constant 0 : index
    %169 = vector.load %arg1[%c172, %c0_40] : memref<584x128xf32, #tpu.memory_space<vmem>>, vector<1x128xf32>
    %170 = vector.shape_cast %169 : vector<1x128xf32> to vector<128xf32>
    %171 = vector.shape_cast %170 : vector<128xf32> to vector<1x1x1x128xf32>
    %172 = vector.broadcast %171 : vector<1x1x1x128xf32> to vector<2x8x8x128xf32>
    %173 = arith.mulf %168, %172 : vector<2x8x8x128xf32>
    %174 = arith.addf %167, %173 : vector<2x8x8x128xf32>
    %175 = vector.extract_strided_slice %132 {offsets = [0, 5, 0, 0], sizes = [2, 8, 8, 128], strides = [1, 1, 1, 1]} : vector<2x14x8x128xf32> to vector<2x8x8x128xf32>
    %c179 = arith.constant 179 : index
    %c0_41 = arith.constant 0 : index
    %176 = vector.load %arg1[%c179, %c0_41] : memref<584x128xf32, #tpu.memory_space<vmem>>, vector<1x128xf32>
    %177 = vector.shape_cast %176 : vector<1x128xf32> to vector<128xf32>
    %178 = vector.shape_cast %177 : vector<128xf32> to vector<1x1x1x128xf32>
    %179 = vector.broadcast %178 : vector<1x1x1x128xf32> to vector<2x8x8x128xf32>
    %180 = arith.mulf %175, %179 : vector<2x8x8x128xf32>
    %181 = arith.addf %174, %180 : vector<2x8x8x128xf32>
    %182 = vector.extract_strided_slice %132 {offsets = [0, 6, 0, 0], sizes = [2, 8, 8, 128], strides = [1, 1, 1, 1]} : vector<2x14x8x128xf32> to vector<2x8x8x128xf32>
    %c186 = arith.constant 186 : index
    %c0_42 = arith.constant 0 : index
    %183 = vector.load %arg1[%c186, %c0_42] : memref<584x128xf32, #tpu.memory_space<vmem>>, vector<1x128xf32>
    %184 = vector.shape_cast %183 : vector<1x128xf32> to vector<128xf32>
    %185 = vector.shape_cast %184 : vector<128xf32> to vector<1x1x1x128xf32>
    %186 = vector.broadcast %185 : vector<1x1x1x128xf32> to vector<2x8x8x128xf32>
    %187 = arith.mulf %182, %186 : vector<2x8x8x128xf32>
    %188 = arith.addf %181, %187 : vector<2x8x8x128xf32>
    %189 = vector.extract_strided_slice %133 {offsets = [0, 0, 0, 0], sizes = [2, 8, 8, 128], strides = [1, 1, 1, 1]} : vector<2x14x8x128xf32> to vector<2x8x8x128xf32>
    %c145 = arith.constant 145 : index
    %c0_43 = arith.constant 0 : index
    %190 = vector.load %arg1[%c145, %c0_43] : memref<584x128xf32, #tpu.memory_space<vmem>>, vector<1x128xf32>
    %191 = vector.shape_cast %190 : vector<1x128xf32> to vector<128xf32>
    %192 = vector.shape_cast %191 : vector<128xf32> to vector<1x1x1x128xf32>
    %193 = vector.broadcast %192 : vector<1x1x1x128xf32> to vector<2x8x8x128xf32>
    %194 = arith.mulf %189, %193 : vector<2x8x8x128xf32>
    %195 = arith.addf %188, %194 : vector<2x8x8x128xf32>
    %196 = vector.extract_strided_slice %133 {offsets = [0, 1, 0, 0], sizes = [2, 8, 8, 128], strides = [1, 1, 1, 1]} : vector<2x14x8x128xf32> to vector<2x8x8x128xf32>
    %c152 = arith.constant 152 : index
    %c0_44 = arith.constant 0 : index
    %197 = vector.load %arg1[%c152, %c0_44] : memref<584x128xf32, #tpu.memory_space<vmem>>, vector<1x128xf32>
    %198 = vector.shape_cast %197 : vector<1x128xf32> to vector<128xf32>
    %199 = vector.shape_cast %198 : vector<128xf32> to vector<1x1x1x128xf32>
    %200 = vector.broadcast %199 : vector<1x1x1x128xf32> to vector<2x8x8x128xf32>
    %201 = arith.mulf %196, %200 : vector<2x8x8x128xf32>
    %202 = arith.addf %195, %201 : vector<2x8x8x128xf32>
    %203 = vector.extract_strided_slice %133 {offsets = [0, 2, 0, 0], sizes = [2, 8, 8, 128], strides = [1, 1, 1, 1]} : vector<2x14x8x128xf32> to vector<2x8x8x128xf32>
    %c159 = arith.constant 159 : index
    %c0_45 = arith.constant 0 : index
    %204 = vector.load %arg1[%c159, %c0_45] : memref<584x128xf32, #tpu.memory_space<vmem>>, vector<1x128xf32>
    %205 = vector.shape_cast %204 : vector<1x128xf32> to vector<128xf32>
    %206 = vector.shape_cast %205 : vector<128xf32> to vector<1x1x1x128xf32>
    %207 = vector.broadcast %206 : vector<1x1x1x128xf32> to vector<2x8x8x128xf32>
    %208 = arith.mulf %203, %207 : vector<2x8x8x128xf32>
    %209 = arith.addf %202, %208 : vector<2x8x8x128xf32>
    %210 = vector.extract_strided_slice %133 {offsets = [0, 3, 0, 0], sizes = [2, 8, 8, 128], strides = [1, 1, 1, 1]} : vector<2x14x8x128xf32> to vector<2x8x8x128xf32>
    %c166 = arith.constant 166 : index
    %c0_46 = arith.constant 0 : index
    %211 = vector.load %arg1[%c166, %c0_46] : memref<584x128xf32, #tpu.memory_space<vmem>>, vector<1x128xf32>
    %212 = vector.shape_cast %211 : vector<1x128xf32> to vector<128xf32>
    %213 = vector.shape_cast %212 : vector<128xf32> to vector<1x1x1x128xf32>
    %214 = vector.broadcast %213 : vector<1x1x1x128xf32> to vector<2x8x8x128xf32>
    %215 = arith.mulf %210, %214 : vector<2x8x8x128xf32>
    %216 = arith.addf %209, %215 : vector<2x8x8x128xf32>
    %217 = vector.extract_strided_slice %133 {offsets = [0, 4, 0, 0], sizes = [2, 8, 8, 128], strides = [1, 1, 1, 1]} : vector<2x14x8x128xf32> to vector<2x8x8x128xf32>
    %c173 = arith.constant 173 : index
    %c0_47 = arith.constant 0 : index
    %218 = vector.load %arg1[%c173, %c0_47] : memref<584x128xf32, #tpu.memory_space<vmem>>, vector<1x128xf32>
    %219 = vector.shape_cast %218 : vector<1x128xf32> to vector<128xf32>
    %220 = vector.shape_cast %219 : vector<128xf32> to vector<1x1x1x128xf32>
    %221 = vector.broadcast %220 : vector<1x1x1x128xf32> to vector<2x8x8x128xf32>
    %222 = arith.mulf %217, %221 : vector<2x8x8x128xf32>
    %223 = arith.addf %216, %222 : vector<2x8x8x128xf32>
    %224 = vector.extract_strided_slice %133 {offsets = [0, 5, 0, 0], sizes = [2, 8, 8, 128], strides = [1, 1, 1, 1]} : vector<2x14x8x128xf32> to vector<2x8x8x128xf32>
    %c180 = arith.constant 180 : index
    %c0_48 = arith.constant 0 : index
    %225 = vector.load %arg1[%c180, %c0_48] : memref<584x128xf32, #tpu.memory_space<vmem>>, vector<1x128xf32>
    %226 = vector.shape_cast %225 : vector<1x128xf32> to vector<128xf32>
    %227 = vector.shape_cast %226 : vector<128xf32> to vector<1x1x1x128xf32>
    %228 = vector.broadcast %227 : vector<1x1x1x128xf32> to vector<2x8x8x128xf32>
    %229 = arith.mulf %224, %228 : vector<2x8x8x128xf32>
    %230 = arith.addf %223, %229 : vector<2x8x8x128xf32>
    %231 = vector.extract_strided_slice %133 {offsets = [0, 6, 0, 0], sizes = [2, 8, 8, 128], strides = [1, 1, 1, 1]} : vector<2x14x8x128xf32> to vector<2x8x8x128xf32>
    %c187 = arith.constant 187 : index
    %c0_49 = arith.constant 0 : index
    %232 = vector.load %arg1[%c187, %c0_49] : memref<584x128xf32, #tpu.memory_space<vmem>>, vector<1x128xf32>
    %233 = vector.shape_cast %232 : vector<1x128xf32> to vector<128xf32>
    %234 = vector.shape_cast %233 : vector<128xf32> to vector<1x1x1x128xf32>
    %235 = vector.broadcast %234 : vector<1x1x1x128xf32> to vector<2x8x8x128xf32>
    %236 = arith.mulf %231, %235 : vector<2x8x8x128xf32>
    %237 = arith.addf %230, %236 : vector<2x8x8x128xf32>
    %238 = vector.extract_strided_slice %134 {offsets = [0, 0, 0, 0], sizes = [2, 8, 8, 128], strides = [1, 1, 1, 1]} : vector<2x14x8x128xf32> to vector<2x8x8x128xf32>
    %c146 = arith.constant 146 : index
    %c0_50 = arith.constant 0 : index
    %239 = vector.load %arg1[%c146, %c0_50] : memref<584x128xf32, #tpu.memory_space<vmem>>, vector<1x128xf32>
    %240 = vector.shape_cast %239 : vector<1x128xf32> to vector<128xf32>
    %241 = vector.shape_cast %240 : vector<128xf32> to vector<1x1x1x128xf32>
    %242 = vector.broadcast %241 : vector<1x1x1x128xf32> to vector<2x8x8x128xf32>
    %243 = arith.mulf %238, %242 : vector<2x8x8x128xf32>
    %244 = arith.addf %237, %243 : vector<2x8x8x128xf32>
    %245 = vector.extract_strided_slice %134 {offsets = [0, 1, 0, 0], sizes = [2, 8, 8, 128], strides = [1, 1, 1, 1]} : vector<2x14x8x128xf32> to vector<2x8x8x128xf32>
    %c153 = arith.constant 153 : index
    %c0_51 = arith.constant 0 : index
    %246 = vector.load %arg1[%c153, %c0_51] : memref<584x128xf32, #tpu.memory_space<vmem>>, vector<1x128xf32>
    %247 = vector.shape_cast %246 : vector<1x128xf32> to vector<128xf32>
    %248 = vector.shape_cast %247 : vector<128xf32> to vector<1x1x1x128xf32>
    %249 = vector.broadcast %248 : vector<1x1x1x128xf32> to vector<2x8x8x128xf32>
    %250 = arith.mulf %245, %249 : vector<2x8x8x128xf32>
    %251 = arith.addf %244, %250 : vector<2x8x8x128xf32>
    %252 = vector.extract_strided_slice %134 {offsets = [0, 2, 0, 0], sizes = [2, 8, 8, 128], strides = [1, 1, 1, 1]} : vector<2x14x8x128xf32> to vector<2x8x8x128xf32>
    %c160 = arith.constant 160 : index
    %c0_52 = arith.constant 0 : index
    %253 = vector.load %arg1[%c160, %c0_52] : memref<584x128xf32, #tpu.memory_space<vmem>>, vector<1x128xf32>
    %254 = vector.shape_cast %253 : vector<1x128xf32> to vector<128xf32>
    %255 = vector.shape_cast %254 : vector<128xf32> to vector<1x1x1x128xf32>
    %256 = vector.broadcast %255 : vector<1x1x1x128xf32> to vector<2x8x8x128xf32>
    %257 = arith.mulf %252, %256 : vector<2x8x8x128xf32>
    %258 = arith.addf %251, %257 : vector<2x8x8x128xf32>
    %259 = vector.extract_strided_slice %134 {offsets = [0, 3, 0, 0], sizes = [2, 8, 8, 128], strides = [1, 1, 1, 1]} : vector<2x14x8x128xf32> to vector<2x8x8x128xf32>
    %c167 = arith.constant 167 : index
    %c0_53 = arith.constant 0 : index
    %260 = vector.load %arg1[%c167, %c0_53] : memref<584x128xf32, #tpu.memory_space<vmem>>, vector<1x128xf32>
    %261 = vector.shape_cast %260 : vector<1x128xf32> to vector<128xf32>
    %262 = vector.shape_cast %261 : vector<128xf32> to vector<1x1x1x128xf32>
    %263 = vector.broadcast %262 : vector<1x1x1x128xf32> to vector<2x8x8x128xf32>
    %264 = arith.mulf %259, %263 : vector<2x8x8x128xf32>
    %265 = arith.addf %258, %264 : vector<2x8x8x128xf32>
    %266 = vector.extract_strided_slice %134 {offsets = [0, 4, 0, 0], sizes = [2, 8, 8, 128], strides = [1, 1, 1, 1]} : vector<2x14x8x128xf32> to vector<2x8x8x128xf32>
    %c174 = arith.constant 174 : index
    %c0_54 = arith.constant 0 : index
    %267 = vector.load %arg1[%c174, %c0_54] : memref<584x128xf32, #tpu.memory_space<vmem>>, vector<1x128xf32>
    %268 = vector.shape_cast %267 : vector<1x128xf32> to vector<128xf32>
    %269 = vector.shape_cast %268 : vector<128xf32> to vector<1x1x1x128xf32>
    %270 = vector.broadcast %269 : vector<1x1x1x128xf32> to vector<2x8x8x128xf32>
    %271 = arith.mulf %266, %270 : vector<2x8x8x128xf32>
    %272 = arith.addf %265, %271 : vector<2x8x8x128xf32>
    %273 = vector.extract_strided_slice %134 {offsets = [0, 5, 0, 0], sizes = [2, 8, 8, 128], strides = [1, 1, 1, 1]} : vector<2x14x8x128xf32> to vector<2x8x8x128xf32>
    %c181 = arith.constant 181 : index
    %c0_55 = arith.constant 0 : index
    %274 = vector.load %arg1[%c181, %c0_55] : memref<584x128xf32, #tpu.memory_space<vmem>>, vector<1x128xf32>
    %275 = vector.shape_cast %274 : vector<1x128xf32> to vector<128xf32>
    %276 = vector.shape_cast %275 : vector<128xf32> to vector<1x1x1x128xf32>
    %277 = vector.broadcast %276 : vector<1x1x1x128xf32> to vector<2x8x8x128xf32>
    %278 = arith.mulf %273, %277 : vector<2x8x8x128xf32>
    %279 = arith.addf %272, %278 : vector<2x8x8x128xf32>
    %280 = vector.extract_strided_slice %134 {offsets = [0, 6, 0, 0], sizes = [2, 8, 8, 128], strides = [1, 1, 1, 1]} : vector<2x14x8x128xf32> to vector<2x8x8x128xf32>
    %c188 = arith.constant 188 : index
    %c0_56 = arith.constant 0 : index
    %281 = vector.load %arg1[%c188, %c0_56] : memref<584x128xf32, #tpu.memory_space<vmem>>, vector<1x128xf32>
    %282 = vector.shape_cast %281 : vector<1x128xf32> to vector<128xf32>
    %283 = vector.shape_cast %282 : vector<128xf32> to vector<1x1x1x128xf32>
    %284 = vector.broadcast %283 : vector<1x1x1x128xf32> to vector<2x8x8x128xf32>
    %285 = arith.mulf %280, %284 : vector<2x8x8x128xf32>
    %286 = arith.addf %279, %285 : vector<2x8x8x128xf32>
    %287 = vector.extract_strided_slice %135 {offsets = [0, 0, 0, 0], sizes = [2, 8, 8, 128], strides = [1, 1, 1, 1]} : vector<2x14x8x128xf32> to vector<2x8x8x128xf32>
    %c147 = arith.constant 147 : index
    %c0_57 = arith.constant 0 : index
    %288 = vector.load %arg1[%c147, %c0_57] : memref<584x128xf32, #tpu.memory_space<vmem>>, vector<1x128xf32>
    %289 = vector.shape_cast %288 : vector<1x128xf32> to vector<128xf32>
    %290 = vector.shape_cast %289 : vector<128xf32> to vector<1x1x1x128xf32>
    %291 = vector.broadcast %290 : vector<1x1x1x128xf32> to vector<2x8x8x128xf32>
    %292 = arith.mulf %287, %291 : vector<2x8x8x128xf32>
    %293 = arith.addf %286, %292 : vector<2x8x8x128xf32>
    %294 = vector.extract_strided_slice %135 {offsets = [0, 1, 0, 0], sizes = [2, 8, 8, 128], strides = [1, 1, 1, 1]} : vector<2x14x8x128xf32> to vector<2x8x8x128xf32>
    %c154 = arith.constant 154 : index
    %c0_58 = arith.constant 0 : index
    %295 = vector.load %arg1[%c154, %c0_58] : memref<584x128xf32, #tpu.memory_space<vmem>>, vector<1x128xf32>
    %296 = vector.shape_cast %295 : vector<1x128xf32> to vector<128xf32>
    %297 = vector.shape_cast %296 : vector<128xf32> to vector<1x1x1x128xf32>
    %298 = vector.broadcast %297 : vector<1x1x1x128xf32> to vector<2x8x8x128xf32>
    %299 = arith.mulf %294, %298 : vector<2x8x8x128xf32>
    %300 = arith.addf %293, %299 : vector<2x8x8x128xf32>
    %301 = vector.extract_strided_slice %135 {offsets = [0, 2, 0, 0], sizes = [2, 8, 8, 128], strides = [1, 1, 1, 1]} : vector<2x14x8x128xf32> to vector<2x8x8x128xf32>
    %c161 = arith.constant 161 : index
    %c0_59 = arith.constant 0 : index
    %302 = vector.load %arg1[%c161, %c0_59] : memref<584x128xf32, #tpu.memory_space<vmem>>, vector<1x128xf32>
    %303 = vector.shape_cast %302 : vector<1x128xf32> to vector<128xf32>
    %304 = vector.shape_cast %303 : vector<128xf32> to vector<1x1x1x128xf32>
    %305 = vector.broadcast %304 : vector<1x1x1x128xf32> to vector<2x8x8x128xf32>
    %306 = arith.mulf %301, %305 : vector<2x8x8x128xf32>
    %307 = arith.addf %300, %306 : vector<2x8x8x128xf32>
    %308 = vector.extract_strided_slice %135 {offsets = [0, 3, 0, 0], sizes = [2, 8, 8, 128], strides = [1, 1, 1, 1]} : vector<2x14x8x128xf32> to vector<2x8x8x128xf32>
    %c168 = arith.constant 168 : index
    %c0_60 = arith.constant 0 : index
    %309 = vector.load %arg1[%c168, %c0_60] : memref<584x128xf32, #tpu.memory_space<vmem>>, vector<1x128xf32>
    %310 = vector.shape_cast %309 : vector<1x128xf32> to vector<128xf32>
    %311 = vector.shape_cast %310 : vector<128xf32> to vector<1x1x1x128xf32>
    %312 = vector.broadcast %311 : vector<1x1x1x128xf32> to vector<2x8x8x128xf32>
    %313 = arith.mulf %308, %312 : vector<2x8x8x128xf32>
    %314 = arith.addf %307, %313 : vector<2x8x8x128xf32>
    %315 = vector.extract_strided_slice %135 {offsets = [0, 4, 0, 0], sizes = [2, 8, 8, 128], strides = [1, 1, 1, 1]} : vector<2x14x8x128xf32> to vector<2x8x8x128xf32>
    %c175 = arith.constant 175 : index
    %c0_61 = arith.constant 0 : index
    %316 = vector.load %arg1[%c175, %c0_61] : memref<584x128xf32, #tpu.memory_space<vmem>>, vector<1x128xf32>
    %317 = vector.shape_cast %316 : vector<1x128xf32> to vector<128xf32>
    %318 = vector.shape_cast %317 : vector<128xf32> to vector<1x1x1x128xf32>
    %319 = vector.broadcast %318 : vector<1x1x1x128xf32> to vector<2x8x8x128xf32>
    %320 = arith.mulf %315, %319 : vector<2x8x8x128xf32>
    %321 = arith.addf %314, %320 : vector<2x8x8x128xf32>
    %322 = vector.extract_strided_slice %135 {offsets = [0, 5, 0, 0], sizes = [2, 8, 8, 128], strides = [1, 1, 1, 1]} : vector<2x14x8x128xf32> to vector<2x8x8x128xf32>
    %c182 = arith.constant 182 : index
    %c0_62 = arith.constant 0 : index
    %323 = vector.load %arg1[%c182, %c0_62] : memref<584x128xf32, #tpu.memory_space<vmem>>, vector<1x128xf32>
    %324 = vector.shape_cast %323 : vector<1x128xf32> to vector<128xf32>
    %325 = vector.shape_cast %324 : vector<128xf32> to vector<1x1x1x128xf32>
    %326 = vector.broadcast %325 : vector<1x1x1x128xf32> to vector<2x8x8x128xf32>
    %327 = arith.mulf %322, %326 : vector<2x8x8x128xf32>
    %328 = arith.addf %321, %327 : vector<2x8x8x128xf32>
    %329 = vector.extract_strided_slice %135 {offsets = [0, 6, 0, 0], sizes = [2, 8, 8, 128], strides = [1, 1, 1, 1]} : vector<2x14x8x128xf32> to vector<2x8x8x128xf32>
    %c189 = arith.constant 189 : index
    %c0_63 = arith.constant 0 : index
    %330 = vector.load %arg1[%c189, %c0_63] : memref<584x128xf32, #tpu.memory_space<vmem>>, vector<1x128xf32>
    %331 = vector.shape_cast %330 : vector<1x128xf32> to vector<128xf32>
    %332 = vector.shape_cast %331 : vector<128xf32> to vector<1x1x1x128xf32>
    %333 = vector.broadcast %332 : vector<1x1x1x128xf32> to vector<2x8x8x128xf32>
    %334 = arith.mulf %329, %333 : vector<2x8x8x128xf32>
    %335 = arith.addf %328, %334 : vector<2x8x8x128xf32>
    %336 = vector.extract_strided_slice %136 {offsets = [0, 0, 0, 0], sizes = [2, 8, 8, 128], strides = [1, 1, 1, 1]} : vector<2x14x8x128xf32> to vector<2x8x8x128xf32>
    %c148 = arith.constant 148 : index
    %c0_64 = arith.constant 0 : index
    %337 = vector.load %arg1[%c148, %c0_64] : memref<584x128xf32, #tpu.memory_space<vmem>>, vector<1x128xf32>
    %338 = vector.shape_cast %337 : vector<1x128xf32> to vector<128xf32>
    %339 = vector.shape_cast %338 : vector<128xf32> to vector<1x1x1x128xf32>
    %340 = vector.broadcast %339 : vector<1x1x1x128xf32> to vector<2x8x8x128xf32>
    %341 = arith.mulf %336, %340 : vector<2x8x8x128xf32>
    %342 = arith.addf %335, %341 : vector<2x8x8x128xf32>
    %343 = vector.extract_strided_slice %136 {offsets = [0, 1, 0, 0], sizes = [2, 8, 8, 128], strides = [1, 1, 1, 1]} : vector<2x14x8x128xf32> to vector<2x8x8x128xf32>
    %c155 = arith.constant 155 : index
    %c0_65 = arith.constant 0 : index
    %344 = vector.load %arg1[%c155, %c0_65] : memref<584x128xf32, #tpu.memory_space<vmem>>, vector<1x128xf32>
    %345 = vector.shape_cast %344 : vector<1x128xf32> to vector<128xf32>
    %346 = vector.shape_cast %345 : vector<128xf32> to vector<1x1x1x128xf32>
    %347 = vector.broadcast %346 : vector<1x1x1x128xf32> to vector<2x8x8x128xf32>
    %348 = arith.mulf %343, %347 : vector<2x8x8x128xf32>
    %349 = arith.addf %342, %348 : vector<2x8x8x128xf32>
    %350 = vector.extract_strided_slice %136 {offsets = [0, 2, 0, 0], sizes = [2, 8, 8, 128], strides = [1, 1, 1, 1]} : vector<2x14x8x128xf32> to vector<2x8x8x128xf32>
    %c162 = arith.constant 162 : index
    %c0_66 = arith.constant 0 : index
    %351 = vector.load %arg1[%c162, %c0_66] : memref<584x128xf32, #tpu.memory_space<vmem>>, vector<1x128xf32>
    %352 = vector.shape_cast %351 : vector<1x128xf32> to vector<128xf32>
    %353 = vector.shape_cast %352 : vector<128xf32> to vector<1x1x1x128xf32>
    %354 = vector.broadcast %353 : vector<1x1x1x128xf32> to vector<2x8x8x128xf32>
    %355 = arith.mulf %350, %354 : vector<2x8x8x128xf32>
    %356 = arith.addf %349, %355 : vector<2x8x8x128xf32>
    %357 = vector.extract_strided_slice %136 {offsets = [0, 3, 0, 0], sizes = [2, 8, 8, 128], strides = [1, 1, 1, 1]} : vector<2x14x8x128xf32> to vector<2x8x8x128xf32>
    %c169 = arith.constant 169 : index
    %c0_67 = arith.constant 0 : index
    %358 = vector.load %arg1[%c169, %c0_67] : memref<584x128xf32, #tpu.memory_space<vmem>>, vector<1x128xf32>
    %359 = vector.shape_cast %358 : vector<1x128xf32> to vector<128xf32>
    %360 = vector.shape_cast %359 : vector<128xf32> to vector<1x1x1x128xf32>
    %361 = vector.broadcast %360 : vector<1x1x1x128xf32> to vector<2x8x8x128xf32>
    %362 = arith.mulf %357, %361 : vector<2x8x8x128xf32>
    %363 = arith.addf %356, %362 : vector<2x8x8x128xf32>
    %364 = vector.extract_strided_slice %136 {offsets = [0, 4, 0, 0], sizes = [2, 8, 8, 128], strides = [1, 1, 1, 1]} : vector<2x14x8x128xf32> to vector<2x8x8x128xf32>
    %c176 = arith.constant 176 : index
    %c0_68 = arith.constant 0 : index
    %365 = vector.load %arg1[%c176, %c0_68] : memref<584x128xf32, #tpu.memory_space<vmem>>, vector<1x128xf32>
    %366 = vector.shape_cast %365 : vector<1x128xf32> to vector<128xf32>
    %367 = vector.shape_cast %366 : vector<128xf32> to vector<1x1x1x128xf32>
    %368 = vector.broadcast %367 : vector<1x1x1x128xf32> to vector<2x8x8x128xf32>
    %369 = arith.mulf %364, %368 : vector<2x8x8x128xf32>
    %370 = arith.addf %363, %369 : vector<2x8x8x128xf32>
    %371 = vector.extract_strided_slice %136 {offsets = [0, 5, 0, 0], sizes = [2, 8, 8, 128], strides = [1, 1, 1, 1]} : vector<2x14x8x128xf32> to vector<2x8x8x128xf32>
    %c183 = arith.constant 183 : index
    %c0_69 = arith.constant 0 : index
    %372 = vector.load %arg1[%c183, %c0_69] : memref<584x128xf32, #tpu.memory_space<vmem>>, vector<1x128xf32>
    %373 = vector.shape_cast %372 : vector<1x128xf32> to vector<128xf32>
    %374 = vector.shape_cast %373 : vector<128xf32> to vector<1x1x1x128xf32>
    %375 = vector.broadcast %374 : vector<1x1x1x128xf32> to vector<2x8x8x128xf32>
    %376 = arith.mulf %371, %375 : vector<2x8x8x128xf32>
    %377 = arith.addf %370, %376 : vector<2x8x8x128xf32>
    %378 = vector.extract_strided_slice %136 {offsets = [0, 6, 0, 0], sizes = [2, 8, 8, 128], strides = [1, 1, 1, 1]} : vector<2x14x8x128xf32> to vector<2x8x8x128xf32>
    %c190 = arith.constant 190 : index
    %c0_70 = arith.constant 0 : index
    %379 = vector.load %arg1[%c190, %c0_70] : memref<584x128xf32, #tpu.memory_space<vmem>>, vector<1x128xf32>
    %380 = vector.shape_cast %379 : vector<1x128xf32> to vector<128xf32>
    %381 = vector.shape_cast %380 : vector<128xf32> to vector<1x1x1x128xf32>
    %382 = vector.broadcast %381 : vector<1x1x1x128xf32> to vector<2x8x8x128xf32>
    %383 = arith.mulf %378, %382 : vector<2x8x8x128xf32>
    %384 = arith.addf %377, %383 : vector<2x8x8x128xf32>
    %385 = vector.extract_strided_slice %137 {offsets = [0, 0, 0, 0], sizes = [2, 8, 8, 128], strides = [1, 1, 1, 1]} : vector<2x14x8x128xf32> to vector<2x8x8x128xf32>
    %c149 = arith.constant 149 : index
    %c0_71 = arith.constant 0 : index
    %386 = vector.load %arg1[%c149, %c0_71] : memref<584x128xf32, #tpu.memory_space<vmem>>, vector<1x128xf32>
    %387 = vector.shape_cast %386 : vector<1x128xf32> to vector<128xf32>
    %388 = vector.shape_cast %387 : vector<128xf32> to vector<1x1x1x128xf32>
    %389 = vector.broadcast %388 : vector<1x1x1x128xf32> to vector<2x8x8x128xf32>
    %390 = arith.mulf %385, %389 : vector<2x8x8x128xf32>
    %391 = arith.addf %384, %390 : vector<2x8x8x128xf32>
    %392 = vector.extract_strided_slice %137 {offsets = [0, 1, 0, 0], sizes = [2, 8, 8, 128], strides = [1, 1, 1, 1]} : vector<2x14x8x128xf32> to vector<2x8x8x128xf32>
    %c156 = arith.constant 156 : index
    %c0_72 = arith.constant 0 : index
    %393 = vector.load %arg1[%c156, %c0_72] : memref<584x128xf32, #tpu.memory_space<vmem>>, vector<1x128xf32>
    %394 = vector.shape_cast %393 : vector<1x128xf32> to vector<128xf32>
    %395 = vector.shape_cast %394 : vector<128xf32> to vector<1x1x1x128xf32>
    %396 = vector.broadcast %395 : vector<1x1x1x128xf32> to vector<2x8x8x128xf32>
    %397 = arith.mulf %392, %396 : vector<2x8x8x128xf32>
    %398 = arith.addf %391, %397 : vector<2x8x8x128xf32>
    %399 = vector.extract_strided_slice %137 {offsets = [0, 2, 0, 0], sizes = [2, 8, 8, 128], strides = [1, 1, 1, 1]} : vector<2x14x8x128xf32> to vector<2x8x8x128xf32>
    %c163 = arith.constant 163 : index
    %c0_73 = arith.constant 0 : index
    %400 = vector.load %arg1[%c163, %c0_73] : memref<584x128xf32, #tpu.memory_space<vmem>>, vector<1x128xf32>
    %401 = vector.shape_cast %400 : vector<1x128xf32> to vector<128xf32>
    %402 = vector.shape_cast %401 : vector<128xf32> to vector<1x1x1x128xf32>
    %403 = vector.broadcast %402 : vector<1x1x1x128xf32> to vector<2x8x8x128xf32>
    %404 = arith.mulf %399, %403 : vector<2x8x8x128xf32>
    %405 = arith.addf %398, %404 : vector<2x8x8x128xf32>
    %406 = vector.extract_strided_slice %137 {offsets = [0, 3, 0, 0], sizes = [2, 8, 8, 128], strides = [1, 1, 1, 1]} : vector<2x14x8x128xf32> to vector<2x8x8x128xf32>
    %c170 = arith.constant 170 : index
    %c0_74 = arith.constant 0 : index
    %407 = vector.load %arg1[%c170, %c0_74] : memref<584x128xf32, #tpu.memory_space<vmem>>, vector<1x128xf32>
    %408 = vector.shape_cast %407 : vector<1x128xf32> to vector<128xf32>
    %409 = vector.shape_cast %408 : vector<128xf32> to vector<1x1x1x128xf32>
    %410 = vector.broadcast %409 : vector<1x1x1x128xf32> to vector<2x8x8x128xf32>
    %411 = arith.mulf %406, %410 : vector<2x8x8x128xf32>
    %412 = arith.addf %405, %411 : vector<2x8x8x128xf32>
    %413 = vector.extract_strided_slice %137 {offsets = [0, 4, 0, 0], sizes = [2, 8, 8, 128], strides = [1, 1, 1, 1]} : vector<2x14x8x128xf32> to vector<2x8x8x128xf32>
    %c177 = arith.constant 177 : index
    %c0_75 = arith.constant 0 : index
    %414 = vector.load %arg1[%c177, %c0_75] : memref<584x128xf32, #tpu.memory_space<vmem>>, vector<1x128xf32>
    %415 = vector.shape_cast %414 : vector<1x128xf32> to vector<128xf32>
    %416 = vector.shape_cast %415 : vector<128xf32> to vector<1x1x1x128xf32>
    %417 = vector.broadcast %416 : vector<1x1x1x128xf32> to vector<2x8x8x128xf32>
    %418 = arith.mulf %413, %417 : vector<2x8x8x128xf32>
    %419 = arith.addf %412, %418 : vector<2x8x8x128xf32>
    %420 = vector.extract_strided_slice %137 {offsets = [0, 5, 0, 0], sizes = [2, 8, 8, 128], strides = [1, 1, 1, 1]} : vector<2x14x8x128xf32> to vector<2x8x8x128xf32>
    %c184 = arith.constant 184 : index
    %c0_76 = arith.constant 0 : index
    %421 = vector.load %arg1[%c184, %c0_76] : memref<584x128xf32, #tpu.memory_space<vmem>>, vector<1x128xf32>
    %422 = vector.shape_cast %421 : vector<1x128xf32> to vector<128xf32>
    %423 = vector.shape_cast %422 : vector<128xf32> to vector<1x1x1x128xf32>
    %424 = vector.broadcast %423 : vector<1x1x1x128xf32> to vector<2x8x8x128xf32>
    %425 = arith.mulf %420, %424 : vector<2x8x8x128xf32>
    %426 = arith.addf %419, %425 : vector<2x8x8x128xf32>
    %427 = vector.extract_strided_slice %137 {offsets = [0, 6, 0, 0], sizes = [2, 8, 8, 128], strides = [1, 1, 1, 1]} : vector<2x14x8x128xf32> to vector<2x8x8x128xf32>
    %c191 = arith.constant 191 : index
    %c0_77 = arith.constant 0 : index
    %428 = vector.load %arg1[%c191, %c0_77] : memref<584x128xf32, #tpu.memory_space<vmem>>, vector<1x128xf32>
    %429 = vector.shape_cast %428 : vector<1x128xf32> to vector<128xf32>
    %430 = vector.shape_cast %429 : vector<128xf32> to vector<1x1x1x128xf32>
    %431 = vector.broadcast %430 : vector<1x1x1x128xf32> to vector<2x8x8x128xf32>
    %432 = arith.mulf %427, %431 : vector<2x8x8x128xf32>
    %433 = arith.addf %426, %432 : vector<2x8x8x128xf32>
    %434 = vector.extract_strided_slice %138 {offsets = [0, 0, 0, 0], sizes = [2, 8, 8, 128], strides = [1, 1, 1, 1]} : vector<2x14x8x128xf32> to vector<2x8x8x128xf32>
    %c150 = arith.constant 150 : index
    %c0_78 = arith.constant 0 : index
    %435 = vector.load %arg1[%c150, %c0_78] : memref<584x128xf32, #tpu.memory_space<vmem>>, vector<1x128xf32>
    %436 = vector.shape_cast %435 : vector<1x128xf32> to vector<128xf32>
    %437 = vector.shape_cast %436 : vector<128xf32> to vector<1x1x1x128xf32>
    %438 = vector.broadcast %437 : vector<1x1x1x128xf32> to vector<2x8x8x128xf32>
    %439 = arith.mulf %434, %438 : vector<2x8x8x128xf32>
    %440 = arith.addf %433, %439 : vector<2x8x8x128xf32>
    %441 = vector.extract_strided_slice %138 {offsets = [0, 1, 0, 0], sizes = [2, 8, 8, 128], strides = [1, 1, 1, 1]} : vector<2x14x8x128xf32> to vector<2x8x8x128xf32>
    %c157 = arith.constant 157 : index
    %c0_79 = arith.constant 0 : index
    %442 = vector.load %arg1[%c157, %c0_79] : memref<584x128xf32, #tpu.memory_space<vmem>>, vector<1x128xf32>
    %443 = vector.shape_cast %442 : vector<1x128xf32> to vector<128xf32>
    %444 = vector.shape_cast %443 : vector<128xf32> to vector<1x1x1x128xf32>
    %445 = vector.broadcast %444 : vector<1x1x1x128xf32> to vector<2x8x8x128xf32>
    %446 = arith.mulf %441, %445 : vector<2x8x8x128xf32>
    %447 = arith.addf %440, %446 : vector<2x8x8x128xf32>
    %448 = vector.extract_strided_slice %138 {offsets = [0, 2, 0, 0], sizes = [2, 8, 8, 128], strides = [1, 1, 1, 1]} : vector<2x14x8x128xf32> to vector<2x8x8x128xf32>
    %c164 = arith.constant 164 : index
    %c0_80 = arith.constant 0 : index
    %449 = vector.load %arg1[%c164, %c0_80] : memref<584x128xf32, #tpu.memory_space<vmem>>, vector<1x128xf32>
    %450 = vector.shape_cast %449 : vector<1x128xf32> to vector<128xf32>
    %451 = vector.shape_cast %450 : vector<128xf32> to vector<1x1x1x128xf32>
    %452 = vector.broadcast %451 : vector<1x1x1x128xf32> to vector<2x8x8x128xf32>
    %453 = arith.mulf %448, %452 : vector<2x8x8x128xf32>
    %454 = arith.addf %447, %453 : vector<2x8x8x128xf32>
    %455 = vector.extract_strided_slice %138 {offsets = [0, 3, 0, 0], sizes = [2, 8, 8, 128], strides = [1, 1, 1, 1]} : vector<2x14x8x128xf32> to vector<2x8x8x128xf32>
    %c171 = arith.constant 171 : index
    %c0_81 = arith.constant 0 : index
    %456 = vector.load %arg1[%c171, %c0_81] : memref<584x128xf32, #tpu.memory_space<vmem>>, vector<1x128xf32>
    %457 = vector.shape_cast %456 : vector<1x128xf32> to vector<128xf32>
    %458 = vector.shape_cast %457 : vector<128xf32> to vector<1x1x1x128xf32>
    %459 = vector.broadcast %458 : vector<1x1x1x128xf32> to vector<2x8x8x128xf32>
    %460 = arith.mulf %455, %459 : vector<2x8x8x128xf32>
    %461 = arith.addf %454, %460 : vector<2x8x8x128xf32>
    %462 = vector.extract_strided_slice %138 {offsets = [0, 4, 0, 0], sizes = [2, 8, 8, 128], strides = [1, 1, 1, 1]} : vector<2x14x8x128xf32> to vector<2x8x8x128xf32>
    %c178 = arith.constant 178 : index
    %c0_82 = arith.constant 0 : index
    %463 = vector.load %arg1[%c178, %c0_82] : memref<584x128xf32, #tpu.memory_space<vmem>>, vector<1x128xf32>
    %464 = vector.shape_cast %463 : vector<1x128xf32> to vector<128xf32>
    %465 = vector.shape_cast %464 : vector<128xf32> to vector<1x1x1x128xf32>
    %466 = vector.broadcast %465 : vector<1x1x1x128xf32> to vector<2x8x8x128xf32>
    %467 = arith.mulf %462, %466 : vector<2x8x8x128xf32>
    %468 = arith.addf %461, %467 : vector<2x8x8x128xf32>
    %469 = vector.extract_strided_slice %138 {offsets = [0, 5, 0, 0], sizes = [2, 8, 8, 128], strides = [1, 1, 1, 1]} : vector<2x14x8x128xf32> to vector<2x8x8x128xf32>
    %c185 = arith.constant 185 : index
    %c0_83 = arith.constant 0 : index
    %470 = vector.load %arg1[%c185, %c0_83] : memref<584x128xf32, #tpu.memory_space<vmem>>, vector<1x128xf32>
    %471 = vector.shape_cast %470 : vector<1x128xf32> to vector<128xf32>
    %472 = vector.shape_cast %471 : vector<128xf32> to vector<1x1x1x128xf32>
    %473 = vector.broadcast %472 : vector<1x1x1x128xf32> to vector<2x8x8x128xf32>
    %474 = arith.mulf %469, %473 : vector<2x8x8x128xf32>
    %475 = arith.addf %468, %474 : vector<2x8x8x128xf32>
    %476 = vector.extract_strided_slice %138 {offsets = [0, 6, 0, 0], sizes = [2, 8, 8, 128], strides = [1, 1, 1, 1]} : vector<2x14x8x128xf32> to vector<2x8x8x128xf32>
    %c192 = arith.constant 192 : index
    %c0_84 = arith.constant 0 : index
    %477 = vector.load %arg1[%c192, %c0_84] : memref<584x128xf32, #tpu.memory_space<vmem>>, vector<1x128xf32>
    %478 = vector.shape_cast %477 : vector<1x128xf32> to vector<128xf32>
    %479 = vector.shape_cast %478 : vector<128xf32> to vector<1x1x1x128xf32>
    %480 = vector.broadcast %479 : vector<1x1x1x128xf32> to vector<2x8x8x128xf32>
    %481 = arith.mulf %476, %480 : vector<2x8x8x128xf32>
    %482 = arith.addf %475, %481 : vector<2x8x8x128xf32>
    %483 = vector.shape_cast %482 : vector<2x8x8x128xf32> to vector<2x64x128xf32>
    %484 = vector.extract_strided_slice %0 {offsets = [6, 0], sizes = [1, 128], strides = [1, 1]} : vector<16x128xf32> to vector<1x128xf32>
    %485 = vector.shape_cast %484 : vector<1x128xf32> to vector<128xf32>
    %486 = vector.shape_cast %485 : vector<128xf32> to vector<1x1x128xf32>
    %487 = vector.broadcast %486 : vector<1x1x128xf32> to vector<2x64x128xf32>
    %488 = arith.addf %483, %487 : vector<2x64x128xf32>
    %489 = vector.extract_strided_slice %0 {offsets = [7, 0], sizes = [1, 128], strides = [1, 1]} : vector<16x128xf32> to vector<1x128xf32>
    %490 = vector.shape_cast %489 : vector<1x128xf32> to vector<128xf32>
    %491 = vector.extract_strided_slice %0 {offsets = [8, 0], sizes = [1, 128], strides = [1, 1]} : vector<16x128xf32> to vector<1x128xf32>
    %492 = vector.shape_cast %491 : vector<1x128xf32> to vector<128xf32>
    %cst_85 = arith.constant dense<0.000000e+00> : vector<2x128xf32>
    %493 = vector.multi_reduction <add>, %488, %cst_85 [1] : vector<2x64x128xf32> to vector<2x128xf32>
    %494 = vector.shape_cast %493 : vector<2x128xf32> to vector<2x1x128xf32>
    %cst_86 = arith.constant 6.400000e+01 : f32
    %495 = vector.broadcast %cst_86 : f32 to vector<2x1x128xf32>
    %496 = arith.divf %494, %495 : vector<2x1x128xf32>
    %497 = vector.broadcast %496 : vector<2x1x128xf32> to vector<2x64x128xf32>
    %498 = arith.subf %488, %497 : vector<2x64x128xf32>
    %499 = arith.mulf %498, %498 : vector<2x64x128xf32>
    %cst_87 = arith.constant dense<0.000000e+00> : vector<2x128xf32>
    %500 = vector.multi_reduction <add>, %499, %cst_87 [1] : vector<2x64x128xf32> to vector<2x128xf32>
    %501 = vector.shape_cast %500 : vector<2x128xf32> to vector<2x1x128xf32>
    %cst_88 = arith.constant 6.400000e+01 : f32
    %502 = vector.broadcast %cst_88 : f32 to vector<2x1x128xf32>
    %503 = arith.divf %501, %502 : vector<2x1x128xf32>
    %cst_89 = arith.constant 9.99999974E-6 : f32
    %504 = vector.broadcast %cst_89 : f32 to vector<2x1x128xf32>
    %505 = arith.addf %503, %504 : vector<2x1x128xf32>
    %506 = math.rsqrt %505 : vector<2x1x128xf32>
    %507 = vector.broadcast %506 : vector<2x1x128xf32> to vector<2x64x128xf32>
    %508 = arith.mulf %498, %507 : vector<2x64x128xf32>
    %509 = vector.shape_cast %490 : vector<128xf32> to vector<1x1x128xf32>
    %510 = vector.broadcast %509 : vector<1x1x128xf32> to vector<2x64x128xf32>
    %511 = arith.mulf %508, %510 : vector<2x64x128xf32>
    %512 = vector.shape_cast %492 : vector<128xf32> to vector<1x1x128xf32>
    %513 = vector.broadcast %512 : vector<1x1x128xf32> to vector<2x64x128xf32>
    %514 = arith.addf %511, %513 : vector<2x64x128xf32>
    %cst_90 = arith.constant 5.000000e-01 : f32
    %515 = vector.broadcast %cst_90 : f32 to vector<2x64x128xf32>
    %516 = arith.mulf %515, %514 : vector<2x64x128xf32>
    %cst_91 = arith.constant 0.707106769 : f32
    %517 = vector.broadcast %cst_91 : f32 to vector<2x64x128xf32>
    %518 = arith.mulf %514, %517 : vector<2x64x128xf32>
    %519 = math.absf %518 : vector<2x64x128xf32>
    %cst_92 = arith.constant 0.327591091 : f32
    %520 = vector.broadcast %cst_92 : f32 to vector<2x64x128xf32>
    %521 = arith.mulf %520, %519 : vector<2x64x128xf32>
    %cst_93 = arith.constant 1.000000e+00 : f32
    %522 = vector.broadcast %cst_93 : f32 to vector<2x64x128xf32>
    %523 = arith.addf %522, %521 : vector<2x64x128xf32>
    %cst_94 = arith.constant 1.000000e+00 : f32
    %524 = vector.broadcast %cst_94 : f32 to vector<2x64x128xf32>
    %525 = arith.divf %524, %523 : vector<2x64x128xf32>
    %cst_95 = arith.constant 1.06140542 : f32
    %526 = vector.broadcast %cst_95 : f32 to vector<2x64x128xf32>
    %527 = arith.mulf %525, %526 : vector<2x64x128xf32>
    %cst_96 = arith.constant -1.45315206 : f32
    %528 = vector.broadcast %cst_96 : f32 to vector<2x64x128xf32>
    %529 = arith.addf %528, %527 : vector<2x64x128xf32>
    %530 = arith.mulf %525, %529 : vector<2x64x128xf32>
    %cst_97 = arith.constant 1.42141378 : f32
    %531 = vector.broadcast %cst_97 : f32 to vector<2x64x128xf32>
    %532 = arith.addf %531, %530 : vector<2x64x128xf32>
    %533 = arith.mulf %525, %532 : vector<2x64x128xf32>
    %cst_98 = arith.constant -0.284496725 : f32
    %534 = vector.broadcast %cst_98 : f32 to vector<2x64x128xf32>
    %535 = arith.addf %534, %533 : vector<2x64x128xf32>
    %536 = arith.mulf %525, %535 : vector<2x64x128xf32>
    %cst_99 = arith.constant 0.254829586 : f32
    %537 = vector.broadcast %cst_99 : f32 to vector<2x64x128xf32>
    %538 = arith.addf %537, %536 : vector<2x64x128xf32>
    %539 = arith.mulf %525, %538 : vector<2x64x128xf32>
    %cst_100 = arith.constant 0.000000e+00 : f32
    %540 = vector.broadcast %cst_100 : f32 to vector<2x64x128xf32>
    %541 = arith.subf %540, %519 : vector<2x64x128xf32>
    %542 = arith.mulf %541, %519 : vector<2x64x128xf32>
    %543 = math.exp %542 : vector<2x64x128xf32>
    %544 = arith.mulf %539, %543 : vector<2x64x128xf32>
    %cst_101 = arith.constant 1.000000e+00 : f32
    %545 = vector.broadcast %cst_101 : f32 to vector<2x64x128xf32>
    %546 = arith.subf %545, %544 : vector<2x64x128xf32>
    %cst_102 = arith.constant 0.000000e+00 : f32
    %547 = vector.broadcast %cst_102 : f32 to vector<2x64x128xf32>
    %548 = arith.cmpf olt, %518, %547 : vector<2x64x128xf32>
    %cst_103 = arith.constant 0.000000e+00 : f32
    %549 = vector.broadcast %cst_103 : f32 to vector<2x64x128xf32>
    %550 = arith.subf %549, %546 : vector<2x64x128xf32>
    %551 = arith.select %548, %550, %546 : vector<2x64x128xi1>, vector<2x64x128xf32>
    %cst_104 = arith.constant 1.000000e+00 : f32
    %552 = vector.broadcast %cst_104 : f32 to vector<2x64x128xf32>
    %553 = arith.addf %552, %551 : vector<2x64x128xf32>
    %554 = arith.mulf %516, %553 : vector<2x64x128xf32>
    %c200 = arith.constant 200 : index
    %c0_105 = arith.constant 0 : index
    %555 = vector.load %arg1[%c200, %c0_105] : memref<584x128xf32, #tpu.memory_space<vmem>>, vector<128x128xf32>
    %556 = vector.extract_strided_slice %0 {offsets = [9, 0], sizes = [1, 128], strides = [1, 1]} : vector<16x128xf32> to vector<1x128xf32>
    %557 = vector.shape_cast %556 : vector<1x128xf32> to vector<128xf32>
    %558 = vector.shape_cast %554 : vector<2x64x128xf32> to vector<128x128xf32>
    %cst_106 = arith.constant dense<0.000000e+00> : vector<128x128xf32>
    %559 = tpu.matmul %558, %555, %cst_106 {dimension_numbers = #tpu.dot_dimension_numbers<[1], [0], [0], [1], [0, 0, 1, 1], [], []>} : vector<128x128xf32>, vector<128x128xf32>, vector<128x128xf32> -> vector<128x128xf32>
    %560 = vector.shape_cast %557 : vector<128xf32> to vector<1x128xf32>
    %561 = vector.broadcast %560 : vector<1x128xf32> to vector<128x128xf32>
    %562 = arith.addf %559, %561 : vector<128x128xf32>
    %563 = vector.shape_cast %562 : vector<128x128xf32> to vector<2x64x128xf32>
    %564 = vector.extract_strided_slice %0 {offsets = [10, 0], sizes = [1, 128], strides = [1, 1]} : vector<16x128xf32> to vector<1x128xf32>
    %565 = vector.shape_cast %564 : vector<1x128xf32> to vector<128xf32>
    %566 = vector.extract_strided_slice %0 {offsets = [11, 0], sizes = [1, 128], strides = [1, 1]} : vector<16x128xf32> to vector<1x128xf32>
    %567 = vector.shape_cast %566 : vector<1x128xf32> to vector<128xf32>
    %cst_107 = arith.constant dense<0.000000e+00> : vector<2x128xf32>
    %568 = vector.multi_reduction <add>, %563, %cst_107 [1] : vector<2x64x128xf32> to vector<2x128xf32>
    %569 = vector.shape_cast %568 : vector<2x128xf32> to vector<2x1x128xf32>
    %cst_108 = arith.constant 6.400000e+01 : f32
    %570 = vector.broadcast %cst_108 : f32 to vector<2x1x128xf32>
    %571 = arith.divf %569, %570 : vector<2x1x128xf32>
    %572 = vector.broadcast %571 : vector<2x1x128xf32> to vector<2x64x128xf32>
    %573 = arith.subf %563, %572 : vector<2x64x128xf32>
    %574 = arith.mulf %573, %573 : vector<2x64x128xf32>
    %cst_109 = arith.constant dense<0.000000e+00> : vector<2x128xf32>
    %575 = vector.multi_reduction <add>, %574, %cst_109 [1] : vector<2x64x128xf32> to vector<2x128xf32>
    %576 = vector.shape_cast %575 : vector<2x128xf32> to vector<2x1x128xf32>
    %cst_110 = arith.constant 6.400000e+01 : f32
    %577 = vector.broadcast %cst_110 : f32 to vector<2x1x128xf32>
    %578 = arith.divf %576, %577 : vector<2x1x128xf32>
    %cst_111 = arith.constant 9.99999974E-6 : f32
    %579 = vector.broadcast %cst_111 : f32 to vector<2x1x128xf32>
    %580 = arith.addf %578, %579 : vector<2x1x128xf32>
    %581 = math.rsqrt %580 : vector<2x1x128xf32>
    %582 = vector.broadcast %581 : vector<2x1x128xf32> to vector<2x64x128xf32>
    %583 = arith.mulf %573, %582 : vector<2x64x128xf32>
    %584 = vector.shape_cast %565 : vector<128xf32> to vector<1x1x128xf32>
    %585 = vector.broadcast %584 : vector<1x1x128xf32> to vector<2x64x128xf32>
    %586 = arith.mulf %583, %585 : vector<2x64x128xf32>
    %587 = vector.shape_cast %567 : vector<128xf32> to vector<1x1x128xf32>
    %588 = vector.broadcast %587 : vector<1x1x128xf32> to vector<2x64x128xf32>
    %589 = arith.addf %586, %588 : vector<2x64x128xf32>
    %cst_112 = arith.constant dense<0.000000e+00> : vector<2x128xf32>
    %590 = vector.multi_reduction <add>, %589, %cst_112 [1] : vector<2x64x128xf32> to vector<2x128xf32>
    %cst_113 = arith.constant 6.400000e+01 : f32
    %591 = vector.broadcast %cst_113 : f32 to vector<2x128xf32>
    %592 = arith.divf %590, %591 : vector<2x128xf32>
    %c328 = arith.constant 328 : index
    %c0_114 = arith.constant 0 : index
    %593 = vector.load %arg1[%c328, %c0_114] : memref<584x128xf32, #tpu.memory_space<vmem>>, vector<128x128xf32>
    %cst_115 = arith.constant dense<0.000000e+00> : vector<2x128xf32>
    %594 = tpu.matmul %592, %593, %cst_115 {dimension_numbers = #tpu.dot_dimension_numbers<[1], [0], [0], [1], [0, 0, 1, 1], [], []>} : vector<2x128xf32>, vector<128x128xf32>, vector<2x128xf32> -> vector<2x128xf32>
    %595 = vector.extract_strided_slice %0 {offsets = [12, 0], sizes = [1, 128], strides = [1, 1]} : vector<16x128xf32> to vector<1x128xf32>
    %596 = vector.shape_cast %595 : vector<1x128xf32> to vector<128xf32>
    %597 = vector.shape_cast %596 : vector<128xf32> to vector<1x128xf32>
    %598 = vector.broadcast %597 : vector<1x128xf32> to vector<2x128xf32>
    %599 = arith.addf %594, %598 : vector<2x128xf32>
    %cst_116 = arith.constant 5.000000e-01 : f32
    %600 = vector.broadcast %cst_116 : f32 to vector<2x128xf32>
    %601 = arith.mulf %600, %599 : vector<2x128xf32>
    %cst_117 = arith.constant 0.707106769 : f32
    %602 = vector.broadcast %cst_117 : f32 to vector<2x128xf32>
    %603 = arith.mulf %599, %602 : vector<2x128xf32>
    %604 = math.absf %603 : vector<2x128xf32>
    %cst_118 = arith.constant 0.327591091 : f32
    %605 = vector.broadcast %cst_118 : f32 to vector<2x128xf32>
    %606 = arith.mulf %605, %604 : vector<2x128xf32>
    %cst_119 = arith.constant 1.000000e+00 : f32
    %607 = vector.broadcast %cst_119 : f32 to vector<2x128xf32>
    %608 = arith.addf %607, %606 : vector<2x128xf32>
    %cst_120 = arith.constant 1.000000e+00 : f32
    %609 = vector.broadcast %cst_120 : f32 to vector<2x128xf32>
    %610 = arith.divf %609, %608 : vector<2x128xf32>
    %cst_121 = arith.constant 1.06140542 : f32
    %611 = vector.broadcast %cst_121 : f32 to vector<2x128xf32>
    %612 = arith.mulf %610, %611 : vector<2x128xf32>
    %cst_122 = arith.constant -1.45315206 : f32
    %613 = vector.broadcast %cst_122 : f32 to vector<2x128xf32>
    %614 = arith.addf %613, %612 : vector<2x128xf32>
    %615 = arith.mulf %610, %614 : vector<2x128xf32>
    %cst_123 = arith.constant 1.42141378 : f32
    %616 = vector.broadcast %cst_123 : f32 to vector<2x128xf32>
    %617 = arith.addf %616, %615 : vector<2x128xf32>
    %618 = arith.mulf %610, %617 : vector<2x128xf32>
    %cst_124 = arith.constant -0.284496725 : f32
    %619 = vector.broadcast %cst_124 : f32 to vector<2x128xf32>
    %620 = arith.addf %619, %618 : vector<2x128xf32>
    %621 = arith.mulf %610, %620 : vector<2x128xf32>
    %cst_125 = arith.constant 0.254829586 : f32
    %622 = vector.broadcast %cst_125 : f32 to vector<2x128xf32>
    %623 = arith.addf %622, %621 : vector<2x128xf32>
    %624 = arith.mulf %610, %623 : vector<2x128xf32>
    %cst_126 = arith.constant 0.000000e+00 : f32
    %625 = vector.broadcast %cst_126 : f32 to vector<2x128xf32>
    %626 = arith.subf %625, %604 : vector<2x128xf32>
    %627 = arith.mulf %626, %604 : vector<2x128xf32>
    %628 = math.exp %627 : vector<2x128xf32>
    %629 = arith.mulf %624, %628 : vector<2x128xf32>
    %cst_127 = arith.constant 1.000000e+00 : f32
    %630 = vector.broadcast %cst_127 : f32 to vector<2x128xf32>
    %631 = arith.subf %630, %629 : vector<2x128xf32>
    %cst_128 = arith.constant 0.000000e+00 : f32
    %632 = vector.broadcast %cst_128 : f32 to vector<2x128xf32>
    %633 = arith.cmpf olt, %603, %632 : vector<2x128xf32>
    %cst_129 = arith.constant 0.000000e+00 : f32
    %634 = vector.broadcast %cst_129 : f32 to vector<2x128xf32>
    %635 = arith.subf %634, %631 : vector<2x128xf32>
    %636 = arith.select %633, %635, %631 : vector<2x128xi1>, vector<2x128xf32>
    %cst_130 = arith.constant 1.000000e+00 : f32
    %637 = vector.broadcast %cst_130 : f32 to vector<2x128xf32>
    %638 = arith.addf %637, %636 : vector<2x128xf32>
    %639 = arith.mulf %601, %638 : vector<2x128xf32>
    %c456 = arith.constant 456 : index
    %c0_131 = arith.constant 0 : index
    %640 = vector.load %arg1[%c456, %c0_131] : memref<584x128xf32, #tpu.memory_space<vmem>>, vector<128x128xf32>
    %cst_132 = arith.constant dense<0.000000e+00> : vector<2x128xf32>
    %641 = tpu.matmul %639, %640, %cst_132 {dimension_numbers = #tpu.dot_dimension_numbers<[1], [0], [0], [1], [0, 0, 1, 1], [], []>} : vector<2x128xf32>, vector<128x128xf32>, vector<2x128xf32> -> vector<2x128xf32>
    %642 = vector.extract_strided_slice %0 {offsets = [13, 0], sizes = [1, 128], strides = [1, 1]} : vector<16x128xf32> to vector<1x128xf32>
    %643 = vector.shape_cast %642 : vector<1x128xf32> to vector<128xf32>
    %644 = vector.shape_cast %643 : vector<128xf32> to vector<1x128xf32>
    %645 = vector.broadcast %644 : vector<1x128xf32> to vector<2x128xf32>
    %646 = arith.addf %641, %645 : vector<2x128xf32>
    %cst_133 = arith.constant 0.000000e+00 : f32
    %647 = vector.broadcast %cst_133 : f32 to vector<2x128xf32>
    %648 = arith.subf %647, %646 : vector<2x128xf32>
    %649 = math.exp %648 : vector<2x128xf32>
    %cst_134 = arith.constant 1.000000e+00 : f32
    %650 = vector.broadcast %cst_134 : f32 to vector<2x128xf32>
    %651 = arith.addf %650, %649 : vector<2x128xf32>
    %cst_135 = arith.constant 1.000000e+00 : f32
    %652 = vector.broadcast %cst_135 : f32 to vector<2x128xf32>
    %653 = arith.divf %652, %651 : vector<2x128xf32>
    %654 = vector.shape_cast %653 : vector<2x128xf32> to vector<2x1x128xf32>
    %655 = vector.broadcast %654 : vector<2x1x128xf32> to vector<2x64x128xf32>
    %656 = arith.mulf %589, %655 : vector<2x64x128xf32>
    %657 = vector.shape_cast %656 : vector<2x64x128xf32> to vector<128x128xf32>
    %c0_136 = arith.constant 0 : index
    %c0_137 = arith.constant 0 : index
    %658 = vector.load %arg3[%c0_136, %c0_137] : memref<256x32xf32, #tpu.memory_space<vmem>>, vector<128x32xf32>
    %cst_138 = arith.constant dense<0.000000e+00> : vector<128x32xf32>
    %659 = tpu.matmul %657, %658, %cst_138 {dimension_numbers = #tpu.dot_dimension_numbers<[1], [0], [0], [1], [0, 0, 1, 1], [], []>} : vector<128x128xf32>, vector<128x32xf32>, vector<128x32xf32> -> vector<128x32xf32>
    %660 = vector.shape_cast %41 : vector<2x64x128xf32> to vector<128x128xf32>
    %c128 = arith.constant 128 : index
    %c0_139 = arith.constant 0 : index
    %661 = vector.load %arg3[%c128, %c0_139] : memref<256x32xf32, #tpu.memory_space<vmem>>, vector<128x32xf32>
    %cst_140 = arith.constant dense<0.000000e+00> : vector<128x32xf32>
    %662 = tpu.matmul %660, %661, %cst_140 {dimension_numbers = #tpu.dot_dimension_numbers<[1], [0], [0], [1], [0, 0, 1, 1], [], []>} : vector<128x128xf32>, vector<128x32xf32>, vector<128x32xf32> -> vector<128x32xf32>
    %663 = arith.addf %659, %662 : vector<128x32xf32>
    %664 = vector.shape_cast %663 : vector<128x32xf32> to vector<2x64x32xf32>
    %665 = vector.extract_strided_slice %664 {offsets = [0, 0, 0], sizes = [1, 64, 32], strides = [1, 1, 1]} : vector<2x64x32xf32> to vector<1x64x32xf32>
    %666 = vector.shape_cast %665 : vector<1x64x32xf32> to vector<64x32xf32>
    %667 = tpu.transpose %666, [1, 0] : vector<64x32xf32> -> vector<32x64xf32>
    %c0_141 = arith.constant 0 : index
    %c0_142 = arith.constant 0 : index
    %c0_143 = arith.constant 0 : index
    %668 = vector.load %arg4[%c0_141, %c0_142, %c0_143] : memref<2x32x64xf32, #tpu.memory_space<vmem>>, vector<1x32x64xf32>
    %669 = vector.shape_cast %668 : vector<1x32x64xf32> to vector<32x64xf32>
    %670 = vector.shape_cast %667 : vector<32x64xf32> to vector<1x32x64xf32>
    tpu.vector_store %arg4[%c0_141, %c0_142, %c0_143], %670 {strides = array<i32>} : memref<2x32x64xf32, #tpu.memory_space<vmem>>, vector<1x32x64xf32>,
    %671 = vector.extract_strided_slice %664 {offsets = [1, 0, 0], sizes = [1, 64, 32], strides = [1, 1, 1]} : vector<2x64x32xf32> to vector<1x64x32xf32>
    %672 = vector.shape_cast %671 : vector<1x64x32xf32> to vector<64x32xf32>
    %673 = tpu.transpose %672, [1, 0] : vector<64x32xf32> -> vector<32x64xf32>
    %c1_144 = arith.constant 1 : index
    %c0_145 = arith.constant 0 : index
    %c0_146 = arith.constant 0 : index
    %674 = vector.load %arg4[%c1_144, %c0_145, %c0_146] : memref<2x32x64xf32, #tpu.memory_space<vmem>>, vector<1x32x64xf32>
    %675 = vector.shape_cast %674 : vector<1x32x64xf32> to vector<32x64xf32>
    %676 = vector.shape_cast %673 : vector<32x64xf32> to vector<1x32x64xf32>
    tpu.vector_store %arg4[%c1_144, %c0_145, %c0_146], %676 {strides = array<i32>} : memref<2x32x64xf32, #tpu.memory_space<vmem>>, vector<1x32x64xf32>,
    return
  }
}

</mosaic_0001>

<bundles_post_ra>
// kernel: basic_block_forward.1
= control target key start
LH: loop header
LB: loop body
LE: loop exit
PB: predicated region body
PF: predicated region fallthrough
CT: control target
= control target key end

     0   :  { %9 = vsyncpa [#allocation3], 0  ;;  %s9191_s15 = smov [#allocation2]   ;;  %s12973_s0 = inlined_call_operand.vmem [shape: f32[2,16,64], index: 0, kind: input, shape index: {}]   ;;  %s12974_s1 = inlined_call_operand.hbm [shape: f32[584,128], index: 1, kind: input, shape index: {}]   ;;  %s12975_s2 = inlined_call_operand.vmem [shape: f32[16,128], index: 2, kind: input, shape index: {}]   ;;  %s12976_s3 = inlined_call_operand.vmem [shape: f32[256,32], index: 3, kind: input, shape index: {}]   ;;  %s12977_s4 = inlined_call_operand.vmem [shape: f32[2,32,64], index: 4, kind: output, shape index: {}]  }
   0x1   :  { %s17_s16 = sshll.u32 %s9191_s15, 4  ;;  %s18_s16 = int_to_ptr.vmem [resolvable:$true] %s17_s16 }
   0x2   :  { %s9177_s17 = scalar_lea.vmem %s18_s16, 9344  ;;  %p9182_p1 = scmp.lt.s32.totalorder %s18_s16, %s18_s16 }
   0x3   :  { %p9178_p0 = scmp.ne.s32.totalorder %s18_s16, %s9177_s17  ;;  %p9183_p2 = scmp.lt.s32.totalorder %s9177_s17, %s9177_s17 }
   0x5   :  { %p9184_p3 = por %p9183_p2, %p9182_p1 }
   0x7   :  { %p9185_p4 = pnand %p9184_p3, %p9178_p0 }
   0x9   :  { %9188 = shalt.err (!%p9185_p4)
}
   0xa   :  { %s9192_s18 = smov 128   ;;  %s9193_s19 = smov 8  }
   0xb   :  { %23 = dma.hbm_to_vmem [thread:$0]  %s12974_s1, 9344, %s18_s16, [#allocation3], %s9192_s18, %s9192_s18, %s9193_s19  }
   0xc   :  { %9189 = dma.done.wait [#allocation3], 9344  }
   0xd   :  { %9190 = vsyncadd [#allocation3], 4294957952  ;;  %v33_v0 = vld [vmem:[%s12973_s0] sm:$0xff]  ;;  %v8387_v1 = vld [vmem:[%s12973_s0 + $0x10] sm:$0xff]  ;;  %vm108_vm0 = vcmask 130048   ;;  %v104_v38 = vlaneseq  ;;  %vm1340_vm9 = vcmask 1040384  }
   0xe   :  { %35 = vxpose.xlu0.b32.start [1/2] (short) (narrow) %v33_v0, 64  ;;  %70 = vxpose.xlu1.b32.start [1/2] (short) (narrow) %v8387_v1, 64  ;;  %v103_v2 = vld [vmem:[#allocation2 + $0x8] sm:$0xff]  ;;  %v102_v3 = vld [vmem:[#allocation2] sm:$0xff]  ;;  %v8388_v5 = vld [vmem:[%s12973_s0 + $0x18] sm:$0xff]  ;;  %vm1357_vm10 = vcmask 1041408  }
   0xf   :  { %v34_v4 = vld [vmem:[%s12973_s0 + $0x8] sm:$0xff]  ;;  %8638 = vmatprep.subr.mxu0 %v103_v2  ;;  %v465_v23 = vld [vmem:[#allocation2 + $0x80] sm:$0xff]  ;;  %v464_v24 = vld [vmem:[#allocation2 + $0x78] sm:$0xff]  ;;  %v9253_v39 = vshrl.u32 %v104_v38, 7  ;;  %vm1374_vm11 = vcmask 1042432   ;;  %vm1407_vm12 = vcmask 1043456  }
  0x10   :  { %8639 = vmatpush3.msra.mxu0 %v103_v2  ;;  %v466_v22 = vld [vmem:[#allocation2 + $0x88] sm:$0xff]  ;;  %v463_v25 = vld [vmem:[#allocation2 + $0x70] sm:$0xff]  ;;  %v461_v27 = vld [vmem:[#allocation2 + $0x60] sm:$0xff]  ;;  %vm1424_vm13 = vcmask 1044480  }
  0x11   :  { %8640 = vmatprep.subr.mxu0 %v102_v3  ;;  %8666 = vmatprep.subr.mxu1 %v466_v22  ;;  %v462_v26 = vld [vmem:[#allocation2 + $0x68] sm:$0xff]  ;;  %v460_v28 = vld [vmem:[#allocation2 + $0x58] sm:$0xff]  ;;  %v459_v29 = vld [vmem:[#allocation2 + $0x50] sm:$0xff]  ;;  %13076 = vst [vmem:[#allocation5_spill] sm:$0xff] %v9253_v39  ;;  %v9256_v41 = vsub.s32 0, %v9253_v39 }
  0x12   :  { %36 = vxpose.xlu0.b32.end [2/2] (short) (narrow) %v34_v4, 64  ;;  %71 = vxpose.xlu1.b32.end [2/2] (short) (narrow) %v8388_v5, 64  ;;  %v458_v30 = vld [vmem:[#allocation2 + $0x48] sm:$0xff]  ;;  %v457_v31 = vld [vmem:[#allocation2 + $0x40] sm:$0xff]  ;;  %v456_v32 = vld [vmem:[#allocation2 + $0x38] sm:$0xff] }
  0x13   :  { %8641 = vmatpush3.msra.mxu0 %v102_v3  ;;  %8667 = vmatpush3.msra.mxu1 %v466_v22  ;;  %v455_v33 = vld [vmem:[#allocation2 + $0x30] sm:$0xff]  ;;  %v454_v34 = vld [vmem:[#allocation2 + $0x28] sm:$0xff]  ;;  %v453_v35 = vld [vmem:[#allocation2 + $0x20] sm:$0xff]  ;;  %13077 = vst [vmem:[#allocation6_spill] sm:$0xff] %v9256_v41 }
  0x14   :  { %8668 = vmatprep.subr.mxu1 %v465_v23  ;;  %v452_v36 = vld [vmem:[#allocation2 + $0x18] sm:$0xff]  ;;  %v451_v37 = vld [vmem:[#allocation2 + $0x10] sm:$0xff]  ;;  %v9261_v42 = vld [vmem:[%s12975_s2] sm:$0xff] }
  0x15   :  { %8669 = vmatpush3.msra.mxu1 %v465_v23  ;;  %v107_v45 = vrot.slane %v9261_v42, %v9256_v41 }
  0x16   :  { %8670 = vmatprep.subr.mxu1 %v464_v24 }
  0x17   :  { %8671 = vmatpush3.msra.mxu1 %v464_v24 }
  0x18   :  { %8672 = vmatprep.subr.mxu1 %v463_v25 }
  0x19   :  { %8673 = vmatpush3.msra.mxu1 %v463_v25 }
  0x1a   :  { %8674 = vmatprep.subr.mxu1 %v462_v26 }
  0x1b   :  { %8675 = vmatpush3.msra.mxu1 %v462_v26 }
  0x1c   :  { %8676 = vmatprep.subr.mxu1 %v461_v27 }
  0x1d   :  { %8677 = vmatpush3.msra.mxu1 %v461_v27 }
  0x1e   :  { %8678 = vmatprep.subr.mxu1 %v460_v28 }
  0x1f   :  { %8679 = vmatpush3.msra.mxu1 %v460_v28 }
  0x20   :  { %8680 = vmatprep.subr.mxu1 %v459_v29 }
  0x21   :  { %8681 = vmatpush3.msra.mxu1 %v459_v29 }
  0x22   :  { %8682 = vmatprep.subr.mxu1 %v458_v30 }
  0x23   :  { %8683 = vmatpush3.msra.mxu1 %v458_v30 }
  0x24   :  { %8684 = vmatprep.subr.mxu1 %v457_v31 }
  0x25   :  { %8685 = vmatpush3.msra.mxu1 %v457_v31 }
  0x26   :  { %8686 = vmatprep.subr.mxu1 %v456_v32 }
  0x27   :  { %8687 = vmatpush3.msra.mxu1 %v456_v32 }
  0x28   :  { %8688 = vmatprep.subr.mxu1 %v455_v33 }
  0x29   :  { %8689 = vmatpush3.msra.mxu1 %v455_v33 }
  0x2a   :  { %8690 = vmatprep.subr.mxu1 %v454_v34 }
  0x2b   :  { %8691 = vmatpush3.msra.mxu1 %v454_v34 }
  0x2c   :  { %8692 = vmatprep.subr.mxu1 %v453_v35 }
  0x2d   :  { %8693 = vmatpush3.msra.mxu1 %v453_v35 }
  0x2e   :  { %8694 = vmatprep.subr.mxu1 %v452_v36 }
  0x2f   :  { %8695 = vmatpush3.msra.mxu1 %v452_v36 }
  0x30   :  { %8696 = vmatprep.subr.mxu1 %v451_v37 }
  0x31   :  { %8697 = vmatpush3.msra.mxu1 %v451_v37 }
  0x8a   :  { %v51_v6 = vpop.trf.xlu0  ;;  %v86_v7 = vpop.trf.xlu1 }
  0x8b   :  { %8642 = vmatprep.mubr.msk.f32.mxu0 %vm108_vm0, %v51_v6 }
  0x8e   :  { %v52_v8 = vpop.trf.xlu0  ;;  %v87_v9 = vpop.trf.xlu1 }
  0x8f   :  { %8643 = vmatmul.mubr.msk.f32.vlgmr.msra.gmra.mxu0 %vm108_vm0, %v52_v8 }
  0x92   :  { %v53_v10 = vpop.trf.xlu0  ;;  %v88_v12 = vpop.trf.xlu1 }
  0x93   :  { %8645 = vmatprep.mubr.msk.f32.mxu0 %vm108_vm0, %v53_v10 }
  0x96   :  { %v54_v11 = vpop.trf.xlu0  ;;  %v89_v14 = vpop.trf.xlu1 }
  0x97   :  { %8646 = vmatmul.mubr.msk.f32.gmra.mxu0 %vm108_vm0, %v54_v11 }
  0x9a   :  { %v55_v13 = vpop.trf.xlu0  ;;  %v90_v17 = vpop.trf.xlu1 }
  0x9b   :  { %8648 = vmatprep.mubr.msk.f32.mxu0 %vm108_vm0, %v55_v13 }
  0x9e   :  { %v56_v15 = vpop.trf.xlu0  ;;  %v91_v19 = vpop.trf.xlu1 }
  0x9f   :  { %8649 = vmatmul.mubr.msk.f32.gmra.mxu0 %vm108_vm0, %v56_v15 }
  0xa2   :  { %v57_v16 = vpop.trf.xlu0  ;;  %v92_v20 = vpop.trf.xlu1 }
  0xa3   :  { %8651 = vmatprep.mubr.msk.f32.mxu0 %vm108_vm0, %v57_v16 }
  0xa6   :  { %v58_v18 = vpop.trf.xlu0  ;;  %v93_v21 = vpop.trf.xlu1 }
  0xa7   :  { %8652 = vmatmul.mubr.msk.f32.gmra.mxu0 %vm108_vm0, %v58_v18 }
  0xa8   :  { %8654 = vmatprep.mubr.msk.f32.mxu0 %vm108_vm0, %v86_v7 }
  0xab   :  { %8655 = vmatmul.mubr.msk.f32.gmra.mxu0 %vm108_vm0, %v87_v9 }
  0xac   :  { %8657 = vmatprep.mubr.msk.f32.mxu0 %vm108_vm0, %v88_v12 }
  0xaf   :  { %8658 = vmatmul.mubr.msk.f32.gmra.mxu0 %vm108_vm0, %v89_v14 }
  0xb0   :  { %8660 = vmatprep.mubr.msk.f32.mxu0 %vm108_vm0, %v90_v17 }
  0xb3   :  { %8661 = vmatmul.mubr.msk.f32.gmra.mxu0 %vm108_vm0, %v91_v19 }
  0xb4   :  { %8663 = vmatprep.mubr.msk.f32.mxu0 %vm108_vm0, %v92_v20 }
  0xb7   :  { %8664 = vmatmul.mubr.msk.f32.gmra.mxu0 %vm108_vm0, %v93_v21 }
 0x14f   :  { %v8644_v40 = vpop.f32.mrf.mxu0 }
 0x150   :  { %v229_v48 = vadd.f32 %v8644_v40, %v107_v45 }
 0x151   :  { %v223_v43 = vpop.f32.mrf.mxu0 }
 0x152   :  { %v224_v47 = vadd.f32 %v223_v43, %v107_v45 }
 0x154   :  { %v302_v50 = vadd.f32 %v229_v48, %v224_v47 }
 0x157   :  { %v8647_v44 = vpop.f32.mrf.mxu0 }
 0x158   :  { %v239_v54 = vadd.f32 %v8647_v44, %v107_v45 }
 0x159   :  { %v233_v46 = vpop.f32.mrf.mxu0 }
 0x15a   :  { %v234_v49 = vadd.f32 %v233_v46, %v107_v45 }
 0x15c   :  { %v303_v52 = vadd.f32 %v302_v50, %v234_v49 }
 0x15e   :  { %v304_v56 = vadd.f32 %v303_v52, %v239_v54 }
 0x15f   :  { %v8650_v51 = vpop.f32.mrf.mxu0 }
 0x160   :  { %v249_v59 = vadd.f32 %v8650_v51, %v107_v45 }
 0x161   :  { %v243_v53 = vpop.f32.mrf.mxu0 }
 0x162   :  { %v244_v55 = vadd.f32 %v243_v53, %v107_v45 }
 0x164   :  { %v305_v57 = vadd.f32 %v304_v56, %v244_v55 }
 0x166   :  { %v306_v62 = vadd.f32 %v305_v57, %v249_v59 }
 0x167   :  { %v8653_v58 = vpop.f32.mrf.mxu0 }
 0x168   :  { %v259_v0 = vadd.f32 %v8653_v58, %v107_v45 }
 0x169   :  { %v253_v60 = vpop.f32.mrf.mxu0 }
 0x16a   :  { %v254_v61 = vadd.f32 %v253_v60, %v107_v45 }
 0x16b   :  { %v8656_v63 = vpop.f32.mrf.mxu0 }
 0x16c   :  { %v307_v1 = vadd.f32 %v306_v62, %v254_v61  ;;  %v269_v7 = vadd.f32 %v8656_v63, %v107_v45 }
 0x16d   :  { %v263_v2 = vpop.f32.mrf.mxu0 }
 0x16e   :  { %v308_v3 = vadd.f32 %v307_v1, %v259_v0  ;;  %v264_v4 = vadd.f32 %v263_v2, %v107_v45 }
 0x16f   :  { %v8659_v5 = vpop.f32.mrf.mxu0 }
 0x170   :  { %v309_v6 = vrot.slane %v308_v3, 4  ;;  %v315_v10 = vadd.f32 %v269_v7, %v264_v4  ;;  %v279_v14 = vadd.f32 %v8659_v5, %v107_v45 }
 0x171   :  { %v273_v8 = vpop.f32.mrf.mxu0 }
 0x172   :  { %v310_v9 = vadd.f32 %v309_v6, %v308_v3  ;;  %v274_v11 = vadd.f32 %v273_v8, %v107_v45 }
 0x173   :  { %v8662_v12 = vpop.f32.mrf.mxu0 }
 0x174   :  { %v311_v13 = vrot.slane %v310_v9, 2  ;;  %v316_v15 = vadd.f32 %v315_v10, %v274_v11  ;;  %v289_v22 = vadd.f32 %v8662_v12, %v107_v45 }
 0x175   :  { %v283_v16 = vpop.f32.mrf.mxu0 }
 0x176   :  { %v312_v17 = vadd.f32 %v311_v13, %v310_v9  ;;  %v284_v18 = vadd.f32 %v283_v16, %v107_v45  ;;  %v317_v19 = vadd.f32 %v316_v15, %v279_v14 }
 0x177   :  { %v8665_v20 = vpop.f32.mrf.mxu0 }
 0x178   :  { %v313_v21 = vrot.slane %v312_v17, 1  ;;  %v318_v23 = vadd.f32 %v317_v19, %v284_v18  ;;  %v299_v36 = vadd.f32 %v8665_v20, %v107_v45 }
 0x179   :  { %v293_v24 = vpop.f32.mrf.mxu0 }
 0x17a   :  { %v314_v25 = vadd.f32 %v313_v21, %v312_v17  ;;  %v294_v26 = vadd.f32 %v293_v24, %v107_v45  ;;  %v319_v27 = vadd.f32 %v318_v23, %v289_v22 }
 0x17c   :  { %v329_v28 = vmul.f32 0.015625, %v314_v25  ;;  %v320_v32 = vadd.f32 %v319_v27, %v294_v26 }
 0x17e   :  { %v9265_v29 = vsub.f32 %v224_v47, %v329_v28  ;;  %v9267_v30 = vsub.f32 %v229_v48, %v329_v28  ;;  %v9269_v31 = vsub.f32 %v234_v49, %v329_v28  ;;  %v9271_v33 = vsub.f32 %v239_v54, %v329_v28 }
 0x17f   :  { %v9277_v37 = vsub.f32 %v244_v55, %v329_v28  ;;  %v321_v43 = vadd.f32 %v320_v32, %v299_v36  ;;  %v9281_v44 = vsub.f32 %v249_v59, %v329_v28  ;;  %v9285_v49 = vsub.f32 %v254_v61, %v329_v28 }
 0x180   :  { %v347_v34 = vmul.f32 %v9265_v29, %v9265_v29  ;;  %v348_v35 = vmul.f32 %v9267_v30, %v9267_v30  ;;  %v349_v38 = vmul.f32 %v9269_v31, %v9269_v31  ;;  %v350_v46 = vmul.f32 %v9271_v33, %v9271_v33 }
 0x181   :  { %v322_v48 = vrot.slane %v321_v43, 4  ;;  %v351_v50 = vmul.f32 %v9277_v37, %v9277_v37  ;;  %v9289_v52 = vsub.f32 %v259_v0, %v329_v28  ;;  %v352_v53 = vmul.f32 %v9281_v44, %v9281_v44 }
 0x182   :  { %v363_v40 = vadd.f32 %v348_v35, %v347_v34  ;;  %v353_v56 = vmul.f32 %v9285_v49, %v9285_v49 }
 0x183   :  { %v323_v51 = vadd.f32 %v322_v48, %v321_v43  ;;  %v354_v59 = vmul.f32 %v9289_v52, %v9289_v52 }
 0x184   :  { %v364_v47 = vadd.f32 %v363_v40, %v349_v38 }
 0x185   :  { %v324_v55 = vrot.slane %v323_v51, 2 }
 0x186   :  { %v365_v45 = vadd.f32 %v364_v47, %v350_v46  ;;  %v12981_v47 = vsub.s32 2, %v9253_v39 }
 0x187   :  { %v325_v58 = vadd.f32 %v324_v55, %v323_v51 }
 0x188   :  { %v366_v54 = vadd.f32 %v365_v45, %v351_v50 }
 0x189   :  { %v326_v61 = vrot.slane %v325_v58, 1 }
 0x18a   :  { %v367_v57 = vadd.f32 %v366_v54, %v352_v53  ;;  %v9340_v54 = vrot.slane %v9261_v42, %v12981_v47 }
 0x18b   :  { %v327_v63 = vadd.f32 %v326_v61, %v325_v58 }
 0x18c   :  { %v368_v60 = vadd.f32 %v367_v57, %v353_v56 }
 0x18d   :  { %v330_v0 = vmul.f32 0.015625, %v327_v63 }
 0x18e   :  { %v369_v62 = vadd.f32 %v368_v60, %v354_v59 }
 0x18f   :  { %v9297_v3 = vsub.f32 %v264_v4, %v330_v0  ;;  %v9299_v5 = vsub.f32 %v269_v7, %v330_v0  ;;  %v9301_v6 = vsub.f32 %v274_v11, %v330_v0  ;;  %v9303_v9 = vsub.f32 %v279_v14, %v330_v0 }
 0x190   :  { %v370_v1 = vrot.slane %v369_v62, 4  ;;  %v9309_v15 = vsub.f32 %v284_v18, %v330_v0  ;;  %v9313_v17 = vsub.f32 %v289_v22, %v330_v0  ;;  %v9317_v20 = vsub.f32 %v294_v26, %v330_v0 }
 0x191   :  { %v355_v10 = vmul.f32 %v9297_v3, %v9297_v3  ;;  %v356_v12 = vmul.f32 %v9299_v5, %v9299_v5  ;;  %v357_v4 = vmul.f32 %v9301_v6, %v9301_v6  ;;  %v358_v11 = vmul.f32 %v9303_v9, %v9303_v9 }
 0x192   :  { %v371_v2 = vadd.f32 %v370_v1, %v369_v62  ;;  %v359_v21 = vmul.f32 %v9309_v15, %v9309_v15  ;;  %v9321_v24 = vsub.f32 %v299_v36, %v330_v0  ;;  %v360_v25 = vmul.f32 %v9313_v17, %v9313_v17 }
 0x193   :  { %v376_v16 = vadd.f32 %v356_v12, %v355_v10  ;;  %v361_v28 = vmul.f32 %v9317_v20, %v9317_v20  ;;  %v12982_v36 = vsub.s32 1, %v9253_v39 }
 0x194   :  { %v372_v8 = vrot.slane %v371_v2, 2  ;;  %v362_v26 = vmul.f32 %v9321_v24, %v9321_v24 }
 0x195   :  { %v377_v14 = vadd.f32 %v376_v16, %v357_v4  ;;  %v9334_v50 = vrot.slane %v9261_v42, %v12982_v36 }
 0x196   :  { %v373_v13 = vadd.f32 %v372_v8, %v371_v2 }
 0x197   :  { %v378_v23 = vadd.f32 %v377_v14, %v358_v11 }
 0x198   :  { %v374_v7 = vrot.slane %v373_v13, 1 }
 0x199   :  { %v379_v27 = vadd.f32 %v378_v23, %v359_v21 }
 0x19a   :  { %v375_v19 = vadd.f32 %v374_v7, %v373_v13 }
 0x19b   :  { %v380_v32 = vadd.f32 %v379_v27, %v360_v25 }
 0x19c   :  { %v389_v18 = vmul.f32 0.015625, %v375_v19 }
 0x19d   :  { %v381_v34 = vadd.f32 %v380_v32, %v361_v28 }
 0x19e   :  { %v391_v22 = vadd.f32 1e-05, %v389_v18 }
 0x19f   :  { %v382_v35 = vadd.f32 %v381_v34, %v362_v26 }
 0x1a0   :  { %8966 = vrsqrt.f32 %v391_v22 }
 0x1a1   :  { %v383_v38 = vrot.slane %v382_v35, 4 }
 0x1a3   :  { %v384_v40 = vadd.f32 %v383_v38, %v382_v35 }
 0x1a5   :  { %v385_v43 = vrot.slane %v384_v40, 2 }
 0x1a7   :  { %v386_v46 = vadd.f32 %v385_v43, %v384_v40  ;;  %v12980_v40 = vsub.s32 3, %v9253_v39 }
 0x1a9   :  { %v387_v48 = vrot.slane %v386_v46, 1 }
 0x1ab   :  { %v388_v51 = vadd.f32 %v387_v48, %v386_v46  ;;  %v470_v46 = vrot.slane %v9261_v42, %v12980_v40 }
 0x1ad   :  { %v8967_v45 = vpop.eup %8966  ;;  %v390_v58 = vmul.f32 0.015625, %v388_v51 }
 0x1ae   :  { %v395_v53 = vmul.f32 %v8967_v45, %v9265_v29  ;;  %v396_v55 = vmul.f32 %v8967_v45, %v9267_v30  ;;  %v397_v56 = vmul.f32 %v8967_v45, %v9269_v31  ;;  %v398_v57 = vmul.f32 %v8967_v45, %v9271_v33 }
 0x1af   :  { %v399_v61 = vmul.f32 %v8967_v45, %v9277_v37  ;;  %v392_v62 = vadd.f32 1e-05, %v390_v58  ;;  %v400_v31 = vmul.f32 %v8967_v45, %v9281_v44  ;;  %v401_v33 = vmul.f32 %v8967_v45, %v9285_v49 }
 0x1b0   :  { %v415_v59 = vmul.f32 %v9334_v50, %v395_v53  ;;  %v416_v60 = vmul.f32 %v9334_v50, %v396_v55  ;;  %v417_v29 = vmul.f32 %v9334_v50, %v397_v56  ;;  %v418_v30 = vmul.f32 %v9334_v50, %v398_v57 }
 0x1b1   :  { %8968 = vrsqrt.f32 %v392_v62  ;;  %v419_v0 = vmul.f32 %v9334_v50, %v399_v61  ;;  %v420_v8 = vmul.f32 %v9334_v50, %v400_v31  ;;  %v402_v44 = vmul.f32 %v8967_v45, %v9289_v52 }
 0x1b2   :  { %v9350_v63 = vadd.f32 %v9340_v54, %v415_v59  ;;  %v9353_v1 = vadd.f32 %v9340_v54, %v416_v60  ;;  %v9360_v37 = vadd.f32 %v9340_v54, %v417_v29  ;;  %v9366_v2 = vadd.f32 %v9340_v54, %v418_v30 }
 0x1b3   :  { %v9371_v49 = vadd.f32 %v9340_v54, %v419_v0  ;;  %v421_v10 = vmul.f32 %v9334_v50, %v401_v33  ;;  %v9377_v12 = vadd.f32 %v9340_v54, %v420_v8  ;;  %v422_v13 = vmul.f32 %v9334_v50, %v402_v44 }
 0x1b4   :  { %13078 = vst [vmem:[#allocation7_spill] sm:$0xff] %v9350_v63  ;;  %13079 = vst [vmem:[#allocation8_spill] sm:$0xff] %v9353_v1  ;;  %8698 = vmatprep.mubr.f32.mxu1 %v9350_v63 }
 0x1b5   :  { %13080 = vst [vmem:[#allocation9_spill] sm:$0xff] %v9360_v37  ;;  %8699 = vmatmul.mubr.f32.vlgmr.msra.gmra.mxu1 %v9353_v1  ;;  %13081 = vst [vmem:[#allocation10_spill] sm:$0xff] %v9366_v2  ;;  %v9381_v4 = vadd.f32 %v9340_v54, %v421_v10  ;;  %v9386_v52 = vadd.f32 %v9340_v54, %v422_v13 }
 0x1b6   :  { %8701 = vmatprep.mubr.f32.mxu1 %v9360_v37  ;;  %13082 = vst [vmem:[#allocation11_spill] sm:$0xff] %v9371_v49  ;;  %13083 = vst [vmem:[#allocation12_spill] sm:$0xff] %v9377_v12 }
 0x1b7   :  { %13084 = vst [vmem:[#allocation13_spill] sm:$0xff] %v9381_v4  ;;  %13085 = vst [vmem:[#allocation14_spill] sm:$0xff] %v9386_v52 }
 0x1b9   :  { %8702 = vmatmul.mubr.f32.gmra.mxu1 %v9366_v2 }
 0x1ba   :  { %8704 = vmatprep.mubr.f32.mxu1 %v9371_v49 }
 0x1bd   :  { %8705 = vmatmul.mubr.f32.gmra.mxu1 %v9377_v12 }
 0x1be   :  { %8707 = vmatprep.mubr.f32.mxu1 %v9381_v4  ;;  %v8969_v16 = vpop.eup %8968 }
 0x1bf   :  { %v403_v7 = vmul.f32 %v8969_v16, %v9297_v3  ;;  %v404_v11 = vmul.f32 %v8969_v16, %v9299_v5  ;;  %v405_v14 = vmul.f32 %v8969_v16, %v9301_v6  ;;  %v406_v19 = vmul.f32 %v8969_v16, %v9303_v9 }
 0x1c0   :  { %v407_v25 = vmul.f32 %v8969_v16, %v9309_v15  ;;  %v408_v5 = vmul.f32 %v8969_v16, %v9313_v17  ;;  %v409_v6 = vmul.f32 %v8969_v16, %v9317_v20  ;;  %v410_v17 = vmul.f32 %v8969_v16, %v9321_v24 }
 0x1c1   :  { %8708 = vmatmul.mubr.f32.gmra.mxu1 %v9386_v52  ;;  %v423_v21 = vmul.f32 %v9334_v50, %v403_v7  ;;  %v424_v23 = vmul.f32 %v9334_v50, %v404_v11  ;;  %v425_v18 = vmul.f32 %v9334_v50, %v405_v14  ;;  %v426_v3 = vmul.f32 %v9334_v50, %v406_v19 }
 0x1c2   :  { %v427_v28 = vmul.f32 %v9334_v50, %v407_v25  ;;  %v428_v32 = vmul.f32 %v9334_v50, %v408_v5  ;;  %v429_v26 = vmul.f32 %v9334_v50, %v409_v6  ;;  %v430_v35 = vmul.f32 %v9334_v50, %v410_v17 }
 0x1c3   :  { %v9398_v27 = vadd.f32 %v9340_v54, %v423_v21  ;;  %v9401_v22 = vadd.f32 %v9340_v54, %v424_v23  ;;  %v9408_v9 = vadd.f32 %v9340_v54, %v425_v18  ;;  %v9414_v15 = vadd.f32 %v9340_v54, %v426_v3 }
 0x1c4   :  { %v9419_v20 = vadd.f32 %v9340_v54, %v427_v28  ;;  %v9425_v34 = vadd.f32 %v9340_v54, %v428_v32  ;;  %v9429_v38 = vadd.f32 %v9340_v54, %v429_v26  ;;  %v9434_v24 = vadd.f32 %v9340_v54, %v430_v35 }
 0x1c5   :  { %13086 = vst [vmem:[#allocation15_spill] sm:$0xff] %v9398_v27  ;;  %13087 = vst [vmem:[#allocation16_spill] sm:$0xff] %v9401_v22  ;;  %8710 = vmatprep.mubr.f32.mxu1 %v9398_v27 }
 0x1c6   :  { %13088 = vst [vmem:[#allocation17_spill] sm:$0xff] %v9408_v9  ;;  %8711 = vmatmul.mubr.f32.gmra.mxu1 %v9401_v22  ;;  %13089 = vst [vmem:[#allocation18_spill] sm:$0xff] %v9414_v15 }
 0x1c7   :  { %8713 = vmatprep.mubr.f32.mxu1 %v9408_v9  ;;  %13090 = vst [vmem:[#allocation19_spill] sm:$0xff] %v9419_v20  ;;  %13091 = vst [vmem:[#allocation20_spill] sm:$0xff] %v9425_v34 }
 0x1c8   :  { %13092 = vst [vmem:[#allocation21_spill] sm:$0xff] %v9429_v38  ;;  %13093 = vst [vmem:[#allocation22_spill] sm:$0xff] %v9434_v24 }
 0x1ca   :  { %8714 = vmatmul.mubr.f32.gmra.mxu1 %v9414_v15 }
 0x1cb   :  { %8716 = vmatprep.mubr.f32.mxu1 %v9419_v20 }
 0x1ce   :  { %8717 = vmatmul.mubr.f32.gmra.mxu1 %v9425_v34 }
 0x1cf   :  { %8719 = vmatprep.mubr.f32.mxu1 %v9429_v38 }
 0x1d2   :  { %8720 = vmatmul.mubr.f32.gmra.mxu1 %v9434_v24 }
 0x275   :  { %v8700_v43 = vpop.f32.mrf.mxu1 }
 0x276   :  { %v543_v51 = vadd.f32 %v8700_v43, %v470_v46 }
 0x277   :  { %v537_v48 = vpop.f32.mrf.mxu1 }
 0x278   :  { %v538_v50 = vadd.f32 %v537_v48, %v470_v46 }
 0x279   :  { %v8703_v45 = vpop.f32.mrf.mxu1 }
 0x27a   :  { %v616_v55 = vadd.f32 %v543_v51, %v538_v50  ;;  %v553_v58 = vadd.f32 %v8703_v45, %v470_v46 }
 0x27b   :  { %v547_v53 = vpop.f32.mrf.mxu1 }
 0x27c   :  { %v548_v56 = vadd.f32 %v547_v53, %v470_v46 }
 0x27d   :  { %v8706_v57 = vpop.f32.mrf.mxu1 }
 0x27e   :  { %v617_v54 = vadd.f32 %v616_v55, %v548_v56  ;;  %v563_v62 = vadd.f32 %v8706_v57, %v470_v46 }
 0x27f   :  { %v557_v59 = vpop.f32.mrf.mxu1 }
 0x280   :  { %v558_v60 = vadd.f32 %v557_v59, %v470_v46  ;;  %v618_v61 = vadd.f32 %v617_v54, %v553_v58 }
 0x281   :  { %v8709_v29 = vpop.f32.mrf.mxu1 }
 0x282   :  { %v619_v30 = vadd.f32 %v618_v61, %v558_v60  ;;  %v573_v8 = vadd.f32 %v8709_v29, %v470_v46 }
 0x283   :  { %v567_v31 = vpop.f32.mrf.mxu1 }
 0x284   :  { %v568_v33 = vadd.f32 %v567_v31, %v470_v46  ;;  %v620_v0 = vadd.f32 %v619_v30, %v563_v62 }
 0x286   :  { %v621_v44 = vadd.f32 %v620_v0, %v568_v33  ;;  %v8712_v13 = vpop.f32.mrf.mxu1 }
 0x287   :  { %v583_v23 = vadd.f32 %v8712_v13, %v470_v46 }
 0x288   :  { %v622_v10 = vadd.f32 %v621_v44, %v573_v8  ;;  %v577_v7 = vpop.f32.mrf.mxu1 }
 0x289   :  { %v578_v14 = vadd.f32 %v577_v7, %v470_v46 }
 0x28a   :  { %v623_v16 = vrot.slane %v622_v10, 4  ;;  %v8715_v19 = vpop.f32.mrf.mxu1 }
 0x28b   :  { %v629_v3 = vadd.f32 %v583_v23, %v578_v14  ;;  %v593_v17 = vadd.f32 %v8715_v19, %v470_v46 }
 0x28c   :  { %v624_v11 = vadd.f32 %v623_v16, %v622_v10  ;;  %v587_v18 = vpop.f32.mrf.mxu1 }
 0x28d   :  { %v588_v5 = vadd.f32 %v587_v18, %v470_v46 }
 0x28e   :  { %v625_v21 = vrot.slane %v624_v11, 2  ;;  %v8718_v6 = vpop.f32.mrf.mxu1 }
 0x28f   :  { %v630_v32 = vadd.f32 %v629_v3, %v588_v5  ;;  %v603_v0 = vadd.f32 %v8718_v6, %v470_v46 }
 0x290   :  { %v626_v25 = vadd.f32 %v625_v21, %v624_v11  ;;  %v597_v26 = vpop.f32.mrf.mxu1 }
 0x291   :  { %v598_v43 = vadd.f32 %v597_v26, %v470_v46  ;;  %v631_v48 = vadd.f32 %v630_v32, %v593_v17 }
 0x292   :  { %v627_v28 = vrot.slane %v626_v25, 1  ;;  %v8721_v45 = vpop.f32.mrf.mxu1 }
 0x293   :  { %v632_v59 = vadd.f32 %v631_v48, %v598_v43  ;;  %v9459_v7 = vadd.f32 %v8721_v45, %v470_v46 }
 0x294   :  { %v628_v35 = vadd.f32 %v627_v28, %v626_v25  ;;  %v607_v61 = vpop.f32.mrf.mxu1 }
 0x296   :  { %v642_v53 = vmul.f32 0.015625, %v628_v35 }
 0x298   :  { %v9441_v55 = vsub.f32 %v538_v50, %v642_v53  ;;  %v9443_v57 = vsub.f32 %v543_v51, %v642_v53  ;;  %v9445_v54 = vsub.f32 %v548_v56, %v642_v53  ;;  %v9447_v29 = vsub.f32 %v553_v58, %v642_v53 }
 0x299   :  { %v648_v44 = vsub.f32 %v558_v60, %v642_v53  ;;  %v9455_v51 = vadd.f32 %v607_v61, %v470_v46  ;;  %v633_v56 = vadd.f32 %v632_v59, %v603_v0  ;;  %v649_v13 = vsub.f32 %v563_v62, %v642_v53 }
 0x29a   :  { %v660_v30 = vmul.f32 %v9441_v55, %v9441_v55  ;;  %v661_v31 = vmul.f32 %v9443_v57, %v9443_v57  ;;  %v662_v50 = vmul.f32 %v9445_v54, %v9445_v54  ;;  %v663_v58 = vmul.f32 %v9447_v29, %v9447_v29 }
 0x29b   :  { %v634_v11 = vadd.f32 %v633_v56, %v9455_v51  ;;  %v650_v19 = vsub.f32 %v568_v33, %v642_v53  ;;  %v664_v21 = vmul.f32 %v648_v44, %v648_v44  ;;  %v651_v25 = vsub.f32 %v573_v8, %v642_v53 }
 0x29c   :  { %v676_v10 = vadd.f32 %v661_v31, %v660_v30  ;;  %v665_v3 = vmul.f32 %v649_v13, %v649_v13 }
 0x29d   :  { %v635_v60 = vadd.f32 %v634_v11, %v9459_v7  ;;  %v666_v32 = vmul.f32 %v650_v19, %v650_v19  ;;  %v667_v35 = vmul.f32 %v651_v25, %v651_v25 }
 0x29e   :  { %v677_v16 = vadd.f32 %v676_v10, %v662_v50 }
 0x29f   :  { %v636_v28 = vrot.slane %v635_v60, 4 }
 0x2a0   :  { %v678_v18 = vadd.f32 %v677_v16, %v663_v58 }
 0x2a1   :  { %v637_v62 = vadd.f32 %v636_v28, %v635_v60 }
 0x2a2   :  { %v679_v6 = vadd.f32 %v678_v18, %v664_v21 }
 0x2a3   :  { %v638_v59 = vrot.slane %v637_v62, 2 }
 0x2a4   :  { %v680_v26 = vadd.f32 %v679_v6, %v665_v3 }
 0x2a5   :  { %v639_v46 = vadd.f32 %v638_v59, %v637_v62  ;;  %v12979_v62 = vsub.s32 4, %v9253_v39 }
 0x2a6   :  { %v681_v48 = vadd.f32 %v680_v26, %v666_v32 }
 0x2a7   :  { %v640_v30 = vrot.slane %v639_v46, 1 }
 0x2a8   :  { %v682_v61 = vadd.f32 %v681_v48, %v667_v35  ;;  %v12978_v35 = vsub.s32 5, %v9253_v39 }
 0x2a9   :  { %v641_v33 = vadd.f32 %v640_v30, %v639_v46 }
 0x2aa   :  { %v683_v45 = vrot.slane %v682_v61, 4 }
 0x2ab   :  { %v643_v10 = vmul.f32 0.015625, %v641_v33 }
 0x2ac   :  { %v684_v31 = vadd.f32 %v683_v45, %v682_v61 }
 0x2ad   :  { %v9463_v8 = vsub.f32 %v578_v14, %v643_v10  ;;  %v9465_v53 = vsub.f32 %v583_v23, %v643_v10  ;;  %v9471_v3 = vsub.f32 %v588_v5, %v643_v10  ;;  %v9473_v28 = vsub.f32 %v593_v17, %v643_v10 }
 0x2ae   :  { %v685_v50 = vrot.slane %v684_v31, 2  ;;  %v9477_v32 = vsub.f32 %v598_v43, %v643_v10  ;;  %v9488_v17 = vrot.slane %v9261_v42, %v12979_v62  ;;  %v9493_v43 = vrot.slane %v9261_v42, %v12978_v35 }
 0x2af   :  { %v668_v21 = vmul.f32 %v9463_v8, %v9463_v8  ;;  %v669_v18 = vmul.f32 %v9465_v53, %v9465_v53  ;;  %v670_v14 = vmul.f32 %v9471_v3, %v9471_v3  ;;  %v671_v26 = vmul.f32 %v9473_v28, %v9473_v28 }
 0x2b0   :  { %v686_v56 = vadd.f32 %v685_v50, %v684_v31  ;;  %v672_v5 = vmul.f32 %v9477_v32, %v9477_v32  ;;  %v9495_v61 = vsub.f32 %v603_v0, %v643_v10 }
 0x2b1   :  { %v689_v6 = vadd.f32 %v669_v18, %v668_v21 }
 0x2b2   :  { %v687_v58 = vrot.slane %v686_v56, 1 }
 0x2b3   :  { %v690_v23 = vadd.f32 %v689_v6, %v670_v14  ;;  %v673_v14 = vmul.f32 %v9495_v61, %v9495_v61 }
 0x2b4   :  { %v688_v16 = vadd.f32 %v687_v58, %v686_v56 }
 0x2b5   :  { %v691_v48 = vadd.f32 %v690_v23, %v671_v26 }
 0x2b6   :  { %v702_v11 = vmul.f32 0.015625, %v688_v16 }
 0x2b7   :  { %v692_v46 = vadd.f32 %v691_v48, %v672_v5 }
 0x2b8   :  { %v704_v60 = vadd.f32 1e-05, %v702_v11 }
 0x2ba   :  { %8970 = vrsqrt.f32 %v704_v60 }
 0x2c7   :  { %v8971_v59 = vpop.eup %8970 }
 0x2c8   :  { %v708_v45 = vmul.f32 %v8971_v59, %v9441_v55  ;;  %v709_v30 = vmul.f32 %v8971_v59, %v9443_v57  ;;  %v710_v31 = vmul.f32 %v8971_v59, %v9445_v54  ;;  %v711_v33 = vmul.f32 %v8971_v59, %v9447_v29 }
 0x2c9   :  { %v712_v50 = vmul.f32 %v8971_v59, %v648_v44  ;;  %v713_v56 = vmul.f32 %v8971_v59, %v649_v13  ;;  %v714_v58 = vmul.f32 %v8971_v59, %v650_v19  ;;  %v715_v16 = vmul.f32 %v8971_v59, %v651_v25 }
 0x2ca   :  { %v728_v11 = vmul.f32 %v9488_v17, %v708_v45  ;;  %v729_v42 = vmul.f32 %v9488_v17, %v709_v30  ;;  %v730_v0 = vmul.f32 %v9488_v17, %v710_v31  ;;  %v731_v21 = vmul.f32 %v9488_v17, %v711_v33 }
 0x2cb   :  { %v732_v55 = vmul.f32 %v9488_v17, %v712_v50  ;;  %v733_v57 = vmul.f32 %v9488_v17, %v713_v56  ;;  %v734_v54 = vmul.f32 %v9488_v17, %v714_v58  ;;  %v735_v29 = vmul.f32 %v9488_v17, %v715_v16 }
 0x2cc   :  { %v9510_v44 = vadd.f32 %v9493_v43, %v728_v11  ;;  %v9513_v13 = vadd.f32 %v9493_v43, %v729_v42  ;;  %v9516_v19 = vadd.f32 %v9493_v43, %v730_v0  ;;  %v9519_v25 = vsub.f32 %v9455_v51, %v643_v10 }
 0x2cd   :  { %v9522_v18 = vadd.f32 %v9493_v43, %v731_v21  ;;  %v9525_v60 = vadd.f32 %v9493_v43, %v732_v55  ;;  %v9528_v6 = vadd.f32 %v9493_v43, %v733_v57  ;;  %v9533_v23 = vadd.f32 %v9493_v43, %v734_v54 }
 0x2ce   :  { %v9536_v26 = vadd.f32 %v9493_v43, %v735_v29  ;;  %v693_v51 = vadd.f32 %v692_v46, %v673_v14  ;;  %v9539_v48 = vmul.f32 0.70710677, %v9510_v44  ;;  %v9542_v5 = vmul.f32 0.70710677, %v9513_v13 }
 0x2cf   :  { %v9545_v59 = vmul.f32 0.70710677, %v9516_v19  ;;  %v9548_v45 = vsub.f32 %v9459_v7, %v643_v10  ;;  %v9551_v30 = vmul.f32 0.70710677, %v9522_v18  ;;  %v9554_v31 = vmul.f32 0.70710677, %v9525_v60 }
 0x2d0   :  { %v9557_v46 = vmul.f32 0.70710677, %v9528_v6  ;;  %v674_v33 = vmul.f32 %v9519_v25, %v9519_v25  ;;  %v9562_v50 = vmul.f32 0.70710677, %v9533_v23  ;;  %v9565_v56 = vmul.f32 0.70710677, %v9536_v26 }
 0x2d1   :  { %v796_v7 = vand.u32 2147483647, %v9539_v48  ;;  %v797_v10 = vand.u32 2147483647, %v9542_v5  ;;  %v798_v58 = vand.u32 2147483647, %v9545_v59  ;;  %v675_v29 = vmul.f32 %v9548_v45, %v9548_v45 }
 0x2d2   :  { %v799_v16 = vand.u32 2147483647, %v9551_v30  ;;  %v694_v11 = vadd.f32 %v693_v51, %v674_v33  ;;  %v800_v42 = vand.u32 2147483647, %v9554_v31  ;;  %v801_v0 = vand.u32 2147483647, %v9557_v46 }
 0x2d3   :  { %v802_v21 = vand.u32 2147483647, %v9562_v50  ;;  %v803_v55 = vand.u32 2147483647, %v9565_v56  ;;  %v812_v57 = vmul.f32 0.3275911, %v796_v7 }
 0x2d4   :  { %v813_v54 = vmul.f32 0.3275911, %v797_v10  ;;  %v814_v14 = vmul.f32 0.3275911, %v798_v58  ;;  %v815_v35 = vmul.f32 0.3275911, %v799_v16  ;;  %v695_v47 = vadd.f32 %v694_v11, %v675_v29 }
 0x2d5   :  { %v816_v62 = vmul.f32 0.3275911, %v800_v42  ;;  %v817_v40 = vmul.f32 0.3275911, %v801_v0  ;;  %v818_v36 = vmul.f32 0.3275911, %v802_v21 }
 0x2d6   :  { %v828_v51 = vadd.f32 1.0, %v812_v57  ;;  %v829_v33 = vadd.f32 1.0, %v813_v54  ;;  %v830_v24 = vadd.f32 1.0, %v814_v14  ;;  %v819_v38 = vmul.f32 0.3275911, %v803_v55 }
 0x2d7   :  { %v831_v34 = vadd.f32 1.0, %v815_v35  ;;  %v832_v20 = vadd.f32 1.0, %v816_v62  ;;  %v1020_v15 = vsub.f32 0.0, %v796_v7  ;;  %v833_v9 = vadd.f32 1.0, %v817_v40 }
 0x2d8   :  { %8972 = vrcp.f32 %v828_v51  ;;  %v1021_v22 = vsub.f32 0.0, %v797_v10  ;;  %v696_v27 = vrot.slane %v695_v47, 4  ;;  %v834_v52 = vadd.f32 1.0, %v818_v36 }
 0x2d9   :  { %8974 = vrcp.f32 %v829_v33  ;;  %v1022_v4 = vsub.f32 0.0, %v798_v58  ;;  %v835_v12 = vadd.f32 1.0, %v819_v38  ;;  %v1023_v49 = vsub.f32 0.0, %v799_v16 }
 0x2da   :  { %8976 = vrcp.f32 %v830_v24  ;;  %v1024_v11 = vsub.f32 0.0, %v800_v42  ;;  %v1036_v57 = vmul.f32 %v1020_v15, %v796_v7  ;;  %v1025_v54 = vsub.f32 0.0, %v801_v0 }
 0x2db   :  { %8978 = vrcp.f32 %v831_v34  ;;  %v1037_v29 = vmul.f32 %v1021_v22, %v797_v10  ;;  %v697_v35 = vadd.f32 %v696_v27, %v695_v47  ;;  %v1026_v62 = vsub.f32 0.0, %v802_v21 }
 0x2dc   :  { %8980 = vrcp.f32 %v832_v20  ;;  %v1038_v14 = vmul.f32 %v1022_v4, %v798_v58  ;;  %v1027_v40 = vsub.f32 0.0, %v803_v55  ;;  %v1039_v51 = vmul.f32 %v1023_v49, %v799_v16 }
 0x2dd   :  { %8982 = vrcp.f32 %v833_v9  ;;  %v1040_v33 = vmul.f32 %v1024_v11, %v800_v42  ;;  %v1052_v36 = vmul.f32 1.442695, %v1036_v57  ;;  %v1041_v24 = vmul.f32 %v1025_v54, %v801_v0 }
 0x2de   :  { %8984 = vrcp.f32 %v834_v52  ;;  %v1054_v2 = vmul.f32 1.442695, %v1037_v29  ;;  %v698_v38 = vrot.slane %v697_v35, 2  ;;  %v1042_v34 = vmul.f32 %v1026_v62, %v802_v21 }
 0x2df   :  { %8986 = vrcp.f32 %v835_v12  ;;  %v1056_v37 = vmul.f32 1.442695, %v1038_v14  ;;  %v1043_v20 = vmul.f32 %v1027_v40, %v803_v55  ;;  %v1058_v1 = vmul.f32 1.442695, %v1039_v51 }
 0x2e0   :  { %8988 = vpow2.f32 %v1052_v36  ;;  %v1060_v9 = vmul.f32 1.442695, %v1040_v33  ;;  %v1062_v47 = vmul.f32 1.442695, %v1041_v24  ;;  %v9579_v52 = vadd.f32 %v698_v38, %v697_v35 }
 0x2e1   :  { %8990 = vpow2.f32 %v1054_v2  ;;  %v1064_v4 = vmul.f32 1.442695, %v1042_v34  ;;  %v1066_v7 = vmul.f32 1.442695, %v1043_v20  ;;  %v9590_v58 = vmul.f32 0.5, %v9510_v44 }
 0x2e2   :  { %8992 = vpow2.f32 %v1056_v37  ;;  %vm1116_vm1 = vcmp.lt.f32.partialorder %v9539_v48, 0.0  ;;  %vm1118_vm2 = vcmp.lt.f32.partialorder %v9545_v59, 0.0  ;;  %vm1117_vm3 = vcmp.lt.f32.partialorder %v9542_v5, 0.0  ;;  %v7382_v59 = vld [vmem:[#allocation2 + $0xe8] sm:$0xff] }
 0x2e3   :  { %8994 = vpow2.f32 %v1058_v1  ;;  %vm1119_vm4 = vcmp.lt.f32.partialorder %v9551_v30, 0.0  ;;  %vm1120_vm5 = vcmp.lt.f32.partialorder %v9554_v31, 0.0  ;;  %vm1121_vm6 = vcmp.lt.f32.partialorder %v9557_v46, 0.0 }
 0x2e4   :  { %8996 = vpow2.f32 %v1060_v9  ;;  %vm1122_vm7 = vcmp.lt.f32.partialorder %v9562_v50, 0.0  ;;  %vm1123_vm8 = vcmp.lt.f32.partialorder %v9565_v56, 0.0  ;;  %v765_v50 = vmul.f32 0.5, %v9513_v13 }
 0x2e5   :  { %v9577_v15 = vpop.eup %8972  ;;  %8998 = vpow2.f32 %v1062_v47  ;;  %v766_v46 = vmul.f32 0.5, %v9516_v19  ;;  %v768_v56 = vmul.f32 0.5, %v9525_v60 }
 0x2e6   :  { %v9581_v12 = vpop.eup %8974  ;;  %v876_v49 = vmul.f32 1.0614054, %v9577_v15  ;;  %9000 = vpow2.f32 %v1064_v4 }
 0x2e7   :  { %v9584_v27 = vpop.eup %8976  ;;  %v877_v22 = vmul.f32 1.0614054, %v9581_v12  ;;  %9002 = vpow2.f32 %v1066_v7 }
 0x2e8   :  { %v9587_v10 = vpop.eup %8978  ;;  %v878_v2 = vmul.f32 1.0614054, %v9584_v27  ;;  %v892_v16 = vadd.f32 -1.4531521, %v876_v49 }
 0x2e9   :  { %v9593_v42 = vpop.eup %8980  ;;  %v879_v37 = vmul.f32 1.0614054, %v9587_v10  ;;  %v893_v0 = vadd.f32 -1.4531521, %v877_v22 }
 0x2ea   :  { %v9597_v55 = vpop.eup %8982  ;;  %v880_v1 = vmul.f32 1.0614054, %v9593_v42  ;;  %v894_v11 = vadd.f32 -1.4531521, %v878_v2  ;;  %v908_v44 = vmul.f32 %v9577_v15, %v892_v16  ;;  %v7393_v16 = vld [vmem:[#allocation2 + $0x140] sm:$0xff] }
 0x2eb   :  { %v9601_v57 = vpop.eup %8984  ;;  %v881_v54 = vmul.f32 1.0614054, %v9597_v55  ;;  %v895_v29 = vadd.f32 -1.4531521, %v879_v37  ;;  %v909_v35 = vmul.f32 %v9581_v12, %v893_v0  ;;  %v7392_v37 = vld [vmem:[#allocation2 + $0x138] sm:$0xff]  ;;  %8722 = vmatprep.subr.mxu0 %v7393_v16 }
 0x2ec   :  { %v9605_v62 = vpop.eup %8986  ;;  %v882_v14 = vmul.f32 1.0614054, %v9601_v57  ;;  %v896_v40 = vadd.f32 -1.4531521, %v880_v1  ;;  %v910_v51 = vmul.f32 %v9584_v27, %v894_v11  ;;  %v924_v33 = vadd.f32 1.4214138, %v908_v44  ;;  %8723 = vmatpush3.msra.mxu0 %v7393_v16 }
 0x2ed   :  { %v883_v36 = vmul.f32 1.0614054, %v9605_v62  ;;  %v897_v24 = vadd.f32 -1.4531521, %v881_v54  ;;  %v911_v38 = vmul.f32 %v9587_v10, %v895_v29  ;;  %v925_v34 = vadd.f32 1.4214138, %v909_v35  ;;  %v8989_v54 = vpop.eup %8988  ;;  %8724 = vmatprep.subr.mxu0 %v7392_v37 }
 0x2ee   :  { %v898_v20 = vadd.f32 -1.4531521, %v882_v14  ;;  %v912_v9 = vmul.f32 %v9593_v42, %v896_v40  ;;  %v926_v47 = vadd.f32 1.4214138, %v910_v51  ;;  %v940_v49 = vmul.f32 %v9577_v15, %v924_v33  ;;  %v7391_v51 = vld [vmem:[#allocation2 + $0x130] sm:$0xff]  ;;  %v8991_v33 = vpop.eup %8990  ;;  %8725 = vmatpush3.msra.mxu0 %v7392_v37 }
 0x2ef   :  { %v899_v4 = vadd.f32 -1.4531521, %v883_v36  ;;  %v913_v22 = vmul.f32 %v9597_v55, %v897_v24  ;;  %v927_v7 = vadd.f32 1.4214138, %v911_v38  ;;  %v941_v2 = vmul.f32 %v9581_v12, %v925_v34  ;;  %8726 = vmatprep.subr.mxu0 %v7391_v51 }
 0x2f0   :  { %v914_v0 = vmul.f32 %v9601_v57, %v898_v20  ;;  %v928_v1 = vadd.f32 1.4214138, %v912_v9  ;;  %v942_v11 = vmul.f32 %v9584_v27, %v926_v47  ;;  %v956_v44 = vadd.f32 -0.28449672, %v940_v49  ;;  %v8993_v20 = vpop.eup %8992  ;;  %8727 = vmatpush3.msra.mxu0 %v7391_v51 }
 0x2f1   :  { %v915_v29 = vmul.f32 %v9605_v62, %v899_v4  ;;  %v929_v35 = vadd.f32 1.4214138, %v913_v22  ;;  %v943_v14 = vmul.f32 %v9587_v10, %v927_v7  ;;  %v957_v40 = vadd.f32 -0.28449672, %v941_v2  ;;  %v7390_v22 = vld [vmem:[#allocation2 + $0x128] sm:$0xff]  ;;  %v8995_v7 = vpop.eup %8994 }
 0x2f2   :  { %v930_v36 = vadd.f32 1.4214138, %v914_v0  ;;  %v944_v24 = vmul.f32 %v9593_v42, %v928_v1  ;;  %v958_v38 = vadd.f32 -0.28449672, %v942_v11  ;;  %v972_v34 = vmul.f32 %v9577_v15, %v956_v44  ;;  %v8997_v11 = vpop.eup %8996  ;;  %8728 = vmatprep.subr.mxu0 %v7390_v22 }
 0x2f3   :  { %v931_v9 = vadd.f32 1.4214138, %v915_v29  ;;  %v945_v47 = vmul.f32 %v9597_v55, %v929_v35  ;;  %v959_v49 = vadd.f32 -0.28449672, %v943_v14  ;;  %v973_v4 = vmul.f32 %v9581_v12, %v957_v40  ;;  %v7389_v14 = vld [vmem:[#allocation2 + $0x120] sm:$0xff]  ;;  %v8999_v40 = vpop.eup %8998  ;;  %8729 = vmatpush3.msra.mxu0 %v7390_v22  ;;  %v7387_v22 = vld [vmem:[#allocation2 + $0x110] sm:$0xff] }
 0x2f4   :  { %v946_v2 = vmul.f32 %v9601_v57, %v930_v36  ;;  %v960_v16 = vadd.f32 -0.28449672, %v944_v24  ;;  %v974_v0 = vmul.f32 %v9584_v27, %v958_v38  ;;  %v988_v1 = vadd.f32 0.2548296, %v972_v34  ;;  %v9001_v24 = vpop.eup %9000  ;;  %8730 = vmatprep.subr.mxu0 %v7389_v14 }
 0x2f5   :  { %v947_v44 = vmul.f32 %v9605_v62, %v931_v9  ;;  %v961_v21 = vadd.f32 -0.28449672, %v945_v47  ;;  %v975_v29 = vmul.f32 %v9587_v10, %v959_v49  ;;  %v989_v35 = vadd.f32 0.2548296, %v973_v4  ;;  %v7388_v47 = vld [vmem:[#allocation2 + $0x118] sm:$0xff]  ;;  %v9003_v49 = vpop.eup %9002  ;;  %8731 = vmatpush3.msra.mxu0 %v7389_v14 }
 0x2f6   :  { %v962_v37 = vadd.f32 -0.28449672, %v946_v2  ;;  %v976_v63 = vmul.f32 %v9593_v42, %v960_v16  ;;  %v990_v41 = vadd.f32 0.2548296, %v974_v0  ;;  %v1004_v36 = vmul.f32 %v9577_v15, %v988_v1  ;;  %8732 = vmatprep.subr.mxu0 %v7388_v47 }
 0x2f7   :  { %v963_v38 = vadd.f32 -0.28449672, %v947_v44  ;;  %v977_v34 = vmul.f32 %v9597_v55, %v961_v21  ;;  %v991_v39 = vadd.f32 0.2548296, %v975_v29  ;;  %v1005_v9 = vmul.f32 %v9581_v12, %v989_v35  ;;  %8733 = vmatpush3.msra.mxu0 %v7388_v47 }
 0x2f8   :  { %v978_v51 = vmul.f32 %v9601_v57, %v962_v37  ;;  %v992_v4 = vadd.f32 0.2548296, %v976_v63  ;;  %v1006_v2 = vmul.f32 %v9584_v27, %v990_v41  ;;  %v1084_v16 = vmul.f32 %v8989_v54, %v1004_v36  ;;  %v7386_v37 = vld [vmem:[#allocation2 + $0x108] sm:$0xff]  ;;  %8734 = vmatprep.subr.mxu0 %v7387_v22 }
 0x2f9   :  { %v979_v15 = vmul.f32 %v9605_v62, %v963_v38  ;;  %v993_v21 = vadd.f32 0.2548296, %v977_v34  ;;  %v1007_v0 = vmul.f32 %v9587_v10, %v991_v39  ;;  %v1085_v12 = vmul.f32 %v8991_v33, %v1005_v9  ;;  %8735 = vmatpush3.msra.mxu0 %v7387_v22  ;;  %v7385_v38 = vld [vmem:[#allocation2 + $0x100] sm:$0xff] }
 0x2fa   :  { %v994_v1 = vadd.f32 0.2548296, %v978_v51  ;;  %v1008_v63 = vmul.f32 %v9593_v42, %v992_v4  ;;  %v1086_v41 = vmul.f32 %v8993_v20, %v1006_v2  ;;  %v1100_v27 = vsub.f32 1.0, %v1084_v16  ;;  %8736 = vmatprep.subr.mxu0 %v7386_v37  ;;  %v7384_v2 = vld [vmem:[#allocation2 + $0xf8] sm:$0xff] }
 0x2fb   :  { %v995_v54 = vadd.f32 0.2548296, %v979_v15  ;;  %v1009_v44 = vmul.f32 %v9597_v55, %v993_v21  ;;  %v1087_v29 = vmul.f32 %v8995_v7, %v1007_v0  ;;  %v1101_v35 = vsub.f32 1.0, %v1085_v12  ;;  %8737 = vmatpush3.msra.mxu0 %v7386_v37  ;;  %v7383_v21 = vld [vmem:[#allocation2 + $0xf0] sm:$0xff] }
 0x2fc   :  { %v1010_v39 = vmul.f32 %v9601_v57, %v994_v1  ;;  %v1088_v10 = vmul.f32 %v8997_v11, %v1008_v63  ;;  %v1102_v33 = vsub.f32 1.0, %v1086_v41  ;;  %v1132_v36 = vsub.f32 0.0, %v1100_v27  ;;  %8738 = vmatprep.subr.mxu0 %v7385_v38 }
 0x2fd   :  { %v1011_v14 = vmul.f32 %v9605_v62, %v995_v54  ;;  %v1089_v42 = vmul.f32 %v8999_v40, %v1009_v44  ;;  %v1103_v20 = vsub.f32 1.0, %v1087_v29  ;;  %v1133_v7 = vsub.f32 0.0, %v1101_v35  ;;  %8739 = vmatpush3.msra.mxu0 %v7385_v38  ;;  %v7381_v29 = vld [vmem:[#allocation2 + $0xe0] sm:$0xff] }
 0x2fe   :  { %v1090_v34 = vmul.f32 %v9001_v24, %v1010_v39  ;;  %v1104_v55 = vsub.f32 1.0, %v1088_v10  ;;  %v1134_v9 = vsub.f32 0.0, %v1102_v33  ;;  %v13094_v11 = vrot.slane %v9579_v52, 1  ;;  %8740 = vmatprep.subr.mxu0 %v7384_v2 }
 0x2ff   :  { %v1091_v47 = vmul.f32 %v9003_v49, %v1011_v14  ;;  %v1105_v51 = vsub.f32 1.0, %v1089_v42  ;;  %v1135_v57 = vsub.f32 0.0, %v1103_v20  ;;  %v1148_v49 = vsel %vm1116_vm1, %v1132_v36, %v1100_v27  ;;  %8741 = vmatpush3.msra.mxu0 %v7384_v2  ;;  %v7380_v14 = vld [vmem:[#allocation2 + $0xd8] sm:$0xff] }
 0x300   :  { %v701_v4 = vadd.f32 %v13094_v11, %v9579_v52  ;;  %v1106_v62 = vsub.f32 1.0, %v1090_v34  ;;  %v1136_v40 = vsub.f32 0.0, %v1104_v55  ;;  %v1150_v15 = vsel %vm1118_vm2, %v1134_v9, %v1102_v33  ;;  %8742 = vmatprep.subr.mxu0 %v7383_v21  ;;  %v7379_v34 = vld [vmem:[#allocation2 + $0xd0] sm:$0xff] }
 0x301   :  { %v1107_v24 = vsub.f32 1.0, %v1091_v47  ;;  %v1137_v16 = vsub.f32 0.0, %v1105_v51  ;;  %v1149_v0 = vsel %vm1117_vm3, %v1133_v7, %v1101_v35  ;;  %v1151_v31 = vsel %vm1119_vm4, %v1135_v57, %v1103_v20  ;;  %8743 = vmatpush3.msra.mxu0 %v7383_v21 }
 0x302   :  { %v1138_v52 = vsub.f32 0.0, %v1106_v62  ;;  %v1152_v12 = vsel %vm1120_vm5, %v1136_v40, %v1104_v55  ;;  %v703_v1 = vmul.f32 0.015625, %v701_v4  ;;  %v1164_v41 = vadd.f32 1.0, %v1148_v49  ;;  %8744 = vmatprep.subr.mxu0 %v7382_v59 }
 0x303   :  { %v1139_v22 = vsub.f32 0.0, %v1107_v24  ;;  %v1153_v48 = vsel %vm1121_vm6, %v1137_v16, %v1105_v51  ;;  %v1166_v5 = vadd.f32 1.0, %v1150_v15  ;;  %v1165_v30 = vadd.f32 1.0, %v1149_v0  ;;  %8745 = vmatpush3.msra.mxu0 %v7382_v59 }
 0x304   :  { %v1154_v63 = vsel %vm1122_vm7, %v1138_v52, %v1106_v62  ;;  %v1167_v54 = vadd.f32 1.0, %v1151_v31  ;;  %v1168_v44 = vadd.f32 1.0, %v1152_v12  ;;  %v1169_v35 = vadd.f32 1.0, %v1153_v48  ;;  %8746 = vmatprep.subr.mxu0 %v7381_v29 }
 0x305   :  { %v1155_v27 = vsel %vm1123_vm8, %v1139_v22, %v1107_v24  ;;  %v1170_v37 = vadd.f32 1.0, %v1154_v63  ;;  %v767_v39 = vmul.f32 0.5, %v9522_v18  ;;  %v705_v33 = vadd.f32 1e-05, %v703_v1  ;;  %8747 = vmatpush3.msra.mxu0 %v7381_v29 }
 0x306   :  { %v1171_v10 = vadd.f32 1.0, %v1155_v27  ;;  %v769_v42 = vmul.f32 0.5, %v9528_v6  ;;  %v770_v20 = vmul.f32 0.5, %v9533_v23  ;;  %v771_v36 = vmul.f32 0.5, %v9536_v26  ;;  %8748 = vmatprep.subr.mxu0 %v7380_v14  ;;  %v7378_v26 = vld [vmem:[#allocation2 + $0xc8] sm:$0xff] }
 0x307   :  { %v9667_v13 = vmul.f32 %v1166_v5, %v766_v46  ;;  %v9670_v19 = vmul.f32 %v1164_v41, %v9590_v58  ;;  %v9672_v38 = vmul.f32 %v1165_v30, %v765_v50  ;;  %v9674_v18 = vmul.f32 %v1167_v54, %v767_v39  ;;  %8749 = vmatpush3.msra.mxu0 %v7380_v14 }
 0x308   :  { %v9676_v60 = vmul.f32 %v1168_v44, %v768_v56  ;;  %v9678_v55 = vmul.f32 %v1169_v35, %v769_v42  ;;  %v9680_v6 = vmul.f32 %v1170_v37, %v770_v20  ;;  %v9682_v23 = vmul.f32 %v1171_v10, %v771_v36  ;;  %8750 = vmatprep.subr.mxu0 %v7379_v34 }
 0x309   :  { %9004 = vrsqrt.f32 %v705_v33  ;;  %v1213_v58 = vrot.slane %v9667_v13, 3  ;;  %v1212_v7 = vrot.slane %v9674_v18, 3  ;;  %v1214_v9 = vrot.slane %v9672_v38, 3  ;;  %8751 = vmatpush3.msra.mxu0 %v7379_v34 }
 0x30a   :  { %v1215_v47 = vrot.slane %v9670_v19, 3  ;;  %v1216_v51 = vrot.slane %v9676_v60, 3  ;;  %v1217_v57 = vrot.slane %v9678_v55, 3  ;;  %v1218_v11 = vrot.slane %v9680_v6, 3  ;;  %8752 = vmatprep.subr.mxu0 %v7378_v26 }
 0x30b   :  { %v1244_v4 = vrot.slane %v9674_v18, 1  ;;  %v1245_v2 = vrot.slane %v9667_v13, 1  ;;  %v1219_v62 = vrot.slane %v9682_v23, 3  ;;  %v1246_v40 = vrot.slane %v9672_v38, 1  ;;  %8753 = vmatpush3.msra.mxu0 %v7378_v26 }
 0x30c   :  { %v1247_v24 = vrot.slane %v9670_v19, 1  ;;  %v1248_v16 = vrot.slane %v9676_v60, 1  ;;  %v1249_v49 = vrot.slane %v9678_v55, 1  ;;  %v1250_v15 = vrot.slane %v9680_v6, 1 }
 0x30d   :  { %v1251_v21 = vrot.slane %v9682_v23, 1  ;;  %v1276_v52 = vrot.slane %v9674_v18, 7  ;;  %v1277_v0 = vrot.slane %v9667_v13, 7  ;;  %v1278_v31 = vrot.slane %v9672_v38, 7 }
 0x30e   :  { %v13007_v12 = vrot.slane %v9670_v19, 7  ;;  %v13006_v22 = vrot.slane %v9676_v60, 7  ;;  %v13005_v48 = vrot.slane %v9678_v55, 7  ;;  %v13004_v1 = vrot.slane %v9680_v6, 7 }
 0x30f   :  { %v13003_v59 = vrot.slane %v9682_v23, 7  ;;  %v1341_v63 = vsel %vm1340_vm9, %v1212_v7, %v1244_v4  ;;  %v1342_v41 = vsel %vm1340_vm9, %v1213_v58, %v1245_v2  ;;  %v1343_v5 = vsel %vm1340_vm9, %v1214_v9, %v1246_v40 }
 0x310   :  { %v1344_v27 = vsel %vm1340_vm9, %v1215_v47, %v1247_v24  ;;  %v1345_v30 = vsel %vm1340_vm9, %v1216_v51, %v1248_v16  ;;  %v1308_v54 = vrot.slane %v9674_v18, 5  ;;  %v1346_v44 = vsel %vm1340_vm9, %v1217_v57, %v1249_v49 }
 0x311   :  { %v1347_v29 = vsel %vm1340_vm9, %v1218_v11, %v1250_v15  ;;  %v1348_v50 = vsel %vm1340_vm9, %v1219_v62, %v1251_v21  ;;  %v1309_v46 = vrot.slane %v9667_v13, 5  ;;  %v1310_v35 = vrot.slane %v9672_v38, 5 }
 0x312   :  { %v1311_v37 = vrot.slane %v9670_v19, 5  ;;  %v1358_v39 = vsel %vm1357_vm10, %v1341_v63, %v1276_v52  ;;  %v1359_v56 = vsel %vm1357_vm10, %v1342_v41, %v1277_v0  ;;  %v1360_v10 = vsel %vm1357_vm10, %v1343_v5, %v1278_v31 }
 0x313   :  { %v1361_v33 = vsel %vm1357_vm10, %v1344_v27, %v13007_v12  ;;  %v1362_v14 = vsel %vm1357_vm10, %v1345_v30, %v13006_v22  ;;  %v1312_v42 = vrot.slane %v9676_v60, 5  ;;  %v1363_v20 = vsel %vm1357_vm10, %v1346_v44, %v13005_v48 }
 0x314   :  { %v1364_v36 = vsel %vm1357_vm10, %v1347_v29, %v13004_v1  ;;  %v1365_v34 = vsel %vm1357_vm10, %v1348_v50, %v13003_v59  ;;  %v1313_v63 = vrot.slane %v9678_v55, 5  ;;  %v1314_v41 = vrot.slane %v9680_v6, 5 }
 0x315   :  { %v1315_v5 = vrot.slane %v9682_v23, 5  ;;  %v9779_v27 = vsel %vm1374_vm11, %v1358_v39, %v1308_v54  ;;  %v9782_v30 = vsel %vm1374_vm11, %v1359_v56, %v1309_v46  ;;  %v9785_v44 = vsel %vm1374_vm11, %v1360_v10, %v1310_v35 }
 0x316   :  { %v9005_v26 = vpop.eup %9004  ;;  %13095 = vst [vmem:[#allocation23_spill] sm:$0xff] %v9779_v27  ;;  %v9788_v29 = vsel %vm1374_vm11, %v1361_v33, %v1311_v37  ;;  %v9791_v50 = vsel %vm1374_vm11, %v1362_v14, %v1312_v42  ;;  %v9794_v59 = vsel %vm1374_vm11, %v1363_v20, %v1313_v63  ;;  %v9797_v1 = vsel %vm1374_vm11, %v1364_v36, %v1314_v41 }
 0x317   :  { %13096 = vst [vmem:[#allocation24_spill] sm:$0xff] %v9791_v50  ;;  %13097 = vst [vmem:[#allocation25_spill] sm:$0xff] %v9794_v59  ;;  %v9800_v39 = vsel %vm1374_vm11, %v1365_v34, %v1315_v5  ;;  %v1391_v56 = vsel %vm1374_vm11, %v1308_v54, %v1212_v7  ;;  %v716_v10 = vmul.f32 %v9005_v26, %v9463_v8  ;;  %v13103_v18 = vrot.slane %v9670_v19, 7 }
 0x318   :  { %13098 = vst [vmem:[#allocation26_spill] sm:$0xff] %v9797_v1  ;;  %13099 = vst [vmem:[#allocation27_spill] sm:$0xff] %v9800_v39  ;;  %v717_v48 = vmul.f32 %v9005_v26, %v9465_v53  ;;  %v718_v33 = vmul.f32 %v9005_v26, %v9471_v3  ;;  %v719_v14 = vmul.f32 %v9005_v26, %v9473_v28  ;;  %v13105_v13 = vrot.slane %v9676_v60, 7 }
 0x319   :  { %v720_v22 = vmul.f32 %v9005_v26, %v9477_v32  ;;  %v721_v20 = vmul.f32 %v9005_v26, %v9495_v61  ;;  %v722_v36 = vmul.f32 %v9005_v26, %v9519_v25  ;;  %v723_v12 = vmul.f32 %v9005_v26, %v9548_v45 }
 0x31a   :  { %v736_v34 = vmul.f32 %v9488_v17, %v716_v10  ;;  %v737_v7 = vmul.f32 %v9488_v17, %v717_v48  ;;  %v738_v8 = vmul.f32 %v9488_v17, %v718_v33  ;;  %v739_v53 = vmul.f32 %v9488_v17, %v719_v14 }
 0x31b   :  { %v740_v3 = vmul.f32 %v9488_v17, %v720_v22  ;;  %v741_v28 = vmul.f32 %v9488_v17, %v721_v20  ;;  %v742_v32 = vmul.f32 %v9488_v17, %v722_v36  ;;  %v743_v61 = vmul.f32 %v9488_v17, %v723_v12 }
 0x31c   :  { %v1392_v25 = vsel %vm1374_vm11, %v1309_v46, %v1213_v58  ;;  %v9823_v45 = vadd.f32 %v9493_v43, %v736_v34  ;;  %v9826_v48 = vadd.f32 %v9493_v43, %v737_v7  ;;  %v9829_v54 = vadd.f32 %v9493_v43, %v738_v8 }
 0x31d   :  { %v1393_v22 = vsel %vm1374_vm11, %v1310_v35, %v1214_v9  ;;  %v9835_v17 = vadd.f32 %v9493_v43, %v739_v53  ;;  %v9838_v12 = vadd.f32 %v9493_v43, %v740_v3  ;;  %v9841_v58 = vadd.f32 %v9493_v43, %v741_v28 }
 0x31e   :  { %v1394_v46 = vsel %vm1374_vm11, %v1311_v37, %v1215_v47  ;;  %v1395_v26 = vsel %vm1374_vm11, %v1312_v42, %v1216_v51  ;;  %v9850_v10 = vadd.f32 %v9493_v43, %v742_v32  ;;  %v9853_v9 = vadd.f32 %v9493_v43, %v743_v61 }
 0x31f   :  { %v1396_v35 = vsel %vm1374_vm11, %v1313_v63, %v1217_v57  ;;  %v1397_v33 = vsel %vm1374_vm11, %v1314_v41, %v1218_v11  ;;  %v1398_v47 = vsel %vm1374_vm11, %v1315_v5, %v1219_v62  ;;  %v1408_v51 = vsel %vm1407_vm12, %v1391_v56, %v1244_v4 }
 0x320   :  { %v1409_v43 = vsel %vm1407_vm12, %v1392_v25, %v1245_v2  ;;  %v9871_v37 = vmul.f32 0.70710677, %v9823_v45  ;;  %v9874_v57 = vmul.f32 0.70710677, %v9826_v48  ;;  %v9877_v11 = vmul.f32 0.70710677, %v9829_v54 }
 0x321   :  { %v1410_v62 = vsel %vm1407_vm12, %v1393_v22, %v1246_v40  ;;  %v9883_v42 = vmul.f32 0.70710677, %v9835_v17  ;;  %v9886_v4 = vmul.f32 0.70710677, %v9838_v12  ;;  %v9889_v2 = vmul.f32 0.70710677, %v9841_v58 }
 0x322   :  { %v1411_v63 = vsel %vm1407_vm12, %v1394_v46, %v1247_v24  ;;  %v9895_v41 = vmul.f32 0.70710677, %v9850_v10  ;;  %v9898_v5 = vmul.f32 0.70710677, %v9853_v9  ;;  %v804_v40 = vand.u32 2147483647, %v9871_v37 }
 0x323   :  { %v1412_v56 = vsel %vm1407_vm12, %v1395_v26, %v1248_v16  ;;  %v805_v14 = vand.u32 2147483647, %v9874_v57  ;;  %v806_v20 = vand.u32 2147483647, %v9877_v11  ;;  %v807_v36 = vand.u32 2147483647, %v9883_v42 }
 0x324   :  { %v1413_v24 = vsel %vm1407_vm12, %v1396_v35, %v1249_v49  ;;  %v808_v34 = vand.u32 2147483647, %v9886_v4  ;;  %v809_v7 = vand.u32 2147483647, %v9889_v2  ;;  %v810_v8 = vand.u32 2147483647, %v9895_v41 }
 0x325   :  { %v1414_v16 = vsel %vm1407_vm12, %v1397_v33, %v1250_v15  ;;  %v811_v53 = vand.u32 2147483647, %v9898_v5  ;;  %v820_v3 = vmul.f32 0.3275911, %v804_v40  ;;  %v821_v28 = vmul.f32 0.3275911, %v805_v14 }
 0x326   :  { %v1415_v32 = vsel %vm1407_vm12, %v1398_v47, %v1251_v21  ;;  %v822_v61 = vmul.f32 0.3275911, %v806_v20  ;;  %v823_v49 = vmul.f32 0.3275911, %v807_v36  ;;  %v824_v25 = vmul.f32 0.3275911, %v808_v34 }
 0x327   :  { %v9923_v22 = vsel %vm1424_vm13, %v1408_v51, %v1276_v52  ;;  %v9928_v15 = vsel %vm1424_vm13, %v1409_v43, %v1277_v0  ;;  %v9933_v46 = vsel %vm1424_vm13, %v1410_v62, %v1278_v31  ;;  %v825_v26 = vmul.f32 0.3275911, %v809_v7 }
 0x328   :  { %13100 = vst [vmem:[#allocation28_spill] sm:$0xff] %v9923_v22  ;;  %13101 = vst [vmem:[#allocation29_spill] sm:$0xff] %v9928_v15  ;;  %v826_v21 = vmul.f32 0.3275911, %v810_v8  ;;  %v836_v35 = vadd.f32 1.0, %v820_v3  ;;  %v837_v33 = vadd.f32 1.0, %v821_v28  ;;  %v9938_v52 = vsel %vm1424_vm13, %v1411_v63, %v13103_v18 }
 0x329   :  { %13102 = vst [vmem:[#allocation30_spill] sm:$0xff] %v9933_v46  ;;  %v838_v47 = vadd.f32 1.0, %v822_v61  ;;  %13104 = vst [vmem:[#allocation31_spill] sm:$0xff] %v9938_v52  ;;  %v9943_v0 = vsel %vm1424_vm13, %v1412_v56, %v13105_v13  ;;  %v827_v51 = vmul.f32 0.3275911, %v811_v53  ;;  %v839_v38 = vadd.f32 1.0, %v823_v49 }
 0x32a   :  { %13106 = vst [vmem:[#allocation32_spill] sm:$0xff] %v9943_v0  ;;  %v13107_v31 = vrot.slane %v9678_v55, 7  ;;  %v840_v62 = vadd.f32 1.0, %v824_v25  ;;  %9006 = vrcp.f32 %v836_v35  ;;  %v1028_v3 = vsub.f32 0.0, %v804_v40 }
 0x32b   :  { %v13109_v19 = vrot.slane %v9680_v6, 7  ;;  %v841_v28 = vadd.f32 1.0, %v825_v26  ;;  %9008 = vrcp.f32 %v837_v33  ;;  %v1029_v60 = vsub.f32 0.0, %v805_v14 }
 0x32c   :  { %v9948_v43 = vsel %vm1424_vm13, %v1413_v24, %v13107_v31  ;;  %v13111_v56 = vrot.slane %v9682_v23, 7  ;;  %v842_v55 = vadd.f32 1.0, %v826_v21  ;;  %9010 = vrcp.f32 %v838_v47 }
 0x32d   :  { %13108 = vst [vmem:[#allocation33_spill] sm:$0xff] %v9948_v43  ;;  %v9953_v63 = vsel %vm1424_vm13, %v1414_v16, %v13109_v19  ;;  %v1030_v24 = vsub.f32 0.0, %v806_v20  ;;  %v9961_v49 = vmul.f32 0.5, %v9823_v45  ;;  %v843_v25 = vadd.f32 1.0, %v827_v51  ;;  %v8405_v51 = vld [vmem:[#allocation2 + $0x90] ss:$0 sm:$0xff] }
 0x32e   :  { %13110 = vst [vmem:[#allocation34_spill] sm:$0xff] %v9953_v63  ;;  %v9958_v61 = vsel %vm1424_vm13, %v1415_v32, %v13111_v56  ;;  %9012 = vrcp.f32 %v839_v38  ;;  %v1031_v6 = vsub.f32 0.0, %v807_v36  ;;  %v9964_v16 = vmul.f32 0.5, %v9826_v48 }
 0x32f   :  { %13112 = vst [vmem:[#allocation35_spill] sm:$0xff] %v9958_v61  ;;  %9014 = vrcp.f32 %v840_v62  ;;  %v1032_v26 = vsub.f32 0.0, %v808_v34  ;;  %v1044_v35 = vmul.f32 %v1028_v3, %v804_v40  ;;  %v1033_v23 = vsub.f32 0.0, %v809_v7  ;;  %v8406_v3 = vld [vmem:[#allocation2 + $0x97] ss:$0 sm:$0xff] }
 0x330   :  { %9016 = vrcp.f32 %v841_v28  ;;  %v1034_v33 = vsub.f32 0.0, %v810_v8  ;;  %v1045_v32 = vmul.f32 %v1029_v60, %v805_v14  ;;  %v9967_v21 = vmul.f32 0.5, %v9829_v54 }
 0x331   :  { %9018 = vrcp.f32 %v842_v55  ;;  %v1035_v47 = vsub.f32 0.0, %v811_v53  ;;  %v1046_v45 = vmul.f32 %v1030_v24, %v806_v20  ;;  %v9970_v18 = vmul.f32 0.5, %v9835_v17 }
 0x332   :  { %v9973_v13 = vmul.f32 0.5, %v9838_v12  ;;  %9020 = vrcp.f32 %v843_v25  ;;  %v1047_v48 = vmul.f32 %v1031_v6, %v807_v36  ;;  %v9976_v40 = vmul.f32 0.5, %v9841_v58 }
 0x333   :  { %v9979_v14 = vmul.f32 0.5, %v9850_v10  ;;  %v1048_v54 = vmul.f32 %v1032_v26, %v808_v34  ;;  %v1068_v38 = vmul.f32 1.442695, %v1044_v35  ;;  %v9982_v31 = vmul.f32 0.5, %v9853_v9 }
 0x334   :  { %v1049_v20 = vmul.f32 %v1033_v23, %v809_v7  ;;  %v1050_v17 = vmul.f32 %v1034_v33, %v810_v8  ;;  %v1070_v62 = vmul.f32 1.442695, %v1045_v32  ;;  %v1051_v12 = vmul.f32 %v1035_v47, %v811_v53 }
 0x335   :  { %v1072_v19 = vmul.f32 1.442695, %v1046_v45  ;;  %v9985_v36 = vmul.f32 %v8405_v51, %v9779_v27  ;;  %v9988_v58 = vmul.f32 %v8405_v51, %v9782_v30  ;;  %v1074_v28 = vmul.f32 1.442695, %v1047_v48 }
 0x336   :  { %v9991_v10 = vmul.f32 %v8405_v51, %v9785_v44  ;;  %v9994_v34 = vmul.f32 %v8405_v51, %v9788_v29  ;;  %v9997_v9 = vmul.f32 %v8405_v51, %v9791_v50  ;;  %9022 = vpow2.f32 %v1068_v38 }
 0x337   :  { %v1076_v7 = vmul.f32 1.442695, %v1048_v54  ;;  %v10000_v8 = vmul.f32 %v8406_v3, %v9782_v30  ;;  %v10003_v53 = vmul.f32 %v8406_v3, %v9785_v44  ;;  %v10005_v60 = vpop.eup %9006  ;;  %9024 = vpow2.f32 %v1070_v62 }
 0x338   :  { %v1078_v56 = vmul.f32 1.442695, %v1049_v20  ;;  %v1080_v55 = vmul.f32 1.442695, %v1050_v17  ;;  %v10008_v24 = vmul.f32 %v8406_v3, %v9788_v29  ;;  %v10010_v25 = vpop.eup %9008  ;;  %v884_v6 = vmul.f32 1.0614054, %v10005_v60 }
 0x339   :  { %9026 = vpow2.f32 %v1072_v19  ;;  %v1082_v26 = vmul.f32 1.442695, %v1051_v12  ;;  %v10014_v35 = vmul.f32 %v8406_v3, %v9779_v27  ;;  %v10016_v23 = vpop.eup %9010  ;;  %v885_v33 = vmul.f32 1.0614054, %v10010_v25 }
 0x33a   :  { %9028 = vpow2.f32 %v1074_v28  ;;  %v10020_v32 = vmul.f32 %v8406_v3, %v9791_v50  ;;  %v10023_v47 = vmul.f32 %v8406_v3, %v9794_v59  ;;  %v886_v48 = vmul.f32 1.0614054, %v10016_v23 }
 0x33b   :  { %v10025_v45 = vpop.eup %9012  ;;  %v900_v51 = vadd.f32 -1.4531521, %v884_v6  ;;  %9030 = vpow2.f32 %v1076_v7  ;;  %v10030_v54 = vadd.f32 %v10000_v8, %v9985_v36  ;;  %v901_v17 = vadd.f32 -1.4531521, %v885_v33 }
 0x33c   :  { %v10032_v38 = vpop.eup %9014  ;;  %v887_v20 = vmul.f32 1.0614054, %v10025_v45  ;;  %9032 = vpow2.f32 %v1078_v56  ;;  %v10037_v62 = vadd.f32 %v10003_v53, %v9988_v58  ;;  %v902_v19 = vadd.f32 -1.4531521, %v886_v48 }
 0x33d   :  { %13113 = vst [vmem:[#allocation36_spill] sm:$0xff] %v10030_v54  ;;  %v10039_v3 = vpop.eup %9016  ;;  %v888_v12 = vmul.f32 1.0614054, %v10032_v38  ;;  %v916_v28 = vmul.f32 %v10005_v60, %v900_v51  ;;  %9034 = vpow2.f32 %v1080_v55  ;;  %v917_v33 = vmul.f32 %v10010_v25, %v901_v17 }
 0x33e   :  { %13114 = vst [vmem:[#allocation37_spill] sm:$0xff] %v10037_v62  ;;  %v10043_v7 = vpop.eup %9018  ;;  %v889_v6 = vmul.f32 1.0614054, %v10039_v3  ;;  %v903_v61 = vadd.f32 -1.4531521, %v887_v20  ;;  %9036 = vpow2.f32 %v1082_v26  ;;  %v918_v0 = vmul.f32 %v10016_v23, %v902_v19 }
 0x33f   :  { %v10047_v56 = vpop.eup %9020  ;;  %v890_v63 = vmul.f32 1.0614054, %v10043_v7  ;;  %v904_v43 = vadd.f32 -1.4531521, %v888_v12  ;;  %v932_v52 = vadd.f32 1.4214138, %v916_v28 }
 0x340   :  { %v891_v48 = vmul.f32 1.0614054, %v10047_v56  ;;  %v905_v51 = vadd.f32 -1.4531521, %v889_v6  ;;  %v919_v55 = vmul.f32 %v10025_v45, %v903_v61  ;;  %v933_v46 = vadd.f32 1.4214138, %v917_v33 }
 0x341   :  { %v906_v15 = vadd.f32 -1.4531521, %v890_v63  ;;  %v920_v20 = vmul.f32 %v10032_v38, %v904_v43  ;;  %v934_v22 = vadd.f32 1.4214138, %v918_v0  ;;  %v948_v26 = vmul.f32 %v10005_v60, %v932_v52 }
 0x342   :  { %v907_v17 = vadd.f32 -1.4531521, %v891_v48  ;;  %v921_v39 = vmul.f32 %v10039_v3, %v905_v51  ;;  %v935_v62 = vadd.f32 1.4214138, %v919_v55  ;;  %v949_v12 = vmul.f32 %v10010_v25, %v933_v46 }
 0x343   :  { %v922_v19 = vmul.f32 %v10043_v7, %v906_v15  ;;  %v936_v28 = vadd.f32 1.4214138, %v920_v20  ;;  %v950_v6 = vmul.f32 %v10016_v23, %v934_v22  ;;  %v964_v54 = vadd.f32 -0.28449672, %v948_v26  ;;  %v9023_v61 = vpop.eup %9022 }
 0x344   :  { %v923_v63 = vmul.f32 %v10047_v56, %v907_v17  ;;  %v937_v33 = vadd.f32 1.4214138, %v921_v39  ;;  %v951_v0 = vmul.f32 %v10025_v45, %v935_v62  ;;  %v965_v43 = vadd.f32 -0.28449672, %v949_v12  ;;  %v9025_v52 = vpop.eup %9024 }
 0x345   :  { %v938_v48 = vadd.f32 1.4214138, %v922_v19  ;;  %v952_v51 = vmul.f32 %v10032_v38, %v936_v28  ;;  %v966_v55 = vadd.f32 -0.28449672, %v950_v6  ;;  %v980_v46 = vmul.f32 %v10005_v60, %v964_v54 }
 0x346   :  { %v9027_v1 = vpop.eup %9026  ;;  %v939_v15 = vadd.f32 1.4214138, %v923_v63  ;;  %v953_v20 = vmul.f32 %v10039_v3, %v937_v33  ;;  %v967_v22 = vadd.f32 -0.28449672, %v951_v0  ;;  %v981_v26 = vmul.f32 %v10010_v25, %v965_v43 }
 0x347   :  { %v9029_v59 = vpop.eup %9028  ;;  %v954_v39 = vmul.f32 %v10043_v7, %v938_v48  ;;  %v968_v17 = vadd.f32 -0.28449672, %v952_v51  ;;  %v982_v62 = vmul.f32 %v10016_v23, %v966_v55  ;;  %v996_v12 = vadd.f32 0.2548296, %v980_v46 }
 0x348   :  { %v9031_v19 = vpop.eup %9030  ;;  %v955_v28 = vmul.f32 %v10047_v56, %v939_v15  ;;  %v969_v6 = vadd.f32 -0.28449672, %v953_v20  ;;  %v983_v54 = vmul.f32 %v10025_v45, %v967_v22  ;;  %v997_v50 = vadd.f32 0.2548296, %v981_v26 }
 0x349   :  { %vm1124_vm14 = vcmp.lt.f32.partialorder %v9871_v37, 0.0  ;;  %v9033_v63 = vpop.eup %9032  ;;  %v970_v33 = vadd.f32 -0.28449672, %v954_v39  ;;  %v984_v0 = vmul.f32 %v10032_v38, %v968_v17  ;;  %v998_v43 = vadd.f32 0.2548296, %v982_v62 }
 0x34a   :  { %v1012_v48 = vmul.f32 %v10005_v60, %v996_v12  ;;  %vm1125_vm15 = vcmp.lt.f32.partialorder %v9874_v57, 0.0  ;;  %v9035_v51 = vpop.eup %9034  ;;  %v971_v55 = vadd.f32 -0.28449672, %v955_v28  ;;  %v985_v46 = vmul.f32 %v10039_v3, %v969_v6 }
 0x34b   :  { %v999_v15 = vadd.f32 0.2548296, %v983_v54  ;;  %v1013_v20 = vmul.f32 %v10010_v25, %v997_v50  ;;  %vm1126_vm0 = vcmp.lt.f32.partialorder %v9877_v11, 0.0  ;;  %v9037_v22 = vpop.eup %9036  ;;  %v986_v26 = vmul.f32 %v10043_v7, %v970_v33 }
 0x34c   :  { %v1000_v39 = vadd.f32 0.2548296, %v984_v0  ;;  %v1014_v17 = vmul.f32 %v10016_v23, %v998_v43  ;;  %v1092_v62 = vmul.f32 %v9023_v61, %v1012_v48  ;;  %vm1127_vm1 = vcmp.lt.f32.partialorder %v9883_v42, 0.0 }
 0x34d   :  { %v987_v60 = vmul.f32 %v10047_v56, %v971_v55  ;;  %v1001_v12 = vadd.f32 0.2548296, %v985_v46  ;;  %v1015_v28 = vmul.f32 %v10025_v45, %v999_v15  ;;  %v1093_v6 = vmul.f32 %v9025_v52, %v1013_v20 }
 0x34e   :  { %vm1128_vm2 = vcmp.lt.f32.partialorder %v9886_v4, 0.0  ;;  %v1002_v50 = vadd.f32 0.2548296, %v986_v26  ;;  %v1016_v25 = vmul.f32 %v10032_v38, %v1000_v39  ;;  %v1094_v54 = vmul.f32 %v9027_v1, %v1014_v17 }
 0x34f   :  { %v1108_v27 = vsub.f32 1.0, %v1092_v62  ;;  %vm1129_vm3 = vcmp.lt.f32.partialorder %v9889_v2, 0.0  ;;  %v1003_v33 = vadd.f32 0.2548296, %v987_v60  ;;  %v1017_v23 = vmul.f32 %v10039_v3, %v1001_v12 }
 0x350   :  { %v1095_v61 = vmul.f32 %v9029_v59, %v1015_v28  ;;  %v1109_v0 = vsub.f32 1.0, %v1093_v6  ;;  %vm1130_vm4 = vcmp.lt.f32.partialorder %v9895_v41, 0.0  ;;  %v1018_v43 = vmul.f32 %v10043_v7, %v1002_v50 }
 0x351   :  { %v1096_v45 = vmul.f32 %v9031_v19, %v1016_v25  ;;  %v1110_v52 = vsub.f32 1.0, %v1094_v54  ;;  %vm1131_vm5 = vcmp.lt.f32.partialorder %v9898_v5, 0.0  ;;  %v1140_v48 = vsub.f32 0.0, %v1108_v27 }
 0x352   :  { %v1019_v38 = vmul.f32 %v10047_v56, %v1003_v33  ;;  %v1097_v1 = vmul.f32 %v9033_v63, %v1017_v23  ;;  %v1111_v55 = vsub.f32 1.0, %v1095_v61  ;;  %v1141_v46 = vsub.f32 0.0, %v1109_v0 }
 0x353   :  { %v1098_v15 = vmul.f32 %v9035_v51, %v1018_v43  ;;  %v1112_v20 = vsub.f32 1.0, %v1096_v45  ;;  %v1142_v26 = vsub.f32 0.0, %v1110_v52  ;;  %v1156_v59 = vsel %vm1124_vm14, %v1140_v48, %v1108_v27  ;;  %v13125_v43 = vld [vmem:[#allocation25_spill] sm:$0xff]  ;;  %v13126_v45 = vld [vmem:[#allocation26_spill] sm:$0xff]  ;;  %v13127_v48 = vld [vmem:[#allocation36_spill] sm:$0xff] }
 0x354   :  { %v1099_v3 = vmul.f32 %v9037_v22, %v1019_v38  ;;  %v1113_v39 = vsub.f32 1.0, %v1097_v1  ;;  %v1143_v17 = vsub.f32 0.0, %v1111_v55  ;;  %v1157_v7 = vsel %vm1125_vm15, %v1141_v46, %v1109_v0 }
 0x355   :  { %v1114_v19 = vsub.f32 1.0, %v1098_v15  ;;  %v1144_v62 = vsub.f32 0.0, %v1112_v20  ;;  %v1158_v56 = vsel %vm1126_vm0, %v1142_v26, %v1110_v52  ;;  %v10097_v63 = vadd.f32 %v10008_v24, %v9991_v10  ;;  %v8407_v24 = vld [vmem:[#allocation2 + $0x9e] ss:$0 sm:$0xff] }
 0x356   :  { %v1115_v51 = vsub.f32 1.0, %v1099_v3  ;;  %v1145_v60 = vsub.f32 0.0, %v1113_v39  ;;  %v1159_v27 = vsel %vm1127_vm1, %v1143_v17, %v1111_v55  ;;  %v1172_v37 = vadd.f32 1.0, %v1156_v59 }
 0x357   :  { %v1146_v22 = vsub.f32 0.0, %v1114_v19  ;;  %v1160_v57 = vsel %vm1128_vm2, %v1144_v62, %v1112_v20  ;;  %v1173_v12 = vadd.f32 1.0, %v1157_v7  ;;  %v1174_v28 = vadd.f32 1.0, %v1158_v56 }
 0x358   :  { %v1147_v6 = vsub.f32 0.0, %v1115_v51  ;;  %v1161_v11 = vsel %vm1129_vm3, %v1145_v60, %v1113_v39  ;;  %v1175_v50 = vadd.f32 1.0, %v1159_v27  ;;  %v1176_v25 = vadd.f32 1.0, %v1160_v57 }
 0x359   :  { %v1162_v54 = vsel %vm1130_vm4, %v1146_v22, %v1114_v19  ;;  %v1177_v33 = vadd.f32 1.0, %v1161_v11  ;;  %v10109_v42 = vadd.f32 %v10003_v53, %v9994_v34  ;;  %v10113_v4 = vadd.f32 %v10000_v8, %v9991_v10 }
 0x35a   :  { %v1163_v23 = vsel %vm1131_vm5, %v1147_v6, %v1115_v51  ;;  %v1178_v2 = vadd.f32 1.0, %v1162_v54  ;;  %v10119_v61 = vadd.f32 %v10014_v35, %v9988_v58  ;;  %v10123_v41 = vadd.f32 %v10020_v32, %v9985_v36  ;;  %v13123_v32 = vld [vmem:[#allocation23_spill] sm:$0xff] }
 0x35b   :  { %v1179_v0 = vadd.f32 1.0, %v1163_v23  ;;  %v10126_v34 = vmul.f32 %v1174_v28, %v9967_v21  ;;  %v10130_v10 = vadd.f32 %v10023_v47, %v9997_v9  ;;  %v10133_v5 = vmul.f32 %v8407_v24, %v9785_v44  ;;  %v13124_v47 = vld [vmem:[#allocation24_spill] sm:$0xff] }
 0x35c   :  { %v10136_v8 = vmul.f32 %v1172_v37, %v9961_v49  ;;  %v10139_v58 = vmul.f32 %v1173_v12, %v9964_v16  ;;  %v10142_v36 = vmul.f32 %v1175_v50, %v9970_v18  ;;  %v10145_v53 = vmul.f32 %v1176_v25, %v9973_v13 }
 0x35d   :  { %13115 = vst [vmem:[#allocation38_spill] sm:$0xff] %v10126_v34  ;;  %v10148_v21 = vmul.f32 %v1177_v33, %v9976_v40  ;;  %v10151_v9 = vmul.f32 %v1178_v2, %v9979_v14  ;;  %v1505_v35 = vmul.f32 %v8407_v24, %v9788_v29  ;;  %v10155_v49 = vmul.f32 %v8407_v24, %v9782_v30 }
 0x35e   :  { %13116 = vst [vmem:[#allocation39_spill] sm:$0xff] %v10136_v8  ;;  %13117 = vst [vmem:[#allocation40_spill] sm:$0xff] %v10139_v58  ;;  %v10158_v16 = vmul.f32 %v1179_v0, %v9982_v31  ;;  %v10161_v18 = vmul.f32 %v8407_v24, %v13123_v32  ;;  %v10164_v13 = vmul.f32 %v8407_v24, %v13124_v47  ;;  %v1221_v14 = vrot.slane %v10126_v34, 3  ;;  %v13129_v31 = vld [vmem:[#allocation37_spill] sm:$0xff] }
 0x35f   :  { %13118 = vst [vmem:[#allocation41_spill] sm:$0xff] %v10142_v36  ;;  %13119 = vst [vmem:[#allocation42_spill] sm:$0xff] %v10145_v53  ;;  %v10167_v40 = vmul.f32 %v8407_v24, %v13125_v43  ;;  %v10171_v52 = vmul.f32 %v8407_v24, %v13126_v45  ;;  %v10175_v38 = vadd.f32 %v10133_v5, %v13127_v48  ;;  %v1220_v55 = vrot.slane %v10142_v36, 3 }
 0x360   :  { %13120 = vst [vmem:[#allocation43_spill] sm:$0xff] %v10148_v21  ;;  %13121 = vst [vmem:[#allocation44_spill] sm:$0xff] %v10151_v9  ;;  %v10178_v1 = vadd.f32 %v1505_v35, %v13129_v31  ;;  %v1222_v46 = vrot.slane %v10139_v58, 3  ;;  %v1223_v15 = vrot.slane %v10136_v8, 3  ;;  %v1224_v20 = vrot.slane %v10145_v53, 3 }
 0x361   :  { %13122 = vst [vmem:[#allocation45_spill] sm:$0xff] %v10158_v16  ;;  %13128 = vst [vmem:[#allocation23_spill] sm:$0xff] %v10175_v38  ;;  %v1225_v26 = vrot.slane %v10148_v21, 3  ;;  %v1226_v59 = vrot.slane %v10151_v9, 3  ;;  %v1252_v3 = vrot.slane %v10142_v36, 1  ;;  %v1253_v39 = vrot.slane %v10126_v34, 1 }
 0x362   :  { %13130 = vst [vmem:[#allocation24_spill] sm:$0xff] %v10178_v1  ;;  %v1227_v17 = vrot.slane %v10158_v16, 3  ;;  %v1254_v7 = vrot.slane %v10139_v58, 1  ;;  %v1255_v19 = vrot.slane %v10136_v8, 1  ;;  %v1256_v62 = vrot.slane %v10145_v53, 1 }
 0x363   :  { %v1257_v56 = vrot.slane %v10148_v21, 1  ;;  %v1258_v51 = vrot.slane %v10151_v9, 1  ;;  %v1259_v60 = vrot.slane %v10158_v16, 1  ;;  %v13025_v27 = vrot.slane %v10142_v36, 7 }
 0x364   :  { %v13027_v37 = vrot.slane %v10126_v34, 7  ;;  %v13028_v22 = vrot.slane %v10139_v58, 7  ;;  %v1349_v50 = vsel %vm1340_vm9, %v1220_v55, %v1252_v3  ;;  %v1316_v25 = vrot.slane %v10142_v36, 5 }
 0x365   :  { %v1350_v24 = vsel %vm1340_vm9, %v1221_v14, %v1253_v39  ;;  %v1351_v54 = vsel %vm1340_vm9, %v1222_v46, %v1254_v7  ;;  %v1352_v33 = vsel %vm1340_vm9, %v1223_v15, %v1255_v19  ;;  %v1317_v23 = vrot.slane %v10126_v34, 5 }
 0x366   :  { %v1318_v2 = vrot.slane %v10139_v58, 5  ;;  %v1319_v0 = vrot.slane %v10136_v8, 5  ;;  %v1353_v35 = vsel %vm1340_vm9, %v1224_v20, %v1256_v62  ;;  %v1354_v48 = vsel %vm1340_vm9, %v1225_v26, %v1257_v56 }
 0x367   :  { %v1355_v31 = vsel %vm1340_vm9, %v1226_v59, %v1258_v51  ;;  %v1356_v11 = vsel %vm1340_vm9, %v1227_v17, %v1259_v60  ;;  %v1366_v6 = vsel %vm1357_vm10, %v1349_v50, %v13025_v27  ;;  %v1320_v28 = vrot.slane %v10145_v53, 5 }
 0x368   :  { %v1367_v12 = vsel %vm1357_vm10, %v1350_v24, %v13027_v37  ;;  %v1368_v57 = vsel %vm1357_vm10, %v1351_v54, %v13028_v22  ;;  %v13131_v1 = vrot.slane %v10136_v8, 7  ;;  %v1321_v45 = vrot.slane %v10148_v21, 5 }
 0x369   :  { %v1322_v36 = vrot.slane %v10151_v9, 5  ;;  %v1323_v50 = vrot.slane %v10158_v16, 5  ;;  %v13132_v27 = vrot.slane %v10145_v53, 7  ;;  %v13133_v24 = vrot.slane %v10148_v21, 7 }
 0x36a   :  { %v1369_v38 = vsel %vm1357_vm10, %v1352_v33, %v13131_v1  ;;  %v13134_v54 = vrot.slane %v10151_v9, 7  ;;  %v13135_v1 = vrot.slane %v10158_v16, 7  ;;  %v10244_v8 = vsel %vm1374_vm11, %v1366_v6, %v1316_v25  ;;  %v8415_v9 = vld [vmem:[#allocation2 + $0xa6] ss:$0 sm:$0xff] }
 0x36b   :  { %v1370_v34 = vsel %vm1357_vm10, %v1353_v35, %v13132_v27  ;;  %v1371_v37 = vsel %vm1357_vm10, %v1354_v48, %v13133_v24  ;;  %13136 = vst [vmem:[#allocation25_spill] sm:$0xff] %v10244_v8  ;;  %v10247_v58 = vsel %vm1374_vm11, %v1367_v12, %v1317_v23  ;;  %v10250_v27 = vsel %vm1374_vm11, %v1368_v57, %v1318_v2 }
 0x36c   :  { %v1372_v22 = vsel %vm1357_vm10, %v1355_v31, %v13134_v54  ;;  %v1373_v33 = vsel %vm1357_vm10, %v1356_v11, %v13135_v1  ;;  %13137 = vst [vmem:[#allocation36_spill] sm:$0xff] %v10247_v58  ;;  %13138 = vst [vmem:[#allocation37_spill] sm:$0xff] %v10250_v27  ;;  %v10253_v35 = vsel %vm1374_vm11, %v1369_v38, %v1319_v0  ;;  %vm1715_vm6 = vcmask 1046528  }
 0x36d   :  { %13139 = vst [vmem:[#allocation46_spill] sm:$0xff] %v10253_v35  ;;  %v1399_v48 = vsel %vm1374_vm11, %v1316_v25, %v1220_v55  ;;  %v1400_v31 = vsel %vm1374_vm11, %v1317_v23, %v1221_v14  ;;  %v1401_v24 = vsel %vm1374_vm11, %v1318_v2, %v1222_v46  ;;  %v1402_v11 = vsel %vm1374_vm11, %v1319_v0, %v1223_v15 }
 0x36e   :  { %v1403_v6 = vsel %vm1374_vm11, %v1320_v28, %v1224_v20  ;;  %v10261_v54 = vsel %vm1374_vm11, %v1370_v34, %v1320_v28  ;;  %v1404_v12 = vsel %vm1374_vm11, %v1321_v45, %v1225_v26  ;;  %v1405_v57 = vsel %vm1374_vm11, %v1322_v36, %v1226_v59 }
 0x36f   :  { %13140 = vst [vmem:[#allocation47_spill] sm:$0xff] %v10261_v54  ;;  %v1406_v38 = vsel %vm1374_vm11, %v1323_v50, %v1227_v17  ;;  %v10267_v1 = vsel %vm1374_vm11, %v1371_v37, %v1321_v45  ;;  %v10270_v14 = vsel %vm1374_vm11, %v1372_v22, %v1322_v36  ;;  %v10273_v55 = vsel %vm1374_vm11, %v1373_v33, %v1323_v50  ;;  %v8408_v45 = vld [vmem:[#allocation2 + $0xa5] ss:$0 sm:$0xff] }
 0x370   :  { %13141 = vst [vmem:[#allocation48_spill] sm:$0xff] %v10267_v1  ;;  %13142 = vst [vmem:[#allocation49_spill] sm:$0xff] %v10270_v14  ;;  %v1416_v46 = vsel %vm1407_vm12, %v1399_v48, %v1252_v3  ;;  %v1417_v34 = vsel %vm1407_vm12, %v1400_v31, %v1253_v39  ;;  %v10278_v15 = vsel %vm1407_vm12, %v1401_v24, %v1254_v7  ;;  %v8410_v31 = vld [vmem:[#allocation2 + $0xb3] ss:$0 sm:$0xff]  ;;  %v13152_v24 = vld [vmem:[#allocation41_spill] sm:$0xff]  ;;  %vm2567_vm7 = vcmask 1045504  }
 0x371   :  { %13143 = vst [vmem:[#allocation50_spill] sm:$0xff] %v10273_v55  ;;  %v10281_v20 = vsel %vm1407_vm12, %v1402_v11, %v1255_v19  ;;  %v10284_v26 = vsel %vm1407_vm12, %v1403_v6, %v1256_v62  ;;  %v10287_v36 = vsel %vm1407_vm12, %v1404_v12, %v1257_v56  ;;  %v10290_v59 = vsel %vm1407_vm12, %v1405_v57, %v1258_v51  ;;  %v8413_v55 = vld [vmem:[#allocation2 + $0x98] ss:$0 sm:$0xff] }
 0x372   :  { %13144 = vst [vmem:[#allocation51_spill] sm:$0xff] %v10284_v26  ;;  %13145 = vst [vmem:[#allocation52_spill] sm:$0xff] %v10287_v36  ;;  %v10293_v3 = vsel %vm1407_vm12, %v1406_v38, %v1259_v60  ;;  %v1520_v39 = vadd.f32 %v10133_v5, %v10097_v63  ;;  %v1521_v17 = vadd.f32 %v10155_v49, %v10109_v42  ;;  %v13148_v49 = vld [vmem:[#allocation26_spill] sm:$0xff]  ;;  %v13153_v11 = vrot.slane %v13152_v24, 7  ;;  %v13158_v24 = vld [vmem:[#allocation28_spill] sm:$0xff] }
 0x373   :  { %13146 = vst [vmem:[#allocation53_spill] sm:$0xff] %v10290_v59  ;;  %13147 = vst [vmem:[#allocation54_spill] sm:$0xff] %v10293_v3  ;;  %v1522_v7 = vadd.f32 %v10161_v18, %v10113_v4  ;;  %v1523_v19 = vadd.f32 %v10164_v13, %v10119_v61  ;;  %v1524_v62 = vadd.f32 %v10167_v40, %v10123_v41  ;;  %v8409_v18 = vld [vmem:[#allocation2 + $0xac] ss:$0 sm:$0xff]  ;;  %v13149_v13 = vld [vmem:[#allocation27_spill] sm:$0xff] }
 0x374   :  { %v1525_v56 = vadd.f32 %v10171_v52, %v10130_v10  ;;  %v1539_v51 = vmul.f32 %v8408_v45, %v9788_v29  ;;  %v1540_v60 = vmul.f32 %v8408_v45, %v9785_v44  ;;  %v1541_v63 = vmul.f32 %v8408_v45, %v9782_v30  ;;  %v13150_v40 = vld [vmem:[#allocation23_spill] sm:$0xff]  ;;  %v13151_v10 = vld [vmem:[#allocation24_spill] sm:$0xff] }
 0x375   :  { %v1542_v42 = vmul.f32 %v8408_v45, %v13123_v32  ;;  %v1543_v5 = vmul.f32 %v8408_v45, %v13124_v47  ;;  %v1544_v4 = vmul.f32 %v8408_v45, %v13125_v43  ;;  %v1545_v61 = vmul.f32 %v8408_v45, %v13148_v49 }
 0x376   :  { %v1546_v41 = vmul.f32 %v8408_v45, %v13149_v13  ;;  %v1555_v37 = vadd.f32 %v1539_v51, %v13150_v40  ;;  %v1556_v52 = vadd.f32 %v1540_v60, %v13151_v10  ;;  %v1557_v22 = vadd.f32 %v1541_v63, %v1520_v39  ;;  %v8411_v60 = vld [vmem:[#allocation2 + $0xba] ss:$0 sm:$0xff]  ;;  %v8412_v10 = vld [vmem:[#allocation2 + $0x91] ss:$0 sm:$0xff] }
 0x377   :  { %v1558_v28 = vadd.f32 %v1542_v42, %v1521_v17  ;;  %v1559_v25 = vadd.f32 %v1543_v5, %v1522_v7  ;;  %v1560_v23 = vadd.f32 %v1544_v4, %v1523_v19  ;;  %v1561_v2 = vadd.f32 %v1545_v61, %v1524_v62  ;;  %v13155_v4 = vld [vmem:[#allocation38_spill] sm:$0xff] }
 0x378   :  { %v1562_v0 = vadd.f32 %v1546_v41, %v1525_v56  ;;  %v1576_v50 = vmul.f32 %v8409_v18, %v9785_v44  ;;  %v1577_v33 = vmul.f32 %v8409_v18, %v9782_v30  ;;  %v1578_v48 = vmul.f32 %v8409_v18, %v13123_v32 }
 0x379   :  { %v10323_v6 = vsel %vm1424_vm13, %v1416_v46, %v13153_v11  ;;  %v1579_v12 = vmul.f32 %v8409_v18, %v13124_v47  ;;  %v1580_v57 = vmul.f32 %v8409_v18, %v13125_v43  ;;  %v1581_v38 = vmul.f32 %v8409_v18, %v13148_v49 }
 0x37a   :  { %13154 = vst [vmem:[#allocation26_spill] sm:$0xff] %v10323_v6  ;;  %v1582_v45 = vmul.f32 %v8409_v18, %v13149_v13  ;;  %v1590_v39 = vadd.f32 %v1576_v50, %v1555_v37  ;;  %v1591_v17 = vadd.f32 %v1577_v33, %v1556_v52  ;;  %v1592_v7 = vadd.f32 %v1578_v48, %v1557_v22 }
 0x37b   :  { %v1593_v19 = vadd.f32 %v1579_v12, %v1558_v28  ;;  %v1594_v62 = vadd.f32 %v1580_v57, %v1559_v25  ;;  %v1595_v56 = vadd.f32 %v1581_v38, %v1560_v23  ;;  %v1611_v51 = vmul.f32 %v8410_v31, %v9782_v30 }
 0x37c   :  { %v1596_v63 = vadd.f32 %v1582_v45, %v1561_v2  ;;  %v1597_v46 = vadd.f32 %v1581_v38, %v1562_v0  ;;  %v1612_v42 = vmul.f32 %v8410_v31, %v13123_v32  ;;  %v1613_v5 = vmul.f32 %v8410_v31, %v13124_v47  ;;  %v13159_v38 = vld [vmem:[#allocation29_spill] sm:$0xff] }
 0x37d   :  { %v13156_v61 = vrot.slane %v13155_v4, 7  ;;  %v1614_v18 = vmul.f32 %v8410_v31, %v13125_v43  ;;  %v1615_v40 = vmul.f32 %v8410_v31, %v13148_v49  ;;  %v1616_v37 = vmul.f32 %v8410_v31, %v13149_v13 }
 0x37e   :  { %v1623_v52 = vadd.f32 %v1611_v51, %v1590_v39  ;;  %v1624_v22 = vadd.f32 %v1612_v42, %v1591_v17  ;;  %v1625_v28 = vadd.f32 %v1613_v5, %v1592_v7  ;;  %v1644_v25 = vmul.f32 %v8411_v60, %v13123_v32  ;;  %v13160_v17 = vld [vmem:[#allocation30_spill] sm:$0xff] }
 0x37f   :  { %v10335_v41 = vsel %vm1424_vm13, %v1417_v34, %v13156_v61  ;;  %v1626_v23 = vadd.f32 %v1614_v18, %v1593_v19  ;;  %v1627_v2 = vadd.f32 %v1615_v40, %v1594_v62  ;;  %v1628_v0 = vadd.f32 %v1616_v37, %v1595_v56  ;;  %v13161_v62 = vld [vmem:[#allocation31_spill] sm:$0xff] }
 0x380   :  { %13157 = vst [vmem:[#allocation27_spill] sm:$0xff] %v10335_v41  ;;  %v1645_v50 = vmul.f32 %v8411_v60, %v13124_v47  ;;  %v1629_v33 = vadd.f32 %v1615_v40, %v1596_v63  ;;  %v1630_v34 = vadd.f32 %v1614_v18, %v1597_v46  ;;  %v1675_v48 = vmul.f32 %v8412_v10, %v13123_v32  ;;  %v13162_v46 = vld [vmem:[#allocation32_spill] sm:$0xff] }
 0x381   :  { %v1676_v11 = vmul.f32 %v8412_v10, %v13158_v24  ;;  %v1646_v12 = vmul.f32 %v8411_v60, %v13125_v43  ;;  %v1647_v31 = vmul.f32 %v8411_v60, %v13148_v49  ;;  %v1677_v57 = vmul.f32 %v8412_v10, %v9782_v30 }
 0x382   :  { %v1678_v45 = vmul.f32 %v8412_v10, %v13159_v38  ;;  %v1679_v39 = vmul.f32 %v8412_v10, %v9785_v44  ;;  %v1680_v7 = vmul.f32 %v8412_v10, %v13160_v17  ;;  %v1681_v19 = vmul.f32 %v8412_v10, %v9788_v29 }
 0x383   :  { %v1682_v56 = vmul.f32 %v8412_v10, %v13161_v62  ;;  %v1648_v51 = vmul.f32 %v8411_v60, %v13149_v13  ;;  %v1683_v63 = vmul.f32 %v8412_v10, %v13124_v47  ;;  %v1684_v42 = vmul.f32 %v8412_v10, %v13162_v46 }
 0x384   :  { %v1716_v5 = vrot.slane %v1675_v48, 1  ;;  %v1717_v4 = vrot.slane %v1676_v11, 1  ;;  %v1719_v61 = vrot.slane %v1677_v57, 1  ;;  %v1720_v18 = vrot.slane %v1678_v45, 1 }
 0x385   :  { %v1722_v40 = vrot.slane %v1679_v39, 1  ;;  %v1723_v37 = vrot.slane %v1680_v7, 1  ;;  %v1725_v41 = vrot.slane %v1681_v19, 1  ;;  %v1726_v6 = vrot.slane %v1682_v56, 1 }
 0x386   :  { %v1654_v14 = vadd.f32 %v1644_v25, %v1623_v52  ;;  %v1655_v1 = vadd.f32 %v1645_v50, %v1624_v22  ;;  %v1656_v54 = vadd.f32 %v1646_v12, %v1625_v28  ;;  %v1657_v35 = vadd.f32 %v1647_v31, %v1626_v23 }
 0x387   :  { %v1658_v27 = vadd.f32 %v1648_v51, %v1627_v2  ;;  %v1659_v60 = vadd.f32 %v1647_v31, %v1628_v0  ;;  %v1660_v58 = vadd.f32 %v1646_v12, %v1629_v33  ;;  %v1661_v8 = vadd.f32 %v1645_v50, %v1630_v34 }
 0x388   :  { %v1718_v10 = vsel %vm1715_vm6, %v1716_v5, %v1717_v4  ;;  %v1721_v48 = vsel %vm1715_vm6, %v1719_v61, %v1720_v18  ;;  %v1728_v11 = vrot.slane %v1683_v63, 1  ;;  %v1777_v57 = vmul.f32 %v8413_v55, %v9782_v30 }
 0x389   :  { %v1724_v45 = vsel %vm1715_vm6, %v1722_v40, %v1723_v37  ;;  %v1727_v39 = vsel %vm1715_vm6, %v1725_v41, %v1726_v6  ;;  %v1729_v7 = vrot.slane %v1684_v42, 1  ;;  %v1778_v52 = vmul.f32 %v8413_v55, %v13159_v38  ;;  %v13163_v42 = vld [vmem:[#allocation33_spill] sm:$0xff]  ;;  %v8414_v37 = vld [vmem:[#allocation2 + $0x9f] ss:$0 sm:$0xff] }
 0x38a   :  { %v1779_v22 = vmul.f32 %v8413_v55, %v9785_v44  ;;  %v1780_v28 = vmul.f32 %v8413_v55, %v13160_v17  ;;  %v1781_v25 = vmul.f32 %v8413_v55, %v9788_v29  ;;  %v1782_v23 = vmul.f32 %v8413_v55, %v13161_v62 }
 0x38b   :  { %v1756_v2 = vadd.f32 %v1718_v10, %v1654_v14  ;;  %v1757_v0 = vadd.f32 %v1721_v48, %v1655_v1  ;;  %v1783_v50 = vmul.f32 %v8413_v55, %v13123_v32  ;;  %v1784_v33 = vmul.f32 %v8413_v55, %v13158_v24 }
 0x38c   :  { %v1785_v34 = vmul.f32 %v8413_v55, %v13124_v47  ;;  %v1786_v6 = vmul.f32 %v8413_v55, %v13162_v46  ;;  %v1825_v41 = vrot.slane %v1777_v57, 1  ;;  %v1826_v12 = vrot.slane %v1778_v52, 1 }
 0x38d   :  { %v1828_v31 = vrot.slane %v1779_v22, 1  ;;  %v1829_v19 = vrot.slane %v1780_v28, 1  ;;  %v1831_v56 = vrot.slane %v1781_v25, 1  ;;  %v1832_v51 = vrot.slane %v1782_v23, 1 }
 0x38e   :  { %v1787_v63 = vmul.f32 %v8413_v55, %v13125_v43  ;;  %v1788_v5 = vmul.f32 %v8413_v55, %v13163_v42  ;;  %v1834_v14 = vrot.slane %v1783_v50, 1  ;;  %v1835_v1 = vrot.slane %v1784_v33, 1 }
 0x38f   :  { %v1730_v4 = vsel %vm1715_vm6, %v1728_v11, %v1729_v7  ;;  %v1758_v61 = vadd.f32 %v1724_v45, %v1656_v54  ;;  %v1759_v18 = vadd.f32 %v1727_v39, %v1657_v35  ;;  %v1760_v40 = vadd.f32 %v1724_v45, %v1658_v27 }
 0x390   :  { %v1761_v3 = vadd.f32 %v1721_v48, %v1659_v60  ;;  %v1762_v16 = vadd.f32 %v1718_v10, %v1660_v58  ;;  %v1763_v57 = vadd.f32 %v1730_v4, %v1661_v8  ;;  %v1827_v52 = vsel %vm1715_vm6, %v1825_v41, %v1826_v12  ;;  %v13164_v4 = vld [vmem:[#allocation34_spill] sm:$0xff] }
 0x391   :  { %v1830_v22 = vsel %vm1715_vm6, %v1828_v31, %v1829_v19  ;;  %v1833_v28 = vsel %vm1715_vm6, %v1831_v56, %v1832_v51  ;;  %v1837_v25 = vrot.slane %v1785_v34, 1  ;;  %v1838_v23 = vrot.slane %v1786_v6, 1 }
 0x392   :  { %v1836_v55 = vsel %vm1715_vm6, %v1834_v14, %v1835_v1  ;;  %v1840_v50 = vrot.slane %v1787_v63, 1  ;;  %v1841_v33 = vrot.slane %v1788_v5, 1  ;;  %v1894_v54 = vmul.f32 %v8414_v37, %v9785_v44 }
 0x393   :  { %v1873_v35 = vadd.f32 %v1827_v52, %v1756_v2  ;;  %v1895_v27 = vmul.f32 %v8414_v37, %v13160_v17  ;;  %v1896_v58 = vmul.f32 %v8414_v37, %v9788_v29  ;;  %v1897_v8 = vmul.f32 %v8414_v37, %v13161_v62 }
 0x394   :  { %v1898_v60 = vmul.f32 %v8414_v37, %v9782_v30  ;;  %v1899_v10 = vmul.f32 %v8414_v37, %v13159_v38  ;;  %v1900_v48 = vmul.f32 %v8414_v37, %v13123_v32  ;;  %v1901_v11 = vmul.f32 %v8414_v37, %v13158_v24 }
 0x395   :  { %v1839_v45 = vsel %vm1715_vm6, %v1837_v25, %v1838_v23  ;;  %v1874_v39 = vadd.f32 %v1830_v22, %v1757_v0  ;;  %v1902_v7 = vmul.f32 %v8414_v37, %v13124_v47  ;;  %v1903_v2 = vmul.f32 %v8414_v37, %v13162_v46 }
 0x396   :  { %v1875_v34 = vadd.f32 %v1833_v28, %v1758_v61  ;;  %v1904_v6 = vmul.f32 %v8414_v37, %v13125_v43  ;;  %v1950_v41 = vrot.slane %v1894_v54, 1  ;;  %v1951_v12 = vrot.slane %v1895_v27, 1 }
 0x397   :  { %v1953_v31 = vrot.slane %v1896_v58, 1  ;;  %v1954_v19 = vrot.slane %v1897_v8, 1  ;;  %v1956_v56 = vrot.slane %v1898_v60, 1  ;;  %v1957_v51 = vrot.slane %v1899_v10, 1 }
 0x398   :  { %v1905_v63 = vmul.f32 %v8414_v37, %v13163_v42  ;;  %v1906_v5 = vmul.f32 %v8414_v37, %v13148_v49  ;;  %v1959_v14 = vrot.slane %v1900_v48, 1  ;;  %v1960_v1 = vrot.slane %v1901_v11, 1 }
 0x399   :  { %v1876_v0 = vadd.f32 %v1830_v22, %v1759_v18  ;;  %v1907_v25 = vmul.f32 %v8414_v37, %v13164_v4  ;;  %v1962_v23 = vrot.slane %v1902_v7, 1  ;;  %v1963_v59 = vrot.slane %v1903_v2, 1 }
 0x39a   :  { %v1842_v61 = vsel %vm1715_vm6, %v1840_v50, %v1841_v33  ;;  %v1877_v28 = vadd.f32 %v1827_v52, %v1760_v40  ;;  %v1878_v54 = vadd.f32 %v1836_v55, %v1761_v3  ;;  %v1879_v27 = vadd.f32 %v1839_v45, %v1762_v16 }
 0x39b   :  { %v1880_v58 = vadd.f32 %v1842_v61, %v1763_v57  ;;  %v1952_v8 = vsel %vm1715_vm6, %v1950_v41, %v1951_v12  ;;  %v1955_v60 = vsel %vm1715_vm6, %v1953_v31, %v1954_v19  ;;  %v1958_v10 = vsel %vm1715_vm6, %v1956_v56, %v1957_v51 }
 0x39c   :  { %v1961_v48 = vsel %vm1715_vm6, %v1959_v14, %v1960_v1  ;;  %v1965_v18 = vrot.slane %v1904_v6, 1  ;;  %v1966_v22 = vrot.slane %v1905_v63, 1  ;;  %v1968_v37 = vrot.slane %v1906_v5, 1 }
 0x39d   :  { %v1964_v11 = vsel %vm1715_vm6, %v1962_v23, %v1963_v59  ;;  %v1969_v7 = vrot.slane %v1907_v25, 1  ;;  %v2006_v50 = vadd.f32 %v1952_v8, %v1873_v35  ;;  %v2007_v40 = vadd.f32 %v1955_v60, %v1874_v39 }
 0x39e   :  { %v2027_v16 = vmul.f32 %v8415_v9, %v9788_v29  ;;  %v2028_v3 = vmul.f32 %v8415_v9, %v13161_v62  ;;  %v2029_v57 = vmul.f32 %v8415_v9, %v9785_v44  ;;  %v2030_v52 = vmul.f32 %v8415_v9, %v13160_v17 }
 0x39f   :  { %v2031_v55 = vmul.f32 %v8415_v9, %v9782_v30  ;;  %v2032_v33 = vmul.f32 %v8415_v9, %v13159_v38  ;;  %v2033_v45 = vmul.f32 %v8415_v9, %v13123_v32  ;;  %v2034_v2 = vmul.f32 %v8415_v9, %v13158_v24 }
 0x3a0   :  { %v1967_v59 = vsel %vm1715_vm6, %v1965_v18, %v1966_v22  ;;  %v2008_v35 = vadd.f32 %v1952_v8, %v1875_v34  ;;  %v2035_v39 = vmul.f32 %v8415_v9, %v13124_v47  ;;  %v2036_v6 = vmul.f32 %v8415_v9, %v13162_v46  ;;  %v13165_v22 = vld [vmem:[#allocation35_spill] sm:$0xff] }
 0x3a1   :  { %v1970_v41 = vsel %vm1715_vm6, %v1968_v37, %v1969_v7  ;;  %v2037_v12 = vmul.f32 %v8415_v9, %v13125_v43  ;;  %v2038_v31 = vmul.f32 %v8415_v9, %v13163_v42  ;;  %v2039_v19 = vmul.f32 %v8415_v9, %v13148_v49 }
 0x3a2   :  { %v2091_v56 = vrot.slane %v2027_v16, 1  ;;  %v2092_v51 = vrot.slane %v2028_v3, 1  ;;  %v2094_v63 = vrot.slane %v2029_v57, 1  ;;  %v2095_v5 = vrot.slane %v2030_v52, 1  ;;  %v8416_v52 = vld [vmem:[#allocation2 + $0xad] ss:$0 sm:$0xff] }
 0x3a3   :  { %v2097_v14 = vrot.slane %v2031_v55, 1  ;;  %v2098_v1 = vrot.slane %v2032_v33, 1  ;;  %v2100_v25 = vrot.slane %v2033_v45, 1  ;;  %v2101_v34 = vrot.slane %v2034_v2, 1 }
 0x3a4   :  { %v2040_v23 = vmul.f32 %v8415_v9, %v13164_v4  ;;  %v2041_v61 = vmul.f32 %v8415_v9, %v13149_v13  ;;  %v2103_v8 = vrot.slane %v2035_v39, 1  ;;  %v2104_v60 = vrot.slane %v2036_v6, 1 }
 0x3a5   :  { %v2009_v18 = vadd.f32 %v1958_v10, %v1876_v0  ;;  %v2042_v37 = vmul.f32 %v8415_v9, %v13165_v22  ;;  %v2106_v7 = vrot.slane %v2037_v12, 1  ;;  %v2107_v36 = vrot.slane %v2038_v31, 1 }
 0x3a6   :  { %v2010_v21 = vadd.f32 %v1961_v48, %v1877_v28  ;;  %v2011_v16 = vadd.f32 %v1964_v11, %v1878_v54  ;;  %v2012_v3 = vadd.f32 %v1967_v59, %v1879_v27  ;;  %v2013_v57 = vadd.f32 %v1970_v41, %v1880_v58 }
 0x3a7   :  { %v2093_v55 = vsel %vm1715_vm6, %v2091_v56, %v2092_v51  ;;  %v2096_v33 = vsel %vm1715_vm6, %v2094_v63, %v2095_v5  ;;  %v2099_v45 = vsel %vm1715_vm6, %v2097_v14, %v2098_v1  ;;  %v2102_v2 = vsel %vm1715_vm6, %v2100_v25, %v2101_v34 }
 0x3a8   :  { %v2105_v39 = vsel %vm1715_vm6, %v2103_v8, %v2104_v60  ;;  %v2109_v0 = vrot.slane %v2039_v19, 1  ;;  %v2110_v10 = vrot.slane %v2040_v23, 1  ;;  %v2112_v9 = vrot.slane %v2041_v61, 1 }
 0x3a9   :  { %v2108_v6 = vsel %vm1715_vm6, %v2106_v7, %v2107_v36  ;;  %v2113_v28 = vrot.slane %v2042_v37, 1  ;;  %v2155_v54 = vadd.f32 %v2093_v55, %v2006_v50  ;;  %v2176_v27 = vmul.f32 %v8416_v52, %v9785_v44 }
 0x3aa   :  { %v2177_v58 = vmul.f32 %v8416_v52, %v13160_v17  ;;  %v2178_v48 = vmul.f32 %v8416_v52, %v9782_v30  ;;  %v2179_v11 = vmul.f32 %v8416_v52, %v13159_v38  ;;  %v2180_v59 = vmul.f32 %v8416_v52, %v13123_v32 }
 0x3ab   :  { %v2181_v41 = vmul.f32 %v8416_v52, %v13158_v24  ;;  %v2182_v12 = vmul.f32 %v8416_v52, %v13124_v47  ;;  %v2183_v31 = vmul.f32 %v8416_v52, %v13162_v46  ;;  %v2184_v36 = vmul.f32 %v8416_v52, %v13125_v43 }
 0x3ac   :  { %v2156_v19 = vadd.f32 %v2096_v33, %v2007_v40  ;;  %v2185_v50 = vmul.f32 %v8416_v52, %v13163_v42  ;;  %v2186_v56 = vmul.f32 %v8416_v52, %v13148_v49  ;;  %v2187_v51 = vmul.f32 %v8416_v52, %v13164_v4 }
 0x3ad   :  { %v2157_v63 = vadd.f32 %v2099_v45, %v2008_v35  ;;  %v2188_v5 = vmul.f32 %v8416_v52, %v13149_v13  ;;  %v2232_v14 = vrot.slane %v2176_v27, 1  ;;  %v2233_v1 = vrot.slane %v2177_v58, 1  ;;  %v8417_v58 = vld [vmem:[#allocation2 + $0xb4] ss:$0 sm:$0xff] }
 0x3ae   :  { %v2235_v25 = vrot.slane %v2178_v48, 1  ;;  %v2236_v34 = vrot.slane %v2179_v11, 1  ;;  %v2238_v23 = vrot.slane %v2180_v59, 1  ;;  %v2239_v61 = vrot.slane %v2181_v41, 1 }
 0x3af   :  { %v2241_v8 = vrot.slane %v2182_v12, 1  ;;  %v2242_v60 = vrot.slane %v2183_v31, 1  ;;  %v2244_v37 = vrot.slane %v2184_v36, 1  ;;  %v2245_v7 = vrot.slane %v2185_v50, 1 }
 0x3b0   :  { %v2111_v40 = vsel %vm1715_vm6, %v2109_v0, %v2110_v10  ;;  %v2189_v55 = vmul.f32 %v8416_v52, %v13165_v22  ;;  %v2247_v33 = vrot.slane %v2186_v56, 1  ;;  %v2248_v26 = vrot.slane %v2187_v51, 1 }
 0x3b1   :  { %v2114_v35 = vsel %vm1715_vm6, %v2112_v9, %v2113_v28  ;;  %v2158_v45 = vadd.f32 %v2102_v2, %v2009_v18  ;;  %v2159_v53 = vadd.f32 %v2105_v39, %v2010_v21  ;;  %v2160_v27 = vadd.f32 %v2108_v6, %v2011_v16 }
 0x3b2   :  { %v2161_v48 = vadd.f32 %v2111_v40, %v2012_v3  ;;  %v2162_v11 = vadd.f32 %v2114_v35, %v2013_v57  ;;  %v2234_v59 = vsel %vm1715_vm6, %v2232_v14, %v2233_v1  ;;  %v2237_v41 = vsel %vm1715_vm6, %v2235_v25, %v2236_v34 }
 0x3b3   :  { %v2240_v12 = vsel %vm1715_vm6, %v2238_v23, %v2239_v61  ;;  %v2243_v0 = vsel %vm1715_vm6, %v2241_v8, %v2242_v60  ;;  %v2246_v52 = vsel %vm1715_vm6, %v2244_v37, %v2245_v7  ;;  %v2250_v10 = vrot.slane %v2188_v5, 1  ;;  %v8418_v7 = vld [vmem:[#allocation2 + $0xbb] ss:$0 sm:$0xff] }
 0x3b4   :  { %v2249_v31 = vsel %vm1715_vm6, %v2247_v33, %v2248_v26  ;;  %v2251_v9 = vrot.slane %v2189_v55, 1  ;;  %v2309_v21 = vmul.f32 %v8417_v58, %v9782_v30  ;;  %v2310_v18 = vmul.f32 %v8417_v58, %v13159_v38 }
 0x3b5   :  { %v2311_v16 = vmul.f32 %v8417_v58, %v13123_v32  ;;  %v2312_v3 = vmul.f32 %v8417_v58, %v13158_v24  ;;  %v2313_v57 = vmul.f32 %v8417_v58, %v13124_v47  ;;  %v2314_v2 = vmul.f32 %v8417_v58, %v13162_v46 }
 0x3b6   :  { %v2288_v39 = vadd.f32 %v2234_v59, %v2155_v54  ;;  %v2289_v6 = vadd.f32 %v2237_v41, %v2156_v19  ;;  %v2315_v28 = vmul.f32 %v8417_v58, %v13125_v43  ;;  %v2316_v36 = vmul.f32 %v8417_v58, %v13163_v42 }
 0x3b7   :  { %v2317_v26 = vmul.f32 %v8417_v58, %v13148_v49  ;;  %v2318_v50 = vmul.f32 %v8417_v58, %v13164_v4  ;;  %v2357_v56 = vrot.slane %v2309_v21, 1  ;;  %v2358_v51 = vrot.slane %v2310_v18, 1 }
 0x3b8   :  { %v2360_v5 = vrot.slane %v2311_v16, 1  ;;  %v2361_v14 = vrot.slane %v2312_v3, 1  ;;  %v2363_v1 = vrot.slane %v2313_v57, 1  ;;  %v2364_v25 = vrot.slane %v2314_v2, 1 }
 0x3b9   :  { %v2319_v34 = vmul.f32 %v8417_v58, %v13149_v13  ;;  %v2320_v23 = vmul.f32 %v8417_v58, %v13165_v22  ;;  %v2366_v54 = vrot.slane %v2315_v28, 1  ;;  %v2367_v19 = vrot.slane %v2316_v36, 1 }
 0x3ba   :  { %v2252_v61 = vsel %vm1715_vm6, %v2250_v10, %v2251_v9  ;;  %v2290_v8 = vadd.f32 %v2240_v12, %v2157_v63  ;;  %v2291_v60 = vadd.f32 %v2243_v0, %v2158_v45  ;;  %v2292_v37 = vadd.f32 %v2246_v52, %v2159_v53 }
 0x3bb   :  { %v2293_v40 = vadd.f32 %v2249_v31, %v2160_v27  ;;  %v2294_v55 = vadd.f32 %v2252_v61, %v2161_v48  ;;  %v2295_v33 = vadd.f32 %v2249_v31, %v2162_v11  ;;  %v2359_v35 = vsel %vm1715_vm6, %v2357_v56, %v2358_v51 }
 0x3bc   :  { %v2362_v59 = vsel %vm1715_vm6, %v2360_v5, %v2361_v14  ;;  %v2365_v41 = vsel %vm1715_vm6, %v2363_v1, %v2364_v25  ;;  %v2369_v21 = vrot.slane %v2317_v26, 1  ;;  %v2370_v18 = vrot.slane %v2318_v50, 1 }
 0x3bd   :  { %v2368_v58 = vsel %vm1715_vm6, %v2366_v54, %v2367_v19  ;;  %v2372_v16 = vrot.slane %v2319_v34, 1  ;;  %v2373_v3 = vrot.slane %v2320_v23, 1  ;;  %v2426_v63 = vmul.f32 %v8418_v7, %v13123_v32  ;;  %v8419_v34 = vld [vmem:[#allocation2 + $0x92] ss:$0 sm:$0xff] }
 0x3be   :  { %v2405_v45 = vadd.f32 %v2359_v35, %v2288_v39  ;;  %v2427_v53 = vmul.f32 %v8418_v7, %v13158_v24  ;;  %v2428_v27 = vmul.f32 %v8418_v7, %v13124_v47  ;;  %v2429_v48 = vmul.f32 %v8418_v7, %v13162_v46 }
 0x3bf   :  { %v2430_v11 = vmul.f32 %v8418_v7, %v13125_v43  ;;  %v2431_v12 = vmul.f32 %v8418_v7, %v13163_v42  ;;  %v2432_v0 = vmul.f32 %v8418_v7, %v13148_v49  ;;  %v2433_v52 = vmul.f32 %v8418_v7, %v13164_v4 }
 0x3c0   :  { %v2434_v10 = vmul.f32 %v8418_v7, %v13149_v13  ;;  %v2435_v31 = vmul.f32 %v8418_v7, %v13165_v22  ;;  %v2466_v9 = vrot.slane %v2426_v63, 1  ;;  %v2467_v57 = vrot.slane %v2427_v53, 1 }
 0x3c1   :  { %v2469_v2 = vrot.slane %v2428_v27, 1  ;;  %v2470_v39 = vrot.slane %v2429_v48, 1  ;;  %v2472_v28 = vrot.slane %v2430_v11, 1  ;;  %v2473_v36 = vrot.slane %v2431_v12, 1 }
 0x3c2   :  { %v2371_v26 = vsel %vm1715_vm6, %v2369_v21, %v2370_v18  ;;  %v2406_v50 = vadd.f32 %v2362_v59, %v2289_v6  ;;  %v2407_v56 = vadd.f32 %v2365_v41, %v2290_v8  ;;  %v2408_v51 = vadd.f32 %v2368_v58, %v2291_v60 }
 0x3c3   :  { %v2374_v5 = vsel %vm1715_vm6, %v2372_v16, %v2373_v3  ;;  %v2409_v14 = vadd.f32 %v2371_v26, %v2292_v37  ;;  %v2411_v1 = vadd.f32 %v2371_v26, %v2294_v55  ;;  %v2412_v25 = vadd.f32 %v2368_v58, %v2295_v33 }
 0x3c4   :  { %v2410_v23 = vadd.f32 %v2374_v5, %v2293_v40  ;;  %v2468_v54 = vsel %vm1715_vm6, %v2466_v9, %v2467_v57  ;;  %v2475_v19 = vrot.slane %v2432_v0, 1  ;;  %v2476_v61 = vrot.slane %v2433_v52, 1  ;;  %v8420_v9 = vld [vmem:[#allocation2 + $0x99] ss:$0 sm:$0xff] }
 0x3c5   :  { %v2471_v7 = vsel %vm1715_vm6, %v2469_v2, %v2470_v39  ;;  %v2474_v35 = vsel %vm1715_vm6, %v2472_v28, %v2473_v36  ;;  %v2478_v63 = vrot.slane %v2434_v10, 1  ;;  %v2479_v21 = vrot.slane %v2435_v31, 1 }
 0x3c6   :  { %v2506_v6 = vadd.f32 %v2468_v54, %v2405_v45  ;;  %v2527_v8 = vmul.f32 %v8419_v34, %v13123_v32  ;;  %v2528_v60 = vmul.f32 %v8419_v34, %v13158_v24  ;;  %v2529_v37 = vmul.f32 %v8419_v34, %v9782_v30 }
 0x3c7   :  { %v2530_v55 = vmul.f32 %v8419_v34, %v13159_v38  ;;  %v2531_v40 = vmul.f32 %v8419_v34, %v9785_v44  ;;  %v2532_v33 = vmul.f32 %v8419_v34, %v13160_v17  ;;  %v2533_v59 = vmul.f32 %v8419_v34, %v9788_v29 }
 0x3c8   :  { %v2534_v41 = vmul.f32 %v8419_v34, %v13161_v62  ;;  %v2535_v18 = vmul.f32 %v8419_v34, %v13124_v47  ;;  %v2536_v58 = vmul.f32 %v8419_v34, %v13162_v46  ;;  %v2568_v16 = vrot.slane %v2527_v8, 2 }
 0x3c9   :  { %v2569_v3 = vrot.slane %v2528_v60, 2  ;;  %v2571_v45 = vrot.slane %v2529_v37, 2  ;;  %v2572_v53 = vrot.slane %v2530_v55, 2  ;;  %v2574_v27 = vrot.slane %v2531_v40, 2 }
 0x3ca   :  { %v2575_v48 = vrot.slane %v2532_v33, 2  ;;  %v2577_v11 = vrot.slane %v2533_v59, 2  ;;  %v2578_v12 = vrot.slane %v2534_v41, 2  ;;  %v2477_v0 = vsel %vm1715_vm6, %v2475_v19, %v2476_v61 }
 0x3cb   :  { %v2507_v52 = vadd.f32 %v2471_v7, %v2406_v50  ;;  %v2508_v10 = vadd.f32 %v2474_v35, %v2407_v56  ;;  %v2512_v31 = vadd.f32 %v2474_v35, %v2411_v1  ;;  %v2480_v57 = vsel %vm1715_vm6, %v2478_v63, %v2479_v21 }
 0x3cc   :  { %v2509_v2 = vadd.f32 %v2477_v0, %v2408_v51  ;;  %v2511_v39 = vadd.f32 %v2477_v0, %v2410_v23  ;;  %v2513_v28 = vadd.f32 %v2471_v7, %v2412_v25  ;;  %v2510_v36 = vadd.f32 %v2480_v57, %v2409_v14 }
 0x3cd   :  { %v2570_v26 = vsel %vm2567_vm7, %v2568_v16, %v2569_v3  ;;  %v2573_v5 = vsel %vm2567_vm7, %v2571_v45, %v2572_v53  ;;  %v2580_v34 = vrot.slane %v2535_v18, 2  ;;  %v2576_v54 = vsel %vm2567_vm7, %v2574_v27, %v2575_v48 }
 0x3ce   :  { %v2579_v8 = vsel %vm2567_vm7, %v2577_v11, %v2578_v12  ;;  %v2581_v19 = vrot.slane %v2536_v58, 2  ;;  %v2629_v50 = vmul.f32 %v8420_v9, %v9782_v30  ;;  %v2630_v56 = vmul.f32 %v8420_v9, %v13159_v38  ;;  %v8421_v12 = vld [vmem:[#allocation2 + $0xa0] ss:$0 sm:$0xff] }
 0x3cf   :  { %v2631_v1 = vmul.f32 %v8420_v9, %v9785_v44  ;;  %v2632_v51 = vmul.f32 %v8420_v9, %v13160_v17  ;;  %v2633_v14 = vmul.f32 %v8420_v9, %v9788_v29  ;;  %v2608_v25 = vadd.f32 %v2570_v26, %v2506_v6 }
 0x3d0   :  { %v2634_v23 = vmul.f32 %v8420_v9, %v13161_v62  ;;  %v2635_v61 = vmul.f32 %v8420_v9, %v13123_v32  ;;  %v2636_v7 = vmul.f32 %v8420_v9, %v13158_v24  ;;  %v2637_v35 = vmul.f32 %v8420_v9, %v13124_v47 }
 0x3d1   :  { %v2638_v63 = vmul.f32 %v8420_v9, %v13162_v46  ;;  %v2639_v21 = vmul.f32 %v8420_v9, %v13125_v43  ;;  %v2640_v60 = vmul.f32 %v8420_v9, %v13163_v42  ;;  %v2677_v37 = vrot.slane %v2629_v50, 2 }
 0x3d2   :  { %v2678_v55 = vrot.slane %v2630_v56, 2  ;;  %v2680_v40 = vrot.slane %v2631_v1, 2  ;;  %v2681_v33 = vrot.slane %v2632_v51, 2  ;;  %v2683_v59 = vrot.slane %v2633_v14, 2 }
 0x3d3   :  { %v2684_v6 = vrot.slane %v2634_v23, 2  ;;  %v2686_v41 = vrot.slane %v2635_v61, 2  ;;  %v2687_v18 = vrot.slane %v2636_v7, 2  ;;  %v2582_v58 = vsel %vm2567_vm7, %v2580_v34, %v2581_v19 }
 0x3d4   :  { %v2609_v16 = vadd.f32 %v2573_v5, %v2507_v52  ;;  %v2610_v3 = vadd.f32 %v2576_v54, %v2508_v10  ;;  %v2611_v45 = vadd.f32 %v2579_v8, %v2509_v2  ;;  %v2612_v53 = vadd.f32 %v2576_v54, %v2510_v36 }
 0x3d5   :  { %v2613_v27 = vadd.f32 %v2573_v5, %v2511_v39  ;;  %v2614_v48 = vadd.f32 %v2570_v26, %v2512_v31  ;;  %v2615_v11 = vadd.f32 %v2582_v58, %v2513_v28  ;;  %v2679_v0 = vsel %vm2567_vm7, %v2677_v37, %v2678_v55 }
 0x3d6   :  { %v2682_v9 = vsel %vm2567_vm7, %v2680_v40, %v2681_v33  ;;  %v2689_v57 = vrot.slane %v2637_v35, 2  ;;  %v2690_v50 = vrot.slane %v2638_v63, 2  ;;  %v2685_v56 = vsel %vm2567_vm7, %v2683_v59, %v2684_v6 }
 0x3d7   :  { %v2688_v1 = vsel %vm2567_vm7, %v2686_v41, %v2687_v18  ;;  %v2692_v51 = vrot.slane %v2639_v21, 2  ;;  %v2693_v34 = vrot.slane %v2640_v60, 2  ;;  %v2725_v52 = vadd.f32 %v2679_v0, %v2608_v25 }
 0x3d8   :  { %v2746_v10 = vmul.f32 %v8421_v12, %v9785_v44  ;;  %v2747_v2 = vmul.f32 %v8421_v12, %v13160_v17  ;;  %v2748_v31 = vmul.f32 %v8421_v12, %v9788_v29  ;;  %v2749_v39 = vmul.f32 %v8421_v12, %v13161_v62 }
 0x3d9   :  { %v2750_v28 = vmul.f32 %v8421_v12, %v9782_v30  ;;  %v2751_v36 = vmul.f32 %v8421_v12, %v13159_v38  ;;  %v2752_v26 = vmul.f32 %v8421_v12, %v13123_v32  ;;  %v2691_v5 = vsel %vm2567_vm7, %v2689_v57, %v2690_v50 }
 0x3da   :  { %v2753_v54 = vmul.f32 %v8421_v12, %v13158_v24  ;;  %v2754_v8 = vmul.f32 %v8421_v12, %v13124_v47  ;;  %v2755_v19 = vmul.f32 %v8421_v12, %v13162_v46  ;;  %v2726_v14 = vadd.f32 %v2682_v9, %v2609_v16 }
 0x3db   :  { %v2727_v25 = vadd.f32 %v2685_v56, %v2610_v3  ;;  %v2756_v23 = vmul.f32 %v8421_v12, %v13125_v43  ;;  %v2757_v61 = vmul.f32 %v8421_v12, %v13163_v42  ;;  %v2802_v7 = vrot.slane %v2746_v10, 2 }
 0x3dc   :  { %v2803_v35 = vrot.slane %v2747_v2, 2  ;;  %v2805_v63 = vrot.slane %v2748_v31, 2  ;;  %v2806_v21 = vrot.slane %v2749_v39, 2  ;;  %v2808_v60 = vrot.slane %v2750_v28, 2  ;;  %v8422_v2 = vld [vmem:[#allocation2 + $0xa7] ss:$0 sm:$0xff] }
 0x3dd   :  { %v2809_v37 = vrot.slane %v2751_v36, 2  ;;  %v2811_v55 = vrot.slane %v2752_v26, 2  ;;  %v2812_v40 = vrot.slane %v2753_v54, 2  ;;  %v2758_v33 = vmul.f32 %v8421_v12, %v13148_v49 }
 0x3de   :  { %v2759_v59 = vmul.f32 %v8421_v12, %v13164_v4  ;;  %v2814_v6 = vrot.slane %v2754_v8, 2  ;;  %v2815_v41 = vrot.slane %v2755_v19, 2  ;;  %v2694_v18 = vsel %vm2567_vm7, %v2692_v51, %v2693_v34 }
 0x3df   :  { %v2728_v58 = vadd.f32 %v2682_v9, %v2611_v45  ;;  %v2817_v16 = vrot.slane %v2756_v23, 2  ;;  %v2818_v3 = vrot.slane %v2757_v61, 2  ;;  %v2729_v57 = vadd.f32 %v2679_v0, %v2612_v53 }
 0x3e0   :  { %v2730_v50 = vadd.f32 %v2688_v1, %v2613_v27  ;;  %v2731_v56 = vadd.f32 %v2691_v5, %v2614_v48  ;;  %v2732_v10 = vadd.f32 %v2694_v18, %v2615_v11  ;;  %v2804_v31 = vsel %vm2567_vm7, %v2802_v7, %v2803_v35 }
 0x3e1   :  { %v2807_v39 = vsel %vm2567_vm7, %v2805_v63, %v2806_v21  ;;  %v2810_v28 = vsel %vm2567_vm7, %v2808_v60, %v2809_v37  ;;  %v2813_v12 = vsel %vm2567_vm7, %v2811_v55, %v2812_v40  ;;  %v2816_v36 = vsel %vm2567_vm7, %v2814_v6, %v2815_v41 }
 0x3e2   :  { %v2820_v26 = vrot.slane %v2758_v33, 2  ;;  %v2821_v51 = vrot.slane %v2759_v59, 2  ;;  %v2858_v45 = vadd.f32 %v2804_v31, %v2725_v52  ;;  %v2819_v9 = vsel %vm2567_vm7, %v2817_v16, %v2818_v3 }
 0x3e3   :  { %v2859_v53 = vadd.f32 %v2807_v39, %v2726_v14  ;;  %v2879_v27 = vmul.f32 %v8422_v2, %v9788_v29  ;;  %v2880_v48 = vmul.f32 %v8422_v2, %v13161_v62  ;;  %v2881_v11 = vmul.f32 %v8422_v2, %v9785_v44 }
 0x3e4   :  { %v2882_v0 = vmul.f32 %v8422_v2, %v13160_v17  ;;  %v2883_v1 = vmul.f32 %v8422_v2, %v9782_v30  ;;  %v2884_v34 = vmul.f32 %v8422_v2, %v13159_v38  ;;  %v2885_v5 = vmul.f32 %v8422_v2, %v13123_v32 }
 0x3e5   :  { %v2886_v54 = vmul.f32 %v8422_v2, %v13158_v24  ;;  %v2887_v52 = vmul.f32 %v8422_v2, %v13124_v47  ;;  %v2888_v8 = vmul.f32 %v8422_v2, %v13162_v46  ;;  %v2860_v19 = vadd.f32 %v2804_v31, %v2727_v25 }
 0x3e6   :  { %v2861_v14 = vadd.f32 %v2810_v28, %v2728_v58  ;;  %v2889_v23 = vmul.f32 %v8422_v2, %v13125_v43  ;;  %v2890_v61 = vmul.f32 %v8422_v2, %v13163_v42  ;;  %v2891_v7 = vmul.f32 %v8422_v2, %v13148_v49 }
 0x3e7   :  { %v2892_v35 = vmul.f32 %v8422_v2, %v13164_v4  ;;  %v2943_v63 = vrot.slane %v2879_v27, 2  ;;  %v2944_v21 = vrot.slane %v2880_v48, 2  ;;  %v2946_v60 = vrot.slane %v2881_v11, 2  ;;  %v8423_v27 = vld [vmem:[#allocation2 + $0xae] ss:$0 sm:$0xff] }
 0x3e8   :  { %v2947_v37 = vrot.slane %v2882_v0, 2  ;;  %v2949_v55 = vrot.slane %v2883_v1, 2  ;;  %v2950_v40 = vrot.slane %v2884_v34, 2  ;;  %v2952_v33 = vrot.slane %v2885_v5, 2 }
 0x3e9   :  { %v2953_v59 = vrot.slane %v2886_v54, 2  ;;  %v2955_v6 = vrot.slane %v2887_v52, 2  ;;  %v2956_v41 = vrot.slane %v2888_v8, 2  ;;  %v2893_v25 = vmul.f32 %v8422_v2, %v13149_v13 }
 0x3ea   :  { %v2894_v18 = vmul.f32 %v8422_v2, %v13165_v22  ;;  %v2958_v58 = vrot.slane %v2889_v23, 2  ;;  %v2959_v16 = vrot.slane %v2890_v61, 2  ;;  %v2822_v3 = vsel %vm2567_vm7, %v2820_v26, %v2821_v51 }
 0x3eb   :  { %v2862_v31 = vadd.f32 %v2813_v12, %v2729_v57  ;;  %v2863_v39 = vadd.f32 %v2816_v36, %v2730_v50  ;;  %v2864_v28 = vadd.f32 %v2819_v9, %v2731_v56  ;;  %v2865_v48 = vadd.f32 %v2822_v3, %v2732_v10 }
 0x3ec   :  { %v2945_v11 = vsel %vm2567_vm7, %v2943_v63, %v2944_v21  ;;  %v2948_v0 = vsel %vm2567_vm7, %v2946_v60, %v2947_v37  ;;  %v2951_v1 = vsel %vm2567_vm7, %v2949_v55, %v2950_v40  ;;  %v2954_v34 = vsel %vm2567_vm7, %v2952_v33, %v2953_v59 }
 0x3ed   :  { %v2957_v5 = vsel %vm2567_vm7, %v2955_v6, %v2956_v41  ;;  %v2961_v2 = vrot.slane %v2891_v7, 2  ;;  %v2962_v54 = vrot.slane %v2892_v35, 2  ;;  %v2960_v52 = vsel %vm2567_vm7, %v2958_v58, %v2959_v16 }
 0x3ee   :  { %v2964_v26 = vrot.slane %v2893_v25, 2  ;;  %v2965_v57 = vrot.slane %v2894_v18, 2  ;;  %v3028_v50 = vmul.f32 %v8423_v27, %v9785_v44  ;;  %v3007_v56 = vadd.f32 %v2945_v11, %v2858_v45 }
 0x3ef   :  { %v3029_v10 = vmul.f32 %v8423_v27, %v13160_v17  ;;  %v3030_v12 = vmul.f32 %v8423_v27, %v9782_v30  ;;  %v3031_v36 = vmul.f32 %v8423_v27, %v13159_v38  ;;  %v3032_v51 = vmul.f32 %v8423_v27, %v13123_v32 }
 0x3f0   :  { %v3033_v9 = vmul.f32 %v8423_v27, %v13158_v24  ;;  %v3034_v8 = vmul.f32 %v8423_v27, %v13124_v47  ;;  %v3035_v23 = vmul.f32 %v8423_v27, %v13162_v46  ;;  %v2963_v61 = vsel %vm2567_vm7, %v2961_v2, %v2962_v54  ;;  %v8424_v2 = vld [vmem:[#allocation2 + $0xb5] ss:$0 sm:$0xff] }
 0x3f1   :  { %v3008_v7 = vadd.f32 %v2948_v0, %v2859_v53  ;;  %v3036_v35 = vmul.f32 %v8423_v27, %v13125_v43  ;;  %v3037_v45 = vmul.f32 %v8423_v27, %v13163_v42  ;;  %v3009_v63 = vadd.f32 %v2951_v1, %v2860_v19 }
 0x3f2   :  { %v3038_v21 = vmul.f32 %v8423_v27, %v13148_v49  ;;  %v3084_v60 = vrot.slane %v3028_v50, 2  ;;  %v3085_v37 = vrot.slane %v3029_v10, 2  ;;  %v3087_v55 = vrot.slane %v3030_v12, 2 }
 0x3f3   :  { %v3088_v40 = vrot.slane %v3031_v36, 2  ;;  %v3090_v33 = vrot.slane %v3032_v51, 2  ;;  %v3091_v59 = vrot.slane %v3033_v9, 2  ;;  %v3039_v6 = vmul.f32 %v8423_v27, %v13164_v4 }
 0x3f4   :  { %v3040_v41 = vmul.f32 %v8423_v27, %v13149_v13  ;;  %v3093_v25 = vrot.slane %v3034_v8, 2  ;;  %v3094_v18 = vrot.slane %v3035_v23, 2  ;;  %v3010_v53 = vadd.f32 %v2954_v34, %v2861_v14 }
 0x3f5   :  { %v3041_v58 = vmul.f32 %v8423_v27, %v13165_v22  ;;  %v3096_v16 = vrot.slane %v3036_v35, 2  ;;  %v3097_v3 = vrot.slane %v3037_v45, 2  ;;  %v2966_v19 = vsel %vm2567_vm7, %v2964_v26, %v2965_v57 }
 0x3f6   :  { %v3011_v11 = vadd.f32 %v2957_v5, %v2862_v31  ;;  %v3012_v0 = vadd.f32 %v2960_v52, %v2863_v39  ;;  %v3013_v1 = vadd.f32 %v2963_v61, %v2864_v28  ;;  %v3014_v54 = vadd.f32 %v2966_v19, %v2865_v48 }
 0x3f7   :  { %v3086_v50 = vsel %vm2567_vm7, %v3084_v60, %v3085_v37  ;;  %v3089_v10 = vsel %vm2567_vm7, %v3087_v55, %v3088_v40  ;;  %v3092_v12 = vsel %vm2567_vm7, %v3090_v33, %v3091_v59  ;;  %v3095_v36 = vsel %vm2567_vm7, %v3093_v25, %v3094_v18 }
 0x3f8   :  { %v3099_v14 = vrot.slane %v3038_v21, 2  ;;  %v3100_v34 = vrot.slane %v3039_v6, 2  ;;  %v3102_v27 = vrot.slane %v3040_v41, 2  ;;  %v3098_v51 = vsel %vm2567_vm7, %v3096_v16, %v3097_v3 }
 0x3f9   :  { %v3103_v9 = vrot.slane %v3041_v58, 2  ;;  %v3140_v26 = vadd.f32 %v3086_v50, %v3007_v56  ;;  %v3161_v31 = vmul.f32 %v8424_v2, %v9782_v30  ;;  %v3162_v39 = vmul.f32 %v8424_v2, %v13159_v38  ;;  %v8425_v50 = vld [vmem:[#allocation2 + $0xbc] ss:$0 sm:$0xff] }
 0x3fa   :  { %v3163_v28 = vmul.f32 %v8424_v2, %v13123_v32  ;;  %v3164_v48 = vmul.f32 %v8424_v2, %v13158_v24  ;;  %v3165_v5 = vmul.f32 %v8424_v2, %v13124_v47  ;;  %v3141_v52 = vadd.f32 %v3089_v10, %v3008_v7 }
 0x3fb   :  { %v3166_v57 = vmul.f32 %v8424_v2, %v13162_v46  ;;  %v3167_v8 = vmul.f32 %v8424_v2, %v13125_v43  ;;  %v3168_v23 = vmul.f32 %v8424_v2, %v13163_v42  ;;  %v3169_v61 = vmul.f32 %v8424_v2, %v13148_v49 }
 0x3fc   :  { %v3170_v56 = vmul.f32 %v8424_v2, %v13164_v4  ;;  %v3171_v35 = vmul.f32 %v8424_v2, %v13149_v13  ;;  %v3172_v45 = vmul.f32 %v8424_v2, %v13165_v22  ;;  %v3209_v21 = vrot.slane %v3161_v31, 2 }
 0x3fd   :  { %v3210_v60 = vrot.slane %v3162_v39, 2  ;;  %v3212_v37 = vrot.slane %v3163_v28, 2  ;;  %v3213_v55 = vrot.slane %v3164_v48, 2  ;;  %v3215_v40 = vrot.slane %v3165_v5, 2 }
 0x3fe   :  { %v3216_v7 = vrot.slane %v3166_v57, 2  ;;  %v3218_v33 = vrot.slane %v3167_v8, 2  ;;  %v3219_v59 = vrot.slane %v3168_v23, 2  ;;  %v3101_v6 = vsel %vm2567_vm7, %v3099_v14, %v3100_v34 }
 0x3ff   :  { %v3104_v41 = vsel %vm2567_vm7, %v3102_v27, %v3103_v9  ;;  %v3142_v25 = vadd.f32 %v3092_v12, %v3009_v63  ;;  %v3143_v18 = vadd.f32 %v3095_v36, %v3010_v53  ;;  %v3144_v58 = vadd.f32 %v3098_v51, %v3011_v11 }
 0x400   :  { %v3145_v16 = vadd.f32 %v3101_v6, %v3012_v0  ;;  %v3146_v3 = vadd.f32 %v3104_v41, %v3013_v1  ;;  %v3147_v19 = vadd.f32 %v3101_v6, %v3014_v54  ;;  %v3211_v2 = vsel %vm2567_vm7, %v3209_v21, %v3210_v60  ;;  %v8426_v21 = vld [vmem:[#allocation2 + $0x93] ss:$0 sm:$0xff] }
 0x401   :  { %v3214_v10 = vsel %vm2567_vm7, %v3212_v37, %v3213_v55  ;;  %v3221_v31 = vrot.slane %v3169_v61, 2  ;;  %v3222_v39 = vrot.slane %v3170_v56, 2  ;;  %v3217_v28 = vsel %vm2567_vm7, %v3215_v40, %v3216_v7 }
 0x402   :  { %v3220_v48 = vsel %vm2567_vm7, %v3218_v33, %v3219_v59  ;;  %v3224_v14 = vrot.slane %v3171_v35, 2  ;;  %v3225_v34 = vrot.slane %v3172_v45, 2  ;;  %v3257_v27 = vadd.f32 %v3211_v2, %v3140_v26 }
 0x403   :  { %v3278_v63 = vmul.f32 %v8425_v50, %v13123_v32  ;;  %v3279_v53 = vmul.f32 %v8425_v50, %v13158_v24  ;;  %v3280_v11 = vmul.f32 %v8425_v50, %v13124_v47  ;;  %v3281_v0 = vmul.f32 %v8425_v50, %v13162_v46 }
 0x404   :  { %v3282_v1 = vmul.f32 %v8425_v50, %v13125_v43  ;;  %v3283_v54 = vmul.f32 %v8425_v50, %v13163_v42  ;;  %v3284_v12 = vmul.f32 %v8425_v50, %v13148_v49  ;;  %v3223_v36 = vsel %vm2567_vm7, %v3221_v31, %v3222_v39 }
 0x405   :  { %v3285_v51 = vmul.f32 %v8425_v50, %v13164_v4  ;;  %v3286_v9 = vmul.f32 %v8425_v50, %v13149_v13  ;;  %v3287_v26 = vmul.f32 %v8425_v50, %v13165_v22  ;;  %v3318_v5 = vrot.slane %v3278_v63, 2 }
 0x406   :  { %v3319_v57 = vrot.slane %v3279_v53, 2  ;;  %v3321_v8 = vrot.slane %v3280_v11, 2  ;;  %v3322_v23 = vrot.slane %v3281_v0, 2  ;;  %v3324_v61 = vrot.slane %v3282_v1, 2 }
 0x407   :  { %v3325_v56 = vrot.slane %v3283_v54, 2  ;;  %v3327_v35 = vrot.slane %v3284_v12, 2  ;;  %v3328_v45 = vrot.slane %v3285_v51, 2  ;;  %v3226_v60 = vsel %vm2567_vm7, %v3224_v14, %v3225_v34 }
 0x408   :  { %v3258_v37 = vadd.f32 %v3214_v10, %v3141_v52  ;;  %v3259_v55 = vadd.f32 %v3217_v28, %v3142_v25  ;;  %v3260_v40 = vadd.f32 %v3220_v48, %v3143_v18  ;;  %v3261_v7 = vadd.f32 %v3223_v36, %v3144_v58 }
 0x409   :  { %v3262_v33 = vadd.f32 %v3226_v60, %v3145_v16  ;;  %v3263_v59 = vadd.f32 %v3223_v36, %v3146_v3  ;;  %v3264_v6 = vadd.f32 %v3220_v48, %v3147_v19  ;;  %v3320_v41 = vsel %vm2567_vm7, %v3318_v5, %v3319_v57  ;;  %v8427_v5 = vld [vmem:[#allocation2 + $0x9a] ss:$0 sm:$0xff] }
 0x40a   :  { %v3323_v50 = vsel %vm2567_vm7, %v3321_v8, %v3322_v23  ;;  %v3330_v2 = vrot.slane %v3286_v9, 2  ;;  %v3379_v31 = vmul.f32 %v8426_v21, %v13123_v32  ;;  %v3326_v39 = vsel %vm2567_vm7, %v3324_v61, %v3325_v56 }
 0x40b   :  { %v3329_v63 = vsel %vm2567_vm7, %v3327_v35, %v3328_v45  ;;  %v3331_v53 = vrot.slane %v3287_v26, 2  ;;  %v3380_v52 = vmul.f32 %v8426_v21, %v13158_v24  ;;  %v3381_v25 = vmul.f32 %v8426_v21, %v9782_v30 }
 0x40c   :  { %v3382_v18 = vmul.f32 %v8426_v21, %v13159_v38  ;;  %v3383_v58 = vmul.f32 %v8426_v21, %v9785_v44  ;;  %v3384_v16 = vmul.f32 %v8426_v21, %v13160_v17  ;;  %v3385_v3 = vmul.f32 %v8426_v21, %v9788_v29 }
 0x40d   :  { %v3386_v19 = vmul.f32 %v8426_v21, %v13161_v62  ;;  %v3387_v10 = vmul.f32 %v8426_v21, %v13124_v47  ;;  %v3388_v28 = vmul.f32 %v8426_v21, %v13162_v46  ;;  %v3419_v48 = vrot.slane %v3379_v31, 3 }
 0x40e   :  { %v3420_v14 = vrot.slane %v3380_v52, 3  ;;  %v3422_v34 = vrot.slane %v3381_v25, 3  ;;  %v3423_v11 = vrot.slane %v3382_v18, 3  ;;  %v3425_v0 = vrot.slane %v3383_v58, 3 }
 0x40f   :  { %v3426_v1 = vrot.slane %v3384_v16, 3  ;;  %v3428_v54 = vrot.slane %v3385_v3, 3  ;;  %v3429_v12 = vrot.slane %v3386_v19, 3  ;;  %v3332_v36 = vsel %vm2567_vm7, %v3330_v2, %v3331_v53 }
 0x410   :  { %v3358_v51 = vadd.f32 %v3320_v41, %v3257_v27  ;;  %v3359_v9 = vadd.f32 %v3323_v50, %v3258_v37  ;;  %v3360_v26 = vadd.f32 %v3326_v39, %v3259_v55  ;;  %v3361_v57 = vadd.f32 %v3329_v63, %v3260_v40 }
 0x411   :  { %v3362_v8 = vadd.f32 %v3332_v36, %v3261_v7  ;;  %v3363_v23 = vadd.f32 %v3329_v63, %v3262_v33  ;;  %v3364_v61 = vadd.f32 %v3326_v39, %v3263_v59  ;;  %v3365_v56 = vadd.f32 %v3323_v50, %v3264_v6 }
 0x412   :  { %v3421_v35 = vsel %vm1424_vm13, %v3419_v48, %v3420_v14  ;;  %v3424_v45 = vsel %vm1424_vm13, %v3422_v34, %v3423_v11  ;;  %v3431_v21 = vrot.slane %v3387_v10, 3  ;;  %v3427_v60 = vsel %vm1424_vm13, %v3425_v0, %v3426_v1 }
 0x413   :  { %v3430_v31 = vsel %vm1424_vm13, %v3428_v54, %v3429_v12  ;;  %v3432_v52 = vrot.slane %v3388_v28, 3  ;;  %v3480_v27 = vmul.f32 %v8427_v5, %v9782_v30  ;;  %v3481_v37 = vmul.f32 %v8427_v5, %v13159_v38  ;;  %v8428_v12 = vld [vmem:[#allocation2 + $0xa1] ss:$0 sm:$0xff] }
 0x414   :  { %v3482_v55 = vmul.f32 %v8427_v5, %v9785_v44  ;;  %v3483_v40 = vmul.f32 %v8427_v5, %v13160_v17  ;;  %v3484_v7 = vmul.f32 %v8427_v5, %v9788_v29  ;;  %v3459_v33 = vadd.f32 %v3421_v35, %v3358_v51 }
 0x415   :  { %v3485_v59 = vmul.f32 %v8427_v5, %v13161_v62  ;;  %v3486_v6 = vmul.f32 %v8427_v5, %v13123_v32  ;;  %v3487_v41 = vmul.f32 %v8427_v5, %v13158_v24  ;;  %v3488_v50 = vmul.f32 %v8427_v5, %v13124_v47 }
 0x416   :  { %v3489_v2 = vmul.f32 %v8427_v5, %v13162_v46  ;;  %v3490_v39 = vmul.f32 %v8427_v5, %v13125_v43  ;;  %v3491_v63 = vmul.f32 %v8427_v5, %v13163_v42  ;;  %v3528_v53 = vrot.slane %v3480_v27, 3 }
 0x417   :  { %v3529_v25 = vrot.slane %v3481_v37, 3  ;;  %v3531_v18 = vrot.slane %v3482_v55, 3  ;;  %v3532_v58 = vrot.slane %v3483_v40, 3  ;;  %v3534_v16 = vrot.slane %v3484_v7, 3 }
 0x418   :  { %v3535_v3 = vrot.slane %v3485_v59, 3  ;;  %v3537_v19 = vrot.slane %v3486_v6, 3  ;;  %v3538_v10 = vrot.slane %v3487_v41, 3  ;;  %v3433_v28 = vsel %vm1424_vm13, %v3431_v21, %v3432_v52 }
 0x419   :  { %v3460_v48 = vadd.f32 %v3424_v45, %v3359_v9  ;;  %v3461_v14 = vadd.f32 %v3427_v60, %v3360_v26  ;;  %v3462_v34 = vadd.f32 %v3430_v31, %v3361_v57  ;;  %v3463_v11 = vadd.f32 %v3427_v60, %v3362_v8 }
 0x41a   :  { %v3464_v0 = vadd.f32 %v3424_v45, %v3363_v23  ;;  %v3465_v1 = vadd.f32 %v3421_v35, %v3364_v61  ;;  %v3466_v54 = vadd.f32 %v3433_v28, %v3365_v56  ;;  %v3530_v36 = vsel %vm1424_vm13, %v3528_v53, %v3529_v25 }
 0x41b   :  { %v3533_v51 = vsel %vm1424_vm13, %v3531_v18, %v3532_v58  ;;  %v3540_v5 = vrot.slane %v3488_v50, 3  ;;  %v3541_v27 = vrot.slane %v3489_v2, 3  ;;  %v3536_v37 = vsel %vm1424_vm13, %v3534_v16, %v3535_v3 }
 0x41c   :  { %v3539_v55 = vsel %vm1424_vm13, %v3537_v19, %v3538_v10  ;;  %v3543_v40 = vrot.slane %v3490_v39, 3  ;;  %v3544_v21 = vrot.slane %v3491_v63, 3  ;;  %v3576_v9 = vadd.f32 %v3530_v36, %v3459_v33 }
 0x41d   :  { %v3597_v26 = vmul.f32 %v8428_v12, %v9785_v44  ;;  %v3598_v57 = vmul.f32 %v8428_v12, %v13160_v17  ;;  %v3599_v8 = vmul.f32 %v8428_v12, %v9788_v29  ;;  %v3600_v23 = vmul.f32 %v8428_v12, %v13161_v62 }
 0x41e   :  { %v3601_v61 = vmul.f32 %v8428_v12, %v9782_v30  ;;  %v3602_v56 = vmul.f32 %v8428_v12, %v13159_v38  ;;  %v3603_v35 = vmul.f32 %v8428_v12, %v13123_v32  ;;  %v3542_v45 = vsel %vm1424_vm13, %v3540_v5, %v3541_v27 }
 0x41f   :  { %v3604_v60 = vmul.f32 %v8428_v12, %v13158_v24  ;;  %v3605_v31 = vmul.f32 %v8428_v12, %v13124_v47  ;;  %v3606_v52 = vmul.f32 %v8428_v12, %v13162_v46  ;;  %v3577_v7 = vadd.f32 %v3533_v51, %v3460_v48 }
 0x420   :  { %v3578_v33 = vadd.f32 %v3536_v37, %v3461_v14  ;;  %v3607_v59 = vmul.f32 %v8428_v12, %v13125_v43  ;;  %v3608_v6 = vmul.f32 %v8428_v12, %v13163_v42  ;;  %v3653_v41 = vrot.slane %v3597_v26, 3 }
 0x421   :  { %v3654_v50 = vrot.slane %v3598_v57, 3  ;;  %v3656_v2 = vrot.slane %v3599_v8, 3  ;;  %v3657_v39 = vrot.slane %v3600_v23, 3  ;;  %v3659_v63 = vrot.slane %v3601_v61, 3  ;;  %v8429_v57 = vld [vmem:[#allocation2 + $0xa8] ss:$0 sm:$0xff] }
 0x422   :  { %v3660_v53 = vrot.slane %v3602_v56, 3  ;;  %v3662_v25 = vrot.slane %v3603_v35, 3  ;;  %v3663_v18 = vrot.slane %v3604_v60, 3  ;;  %v3609_v58 = vmul.f32 %v8428_v12, %v13148_v49 }
 0x423   :  { %v3610_v16 = vmul.f32 %v8428_v12, %v13164_v4  ;;  %v3665_v3 = vrot.slane %v3605_v31, 3  ;;  %v3666_v19 = vrot.slane %v3606_v52, 3  ;;  %v3545_v10 = vsel %vm1424_vm13, %v3543_v40, %v3544_v21 }
 0x424   :  { %v3579_v28 = vadd.f32 %v3533_v51, %v3462_v34  ;;  %v3668_v48 = vrot.slane %v3607_v59, 3  ;;  %v3669_v14 = vrot.slane %v3608_v6, 3  ;;  %v3580_v5 = vadd.f32 %v3530_v36, %v3463_v11 }
 0x425   :  { %v3581_v27 = vadd.f32 %v3539_v55, %v3464_v0  ;;  %v3582_v37 = vadd.f32 %v3542_v45, %v3465_v1  ;;  %v3583_v26 = vadd.f32 %v3545_v10, %v3466_v54  ;;  %v3655_v8 = vsel %vm1424_vm13, %v3653_v41, %v3654_v50 }
 0x426   :  { %v3658_v23 = vsel %vm1424_vm13, %v3656_v2, %v3657_v39  ;;  %v3661_v61 = vsel %vm1424_vm13, %v3659_v63, %v3660_v53  ;;  %v3664_v12 = vsel %vm1424_vm13, %v3662_v25, %v3663_v18  ;;  %v3667_v56 = vsel %vm1424_vm13, %v3665_v3, %v3666_v19 }
 0x427   :  { %v3671_v35 = vrot.slane %v3609_v58, 3  ;;  %v3672_v40 = vrot.slane %v3610_v16, 3  ;;  %v3709_v34 = vadd.f32 %v3655_v8, %v3576_v9  ;;  %v3670_v51 = vsel %vm1424_vm13, %v3668_v48, %v3669_v14 }
 0x428   :  { %v3710_v11 = vadd.f32 %v3658_v23, %v3577_v7  ;;  %v3730_v0 = vmul.f32 %v8429_v57, %v9788_v29  ;;  %v3731_v1 = vmul.f32 %v8429_v57, %v13161_v62  ;;  %v3732_v54 = vmul.f32 %v8429_v57, %v9785_v44 }
 0x429   :  { %v3733_v36 = vmul.f32 %v8429_v57, %v13160_v17  ;;  %v3734_v55 = vmul.f32 %v8429_v57, %v9782_v30  ;;  %v3735_v21 = vmul.f32 %v8429_v57, %v13159_v38  ;;  %v3736_v45 = vmul.f32 %v8429_v57, %v13123_v32 }
 0x42a   :  { %v3737_v60 = vmul.f32 %v8429_v57, %v13158_v24  ;;  %v3738_v9 = vmul.f32 %v8429_v57, %v13124_v47  ;;  %v3739_v31 = vmul.f32 %v8429_v57, %v13162_v46  ;;  %v3711_v52 = vadd.f32 %v3655_v8, %v3578_v33 }
 0x42b   :  { %v3712_v7 = vadd.f32 %v3661_v61, %v3579_v28  ;;  %v3740_v59 = vmul.f32 %v8429_v57, %v13125_v43  ;;  %v3741_v6 = vmul.f32 %v8429_v57, %v13163_v42  ;;  %v3742_v41 = vmul.f32 %v8429_v57, %v13148_v49 }
 0x42c   :  { %v3743_v50 = vmul.f32 %v8429_v57, %v13164_v4  ;;  %v3794_v2 = vrot.slane %v3730_v0, 3  ;;  %v3795_v39 = vrot.slane %v3731_v1, 3  ;;  %v3797_v63 = vrot.slane %v3732_v54, 3  ;;  %v8430_v0 = vld [vmem:[#allocation2 + $0xaf] ss:$0 sm:$0xff] }
 0x42d   :  { %v3798_v53 = vrot.slane %v3733_v36, 3  ;;  %v3800_v25 = vrot.slane %v3734_v55, 3  ;;  %v3801_v18 = vrot.slane %v3735_v21, 3  ;;  %v3803_v58 = vrot.slane %v3736_v45, 3 }
 0x42e   :  { %v3804_v16 = vrot.slane %v3737_v60, 3  ;;  %v3806_v3 = vrot.slane %v3738_v9, 3  ;;  %v3807_v19 = vrot.slane %v3739_v31, 3  ;;  %v3744_v33 = vmul.f32 %v8429_v57, %v13149_v13 }
 0x42f   :  { %v3745_v10 = vmul.f32 %v8429_v57, %v13165_v22  ;;  %v3809_v28 = vrot.slane %v3740_v59, 3  ;;  %v3810_v48 = vrot.slane %v3741_v6, 3  ;;  %v3673_v14 = vsel %vm1424_vm13, %v3671_v35, %v3672_v40 }
 0x430   :  { %v3713_v8 = vadd.f32 %v3664_v12, %v3580_v5  ;;  %v3714_v23 = vadd.f32 %v3667_v56, %v3581_v27  ;;  %v3715_v61 = vadd.f32 %v3670_v51, %v3582_v37  ;;  %v3716_v1 = vadd.f32 %v3673_v14, %v3583_v26 }
 0x431   :  { %v3796_v54 = vsel %vm1424_vm13, %v3794_v2, %v3795_v39  ;;  %v3799_v36 = vsel %vm1424_vm13, %v3797_v63, %v3798_v53  ;;  %v3802_v55 = vsel %vm1424_vm13, %v3800_v25, %v3801_v18  ;;  %v3805_v21 = vsel %vm1424_vm13, %v3803_v58, %v3804_v16 }
 0x432   :  { %v3808_v45 = vsel %vm1424_vm13, %v3806_v3, %v3807_v19  ;;  %v3812_v57 = vrot.slane %v3742_v41, 3  ;;  %v3813_v60 = vrot.slane %v3743_v50, 3  ;;  %v3811_v9 = vsel %vm1424_vm13, %v3809_v28, %v3810_v48 }
 0x433   :  { %v3815_v35 = vrot.slane %v3744_v33, 3  ;;  %v3816_v5 = vrot.slane %v3745_v10, 3  ;;  %v3879_v27 = vmul.f32 %v8430_v0, %v9785_v44  ;;  %v3858_v37 = vadd.f32 %v3796_v54, %v3709_v34 }
 0x434   :  { %v3880_v26 = vmul.f32 %v8430_v0, %v13160_v17  ;;  %v3881_v12 = vmul.f32 %v8430_v0, %v9782_v30  ;;  %v3882_v56 = vmul.f32 %v8430_v0, %v13159_v38  ;;  %v3883_v40 = vmul.f32 %v8430_v0, %v13123_v32 }
 0x435   :  { %v3884_v51 = vmul.f32 %v8430_v0, %v13158_v24  ;;  %v3885_v31 = vmul.f32 %v8430_v0, %v13124_v47  ;;  %v3886_v59 = vmul.f32 %v8430_v0, %v13162_v46  ;;  %v3814_v6 = vsel %vm1424_vm13, %v3812_v57, %v3813_v60  ;;  %v8431_v57 = vld [vmem:[#allocation2 + $0xb6] ss:$0 sm:$0xff] }
 0x436   :  { %v3859_v41 = vadd.f32 %v3799_v36, %v3710_v11  ;;  %v3887_v50 = vmul.f32 %v8430_v0, %v13125_v43  ;;  %v3888_v34 = vmul.f32 %v8430_v0, %v13163_v42  ;;  %v3860_v2 = vadd.f32 %v3802_v55, %v3711_v52 }
 0x437   :  { %v3889_v39 = vmul.f32 %v8430_v0, %v13148_v49  ;;  %v3935_v63 = vrot.slane %v3879_v27, 3  ;;  %v3936_v53 = vrot.slane %v3880_v26, 3  ;;  %v3938_v25 = vrot.slane %v3881_v12, 3 }
 0x438   :  { %v3939_v18 = vrot.slane %v3882_v56, 3  ;;  %v3941_v58 = vrot.slane %v3883_v40, 3  ;;  %v3942_v16 = vrot.slane %v3884_v51, 3  ;;  %v3890_v3 = vmul.f32 %v8430_v0, %v13164_v4 }
 0x439   :  { %v3891_v19 = vmul.f32 %v8430_v0, %v13149_v13  ;;  %v3944_v33 = vrot.slane %v3885_v31, 3  ;;  %v3945_v10 = vrot.slane %v3886_v59, 3  ;;  %v3861_v11 = vadd.f32 %v3805_v21, %v3712_v7 }
 0x43a   :  { %v3892_v28 = vmul.f32 %v8430_v0, %v13165_v22  ;;  %v3947_v48 = vrot.slane %v3887_v50, 3  ;;  %v3948_v14 = vrot.slane %v3888_v34, 3  ;;  %v3817_v52 = vsel %vm1424_vm13, %v3815_v35, %v3816_v5 }
 0x43b   :  { %v3862_v54 = vadd.f32 %v3808_v45, %v3713_v8  ;;  %v3863_v36 = vadd.f32 %v3811_v9, %v3714_v23  ;;  %v3864_v55 = vadd.f32 %v3814_v6, %v3715_v61  ;;  %v3865_v60 = vadd.f32 %v3817_v52, %v3716_v1 }
 0x43c   :  { %v3937_v27 = vsel %vm1424_vm13, %v3935_v63, %v3936_v53  ;;  %v3940_v26 = vsel %vm1424_vm13, %v3938_v25, %v3939_v18  ;;  %v3943_v12 = vsel %vm1424_vm13, %v3941_v58, %v3942_v16  ;;  %v3946_v56 = vsel %vm1424_vm13, %v3944_v33, %v3945_v10 }
 0x43d   :  { %v3950_v7 = vrot.slane %v3889_v39, 3  ;;  %v3951_v21 = vrot.slane %v3890_v3, 3  ;;  %v3953_v0 = vrot.slane %v3891_v19, 3  ;;  %v3949_v40 = vsel %vm1424_vm13, %v3947_v48, %v3948_v14 }
 0x43e   :  { %v3954_v51 = vrot.slane %v3892_v28, 3  ;;  %v3991_v35 = vadd.f32 %v3937_v27, %v3858_v37  ;;  %v4012_v8 = vmul.f32 %v8431_v57, %v9782_v30  ;;  %v4013_v23 = vmul.f32 %v8431_v57, %v13159_v38  ;;  %v8432_v27 = vld [vmem:[#allocation2 + $0xbd] ss:$0 sm:$0xff] }
 0x43f   :  { %v4014_v61 = vmul.f32 %v8431_v57, %v13123_v32  ;;  %v4015_v1 = vmul.f32 %v8431_v57, %v13158_v24  ;;  %v4016_v45 = vmul.f32 %v8431_v57, %v13124_v47  ;;  %v3992_v9 = vadd.f32 %v3940_v26, %v3859_v41 }
 0x440   :  { %v4017_v5 = vmul.f32 %v8431_v57, %v13162_v46  ;;  %v4018_v31 = vmul.f32 %v8431_v57, %v13125_v43  ;;  %v4019_v59 = vmul.f32 %v8431_v57, %v13163_v42  ;;  %v4020_v6 = vmul.f32 %v8431_v57, %v13148_v49 }
 0x441   :  { %v4021_v37 = vmul.f32 %v8431_v57, %v13164_v4  ;;  %v4022_v50 = vmul.f32 %v8431_v57, %v13149_v13  ;;  %v4023_v34 = vmul.f32 %v8431_v57, %v13165_v22  ;;  %v4060_v39 = vrot.slane %v4012_v8, 3 }
 0x442   :  { %v4061_v63 = vrot.slane %v4013_v23, 3  ;;  %v4063_v53 = vrot.slane %v4014_v61, 3  ;;  %v4064_v25 = vrot.slane %v4015_v1, 3  ;;  %v4066_v18 = vrot.slane %v4016_v45, 3 }
 0x443   :  { %v4067_v41 = vrot.slane %v4017_v5, 3  ;;  %v4069_v58 = vrot.slane %v4018_v31, 3  ;;  %v4070_v16 = vrot.slane %v4019_v59, 3  ;;  %v3952_v3 = vsel %vm1424_vm13, %v3950_v7, %v3951_v21 }
 0x444   :  { %v3955_v19 = vsel %vm1424_vm13, %v3953_v0, %v3954_v51  ;;  %v3993_v33 = vadd.f32 %v3943_v12, %v3860_v2  ;;  %v3994_v10 = vadd.f32 %v3946_v56, %v3861_v11  ;;  %v3995_v28 = vadd.f32 %v3949_v40, %v3862_v54 }
 0x445   :  { %v3996_v48 = vadd.f32 %v3952_v3, %v3863_v36  ;;  %v3997_v14 = vadd.f32 %v3955_v19, %v3864_v55  ;;  %v3998_v52 = vadd.f32 %v3952_v3, %v3865_v60  ;;  %v4062_v57 = vsel %vm1424_vm13, %v4060_v39, %v4061_v63  ;;  %v8433_v39 = vld [vmem:[#allocation2 + $0x94] ss:$0 sm:$0xff] }
 0x446   :  { %v4065_v26 = vsel %vm1424_vm13, %v4063_v53, %v4064_v25  ;;  %v4072_v8 = vrot.slane %v4020_v6, 3  ;;  %v4073_v23 = vrot.slane %v4021_v37, 3  ;;  %v4068_v61 = vsel %vm1424_vm13, %v4066_v18, %v4067_v41 }
 0x447   :  { %v4071_v1 = vsel %vm1424_vm13, %v4069_v58, %v4070_v16  ;;  %v4075_v7 = vrot.slane %v4022_v50, 3  ;;  %v4076_v21 = vrot.slane %v4023_v34, 3  ;;  %v4108_v0 = vadd.f32 %v4062_v57, %v3991_v35 }
 0x448   :  { %v4129_v2 = vmul.f32 %v8432_v27, %v13123_v32  ;;  %v4130_v11 = vmul.f32 %v8432_v27, %v13158_v24  ;;  %v4131_v54 = vmul.f32 %v8432_v27, %v13124_v47  ;;  %v4132_v36 = vmul.f32 %v8432_v27, %v13162_v46 }
 0x449   :  { %v4133_v55 = vmul.f32 %v8432_v27, %v13125_v43  ;;  %v4134_v60 = vmul.f32 %v8432_v27, %v13163_v42  ;;  %v4135_v12 = vmul.f32 %v8432_v27, %v13148_v49  ;;  %v4074_v56 = vsel %vm1424_vm13, %v4072_v8, %v4073_v23 }
 0x44a   :  { %v4136_v40 = vmul.f32 %v8432_v27, %v13164_v4  ;;  %v4137_v51 = vmul.f32 %v8432_v27, %v13149_v13  ;;  %v4138_v35 = vmul.f32 %v8432_v27, %v13165_v22  ;;  %v4169_v45 = vrot.slane %v4129_v2, 3 }
 0x44b   :  { %v4170_v5 = vrot.slane %v4130_v11, 3  ;;  %v4172_v31 = vrot.slane %v4131_v54, 3  ;;  %v4173_v59 = vrot.slane %v4132_v36, 3  ;;  %v4175_v6 = vrot.slane %v4133_v55, 3 }
 0x44c   :  { %v4176_v37 = vrot.slane %v4134_v60, 3  ;;  %v4178_v50 = vrot.slane %v4135_v12, 3  ;;  %v4179_v34 = vrot.slane %v4136_v40, 3  ;;  %v4077_v63 = vsel %vm1424_vm13, %v4075_v7, %v4076_v21 }
 0x44d   :  { %v4109_v53 = vadd.f32 %v4065_v26, %v3992_v9  ;;  %v4110_v25 = vadd.f32 %v4068_v61, %v3993_v33  ;;  %v4111_v18 = vadd.f32 %v4071_v1, %v3994_v10  ;;  %v4112_v41 = vadd.f32 %v4074_v56, %v3995_v28 }
 0x44e   :  { %v4113_v58 = vadd.f32 %v4077_v63, %v3996_v48  ;;  %v4114_v16 = vadd.f32 %v4074_v56, %v3997_v14  ;;  %v4115_v3 = vadd.f32 %v4071_v1, %v3998_v52  ;;  %v4171_v19 = vsel %vm1424_vm13, %v4169_v45, %v4170_v5  ;;  %v8434_v45 = vld [vmem:[#allocation2 + $0x9b] ss:$0 sm:$0xff] }
 0x44f   :  { %v4174_v27 = vsel %vm1424_vm13, %v4172_v31, %v4173_v59  ;;  %v4181_v57 = vrot.slane %v4137_v51, 3  ;;  %v4230_v8 = vmul.f32 %v8433_v39, %v13123_v32  ;;  %v4177_v23 = vsel %vm1424_vm13, %v4175_v6, %v4176_v37 }
 0x450   :  { %v4180_v2 = vsel %vm1424_vm13, %v4178_v50, %v4179_v34  ;;  %v4182_v11 = vrot.slane %v4138_v35, 3  ;;  %v4231_v9 = vmul.f32 %v8433_v39, %v13158_v24  ;;  %v4232_v33 = vmul.f32 %v8433_v39, %v9782_v30 }
 0x451   :  { %v4233_v10 = vmul.f32 %v8433_v39, %v13159_v38  ;;  %v4234_v28 = vmul.f32 %v8433_v39, %v9785_v44  ;;  %v4235_v48 = vmul.f32 %v8433_v39, %v13160_v17  ;;  %v4236_v14 = vmul.f32 %v8433_v39, %v9788_v29 }
 0x452   :  { %v4237_v52 = vmul.f32 %v8433_v39, %v13161_v62  ;;  %v4238_v26 = vmul.f32 %v8433_v39, %v13124_v47  ;;  %v4239_v61 = vmul.f32 %v8433_v39, %v13162_v46  ;;  %v4270_v1 = vrot.slane %v4230_v8, 4 }
 0x453   :  { %v4271_v7 = vrot.slane %v4231_v9, 4  ;;  %v4273_v21 = vrot.slane %v4232_v33, 4  ;;  %v4274_v54 = vrot.slane %v4233_v10, 4  ;;  %v4276_v36 = vrot.slane %v4234_v28, 4 }
 0x454   :  { %v4277_v55 = vrot.slane %v4235_v48, 4  ;;  %v4279_v60 = vrot.slane %v4236_v14, 4  ;;  %v4280_v12 = vrot.slane %v4237_v52, 4  ;;  %v4183_v56 = vsel %vm1424_vm13, %v4181_v57, %v4182_v11 }
 0x455   :  { %v4209_v40 = vadd.f32 %v4171_v19, %v4108_v0  ;;  %v4210_v51 = vadd.f32 %v4174_v27, %v4109_v53  ;;  %v4211_v35 = vadd.f32 %v4177_v23, %v4110_v25  ;;  %v4212_v5 = vadd.f32 %v4180_v2, %v4111_v18 }
 0x456   :  { %v4213_v31 = vadd.f32 %v4183_v56, %v4112_v41  ;;  %v4214_v59 = vadd.f32 %v4180_v2, %v4113_v58  ;;  %v4215_v6 = vadd.f32 %v4177_v23, %v4114_v16  ;;  %v4216_v37 = vadd.f32 %v4174_v27, %v4115_v3 }
 0x457   :  { %v4272_v50 = vsel %vm1407_vm12, %v4270_v1, %v4271_v7  ;;  %v4275_v34 = vsel %vm1407_vm12, %v4273_v21, %v4274_v54  ;;  %v4282_v39 = vrot.slane %v4238_v26, 4  ;;  %v4278_v63 = vsel %vm1407_vm12, %v4276_v36, %v4277_v55 }
 0x458   :  { %v4281_v8 = vsel %vm1407_vm12, %v4279_v60, %v4280_v12  ;;  %v4283_v9 = vrot.slane %v4239_v61, 4  ;;  %v4331_v0 = vmul.f32 %v8434_v45, %v9782_v30  ;;  %v4332_v53 = vmul.f32 %v8434_v45, %v13159_v38  ;;  %v8435_v12 = vld [vmem:[#allocation2 + $0xa2] ss:$0 sm:$0xff] }
 0x459   :  { %v4333_v25 = vmul.f32 %v8434_v45, %v9785_v44  ;;  %v4334_v18 = vmul.f32 %v8434_v45, %v13160_v17  ;;  %v4335_v41 = vmul.f32 %v8434_v45, %v9788_v29  ;;  %v4310_v58 = vadd.f32 %v4272_v50, %v4209_v40 }
 0x45a   :  { %v4336_v16 = vmul.f32 %v8434_v45, %v13161_v62  ;;  %v4337_v3 = vmul.f32 %v8434_v45, %v13123_v32  ;;  %v4338_v19 = vmul.f32 %v8434_v45, %v13158_v24  ;;  %v4339_v27 = vmul.f32 %v8434_v45, %v13124_v47 }
 0x45b   :  { %v4340_v57 = vmul.f32 %v8434_v45, %v13162_v46  ;;  %v4341_v23 = vmul.f32 %v8434_v45, %v13125_v43  ;;  %v4342_v2 = vmul.f32 %v8434_v45, %v13163_v42  ;;  %v4379_v11 = vrot.slane %v4331_v0, 4 }
 0x45c   :  { %v4380_v33 = vrot.slane %v4332_v53, 4  ;;  %v4382_v10 = vrot.slane %v4333_v25, 4  ;;  %v4383_v28 = vrot.slane %v4334_v18, 4  ;;  %v4385_v48 = vrot.slane %v4335_v41, 4 }
 0x45d   :  { %v4386_v14 = vrot.slane %v4336_v16, 4  ;;  %v4388_v52 = vrot.slane %v4337_v3, 4  ;;  %v4389_v26 = vrot.slane %v4338_v19, 4  ;;  %v4284_v61 = vsel %vm1407_vm12, %v4282_v39, %v4283_v9 }
 0x45e   :  { %v4311_v1 = vadd.f32 %v4275_v34, %v4210_v51  ;;  %v4312_v7 = vadd.f32 %v4278_v63, %v4211_v35  ;;  %v4313_v21 = vadd.f32 %v4281_v8, %v4212_v5  ;;  %v4314_v54 = vadd.f32 %v4278_v63, %v4213_v31 }
 0x45f   :  { %v4315_v36 = vadd.f32 %v4275_v34, %v4214_v59  ;;  %v4316_v55 = vadd.f32 %v4272_v50, %v4215_v6  ;;  %v4317_v60 = vadd.f32 %v4284_v61, %v4216_v37  ;;  %v4381_v56 = vsel %vm1407_vm12, %v4379_v11, %v4380_v33 }
 0x460   :  { %v4384_v40 = vsel %vm1407_vm12, %v4382_v10, %v4383_v28  ;;  %v4391_v45 = vrot.slane %v4339_v27, 4  ;;  %v4392_v0 = vrot.slane %v4340_v57, 4  ;;  %v4387_v53 = vsel %vm1407_vm12, %v4385_v48, %v4386_v14 }
 0x461   :  { %v4390_v25 = vsel %vm1407_vm12, %v4388_v52, %v4389_v26  ;;  %v4394_v18 = vrot.slane %v4341_v23, 4  ;;  %v4395_v39 = vrot.slane %v4342_v2, 4  ;;  %v4427_v51 = vadd.f32 %v4381_v56, %v4310_v58 }
 0x462   :  { %v4448_v35 = vmul.f32 %v8435_v12, %v9785_v44  ;;  %v4449_v5 = vmul.f32 %v8435_v12, %v13160_v17  ;;  %v4450_v31 = vmul.f32 %v8435_v12, %v9788_v29  ;;  %v4451_v59 = vmul.f32 %v8435_v12, %v13161_v62 }
 0x463   :  { %v4452_v6 = vmul.f32 %v8435_v12, %v9782_v30  ;;  %v4453_v37 = vmul.f32 %v8435_v12, %v13159_v38  ;;  %v4454_v50 = vmul.f32 %v8435_v12, %v13123_v32  ;;  %v4393_v34 = vsel %vm1407_vm12, %v4391_v45, %v4392_v0 }
 0x464   :  { %v4455_v63 = vmul.f32 %v8435_v12, %v13158_v24  ;;  %v4456_v8 = vmul.f32 %v8435_v12, %v13124_v47  ;;  %v4457_v9 = vmul.f32 %v8435_v12, %v13162_v46  ;;  %v4428_v41 = vadd.f32 %v4384_v40, %v4311_v1 }
 0x465   :  { %v4429_v58 = vadd.f32 %v4387_v53, %v4312_v7  ;;  %v4458_v16 = vmul.f32 %v8435_v12, %v13125_v43  ;;  %v4459_v3 = vmul.f32 %v8435_v12, %v13163_v42  ;;  %v4504_v19 = vrot.slane %v4448_v35, 4 }
 0x466   :  { %v4505_v27 = vrot.slane %v4449_v5, 4  ;;  %v4507_v57 = vrot.slane %v4450_v31, 4  ;;  %v4508_v23 = vrot.slane %v4451_v59, 4  ;;  %v4510_v2 = vrot.slane %v4452_v6, 4  ;;  %v8436_v5 = vld [vmem:[#allocation2 + $0xa9] ss:$0 sm:$0xff] }
 0x467   :  { %v4511_v11 = vrot.slane %v4453_v37, 4  ;;  %v4513_v33 = vrot.slane %v4454_v50, 4  ;;  %v4514_v10 = vrot.slane %v4455_v63, 4  ;;  %v4460_v28 = vmul.f32 %v8435_v12, %v13148_v49 }
 0x468   :  { %v4461_v48 = vmul.f32 %v8435_v12, %v13164_v4  ;;  %v4516_v14 = vrot.slane %v4456_v8, 4  ;;  %v4517_v52 = vrot.slane %v4457_v9, 4  ;;  %v4396_v26 = vsel %vm1407_vm12, %v4394_v18, %v4395_v39 }
 0x469   :  { %v4430_v61 = vadd.f32 %v4384_v40, %v4313_v21  ;;  %v4519_v1 = vrot.slane %v4458_v16, 4  ;;  %v4520_v7 = vrot.slane %v4459_v3, 4  ;;  %v4431_v45 = vadd.f32 %v4381_v56, %v4314_v54 }
 0x46a   :  { %v4432_v0 = vadd.f32 %v4390_v25, %v4315_v36  ;;  %v4433_v53 = vadd.f32 %v4393_v34, %v4316_v55  ;;  %v4434_v35 = vadd.f32 %v4396_v26, %v4317_v60  ;;  %v4506_v31 = vsel %vm1407_vm12, %v4504_v19, %v4505_v27 }
 0x46b   :  { %v4509_v59 = vsel %vm1407_vm12, %v4507_v57, %v4508_v23  ;;  %v4512_v6 = vsel %vm1407_vm12, %v4510_v2, %v4511_v11  ;;  %v4515_v12 = vsel %vm1407_vm12, %v4513_v33, %v4514_v10  ;;  %v4518_v37 = vsel %vm1407_vm12, %v4516_v14, %v4517_v52 }
 0x46c   :  { %v4522_v50 = vrot.slane %v4460_v28, 4  ;;  %v4523_v18 = vrot.slane %v4461_v48, 4  ;;  %v4560_v21 = vadd.f32 %v4506_v31, %v4427_v51  ;;  %v4521_v40 = vsel %vm1407_vm12, %v4519_v1, %v4520_v7 }
 0x46d   :  { %v4561_v54 = vadd.f32 %v4509_v59, %v4428_v41  ;;  %v4581_v36 = vmul.f32 %v8436_v5, %v9788_v29  ;;  %v4582_v55 = vmul.f32 %v8436_v5, %v13161_v62  ;;  %v4583_v60 = vmul.f32 %v8436_v5, %v9785_v44 }
 0x46e   :  { %v4584_v56 = vmul.f32 %v8436_v5, %v13160_v17  ;;  %v4585_v25 = vmul.f32 %v8436_v5, %v9782_v30  ;;  %v4586_v39 = vmul.f32 %v8436_v5, %v13159_v38  ;;  %v4587_v34 = vmul.f32 %v8436_v5, %v13123_v32 }
 0x46f   :  { %v4588_v63 = vmul.f32 %v8436_v5, %v13158_v24  ;;  %v4589_v51 = vmul.f32 %v8436_v5, %v13124_v47  ;;  %v4590_v8 = vmul.f32 %v8436_v5, %v13162_v46  ;;  %v4562_v9 = vadd.f32 %v4506_v31, %v4429_v58 }
 0x470   :  { %v4563_v41 = vadd.f32 %v4512_v6, %v4430_v61  ;;  %v4591_v16 = vmul.f32 %v8436_v5, %v13125_v43  ;;  %v4592_v3 = vmul.f32 %v8436_v5, %v13163_v42  ;;  %v4593_v19 = vmul.f32 %v8436_v5, %v13148_v49 }
 0x471   :  { %v4594_v27 = vmul.f32 %v8436_v5, %v13164_v4  ;;  %v4645_v57 = vrot.slane %v4581_v36, 4  ;;  %v4646_v23 = vrot.slane %v4582_v55, 4  ;;  %v4648_v2 = vrot.slane %v4583_v60, 4  ;;  %v8437_v36 = vld [vmem:[#allocation2 + $0xb0] ss:$0 sm:$0xff] }
 0x472   :  { %v4649_v11 = vrot.slane %v4584_v56, 4  ;;  %v4651_v33 = vrot.slane %v4585_v25, 4  ;;  %v4652_v10 = vrot.slane %v4586_v39, 4  ;;  %v4654_v28 = vrot.slane %v4587_v34, 4 }
 0x473   :  { %v4655_v48 = vrot.slane %v4588_v63, 4  ;;  %v4657_v14 = vrot.slane %v4589_v51, 4  ;;  %v4658_v52 = vrot.slane %v4590_v8, 4  ;;  %v4595_v58 = vmul.f32 %v8436_v5, %v13149_v13 }
 0x474   :  { %v4596_v26 = vmul.f32 %v8436_v5, %v13165_v22  ;;  %v4660_v61 = vrot.slane %v4591_v16, 4  ;;  %v4661_v1 = vrot.slane %v4592_v3, 4  ;;  %v4524_v7 = vsel %vm1407_vm12, %v4522_v50, %v4523_v18 }
 0x475   :  { %v4564_v31 = vadd.f32 %v4515_v12, %v4431_v45  ;;  %v4565_v59 = vadd.f32 %v4518_v37, %v4432_v0  ;;  %v4566_v6 = vadd.f32 %v4521_v40, %v4433_v53  ;;  %v4567_v55 = vadd.f32 %v4524_v7, %v4434_v35 }
 0x476   :  { %v4647_v60 = vsel %vm1407_vm12, %v4645_v57, %v4646_v23  ;;  %v4650_v56 = vsel %vm1407_vm12, %v4648_v2, %v4649_v11  ;;  %v4653_v25 = vsel %vm1407_vm12, %v4651_v33, %v4652_v10  ;;  %v4656_v39 = vsel %vm1407_vm12, %v4654_v28, %v4655_v48 }
 0x477   :  { %v4659_v34 = vsel %vm1407_vm12, %v4657_v14, %v4658_v52  ;;  %v4663_v5 = vrot.slane %v4593_v19, 4  ;;  %v4664_v63 = vrot.slane %v4594_v27, 4  ;;  %v4662_v51 = vsel %vm1407_vm12, %v4660_v61, %v4661_v1 }
 0x478   :  { %v4666_v50 = vrot.slane %v4595_v58, 4  ;;  %v4667_v45 = vrot.slane %v4596_v26, 4  ;;  %v4730_v0 = vmul.f32 %v8437_v36, %v9785_v44  ;;  %v4709_v53 = vadd.f32 %v4647_v60, %v4560_v21 }
 0x479   :  { %v4731_v35 = vmul.f32 %v8437_v36, %v13160_v17  ;;  %v4732_v12 = vmul.f32 %v8437_v36, %v9782_v30  ;;  %v4733_v37 = vmul.f32 %v8437_v36, %v13159_v38  ;;  %v4734_v18 = vmul.f32 %v8437_v36, %v13123_v32 }
 0x47a   :  { %v4735_v40 = vmul.f32 %v8437_v36, %v13158_v24  ;;  %v4736_v8 = vmul.f32 %v8437_v36, %v13124_v47  ;;  %v4737_v16 = vmul.f32 %v8437_v36, %v13162_v46  ;;  %v4665_v3 = vsel %vm1407_vm12, %v4663_v5, %v4664_v63  ;;  %v8438_v5 = vld [vmem:[#allocation2 + $0xb7] ss:$0 sm:$0xff] }
 0x47b   :  { %v4710_v19 = vadd.f32 %v4650_v56, %v4561_v54  ;;  %v4738_v27 = vmul.f32 %v8437_v36, %v13125_v43  ;;  %v4739_v21 = vmul.f32 %v8437_v36, %v13163_v42  ;;  %v4711_v57 = vadd.f32 %v4653_v25, %v4562_v9 }
 0x47c   :  { %v4740_v23 = vmul.f32 %v8437_v36, %v13148_v49  ;;  %v4786_v2 = vrot.slane %v4730_v0, 4  ;;  %v4787_v11 = vrot.slane %v4731_v35, 4  ;;  %v4789_v33 = vrot.slane %v4732_v12, 4 }
 0x47d   :  { %v4790_v10 = vrot.slane %v4733_v37, 4  ;;  %v4792_v28 = vrot.slane %v4734_v18, 4  ;;  %v4793_v48 = vrot.slane %v4735_v40, 4  ;;  %v4741_v14 = vmul.f32 %v8437_v36, %v13164_v4 }
 0x47e   :  { %v4742_v52 = vmul.f32 %v8437_v36, %v13149_v13  ;;  %v4795_v58 = vrot.slane %v4736_v8, 4  ;;  %v4796_v26 = vrot.slane %v4737_v16, 4  ;;  %v4712_v54 = vadd.f32 %v4656_v39, %v4563_v41 }
 0x47f   :  { %v4743_v61 = vmul.f32 %v8437_v36, %v13165_v22  ;;  %v4798_v1 = vrot.slane %v4738_v27, 4  ;;  %v4799_v7 = vrot.slane %v4739_v21, 4  ;;  %v4668_v9 = vsel %vm1407_vm12, %v4666_v50, %v4667_v45 }
 0x480   :  { %v4713_v60 = vadd.f32 %v4659_v34, %v4564_v31  ;;  %v4714_v56 = vadd.f32 %v4662_v51, %v4565_v59  ;;  %v4715_v25 = vadd.f32 %v4665_v3, %v4566_v6  ;;  %v4716_v63 = vadd.f32 %v4668_v9, %v4567_v55 }
 0x481   :  { %v4788_v0 = vsel %vm1407_vm12, %v4786_v2, %v4787_v11  ;;  %v4791_v35 = vsel %vm1407_vm12, %v4789_v33, %v4790_v10  ;;  %v4794_v12 = vsel %vm1407_vm12, %v4792_v28, %v4793_v48  ;;  %v4797_v37 = vsel %vm1407_vm12, %v4795_v58, %v4796_v26 }
 0x482   :  { %v4801_v41 = vrot.slane %v4740_v23, 4  ;;  %v4802_v39 = vrot.slane %v4741_v14, 4  ;;  %v4804_v36 = vrot.slane %v4742_v52, 4  ;;  %v4800_v18 = vsel %vm1407_vm12, %v4798_v1, %v4799_v7 }
 0x483   :  { %v4805_v40 = vrot.slane %v4743_v61, 4  ;;  %v4842_v50 = vadd.f32 %v4788_v0, %v4709_v53  ;;  %v4863_v31 = vmul.f32 %v8438_v5, %v9782_v30  ;;  %v4864_v59 = vmul.f32 %v8438_v5, %v13159_v38  ;;  %v8439_v0 = vld [vmem:[#allocation2 + $0xbe] ss:$0 sm:$0xff] }
 0x484   :  { %v4865_v6 = vmul.f32 %v8438_v5, %v13123_v32  ;;  %v4866_v55 = vmul.f32 %v8438_v5, %v13158_v24  ;;  %v4867_v34 = vmul.f32 %v8438_v5, %v13124_v47  ;;  %v4843_v51 = vadd.f32 %v4791_v35, %v4710_v19 }
 0x485   :  { %v4868_v45 = vmul.f32 %v8438_v5, %v13162_v46  ;;  %v4869_v8 = vmul.f32 %v8438_v5, %v13125_v43  ;;  %v4870_v16 = vmul.f32 %v8438_v5, %v13163_v42  ;;  %v4871_v3 = vmul.f32 %v8438_v5, %v13148_v49 }
 0x486   :  { %v4872_v53 = vmul.f32 %v8438_v5, %v13164_v4  ;;  %v4873_v27 = vmul.f32 %v8438_v5, %v13149_v13  ;;  %v4874_v21 = vmul.f32 %v8438_v5, %v13165_v22  ;;  %v4911_v23 = vrot.slane %v4863_v31, 4 }
 0x487   :  { %v4912_v2 = vrot.slane %v4864_v59, 4  ;;  %v4914_v11 = vrot.slane %v4865_v6, 4  ;;  %v4915_v33 = vrot.slane %v4866_v55, 4  ;;  %v4917_v10 = vrot.slane %v4867_v34, 4 }
 0x488   :  { %v4918_v19 = vrot.slane %v4868_v45, 4  ;;  %v4920_v28 = vrot.slane %v4869_v8, 4  ;;  %v4921_v48 = vrot.slane %v4870_v16, 4  ;;  %v4803_v14 = vsel %vm1407_vm12, %v4801_v41, %v4802_v39 }
 0x489   :  { %v4806_v52 = vsel %vm1407_vm12, %v4804_v36, %v4805_v40  ;;  %v4844_v58 = vadd.f32 %v4794_v12, %v4711_v57  ;;  %v4845_v26 = vadd.f32 %v4797_v37, %v4712_v54  ;;  %v4846_v61 = vadd.f32 %v4800_v18, %v4713_v60 }
 0x48a   :  { %v4847_v1 = vadd.f32 %v4803_v14, %v4714_v56  ;;  %v4848_v7 = vadd.f32 %v4806_v52, %v4715_v25  ;;  %v4849_v9 = vadd.f32 %v4803_v14, %v4716_v63  ;;  %v4913_v5 = vsel %vm1407_vm12, %v4911_v23, %v4912_v2  ;;  %v8440_v23 = vld [vmem:[#allocation2 + $0x95] ss:$0 sm:$0xff] }
 0x48b   :  { %v4916_v35 = vsel %vm1407_vm12, %v4914_v11, %v4915_v33  ;;  %v4923_v31 = vrot.slane %v4871_v3, 4  ;;  %v4924_v59 = vrot.slane %v4872_v53, 4  ;;  %v4919_v6 = vsel %vm1407_vm12, %v4917_v10, %v4918_v19 }
 0x48c   :  { %v4922_v55 = vsel %vm1407_vm12, %v4920_v28, %v4921_v48  ;;  %v4926_v41 = vrot.slane %v4873_v27, 4  ;;  %v4927_v39 = vrot.slane %v4874_v21, 4  ;;  %v4959_v36 = vadd.f32 %v4913_v5, %v4842_v50 }
 0x48d   :  { %v4980_v57 = vmul.f32 %v8439_v0, %v13123_v32  ;;  %v4981_v54 = vmul.f32 %v8439_v0, %v13158_v24  ;;  %v4982_v60 = vmul.f32 %v8439_v0, %v13124_v47  ;;  %v4983_v56 = vmul.f32 %v8439_v0, %v13162_v46 }
 0x48e   :  { %v4984_v25 = vmul.f32 %v8439_v0, %v13125_v43  ;;  %v4985_v63 = vmul.f32 %v8439_v0, %v13163_v42  ;;  %v4986_v12 = vmul.f32 %v8439_v0, %v13148_v49  ;;  %v4925_v37 = vsel %vm1407_vm12, %v4923_v31, %v4924_v59 }
 0x48f   :  { %v4987_v18 = vmul.f32 %v8439_v0, %v13164_v4  ;;  %v4988_v40 = vmul.f32 %v8439_v0, %v13149_v13  ;;  %v4989_v50 = vmul.f32 %v8439_v0, %v13165_v22  ;;  %v5020_v34 = vrot.slane %v4980_v57, 4 }
 0x490   :  { %v5021_v45 = vrot.slane %v4981_v54, 4  ;;  %v5023_v8 = vrot.slane %v4982_v60, 4  ;;  %v5024_v16 = vrot.slane %v4983_v56, 4  ;;  %v5026_v3 = vrot.slane %v4984_v25, 4 }
 0x491   :  { %v5027_v53 = vrot.slane %v4985_v63, 4  ;;  %v5029_v27 = vrot.slane %v4986_v12, 4  ;;  %v5030_v21 = vrot.slane %v4987_v18, 4  ;;  %v4928_v2 = vsel %vm1407_vm12, %v4926_v41, %v4927_v39 }
 0x492   :  { %v4960_v11 = vadd.f32 %v4916_v35, %v4843_v51  ;;  %v4961_v33 = vadd.f32 %v4919_v6, %v4844_v58  ;;  %v4962_v10 = vadd.f32 %v4922_v55, %v4845_v26  ;;  %v4963_v19 = vadd.f32 %v4925_v37, %v4846_v61 }
 0x493   :  { %v4964_v28 = vadd.f32 %v4928_v2, %v4847_v1  ;;  %v4965_v48 = vadd.f32 %v4925_v37, %v4848_v7  ;;  %v4966_v14 = vadd.f32 %v4922_v55, %v4849_v9  ;;  %v5022_v52 = vsel %vm1407_vm12, %v5020_v34, %v5021_v45  ;;  %v8441_v34 = vld [vmem:[#allocation2 + $0x9c] ss:$0 sm:$0xff] }
 0x494   :  { %v5025_v0 = vsel %vm1407_vm12, %v5023_v8, %v5024_v16  ;;  %v5032_v5 = vrot.slane %v4988_v40, 4  ;;  %v5081_v31 = vmul.f32 %v8440_v23, %v13123_v32  ;;  %v5028_v59 = vsel %vm1407_vm12, %v5026_v3, %v5027_v53 }
 0x495   :  { %v5031_v57 = vsel %vm1407_vm12, %v5029_v27, %v5030_v21  ;;  %v5033_v54 = vrot.slane %v4989_v50, 4  ;;  %v5082_v51 = vmul.f32 %v8440_v23, %v13158_v24  ;;  %v5083_v58 = vmul.f32 %v8440_v23, %v9782_v30 }
 0x496   :  { %v5084_v26 = vmul.f32 %v8440_v23, %v13159_v38  ;;  %v5085_v61 = vmul.f32 %v8440_v23, %v9785_v44  ;;  %v5086_v1 = vmul.f32 %v8440_v23, %v13160_v17  ;;  %v5087_v7 = vmul.f32 %v8440_v23, %v9788_v29 }
 0x497   :  { %v5088_v9 = vmul.f32 %v8440_v23, %v13161_v62  ;;  %v5089_v35 = vmul.f32 %v8440_v23, %v13124_v47  ;;  %v5090_v6 = vmul.f32 %v8440_v23, %v13162_v46  ;;  %v5121_v55 = vrot.slane %v5081_v31, 5 }
 0x498   :  { %v5122_v41 = vrot.slane %v5082_v51, 5  ;;  %v5124_v39 = vrot.slane %v5083_v58, 5  ;;  %v5125_v60 = vrot.slane %v5084_v26, 5  ;;  %v5127_v56 = vrot.slane %v5085_v61, 5 }
 0x499   :  { %v5128_v25 = vrot.slane %v5086_v1, 5  ;;  %v5130_v63 = vrot.slane %v5087_v7, 5  ;;  %v5131_v12 = vrot.slane %v5088_v9, 5  ;;  %v5034_v37 = vsel %vm1407_vm12, %v5032_v5, %v5033_v54 }
 0x49a   :  { %v5060_v18 = vadd.f32 %v5022_v52, %v4959_v36  ;;  %v5061_v40 = vadd.f32 %v5025_v0, %v4960_v11  ;;  %v5062_v50 = vadd.f32 %v5028_v59, %v4961_v33  ;;  %v5063_v45 = vadd.f32 %v5031_v57, %v4962_v10 }
 0x49b   :  { %v5064_v8 = vadd.f32 %v5034_v37, %v4963_v19  ;;  %v5065_v16 = vadd.f32 %v5031_v57, %v4964_v28  ;;  %v5066_v3 = vadd.f32 %v5028_v59, %v4965_v48  ;;  %v5067_v53 = vadd.f32 %v5025_v0, %v4966_v14 }
 0x49c   :  { %v5123_v27 = vsel %vm1374_vm11, %v5121_v55, %v5122_v41  ;;  %v5126_v21 = vsel %vm1374_vm11, %v5124_v39, %v5125_v60  ;;  %v5133_v23 = vrot.slane %v5089_v35, 5  ;;  %v5129_v2 = vsel %vm1374_vm11, %v5127_v56, %v5128_v25 }
 0x49d   :  { %v5132_v31 = vsel %vm1374_vm11, %v5130_v63, %v5131_v12  ;;  %v5134_v51 = vrot.slane %v5090_v6, 5  ;;  %v5182_v36 = vmul.f32 %v8441_v34, %v9782_v30  ;;  %v5183_v11 = vmul.f32 %v8441_v34, %v13159_v38  ;;  %v8442_v12 = vld [vmem:[#allocation2 + $0xa3] ss:$0 sm:$0xff] }
 0x49e   :  { %v5184_v33 = vmul.f32 %v8441_v34, %v9785_v44  ;;  %v5185_v10 = vmul.f32 %v8441_v34, %v13160_v17  ;;  %v5186_v19 = vmul.f32 %v8441_v34, %v9788_v29  ;;  %v5161_v28 = vadd.f32 %v5123_v27, %v5060_v18 }
 0x49f   :  { %v5187_v48 = vmul.f32 %v8441_v34, %v13161_v62  ;;  %v5188_v14 = vmul.f32 %v8441_v34, %v13123_v32  ;;  %v5189_v52 = vmul.f32 %v8441_v34, %v13158_v24  ;;  %v5190_v0 = vmul.f32 %v8441_v34, %v13124_v47 }
 0x4a0   :  { %v5191_v5 = vmul.f32 %v8441_v34, %v13162_v46  ;;  %v5192_v59 = vmul.f32 %v8441_v34, %v13125_v43  ;;  %v5193_v57 = vmul.f32 %v8441_v34, %v13163_v42  ;;  %v5230_v54 = vrot.slane %v5182_v36, 5 }
 0x4a1   :  { %v5231_v58 = vrot.slane %v5183_v11, 5  ;;  %v5233_v26 = vrot.slane %v5184_v33, 5  ;;  %v5234_v61 = vrot.slane %v5185_v10, 5  ;;  %v5236_v1 = vrot.slane %v5186_v19, 5 }
 0x4a2   :  { %v5237_v7 = vrot.slane %v5187_v48, 5  ;;  %v5239_v9 = vrot.slane %v5188_v14, 5  ;;  %v5240_v35 = vrot.slane %v5189_v52, 5  ;;  %v5135_v6 = vsel %vm1374_vm11, %v5133_v23, %v5134_v51 }
 0x4a3   :  { %v5162_v55 = vadd.f32 %v5126_v21, %v5061_v40  ;;  %v5163_v41 = vadd.f32 %v5129_v2, %v5062_v50  ;;  %v5164_v39 = vadd.f32 %v5132_v31, %v5063_v45  ;;  %v5165_v60 = vadd.f32 %v5129_v2, %v5064_v8 }
 0x4a4   :  { %v5166_v56 = vadd.f32 %v5126_v21, %v5065_v16  ;;  %v5167_v25 = vadd.f32 %v5123_v27, %v5066_v3  ;;  %v5168_v63 = vadd.f32 %v5135_v6, %v5067_v53  ;;  %v5232_v37 = vsel %vm1374_vm11, %v5230_v54, %v5231_v58 }
 0x4a5   :  { %v5235_v18 = vsel %vm1374_vm11, %v5233_v26, %v5234_v61  ;;  %v5242_v34 = vrot.slane %v5190_v0, 5  ;;  %v5243_v36 = vrot.slane %v5191_v5, 5  ;;  %v5238_v11 = vsel %vm1374_vm11, %v5236_v1, %v5237_v7 }
 0x4a6   :  { %v5241_v33 = vsel %vm1374_vm11, %v5239_v9, %v5240_v35  ;;  %v5245_v10 = vrot.slane %v5192_v59, 5  ;;  %v5246_v23 = vrot.slane %v5193_v57, 5  ;;  %v5278_v40 = vadd.f32 %v5232_v37, %v5161_v28 }
 0x4a7   :  { %v5299_v50 = vmul.f32 %v8442_v12, %v9785_v44  ;;  %v5300_v45 = vmul.f32 %v8442_v12, %v13160_v17  ;;  %v5301_v8 = vmul.f32 %v8442_v12, %v9788_v29  ;;  %v5302_v16 = vmul.f32 %v8442_v12, %v13161_v62 }
 0x4a8   :  { %v5303_v3 = vmul.f32 %v8442_v12, %v9782_v30  ;;  %v5304_v53 = vmul.f32 %v8442_v12, %v13159_v38  ;;  %v5305_v27 = vmul.f32 %v8442_v12, %v13123_v32  ;;  %v5244_v21 = vsel %vm1374_vm11, %v5242_v34, %v5243_v36 }
 0x4a9   :  { %v5306_v2 = vmul.f32 %v8442_v12, %v13158_v24  ;;  %v5307_v31 = vmul.f32 %v8442_v12, %v13124_v47  ;;  %v5308_v51 = vmul.f32 %v8442_v12, %v13162_v46  ;;  %v5279_v19 = vadd.f32 %v5235_v18, %v5162_v55 }
 0x4aa   :  { %v5280_v28 = vadd.f32 %v5238_v11, %v5163_v41  ;;  %v5309_v48 = vmul.f32 %v8442_v12, %v13125_v43  ;;  %v5310_v14 = vmul.f32 %v8442_v12, %v13163_v42  ;;  %v5355_v52 = vrot.slane %v5299_v50, 5 }
 0x4ab   :  { %v5356_v0 = vrot.slane %v5300_v45, 5  ;;  %v5358_v5 = vrot.slane %v5301_v8, 5  ;;  %v5359_v59 = vrot.slane %v5302_v16, 5  ;;  %v5361_v57 = vrot.slane %v5303_v3, 5  ;;  %v8443_v45 = vld [vmem:[#allocation2 + $0xaa] ss:$0 sm:$0xff] }
 0x4ac   :  { %v5362_v54 = vrot.slane %v5304_v53, 5  ;;  %v5364_v58 = vrot.slane %v5305_v27, 5  ;;  %v5365_v26 = vrot.slane %v5306_v2, 5  ;;  %v5311_v61 = vmul.f32 %v8442_v12, %v13148_v49 }
 0x4ad   :  { %v5312_v1 = vmul.f32 %v8442_v12, %v13164_v4  ;;  %v5367_v7 = vrot.slane %v5307_v31, 5  ;;  %v5368_v9 = vrot.slane %v5308_v51, 5  ;;  %v5247_v35 = vsel %vm1374_vm11, %v5245_v10, %v5246_v23 }
 0x4ae   :  { %v5281_v6 = vadd.f32 %v5235_v18, %v5164_v39  ;;  %v5370_v55 = vrot.slane %v5309_v48, 5  ;;  %v5371_v41 = vrot.slane %v5310_v14, 5  ;;  %v5282_v34 = vadd.f32 %v5232_v37, %v5165_v60 }
 0x4af   :  { %v5283_v36 = vadd.f32 %v5241_v33, %v5166_v56  ;;  %v5284_v11 = vadd.f32 %v5244_v21, %v5167_v25  ;;  %v5285_v50 = vadd.f32 %v5247_v35, %v5168_v63  ;;  %v5357_v8 = vsel %vm1374_vm11, %v5355_v52, %v5356_v0 }
 0x4b0   :  { %v5360_v16 = vsel %vm1374_vm11, %v5358_v5, %v5359_v59  ;;  %v5363_v3 = vsel %vm1374_vm11, %v5361_v57, %v5362_v54  ;;  %v5366_v12 = vsel %vm1374_vm11, %v5364_v58, %v5365_v26  ;;  %v5369_v53 = vsel %vm1374_vm11, %v5367_v7, %v5368_v9 }
 0x4b1   :  { %v5373_v27 = vrot.slane %v5311_v61, 5  ;;  %v5374_v10 = vrot.slane %v5312_v1, 5  ;;  %v5411_v39 = vadd.f32 %v5357_v8, %v5278_v40  ;;  %v5372_v18 = vsel %vm1374_vm11, %v5370_v55, %v5371_v41 }
 0x4b2   :  { %v5412_v60 = vadd.f32 %v5360_v16, %v5279_v19  ;;  %v5432_v56 = vmul.f32 %v8443_v45, %v9788_v29  ;;  %v5433_v25 = vmul.f32 %v8443_v45, %v13161_v62  ;;  %v5434_v63 = vmul.f32 %v8443_v45, %v9785_v44 }
 0x4b3   :  { %v5435_v37 = vmul.f32 %v8443_v45, %v13160_v17  ;;  %v5436_v33 = vmul.f32 %v8443_v45, %v9782_v30  ;;  %v5437_v23 = vmul.f32 %v8443_v45, %v13159_v38  ;;  %v5438_v21 = vmul.f32 %v8443_v45, %v13123_v32 }
 0x4b4   :  { %v5439_v2 = vmul.f32 %v8443_v45, %v13158_v24  ;;  %v5440_v40 = vmul.f32 %v8443_v45, %v13124_v47  ;;  %v5441_v31 = vmul.f32 %v8443_v45, %v13162_v46  ;;  %v5413_v51 = vadd.f32 %v5357_v8, %v5280_v28 }
 0x4b5   :  { %v5414_v19 = vadd.f32 %v5363_v3, %v5281_v6  ;;  %v5442_v48 = vmul.f32 %v8443_v45, %v13125_v43  ;;  %v5443_v14 = vmul.f32 %v8443_v45, %v13163_v42  ;;  %v5444_v52 = vmul.f32 %v8443_v45, %v13148_v49 }
 0x4b6   :  { %v5445_v0 = vmul.f32 %v8443_v45, %v13164_v4  ;;  %v5496_v5 = vrot.slane %v5432_v56, 5  ;;  %v5497_v59 = vrot.slane %v5433_v25, 5  ;;  %v5499_v57 = vrot.slane %v5434_v63, 5  ;;  %v8444_v56 = vld [vmem:[#allocation2 + $0xb1] ss:$0 sm:$0xff] }
 0x4b7   :  { %v5500_v54 = vrot.slane %v5435_v37, 5  ;;  %v5502_v58 = vrot.slane %v5436_v33, 5  ;;  %v5503_v26 = vrot.slane %v5437_v23, 5  ;;  %v5505_v61 = vrot.slane %v5438_v21, 5 }
 0x4b8   :  { %v5506_v1 = vrot.slane %v5439_v2, 5  ;;  %v5508_v7 = vrot.slane %v5440_v40, 5  ;;  %v5509_v9 = vrot.slane %v5441_v31, 5  ;;  %v5446_v28 = vmul.f32 %v8443_v45, %v13149_v13 }
 0x4b9   :  { %v5447_v35 = vmul.f32 %v8443_v45, %v13165_v22  ;;  %v5511_v6 = vrot.slane %v5442_v48, 5  ;;  %v5512_v55 = vrot.slane %v5443_v14, 5  ;;  %v5375_v41 = vsel %vm1374_vm11, %v5373_v27, %v5374_v10 }
 0x4ba   :  { %v5415_v8 = vadd.f32 %v5366_v12, %v5282_v34  ;;  %v5416_v16 = vadd.f32 %v5369_v53, %v5283_v36  ;;  %v5417_v3 = vadd.f32 %v5372_v18, %v5284_v11  ;;  %v5418_v25 = vadd.f32 %v5375_v41, %v5285_v50 }
 0x4bb   :  { %v5498_v63 = vsel %vm1374_vm11, %v5496_v5, %v5497_v59  ;;  %v5501_v37 = vsel %vm1374_vm11, %v5499_v57, %v5500_v54  ;;  %v5504_v33 = vsel %vm1374_vm11, %v5502_v58, %v5503_v26  ;;  %v5507_v23 = vsel %vm1374_vm11, %v5505_v61, %v5506_v1 }
 0x4bc   :  { %v5510_v21 = vsel %vm1374_vm11, %v5508_v7, %v5509_v9  ;;  %v5514_v45 = vrot.slane %v5444_v52, 5  ;;  %v5515_v2 = vrot.slane %v5445_v0, 5  ;;  %v5513_v40 = vsel %vm1374_vm11, %v5511_v6, %v5512_v55 }
 0x4bd   :  { %v5517_v27 = vrot.slane %v5446_v28, 5  ;;  %v5518_v34 = vrot.slane %v5447_v35, 5  ;;  %v5581_v36 = vmul.f32 %v8444_v56, %v9785_v44  ;;  %v5560_v11 = vadd.f32 %v5498_v63, %v5411_v39 }
 0x4be   :  { %v5582_v50 = vmul.f32 %v8444_v56, %v13160_v17  ;;  %v5583_v12 = vmul.f32 %v8444_v56, %v9782_v30  ;;  %v5584_v53 = vmul.f32 %v8444_v56, %v13159_v38  ;;  %v5585_v10 = vmul.f32 %v8444_v56, %v13123_v32 }
 0x4bf   :  { %v5586_v18 = vmul.f32 %v8444_v56, %v13158_v24  ;;  %v5587_v31 = vmul.f32 %v8444_v56, %v13124_v47  ;;  %v5588_v48 = vmul.f32 %v8444_v56, %v13162_v46  ;;  %v5516_v14 = vsel %vm1374_vm11, %v5514_v45, %v5515_v2  ;;  %v8445_v45 = vld [vmem:[#allocation2 + $0xb8] ss:$0 sm:$0xff] }
 0x4c0   :  { %v5561_v52 = vadd.f32 %v5501_v37, %v5412_v60  ;;  %v5589_v0 = vmul.f32 %v8444_v56, %v13125_v43  ;;  %v5590_v39 = vmul.f32 %v8444_v56, %v13163_v42  ;;  %v5562_v5 = vadd.f32 %v5504_v33, %v5413_v51 }
 0x4c1   :  { %v5591_v59 = vmul.f32 %v8444_v56, %v13148_v49  ;;  %v5637_v57 = vrot.slane %v5581_v36, 5  ;;  %v5638_v54 = vrot.slane %v5582_v50, 5  ;;  %v5640_v58 = vrot.slane %v5583_v12, 5 }
 0x4c2   :  { %v5641_v26 = vrot.slane %v5584_v53, 5  ;;  %v5643_v61 = vrot.slane %v5585_v10, 5  ;;  %v5644_v1 = vrot.slane %v5586_v18, 5  ;;  %v5592_v7 = vmul.f32 %v8444_v56, %v13164_v4 }
 0x4c3   :  { %v5593_v9 = vmul.f32 %v8444_v56, %v13149_v13  ;;  %v5646_v28 = vrot.slane %v5587_v31, 5  ;;  %v5647_v35 = vrot.slane %v5588_v48, 5  ;;  %v5563_v60 = vadd.f32 %v5507_v23, %v5414_v19 }
 0x4c4   :  { %v5594_v6 = vmul.f32 %v8444_v56, %v13165_v22  ;;  %v5649_v55 = vrot.slane %v5589_v0, 5  ;;  %v5650_v41 = vrot.slane %v5590_v39, 5  ;;  %v5519_v51 = vsel %vm1374_vm11, %v5517_v27, %v5518_v34 }
 0x4c5   :  { %v5564_v63 = vadd.f32 %v5510_v21, %v5415_v8  ;;  %v5565_v37 = vadd.f32 %v5513_v40, %v5416_v16  ;;  %v5566_v33 = vadd.f32 %v5516_v14, %v5417_v3  ;;  %v5567_v2 = vadd.f32 %v5519_v51, %v5418_v25 }
 0x4c6   :  { %v5639_v36 = vsel %vm1374_vm11, %v5637_v57, %v5638_v54  ;;  %v5642_v50 = vsel %vm1374_vm11, %v5640_v58, %v5641_v26  ;;  %v5645_v12 = vsel %vm1374_vm11, %v5643_v61, %v5644_v1  ;;  %v5648_v53 = vsel %vm1374_vm11, %v5646_v28, %v5647_v35 }
 0x4c7   :  { %v5652_v19 = vrot.slane %v5591_v59, 5  ;;  %v5653_v23 = vrot.slane %v5592_v7, 5  ;;  %v5655_v56 = vrot.slane %v5593_v9, 5  ;;  %v5651_v10 = vsel %vm1374_vm11, %v5649_v55, %v5650_v41 }
 0x4c8   :  { %v5656_v18 = vrot.slane %v5594_v6, 5  ;;  %v5693_v27 = vadd.f32 %v5639_v36, %v5560_v11  ;;  %v5714_v8 = vmul.f32 %v8445_v45, %v9782_v30  ;;  %v5715_v16 = vmul.f32 %v8445_v45, %v13159_v38  ;;  %v8446_v36 = vld [vmem:[#allocation2 + $0xbf] ss:$0 sm:$0xff] }
 0x4c9   :  { %v5716_v3 = vmul.f32 %v8445_v45, %v13123_v32  ;;  %v5717_v25 = vmul.f32 %v8445_v45, %v13158_v24  ;;  %v5718_v21 = vmul.f32 %v8445_v45, %v13124_v47  ;;  %v5694_v40 = vadd.f32 %v5642_v50, %v5561_v52 }
 0x4ca   :  { %v5719_v34 = vmul.f32 %v8445_v45, %v13162_v46  ;;  %v5720_v31 = vmul.f32 %v8445_v45, %v13125_v43  ;;  %v5721_v48 = vmul.f32 %v8445_v45, %v13163_v42  ;;  %v5722_v14 = vmul.f32 %v8445_v45, %v13148_v49 }
 0x4cb   :  { %v5723_v11 = vmul.f32 %v8445_v45, %v13164_v4  ;;  %v5724_v0 = vmul.f32 %v8445_v45, %v13149_v13  ;;  %v5725_v39 = vmul.f32 %v8445_v45, %v13165_v22  ;;  %v5762_v59 = vrot.slane %v5714_v8, 5 }
 0x4cc   :  { %v5763_v57 = vrot.slane %v5715_v16, 5  ;;  %v5765_v54 = vrot.slane %v5716_v3, 5  ;;  %v5766_v58 = vrot.slane %v5717_v25, 5  ;;  %v5768_v26 = vrot.slane %v5718_v21, 5 }
 0x4cd   :  { %v5769_v52 = vrot.slane %v5719_v34, 5  ;;  %v5771_v61 = vrot.slane %v5720_v31, 5  ;;  %v5772_v1 = vrot.slane %v5721_v48, 5  ;;  %v5654_v7 = vsel %vm1374_vm11, %v5652_v19, %v5653_v23 }
 0x4ce   :  { %v5657_v9 = vsel %vm1374_vm11, %v5655_v56, %v5656_v18  ;;  %v5695_v28 = vadd.f32 %v5645_v12, %v5562_v5  ;;  %v5696_v35 = vadd.f32 %v5648_v53, %v5563_v60  ;;  %v5697_v6 = vadd.f32 %v5651_v10, %v5564_v63 }
 0x4cf   :  { %v5698_v55 = vadd.f32 %v5654_v7, %v5565_v37  ;;  %v5699_v41 = vadd.f32 %v5657_v9, %v5566_v33  ;;  %v5700_v51 = vadd.f32 %v5654_v7, %v5567_v2  ;;  %v5764_v45 = vsel %vm1374_vm11, %v5762_v59, %v5763_v57  ;;  %v8447_v59 = vld [vmem:[#allocation2 + $0x96] ss:$0 sm:$0xff] }
 0x4d0   :  { %v5767_v50 = vsel %vm1374_vm11, %v5765_v54, %v5766_v58  ;;  %v5774_v8 = vrot.slane %v5722_v14, 5  ;;  %v5775_v16 = vrot.slane %v5723_v11, 5  ;;  %v5770_v3 = vsel %vm1374_vm11, %v5768_v26, %v5769_v52 }
 0x4d1   :  { %v5773_v25 = vsel %vm1374_vm11, %v5771_v61, %v5772_v1  ;;  %v5777_v19 = vrot.slane %v5724_v0, 5  ;;  %v5778_v23 = vrot.slane %v5725_v39, 5  ;;  %v5810_v56 = vadd.f32 %v5764_v45, %v5693_v27 }
 0x4d2   :  { %v5831_v5 = vmul.f32 %v8446_v36, %v13123_v32  ;;  %v5832_v60 = vmul.f32 %v8446_v36, %v13158_v24  ;;  %v5833_v63 = vmul.f32 %v8446_v36, %v13124_v47  ;;  %v5834_v37 = vmul.f32 %v8446_v36, %v13162_v46 }
 0x4d3   :  { %v5835_v33 = vmul.f32 %v8446_v36, %v13125_v43  ;;  %v5836_v2 = vmul.f32 %v8446_v36, %v13163_v42  ;;  %v5837_v12 = vmul.f32 %v8446_v36, %v13148_v49  ;;  %v5776_v53 = vsel %vm1374_vm11, %v5774_v8, %v5775_v16 }
 0x4d4   :  { %v5838_v10 = vmul.f32 %v8446_v36, %v13164_v4  ;;  %v5839_v18 = vmul.f32 %v8446_v36, %v13149_v13  ;;  %v5840_v27 = vmul.f32 %v8446_v36, %v13165_v22  ;;  %v5871_v21 = vrot.slane %v5831_v5, 5 }
 0x4d5   :  { %v5872_v34 = vrot.slane %v5832_v60, 5  ;;  %v5874_v31 = vrot.slane %v5833_v63, 5  ;;  %v5875_v48 = vrot.slane %v5834_v37, 5  ;;  %v5877_v14 = vrot.slane %v5835_v33, 5 }
 0x4d6   :  { %v5878_v11 = vrot.slane %v5836_v2, 5  ;;  %v5880_v0 = vrot.slane %v5837_v12, 5  ;;  %v5881_v39 = vrot.slane %v5838_v10, 5  ;;  %v5779_v57 = vsel %vm1374_vm11, %v5777_v19, %v5778_v23 }
 0x4d7   :  { %v5811_v54 = vadd.f32 %v5767_v50, %v5694_v40  ;;  %v5812_v58 = vadd.f32 %v5770_v3, %v5695_v28  ;;  %v5813_v26 = vadd.f32 %v5773_v25, %v5696_v35  ;;  %v5814_v52 = vadd.f32 %v5776_v53, %v5697_v6 }
 0x4d8   :  { %v5815_v61 = vadd.f32 %v5779_v57, %v5698_v55  ;;  %v5816_v1 = vadd.f32 %v5776_v53, %v5699_v41  ;;  %v5817_v7 = vadd.f32 %v5773_v25, %v5700_v51  ;;  %v5873_v9 = vsel %vm1374_vm11, %v5871_v21, %v5872_v34  ;;  %v8448_v21 = vld [vmem:[#allocation2 + $0x9d] ss:$0 sm:$0xff] }
 0x4d9   :  { %v5876_v36 = vsel %vm1374_vm11, %v5874_v31, %v5875_v48  ;;  %v5883_v45 = vrot.slane %v5839_v18, 5  ;;  %v5932_v8 = vmul.f32 %v8447_v59, %v13123_v32  ;;  %v5879_v16 = vsel %vm1374_vm11, %v5877_v14, %v5878_v11 }
 0x4da   :  { %v5882_v5 = vsel %vm1374_vm11, %v5880_v0, %v5881_v39  ;;  %v5884_v60 = vrot.slane %v5840_v27, 5  ;;  %v5933_v40 = vmul.f32 %v8447_v59, %v13158_v24  ;;  %v5934_v28 = vmul.f32 %v8447_v59, %v9782_v30 }
 0x4db   :  { %v5935_v35 = vmul.f32 %v8447_v59, %v13159_v38  ;;  %v5936_v6 = vmul.f32 %v8447_v59, %v9785_v44  ;;  %v5937_v55 = vmul.f32 %v8447_v59, %v13160_v17  ;;  %v5938_v41 = vmul.f32 %v8447_v59, %v9788_v29 }
 0x4dc   :  { %v5939_v51 = vmul.f32 %v8447_v59, %v13161_v62  ;;  %v5940_v50 = vmul.f32 %v8447_v59, %v13124_v47  ;;  %v5941_v3 = vmul.f32 %v8447_v59, %v13162_v46  ;;  %v5972_v25 = vrot.slane %v5932_v8, 6 }
 0x4dd   :  { %v5973_v19 = vrot.slane %v5933_v40, 6  ;;  %v5975_v23 = vrot.slane %v5934_v28, 6  ;;  %v5976_v63 = vrot.slane %v5935_v35, 6  ;;  %v5978_v37 = vrot.slane %v5936_v6, 6 }
 0x4de   :  { %v5979_v33 = vrot.slane %v5937_v55, 6  ;;  %v5981_v2 = vrot.slane %v5938_v41, 6  ;;  %v5982_v12 = vrot.slane %v5939_v51, 6  ;;  %v5885_v53 = vsel %vm1374_vm11, %v5883_v45, %v5884_v60 }
 0x4df   :  { %v5911_v10 = vadd.f32 %v5873_v9, %v5810_v56  ;;  %v5912_v18 = vadd.f32 %v5876_v36, %v5811_v54  ;;  %v5913_v27 = vadd.f32 %v5879_v16, %v5812_v58  ;;  %v5914_v34 = vadd.f32 %v5882_v5, %v5813_v26 }
 0x4e0   :  { %v5915_v31 = vadd.f32 %v5885_v53, %v5814_v52  ;;  %v5916_v48 = vadd.f32 %v5882_v5, %v5815_v61  ;;  %v5917_v14 = vadd.f32 %v5879_v16, %v5816_v1  ;;  %v5918_v11 = vadd.f32 %v5876_v36, %v5817_v7 }
 0x4e1   :  { %v5974_v0 = vsel %vm1357_vm10, %v5972_v25, %v5973_v19  ;;  %v5977_v39 = vsel %vm1357_vm10, %v5975_v23, %v5976_v63  ;;  %v5984_v59 = vrot.slane %v5940_v50, 6  ;;  %v5980_v57 = vsel %vm1357_vm10, %v5978_v37, %v5979_v33 }
 0x4e2   :  { %v5983_v8 = vsel %vm1357_vm10, %v5981_v2, %v5982_v12  ;;  %v5985_v40 = vrot.slane %v5941_v3, 6  ;;  %v6033_v56 = vmul.f32 %v8448_v21, %v9782_v30  ;;  %v6034_v54 = vmul.f32 %v8448_v21, %v13159_v38  ;;  %v8449_v12 = vld [vmem:[#allocation2 + $0xa4] ss:$0 sm:$0xff] }
 0x4e3   :  { %v6035_v58 = vmul.f32 %v8448_v21, %v9785_v44  ;;  %v6036_v26 = vmul.f32 %v8448_v21, %v13160_v17  ;;  %v6037_v52 = vmul.f32 %v8448_v21, %v9788_v29  ;;  %v6012_v61 = vadd.f32 %v5974_v0, %v5911_v10 }
 0x4e4   :  { %v6038_v1 = vmul.f32 %v8448_v21, %v13161_v62  ;;  %v6039_v7 = vmul.f32 %v8448_v21, %v13123_v32  ;;  %v6040_v9 = vmul.f32 %v8448_v21, %v13158_v24  ;;  %v6041_v36 = vmul.f32 %v8448_v21, %v13124_v47 }
 0x4e5   :  { %v6042_v45 = vmul.f32 %v8448_v21, %v13162_v46  ;;  %v6043_v16 = vmul.f32 %v8448_v21, %v13125_v43  ;;  %v6044_v5 = vmul.f32 %v8448_v21, %v13163_v42  ;;  %v6081_v60 = vrot.slane %v6033_v56, 6 }
 0x4e6   :  { %v6082_v28 = vrot.slane %v6034_v54, 6  ;;  %v6084_v35 = vrot.slane %v6035_v58, 6  ;;  %v6085_v6 = vrot.slane %v6036_v26, 6  ;;  %v6087_v55 = vrot.slane %v6037_v52, 6 }
 0x4e7   :  { %v6088_v41 = vrot.slane %v6038_v1, 6  ;;  %v6090_v51 = vrot.slane %v6039_v7, 6  ;;  %v6091_v50 = vrot.slane %v6040_v9, 6  ;;  %v5986_v3 = vsel %vm1357_vm10, %v5984_v59, %v5985_v40 }
 0x4e8   :  { %v6013_v25 = vadd.f32 %v5977_v39, %v5912_v18  ;;  %v6014_v19 = vadd.f32 %v5980_v57, %v5913_v27  ;;  %v6015_v23 = vadd.f32 %v5983_v8, %v5914_v34  ;;  %v6016_v63 = vadd.f32 %v5980_v57, %v5915_v31 }
 0x4e9   :  { %v6017_v37 = vadd.f32 %v5977_v39, %v5916_v48  ;;  %v6018_v33 = vadd.f32 %v5974_v0, %v5917_v14  ;;  %v6019_v2 = vadd.f32 %v5986_v3, %v5918_v11  ;;  %v6083_v53 = vsel %vm1357_vm10, %v6081_v60, %v6082_v28 }
 0x4ea   :  { %v6086_v10 = vsel %vm1357_vm10, %v6084_v35, %v6085_v6  ;;  %v6093_v21 = vrot.slane %v6041_v36, 6  ;;  %v6094_v56 = vrot.slane %v6042_v45, 6  ;;  %v6089_v54 = vsel %vm1357_vm10, %v6087_v55, %v6088_v41 }
 0x4eb   :  { %v6092_v58 = vsel %vm1357_vm10, %v6090_v51, %v6091_v50  ;;  %v6096_v26 = vrot.slane %v6043_v16, 6  ;;  %v6097_v59 = vrot.slane %v6044_v5, 6  ;;  %v6129_v18 = vadd.f32 %v6083_v53, %v6012_v61 }
 0x4ec   :  { %v6150_v27 = vmul.f32 %v8449_v12, %v9785_v44  ;;  %v6151_v34 = vmul.f32 %v8449_v12, %v13160_v17  ;;  %v6152_v31 = vmul.f32 %v8449_v12, %v9788_v29  ;;  %v6153_v48 = vmul.f32 %v8449_v12, %v13161_v62 }
 0x4ed   :  { %v6154_v14 = vmul.f32 %v8449_v12, %v9782_v30  ;;  %v6155_v11 = vmul.f32 %v8449_v12, %v13159_v38  ;;  %v6156_v0 = vmul.f32 %v8449_v12, %v13123_v32  ;;  %v6095_v39 = vsel %vm1357_vm10, %v6093_v21, %v6094_v56 }
 0x4ee   :  { %v6157_v57 = vmul.f32 %v8449_v12, %v13158_v24  ;;  %v6158_v8 = vmul.f32 %v8449_v12, %v13124_v47  ;;  %v6159_v40 = vmul.f32 %v8449_v12, %v13162_v46  ;;  %v6130_v52 = vadd.f32 %v6086_v10, %v6013_v25 }
 0x4ef   :  { %v6131_v61 = vadd.f32 %v6089_v54, %v6014_v19  ;;  %v6160_v1 = vmul.f32 %v8449_v12, %v13125_v43  ;;  %v6161_v7 = vmul.f32 %v8449_v12, %v13163_v42  ;;  %v6206_v9 = vrot.slane %v6150_v27, 6 }
 0x4f0   :  { %v6207_v36 = vrot.slane %v6151_v34, 6  ;;  %v6209_v45 = vrot.slane %v6152_v31, 6  ;;  %v6210_v16 = vrot.slane %v6153_v48, 6  ;;  %v6212_v5 = vrot.slane %v6154_v14, 6  ;;  %v8450_v34 = vld [vmem:[#allocation2 + $0xab] ss:$0 sm:$0xff] }
 0x4f1   :  { %v6213_v60 = vrot.slane %v6155_v11, 6  ;;  %v6215_v28 = vrot.slane %v6156_v0, 6  ;;  %v6216_v35 = vrot.slane %v6157_v57, 6  ;;  %v6162_v6 = vmul.f32 %v8449_v12, %v13148_v49 }
 0x4f2   :  { %v6163_v55 = vmul.f32 %v8449_v12, %v13164_v4  ;;  %v6218_v41 = vrot.slane %v6158_v8, 6  ;;  %v6219_v51 = vrot.slane %v6159_v40, 6  ;;  %v6098_v50 = vsel %vm1357_vm10, %v6096_v26, %v6097_v59 }
 0x4f3   :  { %v6132_v3 = vadd.f32 %v6086_v10, %v6015_v23  ;;  %v6221_v25 = vrot.slane %v6160_v1, 6  ;;  %v6222_v19 = vrot.slane %v6161_v7, 6  ;;  %v6133_v21 = vadd.f32 %v6083_v53, %v6016_v63 }
 0x4f4   :  { %v6134_v56 = vadd.f32 %v6092_v58, %v6017_v37  ;;  %v6135_v54 = vadd.f32 %v6095_v39, %v6018_v33  ;;  %v6136_v27 = vadd.f32 %v6098_v50, %v6019_v2  ;;  %v6208_v31 = vsel %vm1357_vm10, %v6206_v9, %v6207_v36 }
 0x4f5   :  { %v6211_v48 = vsel %vm1357_vm10, %v6209_v45, %v6210_v16  ;;  %v6214_v14 = vsel %vm1357_vm10, %v6212_v5, %v6213_v60  ;;  %v6217_v12 = vsel %vm1357_vm10, %v6215_v28, %v6216_v35  ;;  %v6220_v11 = vsel %vm1357_vm10, %v6218_v41, %v6219_v51 }
 0x4f6   :  { %v6224_v0 = vrot.slane %v6162_v6, 6  ;;  %v6225_v26 = vrot.slane %v6163_v55, 6  ;;  %v6262_v23 = vadd.f32 %v6208_v31, %v6129_v18  ;;  %v6223_v10 = vsel %vm1357_vm10, %v6221_v25, %v6222_v19 }
 0x4f7   :  { %v6263_v63 = vadd.f32 %v6211_v48, %v6130_v52  ;;  %v6283_v37 = vmul.f32 %v8450_v34, %v9788_v29  ;;  %v6284_v33 = vmul.f32 %v8450_v34, %v13161_v62  ;;  %v6285_v2 = vmul.f32 %v8450_v34, %v9785_v44  ;;  %v8451_v48 = vld [vmem:[#allocation2 + $0xb2] ss:$0 sm:$0xff] }
 0x4f8   :  { %v6286_v53 = vmul.f32 %v8450_v34, %v13160_v17  ;;  %v6287_v58 = vmul.f32 %v8450_v34, %v9782_v30  ;;  %v6288_v59 = vmul.f32 %v8450_v34, %v13159_v38  ;;  %v6289_v39 = vmul.f32 %v8450_v34, %v13123_v32 }
 0x4f9   :  { %v6290_v57 = vmul.f32 %v8450_v34, %v13158_v24  ;;  %v6291_v18 = vmul.f32 %v8450_v34, %v13124_v47  ;;  %v6292_v8 = vmul.f32 %v8450_v34, %v13162_v46  ;;  %v6264_v40 = vadd.f32 %v6208_v31, %v6131_v61 }
 0x4fa   :  { %v6265_v29 = vadd.f32 %v6214_v14, %v6132_v3  ;;  %v6293_v62 = vmul.f32 %v8450_v34, %v13125_v43  ;;  %v6294_v52 = vmul.f32 %v8450_v34, %v13163_v42  ;;  %v6295_v1 = vmul.f32 %v8450_v34, %v13148_v49 }
 0x4fb   :  { %v6296_v7 = vmul.f32 %v8450_v34, %v13164_v4  ;;  %v6347_v9 = vrot.slane %v6283_v37, 6  ;;  %v6348_v36 = vrot.slane %v6284_v33, 6  ;;  %v6350_v45 = vrot.slane %v6285_v2, 6 }
 0x4fc   :  { %v6351_v16 = vrot.slane %v6286_v53, 6  ;;  %v6353_v5 = vrot.slane %v6287_v58, 6  ;;  %v6354_v60 = vrot.slane %v6288_v59, 6  ;;  %v6356_v28 = vrot.slane %v6289_v39, 6 }
 0x4fd   :  { %v6357_v35 = vrot.slane %v6290_v57, 6  ;;  %v6359_v6 = vrot.slane %v6291_v18, 6  ;;  %v6360_v55 = vrot.slane %v6292_v8, 6  ;;  %v6297_v61 = vmul.f32 %v8450_v34, %v13149_v13 }
 0x4fe   :  { %v6298_v41 = vmul.f32 %v8450_v34, %v13165_v22  ;;  %v6362_v51 = vrot.slane %v6293_v62, 6  ;;  %v6363_v50 = vrot.slane %v6294_v52, 6  ;;  %v6226_v3 = vsel %vm1357_vm10, %v6224_v0, %v6225_v26 }
 0x4ff   :  { %v6266_v25 = vadd.f32 %v6217_v12, %v6133_v21  ;;  %v6267_v19 = vadd.f32 %v6220_v11, %v6134_v56  ;;  %v6268_v31 = vadd.f32 %v6223_v10, %v6135_v54  ;;  %v6269_v14 = vadd.f32 %v6226_v3, %v6136_v27  ;;  %v8452_v3 = vld [vmem:[#allocation2 + $0xb9] ss:$0 sm:$0xff] }
 0x500   :  { %v6349_v37 = vsel %vm1357_vm10, %v6347_v9, %v6348_v36  ;;  %v6352_v33 = vsel %vm1357_vm10, %v6350_v45, %v6351_v16  ;;  %v6355_v2 = vsel %vm1357_vm10, %v6353_v5, %v6354_v60  ;;  %v6358_v53 = vsel %vm1357_vm10, %v6356_v28, %v6357_v35 }
 0x501   :  { %v6361_v58 = vsel %vm1357_vm10, %v6359_v6, %v6360_v55  ;;  %v6365_v34 = vrot.slane %v6295_v1, 6  ;;  %v6366_v59 = vrot.slane %v6296_v7, 6  ;;  %v6364_v39 = vsel %vm1357_vm10, %v6362_v51, %v6363_v50 }
 0x502   :  { %v6368_v0 = vrot.slane %v6297_v61, 6  ;;  %v6369_v21 = vrot.slane %v6298_v41, 6  ;;  %v6432_v56 = vmul.f32 %v8451_v48, %v9785_v44  ;;  %v6411_v54 = vadd.f32 %v6349_v37, %v6262_v23 }
 0x503   :  { %v6433_v27 = vmul.f32 %v8451_v48, %v13160_v17  ;;  %v6434_v12 = vmul.f32 %v8451_v48, %v9782_v30  ;;  %v6435_v11 = vmul.f32 %v8451_v48, %v13159_v38  ;;  %v6436_v26 = vmul.f32 %v8451_v48, %v13123_v32 }
 0x504   :  { %v6437_v10 = vmul.f32 %v8451_v48, %v13158_v24  ;;  %v6438_v57 = vmul.f32 %v8451_v48, %v13124_v47  ;;  %v6439_v18 = vmul.f32 %v8451_v48, %v13162_v46  ;;  %v6367_v8 = vsel %vm1357_vm10, %v6365_v34, %v6366_v59 }
 0x505   :  { %v6412_v62 = vadd.f32 %v6352_v33, %v6263_v63  ;;  %v6440_v44 = vmul.f32 %v8451_v48, %v13125_v43  ;;  %v6441_v23 = vmul.f32 %v8451_v48, %v13163_v42  ;;  %v6413_v17 = vadd.f32 %v6355_v2, %v6264_v40 }
 0x506   :  { %v6442_v52 = vmul.f32 %v8451_v48, %v13148_v49  ;;  %v6488_v1 = vrot.slane %v6432_v56, 6  ;;  %v6489_v7 = vrot.slane %v6433_v27, 6  ;;  %v6491_v9 = vrot.slane %v6434_v12, 6 }
 0x507   :  { %v6492_v36 = vrot.slane %v6435_v11, 6  ;;  %v6494_v45 = vrot.slane %v6436_v26, 6  ;;  %v6495_v16 = vrot.slane %v6437_v10, 6  ;;  %v6443_v5 = vmul.f32 %v8451_v48, %v13164_v4 }
 0x508   :  { %v6444_v60 = vmul.f32 %v8451_v48, %v13149_v13  ;;  %v6497_v28 = vrot.slane %v6438_v57, 6  ;;  %v6498_v35 = vrot.slane %v6439_v18, 6  ;;  %v6414_v63 = vadd.f32 %v6358_v53, %v6265_v29 }
 0x509   :  { %v6445_v6 = vmul.f32 %v8451_v48, %v13165_v22  ;;  %v6500_v55 = vrot.slane %v6440_v44, 6  ;;  %v6501_v61 = vrot.slane %v6441_v23, 6  ;;  %v6370_v40 = vsel %vm1357_vm10, %v6368_v0, %v6369_v21 }
 0x50a   :  { %v6415_v41 = vadd.f32 %v6361_v58, %v6266_v25  ;;  %v6416_v51 = vadd.f32 %v6364_v39, %v6267_v19  ;;  %v6417_v50 = vadd.f32 %v6367_v8, %v6268_v31  ;;  %v6418_v37 = vadd.f32 %v6370_v40, %v6269_v14 }
 0x50b   :  { %v6490_v33 = vsel %vm1357_vm10, %v6488_v1, %v6489_v7  ;;  %v6493_v2 = vsel %vm1357_vm10, %v6491_v9, %v6492_v36  ;;  %v6496_v34 = vsel %vm1357_vm10, %v6494_v45, %v6495_v16  ;;  %v6499_v59 = vsel %vm1357_vm10, %v6497_v28, %v6498_v35 }
 0x50c   :  { %v6503_v29 = vrot.slane %v6442_v52, 6  ;;  %v6504_v53 = vrot.slane %v6443_v5, 6  ;;  %v6506_v48 = vrot.slane %v6444_v60, 6  ;;  %v6502_v56 = vsel %vm1357_vm10, %v6500_v55, %v6501_v61  ;;  %v8453_v60 = vld [vmem:[#allocation2 + $0xc0] ss:$0 sm:$0xff] }
 0x50d   :  { %v6507_v27 = vrot.slane %v6445_v6, 6  ;;  %v6544_v0 = vadd.f32 %v6490_v33, %v6411_v54  ;;  %v6565_v25 = vmul.f32 %v8452_v3, %v9782_v30  ;;  %v6566_v19 = vmul.f32 %v8452_v3, %v13159_v38 }
 0x50e   :  { %v6567_v31 = vmul.f32 %v8452_v3, %v13123_v32  ;;  %v6568_v14 = vmul.f32 %v8452_v3, %v13158_v24  ;;  %v6569_v58 = vmul.f32 %v8452_v3, %v13124_v47  ;;  %v6545_v39 = vadd.f32 %v6493_v2, %v6412_v62 }
 0x50f   :  { %v6570_v21 = vmul.f32 %v8452_v3, %v13162_v46  ;;  %v6571_v12 = vmul.f32 %v8452_v3, %v13125_v43  ;;  %v6572_v11 = vmul.f32 %v8452_v3, %v13163_v42  ;;  %v6546_v26 = vadd.f32 %v6496_v34, %v6413_v17 }
 0x510   :  { %v6573_v54 = vmul.f32 %v8452_v3, %v13148_v49  ;;  %v6574_v30 = vmul.f32 %v8452_v3, %v13164_v4  ;;  %v6575_v38 = vmul.f32 %v8452_v3, %v13149_v13  ;;  %v6613_v10 = vrot.slane %v6565_v25, 6 }
 0x511   :  { %v6614_v57 = vrot.slane %v6566_v19, 6  ;;  %v6616_v18 = vrot.slane %v6567_v31, 6  ;;  %v6617_v8 = vrot.slane %v6568_v14, 6  ;;  %v6619_v44 = vrot.slane %v6569_v58, 6  ;;  %v13166_v31 = vld [vmem:[#allocation5_spill] sm:$0xff]  ;;  %v13167_v14 = vld [vmem:[#allocation40_spill] sm:$0xff] }
 0x512   :  { %v6620_v23 = vrot.slane %v6570_v21, 6  ;;  %v6622_v62 = vrot.slane %v6571_v12, 6  ;;  %v6623_v52 = vrot.slane %v6572_v11, 6  ;;  %v6505_v1 = vsel %vm1357_vm10, %v6503_v29, %v6504_v53 }
 0x513   :  { %v6508_v7 = vsel %vm1357_vm10, %v6506_v48, %v6507_v27  ;;  %v6547_v9 = vadd.f32 %v6499_v59, %v6414_v63  ;;  %v6548_v17 = vadd.f32 %v6502_v56, %v6415_v41  ;;  %v6549_v36 = vadd.f32 %v6505_v1, %v6416_v51 }
 0x514   :  { %v6550_v45 = vadd.f32 %v6508_v7, %v6417_v50  ;;  %v6551_v16 = vadd.f32 %v6505_v1, %v6418_v37  ;;  %v6576_v5 = vmul.f32 %v8452_v3, %v13165_v22  ;;  %v6615_v28 = vsel %vm1357_vm10, %v6613_v10, %v6614_v57  ;;  %v11145_v57 = vld [vmem:[%s12975_s2] sm:$0xff] }
 0x515   :  { %v6618_v35 = vsel %vm1357_vm10, %v6616_v18, %v6617_v8  ;;  %v6625_v6 = vrot.slane %v6573_v54, 6  ;;  %v6626_v55 = vrot.slane %v6574_v30, 6  ;;  %v6621_v61 = vsel %vm1357_vm10, %v6619_v44, %v6620_v23 }
 0x516   :  { %v6624_v40 = vsel %vm1357_vm10, %v6622_v62, %v6623_v52  ;;  %v6628_v33 = vrot.slane %v6575_v38, 6  ;;  %v6661_v2 = vadd.f32 %v6615_v28, %v6544_v0  ;;  %v6662_v63 = vadd.f32 %v6618_v35, %v6545_v39  ;;  %v13171_v62 = vld [vmem:[#allocation39_spill] sm:$0xff]  ;;  %v13180_v35 = vld [vmem:[#allocation52_spill] sm:$0xff] }
 0x517   :  { %v6682_v41 = vmul.f32 %v8453_v60, %v13123_v32  ;;  %v6683_v51 = vmul.f32 %v8453_v60, %v13158_v24  ;;  %v6684_v50 = vmul.f32 %v8453_v60, %v13124_v47  ;;  %v6685_v3 = vmul.f32 %v8453_v60, %v13162_v46 }
 0x518   :  { %v6686_v37 = vmul.f32 %v8453_v60, %v13125_v43  ;;  %v6687_v34 = vmul.f32 %v8453_v60, %v13163_v42  ;;  %v6688_v59 = vmul.f32 %v8453_v60, %v13148_v49  ;;  %v6689_v29 = vmul.f32 %v8453_v60, %v13164_v4 }
 0x519   :  { %v6690_v53 = vmul.f32 %v8453_v60, %v13149_v13  ;;  %v6691_v48 = vmul.f32 %v8453_v60, %v13165_v22  ;;  %v6722_v56 = vrot.slane %v6682_v41, 6  ;;  %v6723_v32 = vrot.slane %v6683_v51, 6  ;;  %v13188_v41 = vld [vmem:[#allocation54_spill] sm:$0xff] }
 0x51a   :  { %v6725_v27 = vrot.slane %v6684_v50, 6  ;;  %v6726_v24 = vrot.slane %v6685_v3, 6  ;;  %v6728_v0 = vrot.slane %v6686_v37, 6  ;;  %v6629_v47 = vrot.slane %v6576_v5, 6  ;;  %v13174_v5 = vld [vmem:[#allocation42_spill] sm:$0xff] }
 0x51b   :  { %v6663_v25 = vadd.f32 %v6621_v61, %v6546_v26  ;;  %v6729_v46 = vrot.slane %v6687_v34, 6  ;;  %v6731_v19 = vrot.slane %v6688_v59, 6  ;;  %v6724_v43 = vsel %vm1357_vm10, %v6722_v56, %v6723_v32  ;;  %v13184_v61 = vld [vmem:[#allocation53_spill] sm:$0xff] }
 0x51c   :  { %v6727_v42 = vsel %vm1357_vm10, %v6725_v27, %v6726_v24  ;;  %v6732_v49 = vrot.slane %v6689_v29, 6  ;;  %v6780_v4 = vsub.s32 6, %v13166_v31  ;;  %v13168_v13 = vrot.slane %v13167_v14, 7  ;;  %v32_v32 = vld [vmem:[%s12975_s2 + $0x8] sm:$0xff] }
 0x51d   :  { %v6664_v58 = vadd.f32 %v6624_v40, %v6547_v9  ;;  %v6762_v39 = vadd.f32 %v6724_v43, %v6661_v2  ;;  %v6763_v21 = vadd.f32 %v6727_v42, %v6662_v63  ;;  %v6627_v12 = vsel %vm1357_vm10, %v6625_v6, %v6626_v55  ;;  %v13186_v2 = vld [vmem:[#allocation45_spill] sm:$0xff] }
 0x51e   :  { %v11137_v22 = vsel %vm1424_vm13, %v10278_v15, %v13168_v13  ;;  %v6730_v11 = vsel %vm1357_vm10, %v6728_v0, %v6729_v46  ;;  %v6734_v26 = vrot.slane %v6690_v53, 6  ;;  %v6735_v54 = vrot.slane %v6691_v48, 6  ;;  %v9119_v53 = vld [vmem:[#allocation2 + $0x90] ss:$0 sm:$0xff]  ;;  %v13190_v48 = vld [vmem:[#allocation25_spill] sm:$0xff]  ;;  %v13191_v0 = vld [vmem:[#allocation36_spill] sm:$0xff] }
 0x51f   :  { %13169 = vst [vmem:[#allocation23_spill] sm:$0xff] %v11137_v22  ;;  %v6630_v30 = vsel %vm1357_vm10, %v6628_v33, %v6629_v47  ;;  %v6665_v38 = vadd.f32 %v6627_v12, %v6548_v17  ;;  %v6764_v10 = vadd.f32 %v6730_v11, %v6663_v25  ;;  %v11148_v15 = vrot.slane %v11145_v57, %v6780_v4  ;;  %v13192_v25 = vld [vmem:[#allocation37_spill] sm:$0xff] }
 0x520   :  { %v6666_v18 = vadd.f32 %v6630_v30, %v6549_v36  ;;  %v6667_v8 = vadd.f32 %v6627_v12, %v6550_v45  ;;  %v6668_v44 = vadd.f32 %v6624_v40, %v6551_v16  ;;  %v6733_v23 = vsel %vm1357_vm10, %v6731_v19, %v6732_v49  ;;  %v13176_v36 = vld [vmem:[#allocation51_spill] sm:$0xff]  ;;  %v13193_v19 = vld [vmem:[#allocation46_spill] sm:$0xff] }
 0x521   :  { %13170 = vst [vmem:[#allocation24_spill] sm:$0xff] %v11148_v15  ;;  %v13172_v52 = vrot.slane %v13171_v62, 7  ;;  %v6765_v7 = vadd.f32 %v6733_v23, %v6664_v58  ;;  %v11158_v9 = vadd.f32 %v11148_v15, %v6762_v39  ;;  %v11161_v17 = vadd.f32 %v11148_v15, %v6763_v21  ;;  %v13178_v16 = vld [vmem:[#allocation43_spill] sm:$0xff]  ;;  %v9120_v49 = vld [vmem:[#allocation2 + $0x97] ss:$0 sm:$0xff] }
 0x522   :  { %v13175_v60 = vrot.slane %v13174_v5, 7  ;;  %v13179_v28 = vrot.slane %v13178_v16, 7  ;;  %v6736_v33 = vsel %vm1357_vm10, %v6734_v26, %v6735_v54  ;;  %v13187_v63 = vrot.slane %v13186_v2, 7  ;;  %v13194_v21 = vld [vmem:[#allocation47_spill] sm:$0xff]  ;;  %v13195_v26 = vld [vmem:[#allocation6_spill] sm:$0xff] }
 0x523   :  { %v11155_v1 = vsel %vm1424_vm13, %v10281_v20, %v13172_v52  ;;  %v13182_v20 = vld [vmem:[#allocation44_spill] sm:$0xff]  ;;  %v6766_v50 = vadd.f32 %v6736_v33, %v6665_v38  ;;  %v11189_v3 = vadd.f32 %v11148_v15, %v6764_v10  ;;  %v6798_v37 = vadd.f32 %v11161_v17, %v11158_v9 }
 0x524   :  { %13173 = vst [vmem:[#allocation41_spill] sm:$0xff] %v11155_v1  ;;  %v11167_v45 = vsel %vm1424_vm13, %v13176_v36, %v13175_v60  ;;  %v11173_v6 = vsel %vm1424_vm13, %v13180_v35, %v13179_v28  ;;  %v13183_v55 = vrot.slane %v13182_v20, 7  ;;  %v11186_v51 = vsel %vm1424_vm13, %v13188_v41, %v13187_v63  ;;  %v13197_v38 = vld [vmem:[#allocation48_spill] sm:$0xff]  ;;  %v9121_v20 = vld [vmem:[#allocation2 + $0x9e] ss:$0 sm:$0xff] }
 0x525   :  { %13177 = vst [vmem:[#allocation38_spill] sm:$0xff] %v11167_v45  ;;  %13181 = vst [vmem:[#allocation28_spill] sm:$0xff] %v11173_v6  ;;  %v6767_v34 = vadd.f32 %v6733_v23, %v6666_v18  ;;  %v6768_v59 = vadd.f32 %v6730_v11, %v6667_v8  ;;  %v6769_v29 = vadd.f32 %v6727_v42, %v6668_v44  ;;  %v6908_v11 = vsub.s32 7, %v13166_v31 }
 0x526   :  { %v11179_v40 = vsel %vm1424_vm13, %v13184_v61, %v13183_v55  ;;  %13189 = vst [vmem:[#allocation30_spill] sm:$0xff] %v11186_v51  ;;  %v1451_v56 = vmul.f32 %v9119_v53, %v13190_v48  ;;  %v11198_v27 = vadd.f32 %v11148_v15, %v6765_v7  ;;  %v6799_v24 = vadd.f32 %v6798_v37, %v11189_v3  ;;  %v13198_v37 = vld [vmem:[#allocation49_spill] sm:$0xff] }
 0x527   :  { %13185 = vst [vmem:[#allocation29_spill] sm:$0xff] %v11179_v40  ;;  %v1452_v47 = vmul.f32 %v9119_v53, %v13191_v0  ;;  %v1453_v46 = vmul.f32 %v9119_v53, %v13192_v25  ;;  %v1454_v43 = vmul.f32 %v9119_v53, %v13193_v19  ;;  %v1477_v42 = vmul.f32 %v9120_v49, %v13191_v0 }
 0x528   :  { %v1478_v4 = vmul.f32 %v9120_v49, %v13192_v25  ;;  %v1479_v14 = vmul.f32 %v9120_v49, %v13193_v19  ;;  %v11208_v13 = vadd.f32 %v11148_v15, %v6766_v50  ;;  %v6800_v58 = vadd.f32 %v6799_v24, %v11198_v27 }
 0x529   :  { %v1480_v39 = vmul.f32 %v9120_v49, %v13190_v48  ;;  %v1481_v12 = vmul.f32 %v9120_v49, %v13194_v21  ;;  %v11215_v54 = vrot.slane %v32_v32, %v13195_v26  ;;  %v1455_v30 = vmul.f32 %v9119_v53, %v13194_v21 }
 0x52a   :  { %v1482_v10 = vmul.f32 %v9120_v49, %v13197_v38  ;;  %v11220_v18 = vadd.f32 %v11148_v15, %v6767_v34  ;;  %v11223_v8 = vadd.f32 %v11148_v15, %v6768_v59  ;;  %v11226_v44 = vadd.f32 %v11148_v15, %v6769_v29  ;;  %v9122_v49 = vld [vmem:[#allocation2 + $0xa5] ss:$0 sm:$0xff] }
 0x52b   :  { %13196 = vst [vmem:[#allocation31_spill] sm:$0xff] %v11215_v54  ;;  %v6801_v23 = vadd.f32 %v6800_v58, %v11208_v13  ;;  %v1491_v62 = vadd.f32 %v1477_v42, %v1451_v56  ;;  %v1492_v52 = vadd.f32 %v1478_v4, %v1452_v47  ;;  %v1493_v7 = vadd.f32 %v1479_v14, %v1453_v46 }
 0x52c   :  { %v1494_v5 = vadd.f32 %v1478_v4, %v1454_v43  ;;  %v1495_v36 = vadd.f32 %v1477_v42, %v1453_v46  ;;  %v1496_v16 = vadd.f32 %v1480_v39, %v1452_v47  ;;  %v1497_v28 = vadd.f32 %v1481_v12, %v1451_v56 }
 0x52d   :  { %v6802_v60 = vadd.f32 %v6801_v23, %v11220_v18  ;;  %v1498_v35 = vadd.f32 %v1482_v10, %v1455_v30  ;;  %v1511_v55 = vmul.f32 %v9121_v20, %v13192_v25  ;;  %v1512_v61 = vmul.f32 %v9121_v20, %v13193_v19  ;;  %v13199_v23 = vld [vmem:[#allocation50_spill] sm:$0xff] }
 0x52e   :  { %v1513_v33 = vmul.f32 %v9121_v20, %v13191_v0  ;;  %v1514_v63 = vmul.f32 %v9121_v20, %v13190_v48  ;;  %v1515_v41 = vmul.f32 %v9121_v20, %v13194_v21  ;;  %v1516_v50 = vmul.f32 %v9121_v20, %v13197_v38 }
 0x52f   :  { %v6803_v2 = vadd.f32 %v6802_v60, %v11223_v8  ;;  %v1517_v34 = vmul.f32 %v9121_v20, %v13198_v37  ;;  %v1526_v59 = vadd.f32 %v1511_v55, %v1491_v62  ;;  %v1527_v29 = vadd.f32 %v1512_v61, %v1492_v52  ;;  %v9123_v61 = vld [vmem:[#allocation2 + $0xac] ss:$0 sm:$0xff] }
 0x530   :  { %v1528_v53 = vadd.f32 %v1511_v55, %v1493_v7  ;;  %v1529_v32 = vadd.f32 %v1513_v33, %v1494_v5  ;;  %v1530_v24 = vadd.f32 %v1514_v63, %v1495_v36  ;;  %v1531_v47 = vadd.f32 %v1515_v41, %v1496_v16 }
 0x531   :  { %v6804_v56 = vadd.f32 %v6803_v2, %v11226_v44  ;;  %v1532_v46 = vadd.f32 %v1516_v50, %v1497_v28  ;;  %v1533_v43 = vadd.f32 %v1517_v34, %v1498_v35  ;;  %v1547_v42 = vmul.f32 %v9122_v49, %v13193_v19 }
 0x532   :  { %v1548_v4 = vmul.f32 %v9122_v49, %v13192_v25  ;;  %v1549_v58 = vmul.f32 %v9122_v49, %v13191_v0  ;;  %v1550_v39 = vmul.f32 %v9122_v49, %v13190_v48  ;;  %v1551_v12 = vmul.f32 %v9122_v49, %v13194_v21 }
 0x533   :  { %v6805_v14 = vrot.slane %v6804_v56, 4  ;;  %v1552_v30 = vmul.f32 %v9122_v49, %v13197_v38  ;;  %v1553_v10 = vmul.f32 %v9122_v49, %v13198_v37  ;;  %v1554_v62 = vmul.f32 %v9122_v49, %v13199_v23 }
 0x534   :  { %v1563_v52 = vadd.f32 %v1547_v42, %v1526_v59  ;;  %v1564_v5 = vadd.f32 %v1548_v4, %v1527_v29  ;;  %v1565_v60 = vadd.f32 %v1549_v58, %v1528_v53  ;;  %v1566_v36 = vadd.f32 %v1550_v39, %v1529_v32  ;;  %v9124_v4 = vld [vmem:[#allocation2 + $0xb3] ss:$0 sm:$0xff] }
 0x535   :  { %v6806_v7 = vadd.f32 %v6805_v14, %v6804_v56  ;;  %v1567_v16 = vadd.f32 %v1551_v12, %v1530_v24  ;;  %v1568_v28 = vadd.f32 %v1552_v30, %v1531_v47  ;;  %v1569_v35 = vadd.f32 %v1553_v10, %v1532_v46 }
 0x536   :  { %v1570_v20 = vadd.f32 %v1554_v62, %v1533_v43  ;;  %v1583_v33 = vmul.f32 %v9123_v61, %v13192_v25  ;;  %v1584_v2 = vmul.f32 %v9123_v61, %v13191_v0  ;;  %v1585_v63 = vmul.f32 %v9123_v61, %v13190_v48 }
 0x537   :  { %v6807_v55 = vrot.slane %v6806_v7, 2  ;;  %v1586_v41 = vmul.f32 %v9123_v61, %v13194_v21  ;;  %v1587_v50 = vmul.f32 %v9123_v61, %v13197_v38  ;;  %v1588_v34 = vmul.f32 %v9123_v61, %v13198_v37 }
 0x538   :  { %v1589_v59 = vmul.f32 %v9123_v61, %v13199_v23  ;;  %v1598_v53 = vadd.f32 %v1583_v33, %v1563_v52  ;;  %v1599_v56 = vadd.f32 %v1584_v2, %v1564_v5  ;;  %v1600_v32 = vadd.f32 %v1585_v63, %v1565_v60 }
 0x539   :  { %v6808_v29 = vadd.f32 %v6807_v55, %v6806_v7  ;;  %v1601_v24 = vadd.f32 %v1586_v41, %v1566_v36  ;;  %v1602_v47 = vadd.f32 %v1587_v50, %v1567_v16  ;;  %v1603_v46 = vadd.f32 %v1588_v34, %v1568_v28  ;;  %v9125_v28 = vld [vmem:[#allocation2 + $0xba] ss:$0 sm:$0xff] }
 0x53a   :  { %v1605_v43 = vadd.f32 %v1588_v34, %v1570_v20  ;;  %v1604_v42 = vadd.f32 %v1589_v59, %v1569_v35  ;;  %v1617_v14 = vmul.f32 %v9124_v4, %v13191_v0  ;;  %v1618_v58 = vmul.f32 %v9124_v4, %v13190_v48 }
 0x53b   :  { %v6809_v49 = vrot.slane %v6808_v29, 1  ;;  %v11259_v39 = vrot.slane %v11145_v57, %v6908_v11  ;;  %v1619_v12 = vmul.f32 %v9124_v4, %v13194_v21  ;;  %v1620_v30 = vmul.f32 %v9124_v4, %v13197_v38 }
 0x53c   :  { %v1621_v10 = vmul.f32 %v9124_v4, %v13198_v37  ;;  %v1622_v52 = vmul.f32 %v9124_v4, %v13199_v23  ;;  %v1631_v7 = vadd.f32 %v1617_v14, %v1598_v53  ;;  %v1632_v5 = vadd.f32 %v1618_v58, %v1599_v56 }
 0x53d   :  { %13200 = vst [vmem:[#allocation32_spill] sm:$0xff] %v11259_v39  ;;  %v6810_v62 = vadd.f32 %v6809_v49, %v6808_v29  ;;  %v1633_v60 = vadd.f32 %v1619_v12, %v1600_v32  ;;  %v1634_v36 = vadd.f32 %v1620_v30, %v1601_v24  ;;  %v1638_v16 = vadd.f32 %v1620_v30, %v1605_v43  ;;  %v9126_v32 = vld [vmem:[#allocation2 + $0x91] ss:$0 sm:$0xff]  ;;  %v13205_v49 = vld [vmem:[#allocation27_spill] sm:$0xff] }
 0x53e   :  { %v1649_v35 = vmul.f32 %v9125_v28, %v13190_v48  ;;  %v1635_v57 = vadd.f32 %v1621_v10, %v1602_v47  ;;  %v1636_v11 = vadd.f32 %v1622_v52, %v1603_v46  ;;  %v1637_v55 = vadd.f32 %v1621_v10, %v1604_v42  ;;  %v13204_v46 = vld [vmem:[#allocation26_spill] sm:$0xff] }
 0x53f   :  { %v6824_v20 = vmul.f32 0.015625, %v6810_v62  ;;  %v1650_v61 = vmul.f32 %v9125_v28, %v13194_v21  ;;  %v1651_v33 = vmul.f32 %v9125_v28, %v13197_v38  ;;  %v1652_v2 = vmul.f32 %v9125_v28, %v13198_v37 }
 0x540   :  { %v1653_v63 = vmul.f32 %v9125_v28, %v13199_v23  ;;  %v1662_v59 = vadd.f32 %v1649_v35, %v1631_v7  ;;  %v1685_v24 = vmul.f32 %v9126_v32, %v13190_v48  ;;  %v1686_v43 = vmul.f32 %v9126_v32, %v13204_v46 }
 0x541   :  { %v11271_v41 = vsub.f32 %v11158_v9, %v6824_v20  ;;  %v11274_v50 = vsub.f32 %v11161_v17, %v6824_v20  ;;  %v11277_v34 = vsub.f32 %v11189_v3, %v6824_v20  ;;  %v11280_v29 = vsub.f32 %v11198_v27, %v6824_v20 }
 0x542   :  { %v1663_v53 = vadd.f32 %v1650_v61, %v1632_v5  ;;  %v11282_v56 = vadd.f32 %v1650_v61, %v1638_v16  ;;  %v11286_v47 = vsub.f32 %v11208_v13, %v6824_v20  ;;  %v1664_v3 = vadd.f32 %v1651_v33, %v1633_v60 }
 0x543   :  { %13201 = vst [vmem:[#allocation33_spill] sm:$0xff] %v11277_v34  ;;  %13202 = vst [vmem:[#allocation34_spill] sm:$0xff] %v11280_v29  ;;  %v6842_v9 = vmul.f32 %v11271_v41, %v11271_v41  ;;  %v6843_v17 = vmul.f32 %v11274_v50, %v11274_v50  ;;  %v1687_v27 = vmul.f32 %v9126_v32, %v13191_v0  ;;  %v1731_v28 = vrot.slane %v1685_v24, 1 }
 0x544   :  { %13203 = vst [vmem:[#allocation35_spill] sm:$0xff] %v11286_v47  ;;  %v1688_v42 = vmul.f32 %v9126_v32, %v13205_v49  ;;  %v1689_v4 = vmul.f32 %v9126_v32, %v13192_v25  ;;  %v6844_v14 = vmul.f32 %v11277_v34, %v11277_v34  ;;  %v1690_v58 = vmul.f32 %v9126_v32, %v11137_v22 }
 0x545   :  { %v6858_v13 = vadd.f32 %v6843_v17, %v6842_v9  ;;  %v1691_v12 = vmul.f32 %v9126_v32, %v13193_v19  ;;  %v11301_v30 = vsub.f32 %v11220_v18, %v6824_v20  ;;  %v11304_v10 = vsub.f32 %v11223_v8, %v6824_v20 }
 0x546   :  { %v11307_v62 = vsub.f32 %v11226_v44, %v6824_v20  ;;  %v6845_v52 = vmul.f32 %v11280_v29, %v11280_v29  ;;  %v6846_v7 = vmul.f32 %v11286_v47, %v11286_v47  ;;  %v1692_v60 = vmul.f32 %v9126_v32, %v11155_v1 }
 0x547   :  { %13206 = vst [vmem:[#allocation40_spill] sm:$0xff] %v11301_v30  ;;  %13207 = vst [vmem:[#allocation39_spill] sm:$0xff] %v11304_v10  ;;  %v6859_v5 = vadd.f32 %v6858_v13, %v6844_v14  ;;  %v1693_v16 = vmul.f32 %v9126_v32, %v13194_v21  ;;  %v1732_v18 = vrot.slane %v1686_v43, 1  ;;  %v1734_v35 = vrot.slane %v1687_v27, 1 }
 0x548   :  { %13208 = vst [vmem:[#allocation42_spill] sm:$0xff] %v11307_v62  ;;  %v1735_v61 = vrot.slane %v1688_v42, 1  ;;  %v1694_v9 = vmul.f32 %v9126_v32, %v11167_v45  ;;  %v1737_v44 = vrot.slane %v1689_v4, 1  ;;  %v1738_v20 = vrot.slane %v1690_v58, 1 }
 0x549   :  { %v6860_v8 = vadd.f32 %v6859_v5, %v6845_v52  ;;  %v1665_v17 = vadd.f32 %v1652_v2, %v1634_v36  ;;  %v1666_v26 = vadd.f32 %v1653_v63, %v1635_v57  ;;  %v1667_v31 = vadd.f32 %v1652_v2, %v1636_v11  ;;  %v9127_v2 = vld [vmem:[#allocation2 + $0x98] ss:$0 sm:$0xff] }
 0x54a   :  { %v1668_v15 = vadd.f32 %v1651_v33, %v1637_v55  ;;  %v6847_v14 = vmul.f32 %v11301_v30, %v11301_v30  ;;  %v6848_v13 = vmul.f32 %v11304_v10, %v11304_v10  ;;  %v6849_v24 = vmul.f32 %v11307_v62, %v11307_v62 }
 0x54b   :  { %v6861_v43 = vadd.f32 %v6860_v8, %v6846_v7  ;;  %v1733_v27 = vsel %vm1715_vm6, %v1731_v28, %v1732_v18  ;;  %v1736_v32 = vsel %vm1715_vm6, %v1734_v35, %v1735_v61  ;;  %v1740_v42 = vrot.slane %v1691_v12, 1 }
 0x54c   :  { %v1741_v4 = vrot.slane %v1692_v60, 1  ;;  %v1739_v57 = vsel %vm1715_vm6, %v1737_v44, %v1738_v20  ;;  %v1743_v11 = vrot.slane %v1693_v16, 1  ;;  %v1744_v55 = vrot.slane %v1694_v9, 1 }
 0x54d   :  { %v6862_v36 = vadd.f32 %v6861_v43, %v6847_v14  ;;  %v1764_v33 = vadd.f32 %v1733_v27, %v1662_v59  ;;  %v1789_v63 = vmul.f32 %v9127_v2, %v13191_v0  ;;  %v1790_v58 = vmul.f32 %v9127_v2, %v13205_v49 }
 0x54e   :  { %v1791_v52 = vmul.f32 %v9127_v2, %v13192_v25  ;;  %v1792_v5 = vmul.f32 %v9127_v2, %v11137_v22  ;;  %v1793_v28 = vmul.f32 %v9127_v2, %v13193_v19  ;;  %v1794_v12 = vmul.f32 %v9127_v2, %v11155_v1 }
 0x54f   :  { %v6863_v7 = vadd.f32 %v6862_v36, %v6848_v13  ;;  %v1742_v60 = vsel %vm1715_vm6, %v1740_v42, %v1741_v4  ;;  %v1765_v18 = vadd.f32 %v1736_v32, %v1663_v53  ;;  %v1795_v16 = vmul.f32 %v9127_v2, %v13190_v48 }
 0x550   :  { %v1796_v59 = vmul.f32 %v9127_v2, %v13204_v46  ;;  %v1766_v61 = vadd.f32 %v1739_v57, %v1664_v3  ;;  %v1797_v8 = vmul.f32 %v9127_v2, %v13194_v21  ;;  %v1798_v9 = vmul.f32 %v9127_v2, %v11167_v45 }
 0x551   :  { %v6864_v35 = vadd.f32 %v6863_v7, %v6849_v24  ;;  %v11336_v44 = vadd.f32 %v1739_v57, %v1666_v26  ;;  %v1843_v20 = vrot.slane %v1789_v63, 1  ;;  %v1844_v14 = vrot.slane %v1790_v58, 1 }
 0x552   :  { %v1846_v13 = vrot.slane %v1791_v52, 1  ;;  %v1847_v36 = vrot.slane %v1792_v5, 1  ;;  %v1849_v62 = vrot.slane %v1793_v28, 1  ;;  %v1850_v42 = vrot.slane %v1794_v12, 1 }
 0x553   :  { %v6865_v43 = vrot.slane %v6864_v35, 4  ;;  %v1799_v53 = vmul.f32 %v9127_v2, %v13197_v38  ;;  %v1800_v4 = vmul.f32 %v9127_v2, %v11173_v6  ;;  %v1852_v10 = vrot.slane %v1795_v16, 1 }
 0x554   :  { %v1853_v24 = vrot.slane %v1796_v59, 1  ;;  %v1745_v7 = vsel %vm1715_vm6, %v1743_v11, %v1744_v55  ;;  %v1855_v54 = vrot.slane %v1797_v8, 1  ;;  %v1856_v30 = vrot.slane %v1798_v9, 1 }
 0x555   :  { %v6866_v3 = vadd.f32 %v6865_v43, %v6864_v35  ;;  %v1767_v26 = vadd.f32 %v1742_v60, %v1665_v17  ;;  %v1769_v57 = vadd.f32 %v1736_v32, %v1667_v31  ;;  %v1770_v63 = vadd.f32 %v1733_v27, %v1668_v15 }
 0x556   :  { %v1771_v58 = vadd.f32 %v1745_v7, %v11282_v56  ;;  %v1845_v5 = vsel %vm1715_vm6, %v1843_v20, %v1844_v14  ;;  %v1848_v28 = vsel %vm1715_vm6, %v1846_v13, %v1847_v36  ;;  %v1851_v12 = vsel %vm1715_vm6, %v1849_v62, %v1850_v42  ;;  %v9128_v56 = vld [vmem:[#allocation2 + $0x9f] ss:$0 sm:$0xff] }
 0x557   :  { %v6867_v52 = vrot.slane %v6866_v3, 2  ;;  %v1854_v2 = vsel %vm1715_vm6, %v1852_v10, %v1853_v24  ;;  %v1858_v16 = vrot.slane %v1799_v53, 1  ;;  %v1859_v59 = vrot.slane %v1800_v4, 1 }
 0x558   :  { %v1881_v35 = vadd.f32 %v1845_v5, %v1764_v33  ;;  %v1857_v55 = vsel %vm1715_vm6, %v1855_v54, %v1856_v30  ;;  %v1882_v17 = vadd.f32 %v1848_v28, %v1765_v18  ;;  %v1883_v31 = vadd.f32 %v1851_v12, %v1766_v61 }
 0x559   :  { %v6868_v11 = vadd.f32 %v6867_v52, %v6866_v3  ;;  %v11347_v15 = vadd.f32 %v1848_v28, %v1767_v26  ;;  %v1908_v27 = vmul.f32 %v9128_v56, %v13192_v25  ;;  %v1909_v32 = vmul.f32 %v9128_v56, %v11137_v22 }
 0x55a   :  { %v1910_v60 = vmul.f32 %v9128_v56, %v13193_v19  ;;  %v1911_v10 = vmul.f32 %v9128_v56, %v11155_v1  ;;  %v1912_v8 = vmul.f32 %v9128_v56, %v13191_v0  ;;  %v1913_v33 = vmul.f32 %v9128_v56, %v13205_v49 }
 0x55b   :  { %v6869_v62 = vrot.slane %v6868_v11, 1  ;;  %v1914_v54 = vmul.f32 %v9128_v56, %v13190_v48  ;;  %v1915_v30 = vmul.f32 %v9128_v56, %v13204_v46  ;;  %v1916_v18 = vmul.f32 %v9128_v56, %v13194_v21 }
 0x55c   :  { %v1917_v61 = vmul.f32 %v9128_v56, %v11167_v45  ;;  %v1918_v20 = vmul.f32 %v9128_v56, %v13197_v38  ;;  %v1919_v14 = vmul.f32 %v9128_v56, %v11173_v6  ;;  %v11362_v13 = vmul.f32 %v9128_v56, %v13198_v37 }
 0x55d   :  { %v6870_v9 = vadd.f32 %v6869_v62, %v6868_v11  ;;  %v11365_v43 = vmul.f32 %v9128_v56, %v11179_v40  ;;  %v1971_v36 = vrot.slane %v1908_v27, 1  ;;  %v1972_v42 = vrot.slane %v1909_v32, 1 }
 0x55e   :  { %v1974_v53 = vrot.slane %v1910_v60, 1  ;;  %v1975_v24 = vrot.slane %v1911_v10, 1  ;;  %v1977_v3 = vrot.slane %v1912_v8, 1  ;;  %v1978_v7 = vrot.slane %v1913_v33, 1 }
 0x55f   :  { %v6884_v4 = vmul.f32 0.015625, %v6870_v9  ;;  %v1980_v26 = vrot.slane %v1914_v54, 1  ;;  %v1981_v52 = vrot.slane %v1915_v30, 1  ;;  %v1983_v28 = vrot.slane %v1916_v18, 1 }
 0x560   :  { %v1984_v12 = vrot.slane %v1917_v61, 1  ;;  %v1860_v62 = vsel %vm1715_vm6, %v1858_v16, %v1859_v59  ;;  %v1986_v39 = vrot.slane %v1918_v20, 1  ;;  %v1987_v47 = vrot.slane %v1919_v14, 1 }
 0x561   :  { %v6886_v11 = vadd.f32 1e-05, %v6884_v4  ;;  %v1885_v29 = vadd.f32 %v1845_v5, %v11336_v44  ;;  %v1886_v56 = vadd.f32 %v1854_v2, %v1769_v57  ;;  %v1887_v34 = vadd.f32 %v1857_v55, %v1770_v63  ;;  %v9129_v63 = vld [vmem:[#allocation2 + $0xa6] ss:$0 sm:$0xff] }
 0x562   :  { %v1888_v27 = vadd.f32 %v1860_v62, %v1771_v58  ;;  %v1973_v32 = vsel %vm1715_vm6, %v1971_v36, %v1972_v42  ;;  %v1976_v60 = vsel %vm1715_vm6, %v1974_v53, %v1975_v24  ;;  %v1979_v10 = vsel %vm1715_vm6, %v1977_v3, %v1978_v7 }
 0x563   :  { %9038 = vrsqrt.f32 %v6886_v11  ;;  %v1982_v8 = vsel %vm1715_vm6, %v1980_v26, %v1981_v52  ;;  %v1985_v33 = vsel %vm1715_vm6, %v1983_v28, %v1984_v12  ;;  %v1989_v16 = vrot.slane %v11362_v13, 1 }
 0x564   :  { %v1990_v59 = vrot.slane %v11365_v43, 1  ;;  %v1988_v44 = vsel %vm1715_vm6, %v1986_v39, %v1987_v47  ;;  %v2014_v57 = vadd.f32 %v1973_v32, %v1881_v35  ;;  %v2043_v58 = vmul.f32 %v9129_v63, %v13193_v19 }
 0x565   :  { %v2044_v5 = vmul.f32 %v9129_v63, %v11155_v1  ;;  %v2045_v2 = vmul.f32 %v9129_v63, %v13192_v25  ;;  %v2046_v55 = vmul.f32 %v9129_v63, %v11137_v22  ;;  %v2047_v54 = vmul.f32 %v9129_v63, %v13191_v0 }
 0x566   :  { %v2048_v30 = vmul.f32 %v9129_v63, %v13205_v49  ;;  %v2049_v18 = vmul.f32 %v9129_v63, %v13190_v48  ;;  %v2050_v61 = vmul.f32 %v9129_v63, %v13204_v46  ;;  %v2051_v39 = vmul.f32 %v9129_v63, %v13194_v21 }
 0x567   :  { %v2052_v47 = vmul.f32 %v9129_v63, %v11167_v45  ;;  %v2015_v35 = vadd.f32 %v1976_v60, %v1882_v17  ;;  %v2016_v9 = vadd.f32 %v1973_v32, %v1883_v31  ;;  %v2053_v20 = vmul.f32 %v9129_v63, %v13197_v38 }
 0x568   :  { %v2054_v14 = vmul.f32 %v9129_v63, %v11173_v6  ;;  %v2055_v13 = vmul.f32 %v9129_v63, %v13198_v37  ;;  %v2056_v43 = vmul.f32 %v9129_v63, %v11179_v40  ;;  %v2115_v36 = vrot.slane %v2043_v58, 1 }
 0x569   :  { %v2116_v42 = vrot.slane %v2044_v5, 1  ;;  %v2118_v53 = vrot.slane %v2045_v2, 1  ;;  %v2119_v4 = vrot.slane %v2046_v55, 1  ;;  %v2121_v24 = vrot.slane %v2047_v54, 1 }
 0x56a   :  { %v2122_v3 = vrot.slane %v2048_v30, 1  ;;  %v2124_v7 = vrot.slane %v2049_v18, 1  ;;  %v2125_v26 = vrot.slane %v2050_v61, 1  ;;  %v2127_v52 = vrot.slane %v2051_v39, 1 }
 0x56b   :  { %v2128_v28 = vrot.slane %v2052_v47, 1  ;;  %v2057_v17 = vmul.f32 %v9129_v63, %v13199_v23  ;;  %v2058_v31 = vmul.f32 %v9129_v63, %v11186_v51  ;;  %v2130_v12 = vrot.slane %v2053_v20, 1 }
 0x56c   :  { %v2131_v11 = vrot.slane %v2054_v14, 1  ;;  %v1991_v62 = vsel %vm1715_vm6, %v1989_v16, %v1990_v59  ;;  %v2017_v32 = vadd.f32 %v1979_v10, %v11347_v15  ;;  %v2018_v60 = vadd.f32 %v1982_v8, %v1885_v29  ;;  %v13210_v8 = vld [vmem:[#allocation34_spill] sm:$0xff] }
 0x56d   :  { %v2019_v58 = vadd.f32 %v1985_v33, %v1886_v56  ;;  %v2020_v5 = vadd.f32 %v1988_v44, %v1887_v34  ;;  %v2021_v2 = vadd.f32 %v1991_v62, %v1888_v27  ;;  %v2117_v55 = vsel %vm1715_vm6, %v2115_v36, %v2116_v42  ;;  %v13209_v27 = vld [vmem:[#allocation33_spill] sm:$0xff]  ;;  %v13211_v44 = vld [vmem:[#allocation35_spill] sm:$0xff]  ;;  %v13213_v36 = vld [vmem:[#allocation32_spill] sm:$0xff] }
 0x56e   :  { %v2120_v54 = vsel %vm1715_vm6, %v2118_v53, %v2119_v4  ;;  %v2123_v30 = vsel %vm1715_vm6, %v2121_v24, %v2122_v3  ;;  %v2126_v18 = vsel %vm1715_vm6, %v2124_v7, %v2125_v26  ;;  %v2129_v63 = vsel %vm1715_vm6, %v2127_v52, %v2128_v28  ;;  %v13214_v53 = vld [vmem:[#allocation40_spill] sm:$0xff] }
 0x56f   :  { %v2133_v61 = vrot.slane %v2055_v13, 1  ;;  %v2132_v16 = vsel %vm1715_vm6, %v2130_v12, %v2131_v11  ;;  %v2134_v59 = vrot.slane %v2056_v43, 1  ;;  %v2136_v15 = vrot.slane %v2057_v17, 1  ;;  %v13217_v17 = vld [vmem:[#allocation39_spill] sm:$0xff] }
 0x570   :  { %v9039_v39 = vpop.eup %9038  ;;  %v2137_v29 = vrot.slane %v2058_v31, 1  ;;  %v11406_v20 = vadd.f32 %v2117_v55, %v2014_v57  ;;  %v11408_v14 = vadd.f32 %v2120_v54, %v2015_v35  ;;  %v11410_v13 = vadd.f32 %v2123_v30, %v2016_v9  ;;  %v13216_v35 = vld [vmem:[#allocation31_spill] sm:$0xff] }
 0x571   :  { %v6890_v34 = vmul.f32 %v9039_v39, %v11271_v41  ;;  %v6891_v56 = vmul.f32 %v9039_v39, %v11274_v50  ;;  %v6892_v10 = vmul.f32 %v9039_v39, %v13209_v27  ;;  %v6893_v33 = vmul.f32 %v9039_v39, %v13210_v8 }
 0x572   :  { %v6894_v47 = vmul.f32 %v9039_v39, %v13211_v44  ;;  %13212 = vst [vmem:[#allocation51_spill] sm:$0xff] %v11410_v13  ;;  %v6895_v4 = vmul.f32 %v9039_v39, %v13214_v53  ;;  %v2135_v24 = vsel %vm1715_vm6, %v2133_v61, %v2134_v59  ;;  %v2138_v3 = vsel %vm1715_vm6, %v2136_v15, %v2137_v29 }
 0x573   :  { %v6910_v43 = vmul.f32 %v13213_v36, %v6890_v34  ;;  %v6911_v42 = vmul.f32 %v13213_v36, %v6891_v56  ;;  %v6912_v41 = vmul.f32 %v13213_v36, %v6892_v10  ;;  %v6913_v50 = vmul.f32 %v13213_v36, %v6893_v33 }
 0x574   :  { %v11419_v57 = vadd.f32 %v2126_v18, %v2017_v32  ;;  %v6914_v28 = vmul.f32 %v13213_v36, %v6894_v47  ;;  %v6896_v31 = vmul.f32 %v9039_v39, %v13217_v17  ;;  %v11431_v12 = vadd.f32 %v2129_v63, %v2018_v60  ;;  %v11450_v60 = vld [vmem:[#allocation2 + $0xad] ss:$0 sm:$0xff] }
 0x575   :  { %v6930_v7 = vadd.f32 %v13216_v35, %v6910_v43  ;;  %v6931_v9 = vadd.f32 %v13216_v35, %v6911_v42  ;;  %v11424_v26 = vadd.f32 %v13216_v35, %v6912_v41  ;;  %v11427_v52 = vadd.f32 %v13216_v35, %v6913_v50 }
 0x576   :  { %13215 = vst [vmem:[#allocation43_spill] sm:$0xff] %v11419_v57  ;;  %13218 = vst [vmem:[#allocation52_spill] sm:$0xff] %v11431_v12  ;;  %v11433_v11 = vadd.f32 %v2132_v16, %v2019_v58  ;;  %v11439_v55 = vadd.f32 %v2135_v24, %v2020_v5  ;;  %v11441_v54 = vadd.f32 %v2138_v3, %v2021_v2  ;;  %v13222_v2 = vld [vmem:[#allocation42_spill] sm:$0xff] }
 0x577   :  { %v11435_v62 = vmul.f32 0.70710677, %v6930_v7  ;;  %v11437_v32 = vmul.f32 0.70710677, %v6931_v9  ;;  %v11444_v30 = vmul.f32 0.70710677, %v11424_v26  ;;  %v6915_v61 = vmul.f32 %v13213_v36, %v6895_v4 }
 0x578   :  { %13219 = vst [vmem:[#allocation44_spill] sm:$0xff] %v11433_v11  ;;  %13220 = vst [vmem:[#allocation53_spill] sm:$0xff] %v11439_v55  ;;  %v11447_v18 = vmul.f32 0.70710677, %v11427_v52  ;;  %v11454_v58 = vmul.f32 %v11450_v60, %v13192_v25  ;;  %v6897_v16 = vmul.f32 %v9039_v39, %v13222_v2  ;;  %v11461_v59 = vmul.f32 %v11450_v60, %v11137_v22 }
 0x579   :  { %13221 = vst [vmem:[#allocation45_spill] sm:$0xff] %v11441_v54  ;;  %v6978_v63 = vand.u32 2147483647, %v11435_v62  ;;  %v6979_v5 = vand.u32 2147483647, %v11437_v32  ;;  %v6934_v34 = vadd.f32 %v13216_v35, %v6914_v28  ;;  %v6916_v56 = vmul.f32 %v13213_v36, %v6896_v31 }
 0x57a   :  { %v6980_v15 = vand.u32 2147483647, %v11444_v30  ;;  %v6981_v29 = vand.u32 2147483647, %v11447_v18  ;;  %v6935_v39 = vadd.f32 %v13216_v35, %v6915_v61  ;;  %v6917_v3 = vmul.f32 %v13213_v36, %v6897_v16 }
 0x57b   :  { %v6994_v27 = vmul.f32 0.3275911, %v6978_v63  ;;  %v7202_v10 = vsub.f32 0.0, %v6978_v63  ;;  %v6995_v8 = vmul.f32 0.3275911, %v6979_v5  ;;  %v7203_v33 = vsub.f32 0.0, %v6979_v5 }
 0x57c   :  { %v6996_v44 = vmul.f32 0.3275911, %v6980_v15  ;;  %v7204_v47 = vsub.f32 0.0, %v6980_v15  ;;  %v6997_v43 = vmul.f32 0.3275911, %v6981_v29  ;;  %v7205_v53 = vsub.f32 0.0, %v6981_v29 }
 0x57d   :  { %v7010_v42 = vadd.f32 1.0, %v6994_v27  ;;  %v7218_v41 = vmul.f32 %v7202_v10, %v6978_v63  ;;  %v7011_v50 = vadd.f32 1.0, %v6995_v8  ;;  %v7219_v4 = vmul.f32 %v7203_v33, %v6979_v5 }
 0x57e   :  { %v6936_v24 = vadd.f32 %v13216_v35, %v6916_v56  ;;  %v11472_v28 = vmul.f32 %v11450_v60, %v13191_v0  ;;  %v7012_v17 = vadd.f32 1.0, %v6996_v44  ;;  %v7220_v31 = vmul.f32 %v7204_v47, %v6980_v15 }
 0x57f   :  { %9040 = vrcp.f32 %v7010_v42  ;;  %v11476_v2 = vmul.f32 %v11450_v60, %v13205_v49  ;;  %v7234_v61 = vmul.f32 1.442695, %v7218_v41  ;;  %v11478_v63 = vmul.f32 0.70710677, %v6934_v34 }
 0x580   :  { %9042 = vrcp.f32 %v7011_v50  ;;  %v11482_v5 = vmul.f32 %v11450_v60, %v13190_v48  ;;  %v11484_v16 = vmul.f32 0.5, %v6930_v7  ;;  %v7013_v56 = vadd.f32 1.0, %v6997_v43 }
 0x581   :  { %v7221_v27 = vmul.f32 %v7205_v53, %v6981_v29  ;;  %v11486_v10 = vmul.f32 0.70710677, %v6935_v39  ;;  %v7236_v8 = vmul.f32 1.442695, %v7219_v4  ;;  %v6982_v15 = vand.u32 2147483647, %v11478_v63 }
 0x582   :  { %v11489_v33 = vmul.f32 0.70710677, %v6936_v24  ;;  %v6937_v44 = vadd.f32 %v13216_v35, %v6917_v3  ;;  %v11492_v47 = vmul.f32 0.5, %v6931_v9  ;;  %9044 = vrcp.f32 %v7012_v17 }
 0x583   :  { %v7238_v42 = vmul.f32 1.442695, %v7220_v31  ;;  %v6983_v41 = vand.u32 2147483647, %v11486_v10  ;;  %9046 = vpow2.f32 %v7234_v61  ;;  %v6998_v7 = vmul.f32 0.3275911, %v6982_v15 }
 0x584   :  { %v7206_v50 = vsub.f32 0.0, %v6982_v15  ;;  %v6984_v29 = vand.u32 2147483647, %v11489_v33  ;;  %9048 = vrcp.f32 %v7013_v56  ;;  %v7240_v43 = vmul.f32 1.442695, %v7221_v27 }
 0x585   :  { %v6999_v53 = vmul.f32 0.3275911, %v6983_v41  ;;  %v7207_v4 = vsub.f32 0.0, %v6983_v41  ;;  %9050 = vpow2.f32 %v7236_v8  ;;  %v7014_v36 = vadd.f32 1.0, %v6998_v7 }
 0x586   :  { %v7222_v1 = vmul.f32 %v7206_v50, %v6982_v15  ;;  %v7000_v19 = vmul.f32 0.3275911, %v6984_v29  ;;  %v7208_v35 = vsub.f32 0.0, %v6984_v29  ;;  %v11496_v17 = vmul.f32 0.70710677, %v6937_v44 }
 0x587   :  { %v7015_v3 = vadd.f32 1.0, %v6999_v53  ;;  %v7223_v9 = vmul.f32 %v7207_v4, %v6983_v41  ;;  %v11499_v31 = vmul.f32 0.5, %v11424_v26  ;;  %v11502_v61 = vmul.f32 0.5, %v11427_v52 }
 0x588   :  { %9052 = vrcp.f32 %v7014_v36  ;;  %v7016_v56 = vadd.f32 1.0, %v7000_v19  ;;  %v7242_v27 = vmul.f32 1.442695, %v7222_v1  ;;  %v7224_v22 = vmul.f32 %v7208_v35, %v6984_v29 }
 0x589   :  { %9054 = vrcp.f32 %v7015_v3  ;;  %v6985_v8 = vand.u32 2147483647, %v11496_v17  ;;  %v11505_v15 = vmul.f32 0.5, %v6934_v34  ;;  %v11507_v41 = vmul.f32 0.5, %v6935_v39 }
 0x58a   :  { %9056 = vpow2.f32 %v7238_v42  ;;  %v7244_v7 = vmul.f32 1.442695, %v7223_v9  ;;  %v11509_v50 = vmul.f32 0.5, %v6936_v24  ;;  %v7246_v19 = vmul.f32 1.442695, %v7224_v22 }
 0x58b   :  { %9058 = vpow2.f32 %v7240_v43  ;;  %v7001_v26 = vmul.f32 0.3275911, %v6985_v8  ;;  %v7209_v53 = vsub.f32 0.0, %v6985_v8  ;;  %v11513_v1 = vmul.f32 0.5, %v6937_v44 }
 0x58c   :  { %13223 = vst [vmem:[#allocation54_spill] sm:$0xff] %v11509_v50  ;;  %v11511_v52 = vpop.eup %9040  ;;  %9060 = vrcp.f32 %v7016_v56  ;;  %v11517_v36 = vmul.f32 %v11450_v60, %v13204_v46  ;;  %v11525_v29 = vmul.f32 %v11450_v60, %v13194_v21  ;;  %v11529_v22 = vmul.f32 %v11450_v60, %v11167_v45 }
 0x58d   :  { %13224 = vst [vmem:[#allocation25_spill] sm:$0xff] %v11513_v1  ;;  %v11519_v35 = vpop.eup %9042  ;;  %v7058_v34 = vmul.f32 1.0614054, %v11511_v52  ;;  %9062 = vpow2.f32 %v7242_v27  ;;  %v7017_v39 = vadd.f32 1.0, %v7001_v26  ;;  %v7225_v24 = vmul.f32 %v7209_v53, %v6985_v8 }
 0x58e   :  { %v7059_v42 = vmul.f32 1.0614054, %v11519_v35  ;;  %9064 = vpow2.f32 %v7244_v7  ;;  %v11533_v43 = vmul.f32 %v11450_v60, %v13197_v38  ;;  %v11537_v4 = vmul.f32 %v11450_v60, %v11173_v6 }
 0x58f   :  { %v7074_v44 = vadd.f32 -1.4531521, %v7058_v34  ;;  %9066 = vrcp.f32 %v7017_v39  ;;  %v11539_v3 = vpop.eup %9044  ;;  %v7248_v56 = vmul.f32 1.442695, %v7225_v24  ;;  %v11543_v27 = vmul.f32 %v11450_v60, %v13198_v37 }
 0x590   :  { %v7075_v9 = vadd.f32 -1.4531521, %v7059_v42  ;;  %9068 = vpow2.f32 %v7246_v19  ;;  %v11545_v8 = vpop.eup %9046  ;;  %v7060_v26 = vmul.f32 1.0614054, %v11539_v3  ;;  %v2253_v53 = vrot.slane %v11454_v58, 1 }
 0x591   :  { %v7090_v7 = vmul.f32 %v11511_v52, %v7074_v44  ;;  %v2254_v34 = vrot.slane %v11461_v59, 1  ;;  %v11551_v39 = vpop.eup %9048  ;;  %v11556_v19 = vmul.f32 %v11450_v60, %v11179_v40  ;;  %v2256_v24 = vrot.slane %v11472_v28, 1 }
 0x592   :  { %v7091_v42 = vmul.f32 %v11519_v35, %v7075_v9  ;;  %v2257_v25 = vrot.slane %v11476_v2, 1  ;;  %v11560_v1 = vpop.eup %9050  ;;  %v7076_v54 = vadd.f32 -1.4531521, %v7060_v26  ;;  %v7061_v58 = vmul.f32 1.0614054, %v11551_v39 }
 0x593   :  { %v7106_v44 = vadd.f32 1.4214138, %v7090_v7  ;;  %v11565_v59 = vmul.f32 %v11450_v60, %v13199_v23  ;;  %9070 = vpow2.f32 %v7248_v56  ;;  %v11569_v9 = vmul.f32 %v11450_v60, %v11186_v51 }
 0x594   :  { %v7107_v55 = vadd.f32 1.4214138, %v7091_v42  ;;  %v7092_v7 = vmul.f32 %v11539_v3, %v7076_v54  ;;  %v7077_v26 = vadd.f32 -1.4531521, %v7061_v58  ;;  %v2255_v12 = vsel %vm1715_vm6, %v2253_v53, %v2254_v34 }
 0x595   :  { %v11572_v11 = vpop.eup %9052  ;;  %v7122_v2 = vmul.f32 %v11511_v52, %v7106_v44  ;;  %v11582_v60 = vsel %vm1715_vm6, %v2256_v24, %v2257_v25  ;;  %vm7298_vm8 = vcmp.lt.f32.partialorder %v11435_v62, 0.0  ;;  %vm7299_vm9 = vcmp.lt.f32.partialorder %v11437_v32, 0.0 }
 0x596   :  { %v11577_v57 = vpop.eup %9054  ;;  %v7123_v42 = vmul.f32 %v11519_v35, %v7107_v55  ;;  %v7062_v56 = vmul.f32 1.0614054, %v11572_v11  ;;  %v7108_v13 = vadd.f32 1.4214138, %v7092_v7  ;;  %v7093_v44 = vmul.f32 %v11551_v39, %v7077_v26 }
 0x597   :  { %v9057_v51 = vpop.eup %9056  ;;  %v7138_v23 = vadd.f32 -0.28449672, %v7122_v2  ;;  %v7063_v54 = vmul.f32 1.0614054, %v11577_v57  ;;  %vm7300_vm14 = vcmp.lt.f32.partialorder %v11444_v30, 0.0  ;;  %vm7301_vm15 = vcmp.lt.f32.partialorder %v11447_v18, 0.0 }
 0x598   :  { %v11587_v58 = vpop.eup %9058  ;;  %v7139_v53 = vadd.f32 -0.28449672, %v7123_v42  ;;  %v7078_v34 = vadd.f32 -1.4531521, %v7062_v56  ;;  %v7124_v24 = vmul.f32 %v11539_v3, %v7108_v13  ;;  %v7109_v2 = vadd.f32 1.4214138, %v7093_v44 }
 0x599   :  { %v11591_v37 = vpop.eup %9060  ;;  %v7154_v25 = vmul.f32 %v11511_v52, %v7138_v23  ;;  %v7079_v7 = vadd.f32 -1.4531521, %v7063_v54  ;;  %vm7302_vm0 = vcmp.lt.f32.partialorder %v11478_v63, 0.0  ;;  %vm7303_vm1 = vcmp.lt.f32.partialorder %v11486_v10, 0.0 }
 0x59a   :  { %v11595_v28 = vpop.eup %9062  ;;  %v7155_v26 = vmul.f32 %v11519_v35, %v7139_v53  ;;  %v7094_v50 = vmul.f32 %v11572_v11, %v7078_v34  ;;  %v7064_v42 = vmul.f32 1.0614054, %v11591_v37  ;;  %v7140_v6 = vadd.f32 -0.28449672, %v7124_v24 }
 0x59b   :  { %v11601_v55 = vpop.eup %9064  ;;  %v7170_v40 = vadd.f32 0.2548296, %v7154_v25  ;;  %v7125_v23 = vmul.f32 %v11551_v39, %v7109_v2  ;;  %v7095_v13 = vmul.f32 %v11577_v57, %v7079_v7  ;;  %v11609_v34 = vadd.f32 %v2255_v12, %v11406_v20 }
 0x59c   :  { %v11605_v44 = vpop.eup %9066  ;;  %v7171_v54 = vadd.f32 0.2548296, %v7155_v26  ;;  %v7110_v53 = vadd.f32 1.4214138, %v7094_v50  ;;  %v7080_v38 = vadd.f32 -1.4531521, %v7064_v42  ;;  %v7156_v25 = vmul.f32 %v11539_v3, %v7140_v6 }
 0x59d   :  { %13225 = vst [vmem:[#allocation36_spill] sm:$0xff] %v11609_v34  ;;  %v11611_v45 = vpop.eup %9068  ;;  %v7186_v56 = vmul.f32 %v11511_v52, %v7170_v40  ;;  %v7141_v24 = vadd.f32 -0.28449672, %v7125_v23  ;;  %v7111_v2 = vadd.f32 1.4214138, %v7095_v13  ;;  %vm7304_vm2 = vcmp.lt.f32.partialorder %v11489_v33, 0.0 }
 0x59e   :  { %v7187_v7 = vmul.f32 %v11519_v35, %v7171_v54  ;;  %v7126_v21 = vmul.f32 %v11572_v11, %v7110_v53  ;;  %v7096_v50 = vmul.f32 %v11591_v37, %v7080_v38  ;;  %v7065_v26 = vmul.f32 1.0614054, %v11605_v44 }
 0x59f   :  { %v7266_v20 = vmul.f32 %v11545_v8, %v7186_v56  ;;  %v7172_v12 = vadd.f32 0.2548296, %v7156_v25  ;;  %v7157_v42 = vmul.f32 %v11551_v39, %v7141_v24  ;;  %v7127_v40 = vmul.f32 %v11577_v57, %v7111_v2 }
 0x5a0   :  { %v7267_v52 = vmul.f32 %v11560_v1, %v7187_v7  ;;  %v7142_v6 = vadd.f32 -0.28449672, %v7126_v21  ;;  %v7112_v23 = vadd.f32 1.4214138, %v7096_v50  ;;  %v7081_v35 = vadd.f32 -1.4531521, %v7065_v26  ;;  %v11625_v13 = vpop.eup %9070 }
 0x5a1   :  { %v7282_v54 = vsub.f32 1.0, %v7266_v20  ;;  %v7188_v38 = vmul.f32 %v11539_v3, %v7172_v12  ;;  %v7173_v53 = vadd.f32 0.2548296, %v7157_v42  ;;  %v7143_v34 = vadd.f32 -0.28449672, %v7127_v40 }
 0x5a2   :  { %v7283_v8 = vsub.f32 1.0, %v7267_v52  ;;  %v7158_v56 = vmul.f32 %v11572_v11, %v7142_v6  ;;  %v7128_v25 = vmul.f32 %v11591_v37, %v7112_v23  ;;  %v2266_v1 = vrot.slane %v11537_v4, 1 }
 0x5a3   :  { %v7314_v24 = vsub.f32 0.0, %v7282_v54  ;;  %v7268_v21 = vmul.f32 %v9057_v51, %v7188_v38  ;;  %v7189_v2 = vmul.f32 %v11551_v39, %v7173_v53  ;;  %v7159_v7 = vmul.f32 %v11577_v57, %v7143_v34 }
 0x5a4   :  { %v7315_v50 = vsub.f32 0.0, %v7283_v8  ;;  %v7174_v26 = vadd.f32 0.2548296, %v7158_v56  ;;  %v7144_v3 = vadd.f32 -0.28449672, %v7128_v25  ;;  %v7097_v20 = vmul.f32 %v11605_v44, %v7081_v35 }
 0x5a5   :  { %v7330_v12 = vsel %vm7298_vm8, %v7314_v24, %v7282_v54  ;;  %v7284_v42 = vsub.f32 1.0, %v7268_v21  ;;  %v7269_v40 = vmul.f32 %v11587_v58, %v7189_v2  ;;  %v7175_v4 = vadd.f32 0.2548296, %v7159_v7 }
 0x5a6   :  { %v7346_v52 = vadd.f32 1.0, %v7330_v12  ;;  %v7331_v51 = vsel %vm7299_vm9, %v7315_v50, %v7283_v8  ;;  %v7190_v39 = vmul.f32 %v11572_v11, %v7174_v26  ;;  %v7160_v34 = vmul.f32 %v11591_v37, %v7144_v3 }
 0x5a7   :  { %v7347_v6 = vadd.f32 1.0, %v7331_v51  ;;  %v7316_v23 = vsub.f32 0.0, %v7284_v42  ;;  %v7285_v62 = vsub.f32 1.0, %v7269_v40  ;;  %v7191_v35 = vmul.f32 %v11577_v57, %v7175_v4 }
 0x5a8   :  { %v7362_v58 = vmul.f32 %v7346_v52, %v11484_v16  ;;  %v7270_v54 = vmul.f32 %v11595_v28, %v7190_v39  ;;  %v7176_v38 = vadd.f32 0.2548296, %v7160_v34  ;;  %v7113_v53 = vadd.f32 1.4214138, %v7097_v20  ;;  %v9131_v34 = vld [vmem:[#allocation2 + $0xb4] ss:$0 sm:$0xff] }
 0x5a9   :  { %v7363_v32 = vmul.f32 %v7347_v6, %v11492_v47  ;;  %v7332_v11 = vsel %vm7300_vm14, %v7316_v23, %v7284_v42  ;;  %v7317_v8 = vsub.f32 0.0, %v7285_v62  ;;  %v7271_v56 = vmul.f32 %v11601_v55, %v7191_v35 }
 0x5aa   :  { %8754 = vmatprep.mubr.f32.mxu0 %v7362_v58  ;;  %v7348_v25 = vadd.f32 1.0, %v7332_v11  ;;  %v7286_v24 = vsub.f32 1.0, %v7270_v54  ;;  %v7192_v57 = vmul.f32 %v11591_v37, %v7176_v38  ;;  %v7129_v16 = vmul.f32 %v11605_v44, %v7113_v53  ;;  %v13232_v58 = vld [vmem:[#allocation38_spill] sm:$0xff]  ;;  %v13233_v54 = vld [vmem:[#allocation48_spill] sm:$0xff] }
 0x5ab   :  { %8755 = vmatmul.mubr.f32.vlgmr.msra.gmra.mxu0 %v7363_v32  ;;  %v7333_v28 = vsel %vm7301_vm15, %v7317_v8, %v7285_v62  ;;  %v7287_v47 = vsub.f32 1.0, %v7271_v56  ;;  %v2268_v30 = vrot.slane %v11543_v27, 1  ;;  %v2269_v21 = vrot.slane %v11556_v19, 1  ;;  %v13234_v53 = vld [vmem:[#allocation28_spill] sm:$0xff]  ;;  %v13235_v11 = vld [vmem:[#allocation54_spill] sm:$0xff] }
 0x5ac   :  { %v7364_v55 = vmul.f32 %v7348_v25, %v11499_v31  ;;  %v7349_v2 = vadd.f32 1.0, %v7333_v28  ;;  %v7318_v7 = vsub.f32 0.0, %v7286_v24  ;;  %v7272_v50 = vmul.f32 %v11611_v45, %v7192_v57  ;;  %v13236_v25 = vld [vmem:[#allocation49_spill] sm:$0xff] }
 0x5ad   :  { %v7319_v26 = vsub.f32 0.0, %v7287_v47  ;;  %v7145_v3 = vadd.f32 -0.28449672, %v7129_v16  ;;  %v13226_v37 = vrot.slane %v11517_v36, 1  ;;  %v13227_v20 = vrot.slane %v11482_v5, 1  ;;  %v13238_v16 = vld [vmem:[#allocation51_spill] sm:$0xff] }
 0x5ae   :  { %v13228_v12 = vrot.slane %v11529_v22, 1  ;;  %v13229_v27 = vrot.slane %v11525_v29, 1  ;;  %8757 = vmatprep.mubr.f32.mxu0 %v7364_v55  ;;  %v7365_v31 = vmul.f32 %v7349_v2, %v11502_v61  ;;  %v7334_v45 = vsel %vm7302_vm0, %v7318_v7, %v7286_v24 }
 0x5af   :  { %v2261_v18 = vsel %vm1715_vm6, %v13227_v20, %v13226_v37  ;;  %v7288_v42 = vsub.f32 1.0, %v7272_v50  ;;  %v13230_v40 = vrot.slane %v11533_v43, 1  ;;  %v7350_v5 = vadd.f32 1.0, %v7334_v45  ;;  %v13240_v37 = vld [vmem:[#allocation30_spill] sm:$0xff] }
 0x5b0   :  { %v2264_v19 = vsel %vm1715_vm6, %v13229_v27, %v13228_v12  ;;  %v7335_v4 = vsel %vm7303_vm1, %v7319_v26, %v7287_v47  ;;  %v7161_v22 = vmul.f32 %v11605_v44, %v7145_v3  ;;  %v2270_v29 = vsel %vm1715_vm6, %v2268_v30, %v2269_v21  ;;  %8758 = vmatmul.mubr.f32.gmra.mxu0 %v7365_v31  ;;  %v13239_v26 = vld [vmem:[#allocation50_spill] sm:$0xff]  ;;  %v13241_v31 = vld [vmem:[#allocation43_spill] sm:$0xff] }
 0x5b1   :  { %v2267_v36 = vsel %vm1715_vm6, %v13230_v40, %v2266_v1  ;;  %v7351_v52 = vadd.f32 1.0, %v7335_v4  ;;  %v7320_v51 = vsub.f32 0.0, %v7288_v42  ;;  %v2271_v61 = vrot.slane %v11565_v59, 1  ;;  %v13243_v4 = vld [vmem:[#allocation44_spill] sm:$0xff] }
 0x5b2   :  { %v2272_v63 = vrot.slane %v11569_v9, 1  ;;  %v7366_v39 = vmul.f32 %v7350_v5, %v11505_v15  ;;  %v7177_v43 = vadd.f32 0.2548296, %v7161_v22  ;;  %v2297_v1 = vadd.f32 %v11582_v60, %v11408_v14  ;;  %v13231_v60 = vld [vmem:[#allocation47_spill] sm:$0xff] }
 0x5b3   :  { %v2321_v10 = vmul.f32 %v9131_v34, %v13191_v0  ;;  %v7367_v6 = vmul.f32 %v7351_v52, %v11507_v41  ;;  %v7336_v23 = vsel %vm7304_vm2, %v7320_v51, %v7288_v42  ;;  %vm7305_vm3 = vcmp.lt.f32.partialorder %v11496_v17, 0.0  ;;  %v13244_v52 = vld [vmem:[#allocation53_spill] sm:$0xff] }
 0x5b4   :  { %v2322_v59 = vmul.f32 %v9131_v34, %v13205_v49  ;;  %v2323_v9 = vmul.f32 %v9131_v34, %v13190_v48  ;;  %8760 = vmatprep.mubr.f32.mxu0 %v7366_v39  ;;  %v7352_v15 = vadd.f32 1.0, %v7336_v23  ;;  %v7193_v62 = vmul.f32 %v11605_v44, %v7177_v43  ;;  %v13237_v44 = vld [vmem:[#allocation29_spill] sm:$0xff] }
 0x5b5   :  { %v2324_v14 = vmul.f32 %v9131_v34, %v13204_v46  ;;  %v2325_v35 = vmul.f32 %v9131_v34, %v13231_v60  ;;  %8761 = vmatmul.mubr.f32.gmra.mxu0 %v7367_v6  ;;  %v2273_v41 = vsel %vm1715_vm6, %v2271_v61, %v2272_v63  ;;  %v2326_v33 = vmul.f32 %v9131_v34, %v13232_v58  ;;  %v13245_v61 = vld [vmem:[#allocation45_spill] sm:$0xff] }
 0x5b6   :  { %v2327_v38 = vmul.f32 %v9131_v34, %v13233_v54  ;;  %v2328_v32 = vmul.f32 %v9131_v34, %v13234_v53  ;;  %v7368_v8 = vmul.f32 %v7352_v15, %v13235_v11  ;;  %v7273_v56 = vmul.f32 %v11625_v13, %v7193_v62 }
 0x5b7   :  { %v2329_v24 = vmul.f32 %v9131_v34, %v13236_v25  ;;  %v2330_v57 = vmul.f32 %v9131_v34, %v13237_v44  ;;  %v2298_v28 = vadd.f32 %v2261_v18, %v13238_v16  ;;  %v2375_v47 = vrot.slane %v2321_v10, 1  ;;  %v13242_v18 = vld [vmem:[#allocation52_spill] sm:$0xff] }
 0x5b8   :  { %v2376_v30 = vrot.slane %v2322_v59, 1  ;;  %v2378_v21 = vrot.slane %v2323_v9, 1  ;;  %8763 = vmatprep.mubr.f32.mxu0 %v7368_v8  ;;  %v7289_v55 = vsub.f32 1.0, %v7273_v56  ;;  %v2379_v2 = vrot.slane %v2324_v14, 1  ;;  %v13246_v9 = vld [vmem:[#allocation36_spill] sm:$0xff]  ;;  %v13247_v14 = vld [vmem:[#allocation25_spill] sm:$0xff] }
 0x5b9   :  { %v2381_v7 = vrot.slane %v2325_v35, 1  ;;  %v2382_v50 = vrot.slane %v2326_v33, 1  ;;  %v2331_v3 = vmul.f32 %v9131_v34, %v13239_v26  ;;  %v2332_v20 = vmul.f32 %v9131_v34, %v13240_v37 }
 0x5ba   :  { %v2384_v12 = vrot.slane %v2327_v38, 1  ;;  %v2385_v13 = vrot.slane %v2328_v32, 1  ;;  %v7321_v27 = vsub.f32 0.0, %v7289_v55  ;;  %v2299_v45 = vadd.f32 %v2264_v19, %v13241_v31 }
 0x5bb   :  { %v2387_v42 = vrot.slane %v2329_v24, 1  ;;  %v2388_v40 = vrot.slane %v2330_v57, 1  ;;  %v2300_v5 = vadd.f32 %v2267_v36, %v13242_v18  ;;  %v2301_v22 = vadd.f32 %v2270_v29, %v13243_v4 }
 0x5bc   :  { %v2302_v51 = vadd.f32 %v2273_v41, %v13244_v52  ;;  %v2303_v63 = vadd.f32 %v2270_v29, %v13245_v61  ;;  %v7337_v39 = vsel %vm7305_vm3, %v7321_v27, %v7289_v55  ;;  %v2377_v43 = vsel %vm1715_vm6, %v2375_v47, %v2376_v30  ;;  %v9132_v29 = vld [vmem:[#allocation2 + $0xbb] ss:$0 sm:$0xff] }
 0x5bd   :  { %v2380_v34 = vsel %vm1715_vm6, %v2378_v21, %v2379_v2  ;;  %v2383_v10 = vsel %vm1715_vm6, %v2381_v7, %v2382_v50  ;;  %v7353_v19 = vadd.f32 1.0, %v7337_v39  ;;  %v2386_v6 = vsel %vm1715_vm6, %v2384_v12, %v2385_v13 }
 0x5be   :  { %v2390_v23 = vrot.slane %v2331_v3, 1  ;;  %v2391_v36 = vrot.slane %v2332_v20, 1  ;;  %v2389_v59 = vsel %vm1715_vm6, %v2387_v42, %v2388_v40  ;;  %v2413_v15 = vadd.f32 %v2377_v43, %v13246_v9 }
 0x5bf   :  { %v2414_v62 = vadd.f32 %v2380_v34, %v2297_v1  ;;  %v2436_v17 = vmul.f32 %v9132_v29, %v13190_v48  ;;  %v7369_v35 = vmul.f32 %v7353_v19, %v13247_v14  ;;  %v2437_v41 = vmul.f32 %v9132_v29, %v13204_v46 }
 0x5c0   :  { %v2438_v33 = vmul.f32 %v9132_v29, %v13231_v60  ;;  %v2439_v38 = vmul.f32 %v9132_v29, %v13232_v58  ;;  %v2440_v32 = vmul.f32 %v9132_v29, %v13233_v54  ;;  %v2441_v11 = vmul.f32 %v9132_v29, %v13234_v53 }
 0x5c1   :  { %v2442_v8 = vmul.f32 %v9132_v29, %v13236_v25  ;;  %v2443_v56 = vmul.f32 %v9132_v29, %v13237_v44  ;;  %8764 = vmatmul.mubr.f32.gmra.mxu0 %v7369_v35  ;;  %v2444_v1 = vmul.f32 %v9132_v29, %v13239_v26  ;;  %v2445_v24 = vmul.f32 %v9132_v29, %v13240_v37 }
 0x5c2   :  { %v2481_v57 = vrot.slane %v2436_v17, 1  ;;  %v2482_v16 = vrot.slane %v2437_v41, 1  ;;  %v2484_v47 = vrot.slane %v2438_v33, 1  ;;  %v2485_v30 = vrot.slane %v2439_v38, 1 }
 0x5c3   :  { %v2487_v21 = vrot.slane %v2440_v32, 1  ;;  %v2488_v55 = vrot.slane %v2441_v11, 1  ;;  %v2392_v2 = vsel %vm1715_vm6, %v2390_v23, %v2391_v36  ;;  %v2415_v7 = vadd.f32 %v2383_v10, %v2298_v28  ;;  %v9133_v28 = vld [vmem:[#allocation2 + $0x92] ss:$0 sm:$0xff]  ;;  %v13249_v10 = vld [vmem:[#allocation23_spill] sm:$0xff]  ;;  %v13251_v36 = vld [vmem:[#allocation41_spill] sm:$0xff] }
 0x5c4   :  { %v2490_v50 = vrot.slane %v2442_v8, 1  ;;  %v2491_v3 = vrot.slane %v2443_v56, 1  ;;  %v2416_v20 = vadd.f32 %v2386_v6, %v2299_v45  ;;  %v2417_v12 = vadd.f32 %v2389_v59, %v2300_v5 }
 0x5c5   :  { %v2418_v13 = vadd.f32 %v2392_v2, %v2301_v22  ;;  %v2419_v27 = vadd.f32 %v2389_v59, %v2302_v51  ;;  %v2420_v31 = vadd.f32 %v2386_v6, %v2303_v63  ;;  %v2483_v42 = vsel %vm1715_vm6, %v2481_v57, %v2482_v16  ;;  %v13248_v51 = vld [vmem:[#allocation37_spill] sm:$0xff]  ;;  %v13250_v6 = vld [vmem:[#allocation46_spill] sm:$0xff]  ;;  %v9134_v2 = vld [vmem:[#allocation2 + $0x99] ss:$0 sm:$0xff] }
 0x5c6   :  { %v2486_v40 = vsel %vm1715_vm6, %v2484_v47, %v2485_v30  ;;  %v2493_v18 = vrot.slane %v2444_v1, 1  ;;  %v2489_v4 = vsel %vm1715_vm6, %v2487_v21, %v2488_v55  ;;  %v2492_v52 = vsel %vm1715_vm6, %v2490_v50, %v2491_v3 }
 0x5c7   :  { %v2494_v61 = vrot.slane %v2445_v24, 1  ;;  %v2514_v39 = vadd.f32 %v2483_v42, %v2413_v15  ;;  %v2515_v43 = vadd.f32 %v2486_v40, %v2414_v62  ;;  %v2537_v34 = vmul.f32 %v9133_v28, %v13190_v48 }
 0x5c8   :  { %v2538_v45 = vmul.f32 %v9133_v28, %v13204_v46  ;;  %v2539_v5 = vmul.f32 %v9133_v28, %v13191_v0  ;;  %v2540_v22 = vmul.f32 %v9133_v28, %v13205_v49  ;;  %v2541_v63 = vmul.f32 %v9133_v28, %v13248_v51 }
 0x5c9   :  { %v2542_v19 = vmul.f32 %v9133_v28, %v13249_v10  ;;  %v2543_v23 = vmul.f32 %v9133_v28, %v13250_v6  ;;  %v2544_v59 = vmul.f32 %v9133_v28, %v13251_v36  ;;  %v2545_v9 = vmul.f32 %v9133_v28, %v13231_v60 }
 0x5ca   :  { %v2546_v15 = vmul.f32 %v9133_v28, %v13232_v58  ;;  %v2583_v62 = vrot.slane %v2537_v34, 2  ;;  %v2584_v29 = vrot.slane %v2538_v45, 2  ;;  %v2586_v17 = vrot.slane %v2539_v5, 2 }
 0x5cb   :  { %v2587_v14 = vrot.slane %v2540_v22, 2  ;;  %v2589_v35 = vrot.slane %v2541_v63, 2  ;;  %v2516_v41 = vadd.f32 %v2489_v4, %v2415_v7  ;;  %v2590_v33 = vrot.slane %v2542_v19, 2 }
 0x5cc   :  { %v2592_v38 = vrot.slane %v2543_v23, 2  ;;  %v2593_v32 = vrot.slane %v2544_v59, 2  ;;  %v2495_v11 = vsel %vm1715_vm6, %v2493_v18, %v2494_v61  ;;  %v2517_v8 = vadd.f32 %v2492_v52, %v2416_v20 }
 0x5cd   :  { %v2519_v56 = vadd.f32 %v2492_v52, %v2418_v13  ;;  %v2520_v1 = vadd.f32 %v2489_v4, %v2419_v27  ;;  %v2518_v24 = vadd.f32 %v2495_v11, %v2417_v12  ;;  %v2521_v57 = vadd.f32 %v2486_v40, %v2420_v31 }
 0x5ce   :  { %v2585_v16 = vsel %vm2567_vm7, %v2583_v62, %v2584_v29  ;;  %v2595_v47 = vrot.slane %v2545_v9, 2  ;;  %v2588_v30 = vsel %vm2567_vm7, %v2586_v17, %v2587_v14  ;;  %v2591_v21 = vsel %vm2567_vm7, %v2589_v35, %v2590_v33 }
 0x5cf   :  { %v2596_v55 = vrot.slane %v2546_v15, 2  ;;  %v2641_v7 = vmul.f32 %v9134_v2, %v13191_v0  ;;  %v2594_v50 = vsel %vm2567_vm7, %v2592_v38, %v2593_v32  ;;  %v2616_v3 = vadd.f32 %v2585_v16, %v2514_v39 }
 0x5d0   :  { %v2617_v42 = vadd.f32 %v2588_v30, %v2515_v43  ;;  %v2642_v20 = vmul.f32 %v9134_v2, %v13205_v49  ;;  %v2643_v12 = vmul.f32 %v9134_v2, %v13248_v51  ;;  %v2644_v13 = vmul.f32 %v9134_v2, %v13249_v10 }
 0x5d1   :  { %v2645_v27 = vmul.f32 %v9134_v2, %v13250_v6  ;;  %v2646_v31 = vmul.f32 %v9134_v2, %v13251_v36  ;;  %v2647_v40 = vmul.f32 %v9134_v2, %v13190_v48  ;;  %v2648_v18 = vmul.f32 %v9134_v2, %v13204_v46 }
 0x5d2   :  { %v2649_v4 = vmul.f32 %v9134_v2, %v13231_v60  ;;  %v2650_v52 = vmul.f32 %v9134_v2, %v13232_v58  ;;  %v2597_v61 = vsel %vm2567_vm7, %v2595_v47, %v2596_v55  ;;  %v2651_v39 = vmul.f32 %v9134_v2, %v13233_v54 }
 0x5d3   :  { %v2695_v43 = vrot.slane %v2641_v7, 2  ;;  %v2696_v28 = vrot.slane %v2642_v20, 2  ;;  %v2698_v34 = vrot.slane %v2643_v12, 2  ;;  %v2699_v45 = vrot.slane %v2644_v13, 2  ;;  %v9135_v7 = vld [vmem:[#allocation2 + $0xa0] ss:$0 sm:$0xff] }
 0x5d4   :  { %v2701_v5 = vrot.slane %v2645_v27, 2  ;;  %v2702_v22 = vrot.slane %v2646_v31, 2  ;;  %v2618_v63 = vadd.f32 %v2591_v21, %v2516_v41  ;;  %v2652_v19 = vmul.f32 %v9134_v2, %v13234_v53 }
 0x5d5   :  { %v2704_v23 = vrot.slane %v2647_v40, 2  ;;  %v2705_v59 = vrot.slane %v2648_v18, 2  ;;  %v2619_v9 = vadd.f32 %v2594_v50, %v2517_v8  ;;  %v2620_v15 = vadd.f32 %v2591_v21, %v2518_v24 }
 0x5d6   :  { %v2707_v62 = vrot.slane %v2649_v4, 2  ;;  %v2708_v29 = vrot.slane %v2650_v52, 2  ;;  %v2621_v17 = vadd.f32 %v2588_v30, %v2519_v56  ;;  %v2622_v14 = vadd.f32 %v2585_v16, %v2520_v1 }
 0x5d7   :  { %v2623_v35 = vadd.f32 %v2597_v61, %v2521_v57  ;;  %v2697_v33 = vsel %vm2567_vm7, %v2695_v43, %v2696_v28  ;;  %v2700_v38 = vsel %vm2567_vm7, %v2698_v34, %v2699_v45  ;;  %v2703_v32 = vsel %vm2567_vm7, %v2701_v5, %v2702_v22 }
 0x5d8   :  { %v2706_v11 = vsel %vm2567_vm7, %v2704_v23, %v2705_v59  ;;  %v2710_v41 = vrot.slane %v2651_v39, 2  ;;  %v2711_v47 = vrot.slane %v2652_v19, 2  ;;  %v2733_v55 = vadd.f32 %v2697_v33, %v2616_v3 }
 0x5d9   :  { %v2734_v2 = vadd.f32 %v2700_v38, %v2617_v42  ;;  %v2760_v8 = vmul.f32 %v9135_v7, %v13248_v51  ;;  %v2709_v24 = vsel %vm2567_vm7, %v2707_v62, %v2708_v29  ;;  %v2761_v56 = vmul.f32 %v9135_v7, %v13249_v10 }
 0x5da   :  { %v2762_v1 = vmul.f32 %v9135_v7, %v13250_v6  ;;  %v2763_v57 = vmul.f32 %v9135_v7, %v13251_v36  ;;  %v2764_v16 = vmul.f32 %v9135_v7, %v13191_v0  ;;  %v2765_v30 = vmul.f32 %v9135_v7, %v13205_v49 }
 0x5db   :  { %v2766_v21 = vmul.f32 %v9135_v7, %v13190_v48  ;;  %v2767_v50 = vmul.f32 %v9135_v7, %v13204_v46  ;;  %v2735_v3 = vadd.f32 %v2703_v32, %v2618_v63  ;;  %v2768_v42 = vmul.f32 %v9135_v7, %v13231_v60 }
 0x5dc   :  { %v2769_v20 = vmul.f32 %v9135_v7, %v13232_v58  ;;  %v2770_v12 = vmul.f32 %v9135_v7, %v13233_v54  ;;  %v2771_v13 = vmul.f32 %v9135_v7, %v13234_v53  ;;  %v2772_v27 = vmul.f32 %v9135_v7, %v13236_v25 }
 0x5dd   :  { %v2823_v31 = vrot.slane %v2760_v8, 2  ;;  %v2824_v40 = vrot.slane %v2761_v56, 2  ;;  %v2826_v18 = vrot.slane %v2762_v1, 2  ;;  %v2827_v4 = vrot.slane %v2763_v57, 2 }
 0x5de   :  { %v2829_v52 = vrot.slane %v2764_v16, 2  ;;  %v2830_v61 = vrot.slane %v2765_v30, 2  ;;  %v2773_v39 = vmul.f32 %v9135_v7, %v13237_v44  ;;  %v2832_v43 = vrot.slane %v2766_v21, 2 }
 0x5df   :  { %v2833_v28 = vrot.slane %v2767_v50, 2  ;;  %v2835_v34 = vrot.slane %v2768_v42, 2  ;;  %v2712_v45 = vsel %vm2567_vm7, %v2710_v41, %v2711_v47  ;;  %v2736_v5 = vadd.f32 %v2700_v38, %v2619_v9 }
 0x5e0   :  { %v2737_v22 = vadd.f32 %v2697_v33, %v2620_v15  ;;  %v2836_v63 = vrot.slane %v2769_v20, 2  ;;  %v2738_v19 = vadd.f32 %v2706_v11, %v2621_v17  ;;  %v2739_v23 = vadd.f32 %v2709_v24, %v2622_v14  ;;  %v9136_v17 = vld [vmem:[#allocation2 + $0xa7] ss:$0 sm:$0xff] }
 0x5e1   :  { %v2740_v59 = vadd.f32 %v2712_v45, %v2623_v35  ;;  %v2825_v62 = vsel %vm2567_vm7, %v2823_v31, %v2824_v40  ;;  %v2828_v29 = vsel %vm2567_vm7, %v2826_v18, %v2827_v4  ;;  %v2831_v32 = vsel %vm2567_vm7, %v2829_v52, %v2830_v61 }
 0x5e2   :  { %v2834_v8 = vsel %vm2567_vm7, %v2832_v43, %v2833_v28  ;;  %v2838_v7 = vrot.slane %v2770_v12, 2  ;;  %v2837_v56 = vsel %vm2567_vm7, %v2835_v34, %v2836_v63  ;;  %v2839_v1 = vrot.slane %v2771_v13, 2 }
 0x5e3   :  { %v2841_v57 = vrot.slane %v2772_v27, 2  ;;  %v2842_v41 = vrot.slane %v2773_v39, 2  ;;  %v2866_v9 = vadd.f32 %v2825_v62, %v2733_v55  ;;  %v2867_v15 = vadd.f32 %v2828_v29, %v2734_v2 }
 0x5e4   :  { %v2868_v33 = vadd.f32 %v2825_v62, %v2735_v3  ;;  %v2895_v14 = vmul.f32 %v9136_v17, %v13250_v6  ;;  %v2896_v35 = vmul.f32 %v9136_v17, %v13251_v36  ;;  %v2897_v38 = vmul.f32 %v9136_v17, %v13248_v51 }
 0x5e5   :  { %v2898_v11 = vmul.f32 %v9136_v17, %v13249_v10  ;;  %v2899_v47 = vmul.f32 %v9136_v17, %v13191_v0  ;;  %v2900_v24 = vmul.f32 %v9136_v17, %v13205_v49  ;;  %v2901_v16 = vmul.f32 %v9136_v17, %v13190_v48 }
 0x5e6   :  { %v2902_v30 = vmul.f32 %v9136_v17, %v13204_v46  ;;  %v2903_v55 = vmul.f32 %v9136_v17, %v13231_v60  ;;  %v2840_v2 = vsel %vm2567_vm7, %v2838_v7, %v2839_v1  ;;  %v2843_v21 = vsel %vm2567_vm7, %v2841_v57, %v2842_v41 }
 0x5e7   :  { %v2904_v50 = vmul.f32 %v9136_v17, %v13232_v58  ;;  %v2905_v3 = vmul.f32 %v9136_v17, %v13233_v54  ;;  %v2906_v42 = vmul.f32 %v9136_v17, %v13234_v53  ;;  %v2907_v20 = vmul.f32 %v9136_v17, %v13236_v25 }
 0x5e8   :  { %v2908_v12 = vmul.f32 %v9136_v17, %v13237_v44  ;;  %v2967_v13 = vrot.slane %v2895_v14, 2  ;;  %v2968_v27 = vrot.slane %v2896_v35, 2  ;;  %v2970_v31 = vrot.slane %v2897_v38, 2 }
 0x5e9   :  { %v2971_v40 = vrot.slane %v2898_v11, 2  ;;  %v2973_v18 = vrot.slane %v2899_v47, 2  ;;  %v2974_v4 = vrot.slane %v2900_v24, 2  ;;  %v2976_v52 = vrot.slane %v2901_v16, 2 }
 0x5ea   :  { %v2977_v61 = vrot.slane %v2902_v30, 2  ;;  %v2979_v39 = vrot.slane %v2903_v55, 2  ;;  %v2909_v43 = vmul.f32 %v9136_v17, %v13239_v26  ;;  %v2910_v28 = vmul.f32 %v9136_v17, %v13240_v37 }
 0x5eb   :  { %v2980_v34 = vrot.slane %v2904_v50, 2  ;;  %v2982_v45 = vrot.slane %v2905_v3, 2  ;;  %v2869_v63 = vadd.f32 %v2831_v32, %v2736_v5  ;;  %v2870_v62 = vadd.f32 %v2834_v8, %v2737_v22 }
 0x5ec   :  { %v2871_v29 = vadd.f32 %v2837_v56, %v2738_v19  ;;  %v2983_v7 = vrot.slane %v2906_v42, 2  ;;  %v2872_v1 = vadd.f32 %v2840_v2, %v2739_v23  ;;  %v2873_v57 = vadd.f32 %v2843_v21, %v2740_v59  ;;  %v9137_v59 = vld [vmem:[#allocation2 + $0xae] ss:$0 sm:$0xff] }
 0x5ed   :  { %v2969_v41 = vsel %vm2567_vm7, %v2967_v13, %v2968_v27  ;;  %v2972_v14 = vsel %vm2567_vm7, %v2970_v31, %v2971_v40  ;;  %v2975_v35 = vsel %vm2567_vm7, %v2973_v18, %v2974_v4  ;;  %v2978_v38 = vsel %vm2567_vm7, %v2976_v52, %v2977_v61 }
 0x5ee   :  { %v2981_v11 = vsel %vm2567_vm7, %v2979_v39, %v2980_v34  ;;  %v2985_v47 = vrot.slane %v2907_v20, 2  ;;  %v2984_v17 = vsel %vm2567_vm7, %v2982_v45, %v2983_v7  ;;  %v2986_v24 = vrot.slane %v2908_v12, 2 }
 0x5ef   :  { %v2988_v5 = vrot.slane %v2909_v43, 2  ;;  %v2989_v22 = vrot.slane %v2910_v28, 2  ;;  %v3015_v19 = vadd.f32 %v2969_v41, %v2866_v9  ;;  %v3016_v32 = vadd.f32 %v2972_v14, %v2867_v15 }
 0x5f0   :  { %v3017_v23 = vadd.f32 %v2975_v35, %v2868_v33  ;;  %v3042_v8 = vmul.f32 %v9137_v59, %v13248_v51  ;;  %v3043_v56 = vmul.f32 %v9137_v59, %v13249_v10  ;;  %v3044_v16 = vmul.f32 %v9137_v59, %v13191_v0 }
 0x5f1   :  { %v3045_v30 = vmul.f32 %v9137_v59, %v13205_v49  ;;  %v3046_v55 = vmul.f32 %v9137_v59, %v13190_v48  ;;  %v3047_v2 = vmul.f32 %v9137_v59, %v13204_v46  ;;  %v3048_v21 = vmul.f32 %v9137_v59, %v13231_v60 }
 0x5f2   :  { %v3049_v50 = vmul.f32 %v9137_v59, %v13232_v58  ;;  %v3050_v9 = vmul.f32 %v9137_v59, %v13233_v54  ;;  %v2987_v15 = vsel %vm2567_vm7, %v2985_v47, %v2986_v24  ;;  %v3051_v33 = vmul.f32 %v9137_v59, %v13234_v53 }
 0x5f3   :  { %v3052_v3 = vmul.f32 %v9137_v59, %v13236_v25  ;;  %v3053_v42 = vmul.f32 %v9137_v59, %v13237_v44  ;;  %v3054_v20 = vmul.f32 %v9137_v59, %v13239_v26  ;;  %v3105_v12 = vrot.slane %v3042_v8, 2 }
 0x5f4   :  { %v3106_v13 = vrot.slane %v3043_v56, 2  ;;  %v3108_v27 = vrot.slane %v3044_v16, 2  ;;  %v3109_v31 = vrot.slane %v3045_v30, 2  ;;  %v3111_v40 = vrot.slane %v3046_v55, 2 }
 0x5f5   :  { %v3112_v18 = vrot.slane %v3047_v2, 2  ;;  %v3114_v4 = vrot.slane %v3048_v21, 2  ;;  %v3055_v52 = vmul.f32 %v9137_v59, %v13240_v37  ;;  %v3115_v61 = vrot.slane %v3049_v50, 2 }
 0x5f6   :  { %v3117_v39 = vrot.slane %v3050_v9, 2  ;;  %v3118_v43 = vrot.slane %v3051_v33, 2  ;;  %v2990_v28 = vsel %vm2567_vm7, %v2988_v5, %v2989_v22  ;;  %v3018_v34 = vadd.f32 %v2978_v38, %v2869_v63 }
 0x5f7   :  { %v3120_v45 = vrot.slane %v3052_v3, 2  ;;  %v3121_v7 = vrot.slane %v3053_v42, 2  ;;  %v3019_v41 = vadd.f32 %v2981_v11, %v2870_v62  ;;  %v3020_v14 = vadd.f32 %v2984_v17, %v2871_v29  ;;  %v9138_v62 = vld [vmem:[#allocation2 + $0xb5] ss:$0 sm:$0xff] }
 0x5f8   :  { %v3021_v35 = vadd.f32 %v2987_v15, %v2872_v1  ;;  %v3022_v47 = vadd.f32 %v2990_v28, %v2873_v57  ;;  %v3107_v24 = vsel %vm2567_vm7, %v3105_v12, %v3106_v13  ;;  %v3110_v8 = vsel %vm2567_vm7, %v3108_v27, %v3109_v31 }
 0x5f9   :  { %v3113_v56 = vsel %vm2567_vm7, %v3111_v40, %v3112_v18  ;;  %v3116_v59 = vsel %vm2567_vm7, %v3114_v4, %v3115_v61  ;;  %v3119_v16 = vsel %vm2567_vm7, %v3117_v39, %v3118_v43  ;;  %v3122_v30 = vsel %vm2567_vm7, %v3120_v45, %v3121_v7 }
 0x5fa   :  { %v3123_v5 = vrot.slane %v3054_v20, 2  ;;  %v3124_v63 = vrot.slane %v3055_v52, 2  ;;  %v3148_v38 = vadd.f32 %v3107_v24, %v3015_v19  ;;  %v3149_v22 = vadd.f32 %v3110_v8, %v3016_v32 }
 0x5fb   :  { %v3173_v29 = vmul.f32 %v9138_v62, %v13191_v0  ;;  %v3174_v1 = vmul.f32 %v9138_v62, %v13205_v49  ;;  %v3175_v57 = vmul.f32 %v9138_v62, %v13190_v48  ;;  %v3176_v11 = vmul.f32 %v9138_v62, %v13204_v46 }
 0x5fc   :  { %v3177_v17 = vmul.f32 %v9138_v62, %v13231_v60  ;;  %v3178_v55 = vmul.f32 %v9138_v62, %v13232_v58  ;;  %v3179_v2 = vmul.f32 %v9138_v62, %v13233_v54  ;;  %v3180_v21 = vmul.f32 %v9138_v62, %v13234_v53 }
 0x5fd   :  { %v3181_v19 = vmul.f32 %v9138_v62, %v13236_v25  ;;  %v3182_v32 = vmul.f32 %v9138_v62, %v13237_v44  ;;  %v3150_v50 = vadd.f32 %v3113_v56, %v3017_v23  ;;  %v3183_v9 = vmul.f32 %v9138_v62, %v13239_v26 }
 0x5fe   :  { %v3227_v15 = vrot.slane %v3173_v29, 2  ;;  %v3228_v33 = vrot.slane %v3174_v1, 2  ;;  %v3230_v3 = vrot.slane %v3175_v57, 2  ;;  %v3231_v42 = vrot.slane %v3176_v11, 2 }
 0x5ff   :  { %v3233_v20 = vrot.slane %v3177_v17, 2  ;;  %v3234_v12 = vrot.slane %v3178_v55, 2  ;;  %v3125_v13 = vsel %vm2567_vm7, %v3123_v5, %v3124_v63  ;;  %v3184_v27 = vmul.f32 %v9138_v62, %v13240_v37  ;;  %v9139_v62 = vld [vmem:[#allocation2 + $0xbc] ss:$0 sm:$0xff] }
 0x600   :  { %v3236_v31 = vrot.slane %v3179_v2, 2  ;;  %v3237_v40 = vrot.slane %v3180_v21, 2  ;;  %v3151_v18 = vadd.f32 %v3116_v59, %v3018_v34  ;;  %v3152_v4 = vadd.f32 %v3119_v16, %v3019_v41 }
 0x601   :  { %v3239_v52 = vrot.slane %v3181_v19, 2  ;;  %v3240_v61 = vrot.slane %v3182_v32, 2  ;;  %v3153_v39 = vadd.f32 %v3122_v30, %v3020_v14  ;;  %v3154_v23 = vadd.f32 %v3125_v13, %v3021_v35 }
 0x602   :  { %v3155_v43 = vadd.f32 %v3122_v30, %v3022_v47  ;;  %v3229_v28 = vsel %vm2567_vm7, %v3227_v15, %v3228_v33  ;;  %v3232_v45 = vsel %vm2567_vm7, %v3230_v3, %v3231_v42  ;;  %v3235_v7 = vsel %vm2567_vm7, %v3233_v20, %v3234_v12 }
 0x603   :  { %v3238_v24 = vsel %vm2567_vm7, %v3236_v31, %v3237_v40  ;;  %v3242_v8 = vrot.slane %v3183_v9, 2  ;;  %v3243_v56 = vrot.slane %v3184_v27, 2  ;;  %v3265_v5 = vadd.f32 %v3229_v28, %v3148_v38 }
 0x604   :  { %v3266_v63 = vadd.f32 %v3232_v45, %v3149_v22  ;;  %v3288_v34 = vmul.f32 %v9139_v62, %v13190_v48  ;;  %v3241_v41 = vsel %vm2567_vm7, %v3239_v52, %v3240_v61  ;;  %v3289_v14 = vmul.f32 %v9139_v62, %v13204_v46  ;;  %v9140_v61 = vld [vmem:[#allocation2 + $0x93] ss:$0 sm:$0xff] }
 0x605   :  { %v3290_v35 = vmul.f32 %v9139_v62, %v13231_v60  ;;  %v3291_v47 = vmul.f32 %v9139_v62, %v13232_v58  ;;  %v3292_v59 = vmul.f32 %v9139_v62, %v13233_v54  ;;  %v3293_v16 = vmul.f32 %v9139_v62, %v13234_v53 }
 0x606   :  { %v3294_v30 = vmul.f32 %v9139_v62, %v13236_v25  ;;  %v3295_v38 = vmul.f32 %v9139_v62, %v13237_v44  ;;  %v3296_v22 = vmul.f32 %v9139_v62, %v13239_v26  ;;  %v3297_v29 = vmul.f32 %v9139_v62, %v13240_v37 }
 0x607   :  { %v3333_v1 = vrot.slane %v3288_v34, 2  ;;  %v3334_v57 = vrot.slane %v3289_v14, 2  ;;  %v3336_v11 = vrot.slane %v3290_v35, 2  ;;  %v3337_v17 = vrot.slane %v3291_v47, 2 }
 0x608   :  { %v3339_v55 = vrot.slane %v3292_v59, 2  ;;  %v3340_v2 = vrot.slane %v3293_v16, 2  ;;  %v3267_v21 = vadd.f32 %v3235_v7, %v3150_v50  ;;  %v3268_v19 = vadd.f32 %v3238_v24, %v3151_v18 }
 0x609   :  { %v3342_v32 = vrot.slane %v3294_v30, 2  ;;  %v3343_v9 = vrot.slane %v3295_v38, 2  ;;  %v3244_v15 = vsel %vm2567_vm7, %v3242_v8, %v3243_v56  ;;  %v3269_v33 = vadd.f32 %v3241_v41, %v3152_v4 }
 0x60a   :  { %v3271_v3 = vadd.f32 %v3241_v41, %v3154_v23  ;;  %v3272_v42 = vadd.f32 %v3238_v24, %v3155_v43  ;;  %v3270_v20 = vadd.f32 %v3244_v15, %v3153_v39  ;;  %v3335_v12 = vsel %vm2567_vm7, %v3333_v1, %v3334_v57 }
 0x60b   :  { %v3338_v13 = vsel %vm2567_vm7, %v3336_v11, %v3337_v17  ;;  %v3345_v27 = vrot.slane %v3296_v22, 2  ;;  %v3341_v31 = vsel %vm2567_vm7, %v3339_v55, %v3340_v2  ;;  %v3344_v40 = vsel %vm2567_vm7, %v3342_v32, %v3343_v9  ;;  %v9141_v32 = vld [vmem:[#allocation2 + $0x9a] ss:$0 sm:$0xff] }
 0x60c   :  { %v3346_v52 = vrot.slane %v3297_v29, 2  ;;  %v3366_v50 = vadd.f32 %v3335_v12, %v3265_v5  ;;  %v3367_v18 = vadd.f32 %v3338_v13, %v3266_v63  ;;  %v3389_v28 = vmul.f32 %v9140_v61, %v13190_v48 }
 0x60d   :  { %v3390_v4 = vmul.f32 %v9140_v61, %v13204_v46  ;;  %v3391_v23 = vmul.f32 %v9140_v61, %v13191_v0  ;;  %v3392_v39 = vmul.f32 %v9140_v61, %v13205_v49  ;;  %v3393_v43 = vmul.f32 %v9140_v61, %v13248_v51 }
 0x60e   :  { %v3394_v45 = vmul.f32 %v9140_v61, %v13249_v10  ;;  %v3395_v7 = vmul.f32 %v9140_v61, %v13250_v6  ;;  %v3396_v24 = vmul.f32 %v9140_v61, %v13251_v36  ;;  %v3397_v8 = vmul.f32 %v9140_v61, %v13231_v60 }
 0x60f   :  { %v3398_v56 = vmul.f32 %v9140_v61, %v13232_v58  ;;  %v3434_v5 = vrot.slane %v3389_v28, 3  ;;  %v3435_v63 = vrot.slane %v3390_v4, 3  ;;  %v3437_v62 = vrot.slane %v3391_v23, 3 }
 0x610   :  { %v3438_v34 = vrot.slane %v3392_v39, 3  ;;  %v3440_v41 = vrot.slane %v3393_v43, 3  ;;  %v3368_v14 = vadd.f32 %v3341_v31, %v3267_v21  ;;  %v3441_v35 = vrot.slane %v3394_v45, 3 }
 0x611   :  { %v3443_v47 = vrot.slane %v3395_v7, 3  ;;  %v3444_v59 = vrot.slane %v3396_v24, 3  ;;  %v3347_v16 = vsel %vm2567_vm7, %v3345_v27, %v3346_v52  ;;  %v3369_v30 = vadd.f32 %v3344_v40, %v3268_v19 }
 0x612   :  { %v3371_v38 = vadd.f32 %v3344_v40, %v3270_v20  ;;  %v3372_v22 = vadd.f32 %v3341_v31, %v3271_v3  ;;  %v3370_v29 = vadd.f32 %v3347_v16, %v3269_v33  ;;  %v3373_v1 = vadd.f32 %v3338_v13, %v3272_v42 }
 0x613   :  { %v3436_v57 = vsel %vm1424_vm13, %v3434_v5, %v3435_v63  ;;  %v3446_v11 = vrot.slane %v3397_v8, 3  ;;  %v3439_v17 = vsel %vm1424_vm13, %v3437_v62, %v3438_v34  ;;  %v3442_v55 = vsel %vm1424_vm13, %v3440_v41, %v3441_v35 }
 0x614   :  { %v3447_v2 = vrot.slane %v3398_v56, 3  ;;  %v3492_v21 = vmul.f32 %v9141_v32, %v13191_v0  ;;  %v3445_v9 = vsel %vm1424_vm13, %v3443_v47, %v3444_v59  ;;  %v3467_v15 = vadd.f32 %v3436_v57, %v3366_v50 }
 0x615   :  { %v3468_v12 = vadd.f32 %v3439_v17, %v3367_v18  ;;  %v3493_v19 = vmul.f32 %v9141_v32, %v13205_v49  ;;  %v3494_v33 = vmul.f32 %v9141_v32, %v13248_v51  ;;  %v3495_v3 = vmul.f32 %v9141_v32, %v13249_v10 }
 0x616   :  { %v3496_v42 = vmul.f32 %v9141_v32, %v13250_v6  ;;  %v3497_v20 = vmul.f32 %v9141_v32, %v13251_v36  ;;  %v3498_v13 = vmul.f32 %v9141_v32, %v13190_v48  ;;  %v3499_v27 = vmul.f32 %v9141_v32, %v13204_v46 }
 0x617   :  { %v3500_v31 = vmul.f32 %v9141_v32, %v13231_v60  ;;  %v3501_v40 = vmul.f32 %v9141_v32, %v13232_v58  ;;  %v3448_v52 = vsel %vm1424_vm13, %v3446_v11, %v3447_v2  ;;  %v3502_v50 = vmul.f32 %v9141_v32, %v13233_v54 }
 0x618   :  { %v3546_v18 = vrot.slane %v3492_v21, 3  ;;  %v3547_v61 = vrot.slane %v3493_v19, 3  ;;  %v3549_v28 = vrot.slane %v3494_v33, 3  ;;  %v3550_v4 = vrot.slane %v3495_v3, 3  ;;  %v9142_v21 = vld [vmem:[#allocation2 + $0xa1] ss:$0 sm:$0xff] }
 0x619   :  { %v3552_v23 = vrot.slane %v3496_v42, 3  ;;  %v3553_v39 = vrot.slane %v3497_v20, 3  ;;  %v3469_v43 = vadd.f32 %v3442_v55, %v3368_v14  ;;  %v3503_v45 = vmul.f32 %v9141_v32, %v13234_v53 }
 0x61a   :  { %v3555_v7 = vrot.slane %v3498_v13, 3  ;;  %v3556_v24 = vrot.slane %v3499_v27, 3  ;;  %v3470_v8 = vadd.f32 %v3445_v9, %v3369_v30  ;;  %v3471_v56 = vadd.f32 %v3442_v55, %v3370_v29 }
 0x61b   :  { %v3558_v5 = vrot.slane %v3500_v31, 3  ;;  %v3559_v63 = vrot.slane %v3501_v40, 3  ;;  %v3472_v62 = vadd.f32 %v3439_v17, %v3371_v38  ;;  %v3473_v34 = vadd.f32 %v3436_v57, %v3372_v22 }
 0x61c   :  { %v3474_v41 = vadd.f32 %v3448_v52, %v3373_v1  ;;  %v3548_v35 = vsel %vm1424_vm13, %v3546_v18, %v3547_v61  ;;  %v3551_v47 = vsel %vm1424_vm13, %v3549_v28, %v3550_v4  ;;  %v3554_v59 = vsel %vm1424_vm13, %v3552_v23, %v3553_v39 }
 0x61d   :  { %v3557_v16 = vsel %vm1424_vm13, %v3555_v7, %v3556_v24  ;;  %v3561_v14 = vrot.slane %v3502_v50, 3  ;;  %v3562_v11 = vrot.slane %v3503_v45, 3  ;;  %v3584_v2 = vadd.f32 %v3548_v35, %v3467_v15 }
 0x61e   :  { %v3585_v32 = vadd.f32 %v3551_v47, %v3468_v12  ;;  %v3611_v30 = vmul.f32 %v9142_v21, %v13248_v51  ;;  %v3560_v29 = vsel %vm1424_vm13, %v3558_v5, %v3559_v63  ;;  %v3612_v38 = vmul.f32 %v9142_v21, %v13249_v10 }
 0x61f   :  { %v3613_v22 = vmul.f32 %v9142_v21, %v13250_v6  ;;  %v3614_v1 = vmul.f32 %v9142_v21, %v13251_v36  ;;  %v3615_v57 = vmul.f32 %v9142_v21, %v13191_v0  ;;  %v3616_v17 = vmul.f32 %v9142_v21, %v13205_v49 }
 0x620   :  { %v3617_v55 = vmul.f32 %v9142_v21, %v13190_v48  ;;  %v3618_v9 = vmul.f32 %v9142_v21, %v13204_v46  ;;  %v3586_v15 = vadd.f32 %v3554_v59, %v3469_v43  ;;  %v3619_v12 = vmul.f32 %v9142_v21, %v13231_v60 }
 0x621   :  { %v3620_v19 = vmul.f32 %v9142_v21, %v13232_v58  ;;  %v3621_v33 = vmul.f32 %v9142_v21, %v13233_v54  ;;  %v3622_v3 = vmul.f32 %v9142_v21, %v13234_v53  ;;  %v3623_v42 = vmul.f32 %v9142_v21, %v13236_v25 }
 0x622   :  { %v3674_v20 = vrot.slane %v3611_v30, 3  ;;  %v3675_v13 = vrot.slane %v3612_v38, 3  ;;  %v3677_v27 = vrot.slane %v3613_v22, 3  ;;  %v3678_v31 = vrot.slane %v3614_v1, 3 }
 0x623   :  { %v3680_v40 = vrot.slane %v3615_v57, 3  ;;  %v3681_v52 = vrot.slane %v3616_v17, 3  ;;  %v3624_v50 = vmul.f32 %v9142_v21, %v13237_v44  ;;  %v3683_v18 = vrot.slane %v3617_v55, 3 }
 0x624   :  { %v3684_v61 = vrot.slane %v3618_v9, 3  ;;  %v3686_v28 = vrot.slane %v3619_v12, 3  ;;  %v3563_v4 = vsel %vm1424_vm13, %v3561_v14, %v3562_v11  ;;  %v3587_v23 = vadd.f32 %v3551_v47, %v3470_v8 }
 0x625   :  { %v3588_v39 = vadd.f32 %v3548_v35, %v3471_v56  ;;  %v3687_v43 = vrot.slane %v3620_v19, 3  ;;  %v3589_v45 = vadd.f32 %v3557_v16, %v3472_v62  ;;  %v3590_v7 = vadd.f32 %v3560_v29, %v3473_v34  ;;  %v9143_v62 = vld [vmem:[#allocation2 + $0xa8] ss:$0 sm:$0xff] }
 0x626   :  { %v3591_v24 = vadd.f32 %v3563_v4, %v3474_v41  ;;  %v3676_v5 = vsel %vm1424_vm13, %v3674_v20, %v3675_v13  ;;  %v3679_v63 = vsel %vm1424_vm13, %v3677_v27, %v3678_v31  ;;  %v3682_v59 = vsel %vm1424_vm13, %v3680_v40, %v3681_v52 }
 0x627   :  { %v3685_v30 = vsel %vm1424_vm13, %v3683_v18, %v3684_v61  ;;  %v3689_v21 = vrot.slane %v3621_v33, 3  ;;  %v3688_v38 = vsel %vm1424_vm13, %v3686_v28, %v3687_v43  ;;  %v3690_v22 = vrot.slane %v3622_v3, 3 }
 0x628   :  { %v3692_v1 = vrot.slane %v3623_v42, 3  ;;  %v3693_v14 = vrot.slane %v3624_v50, 3  ;;  %v3717_v8 = vadd.f32 %v3676_v5, %v3584_v2  ;;  %v3718_v56 = vadd.f32 %v3679_v63, %v3585_v32 }
 0x629   :  { %v3719_v35 = vadd.f32 %v3676_v5, %v3586_v15  ;;  %v3746_v34 = vmul.f32 %v9143_v62, %v13250_v6  ;;  %v3747_v41 = vmul.f32 %v9143_v62, %v13251_v36  ;;  %v3748_v47 = vmul.f32 %v9143_v62, %v13248_v51 }
 0x62a   :  { %v3749_v16 = vmul.f32 %v9143_v62, %v13249_v10  ;;  %v3750_v11 = vmul.f32 %v9143_v62, %v13191_v0  ;;  %v3751_v29 = vmul.f32 %v9143_v62, %v13205_v49  ;;  %v3752_v57 = vmul.f32 %v9143_v62, %v13190_v48 }
 0x62b   :  { %v3753_v17 = vmul.f32 %v9143_v62, %v13204_v46  ;;  %v3754_v2 = vmul.f32 %v9143_v62, %v13231_v60  ;;  %v3691_v32 = vsel %vm1424_vm13, %v3689_v21, %v3690_v22  ;;  %v3694_v55 = vsel %vm1424_vm13, %v3692_v1, %v3693_v14 }
 0x62c   :  { %v3755_v9 = vmul.f32 %v9143_v62, %v13232_v58  ;;  %v3756_v15 = vmul.f32 %v9143_v62, %v13233_v54  ;;  %v3757_v12 = vmul.f32 %v9143_v62, %v13234_v53  ;;  %v3758_v19 = vmul.f32 %v9143_v62, %v13236_v25 }
 0x62d   :  { %v3759_v33 = vmul.f32 %v9143_v62, %v13237_v44  ;;  %v3818_v3 = vrot.slane %v3746_v34, 3  ;;  %v3819_v42 = vrot.slane %v3747_v41, 3  ;;  %v3821_v20 = vrot.slane %v3748_v47, 3 }
 0x62e   :  { %v3822_v13 = vrot.slane %v3749_v16, 3  ;;  %v3824_v27 = vrot.slane %v3750_v11, 3  ;;  %v3825_v31 = vrot.slane %v3751_v29, 3  ;;  %v3827_v40 = vrot.slane %v3752_v57, 3 }
 0x62f   :  { %v3828_v52 = vrot.slane %v3753_v17, 3  ;;  %v3830_v50 = vrot.slane %v3754_v2, 3  ;;  %v3760_v18 = vmul.f32 %v9143_v62, %v13239_v26  ;;  %v3761_v61 = vmul.f32 %v9143_v62, %v13240_v37 }
 0x630   :  { %v3831_v28 = vrot.slane %v3755_v9, 3  ;;  %v3833_v4 = vrot.slane %v3756_v15, 3  ;;  %v3720_v43 = vadd.f32 %v3682_v59, %v3587_v23  ;;  %v3721_v5 = vadd.f32 %v3685_v30, %v3588_v39 }
 0x631   :  { %v3722_v63 = vadd.f32 %v3688_v38, %v3589_v45  ;;  %v3834_v21 = vrot.slane %v3757_v12, 3  ;;  %v3723_v22 = vadd.f32 %v3691_v32, %v3590_v7  ;;  %v3724_v1 = vadd.f32 %v3694_v55, %v3591_v24  ;;  %v9144_v24 = vld [vmem:[#allocation2 + $0xaf] ss:$0 sm:$0xff] }
 0x632   :  { %v3820_v14 = vsel %vm1424_vm13, %v3818_v3, %v3819_v42  ;;  %v3823_v34 = vsel %vm1424_vm13, %v3821_v20, %v3822_v13  ;;  %v3826_v41 = vsel %vm1424_vm13, %v3824_v27, %v3825_v31  ;;  %v3829_v47 = vsel %vm1424_vm13, %v3827_v40, %v3828_v52 }
 0x633   :  { %v3832_v16 = vsel %vm1424_vm13, %v3830_v50, %v3831_v28  ;;  %v3836_v11 = vrot.slane %v3758_v19, 3  ;;  %v3835_v62 = vsel %vm1424_vm13, %v3833_v4, %v3834_v21  ;;  %v3837_v29 = vrot.slane %v3759_v33, 3 }
 0x634   :  { %v3839_v23 = vrot.slane %v3760_v18, 3  ;;  %v3840_v39 = vrot.slane %v3761_v61, 3  ;;  %v3866_v45 = vadd.f32 %v3820_v14, %v3717_v8  ;;  %v3867_v59 = vadd.f32 %v3823_v34, %v3718_v56 }
 0x635   :  { %v3868_v7 = vadd.f32 %v3826_v41, %v3719_v35  ;;  %v3893_v30 = vmul.f32 %v9144_v24, %v13248_v51  ;;  %v3894_v38 = vmul.f32 %v9144_v24, %v13249_v10  ;;  %v3895_v57 = vmul.f32 %v9144_v24, %v13191_v0 }
 0x636   :  { %v3896_v17 = vmul.f32 %v9144_v24, %v13205_v49  ;;  %v3897_v2 = vmul.f32 %v9144_v24, %v13190_v48  ;;  %v3898_v32 = vmul.f32 %v9144_v24, %v13204_v46  ;;  %v3899_v55 = vmul.f32 %v9144_v24, %v13231_v60 }
 0x637   :  { %v3900_v9 = vmul.f32 %v9144_v24, %v13232_v58  ;;  %v3901_v8 = vmul.f32 %v9144_v24, %v13233_v54  ;;  %v3838_v56 = vsel %vm1424_vm13, %v3836_v11, %v3837_v29  ;;  %v3902_v35 = vmul.f32 %v9144_v24, %v13234_v53 }
 0x638   :  { %v3903_v15 = vmul.f32 %v9144_v24, %v13236_v25  ;;  %v3904_v12 = vmul.f32 %v9144_v24, %v13237_v44  ;;  %v3905_v19 = vmul.f32 %v9144_v24, %v13239_v26  ;;  %v3956_v33 = vrot.slane %v3893_v30, 3 }
 0x639   :  { %v3957_v3 = vrot.slane %v3894_v38, 3  ;;  %v3959_v42 = vrot.slane %v3895_v57, 3  ;;  %v3960_v20 = vrot.slane %v3896_v17, 3  ;;  %v3962_v13 = vrot.slane %v3897_v2, 3 }
 0x63a   :  { %v3963_v27 = vrot.slane %v3898_v32, 3  ;;  %v3965_v31 = vrot.slane %v3899_v55, 3  ;;  %v3906_v40 = vmul.f32 %v9144_v24, %v13240_v37  ;;  %v3966_v52 = vrot.slane %v3900_v9, 3 }
 0x63b   :  { %v3968_v50 = vrot.slane %v3901_v8, 3  ;;  %v3969_v18 = vrot.slane %v3902_v35, 3  ;;  %v3841_v61 = vsel %vm1424_vm13, %v3839_v23, %v3840_v39  ;;  %v3869_v28 = vadd.f32 %v3829_v47, %v3720_v43 }
 0x63c   :  { %v3971_v4 = vrot.slane %v3903_v15, 3  ;;  %v3972_v21 = vrot.slane %v3904_v12, 3  ;;  %v3870_v14 = vadd.f32 %v3832_v16, %v3721_v5  ;;  %v3871_v34 = vadd.f32 %v3835_v62, %v3722_v63  ;;  %v9145_v5 = vld [vmem:[#allocation2 + $0xb6] ss:$0 sm:$0xff] }
 0x63d   :  { %v3872_v41 = vadd.f32 %v3838_v56, %v3723_v22  ;;  %v3873_v11 = vadd.f32 %v3841_v61, %v3724_v1  ;;  %v3958_v29 = vsel %vm1424_vm13, %v3956_v33, %v3957_v3  ;;  %v3961_v30 = vsel %vm1424_vm13, %v3959_v42, %v3960_v20 }
 0x63e   :  { %v3964_v38 = vsel %vm1424_vm13, %v3962_v13, %v3963_v27  ;;  %v3967_v24 = vsel %vm1424_vm13, %v3965_v31, %v3966_v52  ;;  %v3970_v57 = vsel %vm1424_vm13, %v3968_v50, %v3969_v18  ;;  %v3973_v17 = vsel %vm1424_vm13, %v3971_v4, %v3972_v21 }
 0x63f   :  { %v3974_v23 = vrot.slane %v3905_v19, 3  ;;  %v3975_v43 = vrot.slane %v3906_v40, 3  ;;  %v3999_v47 = vadd.f32 %v3958_v29, %v3866_v45  ;;  %v4000_v39 = vadd.f32 %v3961_v30, %v3867_v59 }
 0x640   :  { %v4024_v63 = vmul.f32 %v9145_v5, %v13191_v0  ;;  %v4025_v22 = vmul.f32 %v9145_v5, %v13205_v49  ;;  %v4026_v1 = vmul.f32 %v9145_v5, %v13190_v48  ;;  %v4027_v16 = vmul.f32 %v9145_v5, %v13204_v46 }
 0x641   :  { %v4028_v62 = vmul.f32 %v9145_v5, %v13231_v60  ;;  %v4029_v2 = vmul.f32 %v9145_v5, %v13232_v58  ;;  %v4030_v32 = vmul.f32 %v9145_v5, %v13233_v54  ;;  %v4031_v55 = vmul.f32 %v9145_v5, %v13234_v53 }
 0x642   :  { %v4032_v45 = vmul.f32 %v9145_v5, %v13236_v25  ;;  %v4033_v59 = vmul.f32 %v9145_v5, %v13237_v44  ;;  %v4001_v9 = vadd.f32 %v3964_v38, %v3868_v7  ;;  %v4034_v8 = vmul.f32 %v9145_v5, %v13239_v26 }
 0x643   :  { %v4078_v56 = vrot.slane %v4024_v63, 3  ;;  %v4079_v35 = vrot.slane %v4025_v22, 3  ;;  %v4081_v15 = vrot.slane %v4026_v1, 3  ;;  %v4082_v12 = vrot.slane %v4027_v16, 3 }
 0x644   :  { %v4084_v19 = vrot.slane %v4028_v62, 3  ;;  %v4085_v33 = vrot.slane %v4029_v2, 3  ;;  %v3976_v3 = vsel %vm1424_vm13, %v3974_v23, %v3975_v43  ;;  %v4035_v42 = vmul.f32 %v9145_v5, %v13240_v37  ;;  %v9146_v5 = vld [vmem:[#allocation2 + $0xbd] ss:$0 sm:$0xff] }
 0x645   :  { %v4087_v20 = vrot.slane %v4030_v32, 3  ;;  %v4088_v13 = vrot.slane %v4031_v55, 3  ;;  %v4002_v27 = vadd.f32 %v3967_v24, %v3869_v28  ;;  %v4003_v31 = vadd.f32 %v3970_v57, %v3870_v14 }
 0x646   :  { %v4090_v40 = vrot.slane %v4032_v45, 3  ;;  %v4091_v52 = vrot.slane %v4033_v59, 3  ;;  %v4004_v50 = vadd.f32 %v3973_v17, %v3871_v34  ;;  %v4005_v7 = vadd.f32 %v3976_v3, %v3872_v41 }
 0x647   :  { %v4006_v18 = vadd.f32 %v3973_v17, %v3873_v11  ;;  %v4080_v61 = vsel %vm1424_vm13, %v4078_v56, %v4079_v35  ;;  %v4083_v4 = vsel %vm1424_vm13, %v4081_v15, %v4082_v12  ;;  %v4086_v21 = vsel %vm1424_vm13, %v4084_v19, %v4085_v33 }
 0x648   :  { %v4089_v29 = vsel %vm1424_vm13, %v4087_v20, %v4088_v13  ;;  %v4093_v30 = vrot.slane %v4034_v8, 3  ;;  %v4094_v38 = vrot.slane %v4035_v42, 3  ;;  %v4116_v23 = vadd.f32 %v4080_v61, %v3999_v47 }
 0x649   :  { %v4117_v43 = vadd.f32 %v4083_v4, %v4000_v39  ;;  %v4139_v28 = vmul.f32 %v9146_v5, %v13190_v48  ;;  %v4092_v14 = vsel %vm1424_vm13, %v4090_v40, %v4091_v52  ;;  %v4140_v34 = vmul.f32 %v9146_v5, %v13204_v46  ;;  %v9147_v52 = vld [vmem:[#allocation2 + $0x94] ss:$0 sm:$0xff] }
 0x64a   :  { %v4141_v41 = vmul.f32 %v9146_v5, %v13231_v60  ;;  %v4142_v11 = vmul.f32 %v9146_v5, %v13232_v58  ;;  %v4143_v24 = vmul.f32 %v9146_v5, %v13233_v54  ;;  %v4144_v57 = vmul.f32 %v9146_v5, %v13234_v53 }
 0x64b   :  { %v4145_v17 = vmul.f32 %v9146_v5, %v13236_v25  ;;  %v4146_v47 = vmul.f32 %v9146_v5, %v13237_v44  ;;  %v4147_v39 = vmul.f32 %v9146_v5, %v13239_v26  ;;  %v4148_v63 = vmul.f32 %v9146_v5, %v13240_v37 }
 0x64c   :  { %v4184_v22 = vrot.slane %v4139_v28, 3  ;;  %v4185_v1 = vrot.slane %v4140_v34, 3  ;;  %v4187_v16 = vrot.slane %v4141_v41, 3  ;;  %v4188_v62 = vrot.slane %v4142_v11, 3 }
 0x64d   :  { %v4190_v2 = vrot.slane %v4143_v24, 3  ;;  %v4191_v32 = vrot.slane %v4144_v57, 3  ;;  %v4118_v55 = vadd.f32 %v4086_v21, %v4001_v9  ;;  %v4119_v45 = vadd.f32 %v4089_v29, %v4002_v27 }
 0x64e   :  { %v4193_v59 = vrot.slane %v4145_v17, 3  ;;  %v4194_v8 = vrot.slane %v4146_v47, 3  ;;  %v4095_v56 = vsel %vm1424_vm13, %v4093_v30, %v4094_v38  ;;  %v4120_v35 = vadd.f32 %v4092_v14, %v4003_v31 }
 0x64f   :  { %v4122_v15 = vadd.f32 %v4092_v14, %v4005_v7  ;;  %v4123_v12 = vadd.f32 %v4089_v29, %v4006_v18  ;;  %v4121_v19 = vadd.f32 %v4095_v56, %v4004_v50  ;;  %v4186_v33 = vsel %vm1424_vm13, %v4184_v22, %v4185_v1 }
 0x650   :  { %v4189_v3 = vsel %vm1424_vm13, %v4187_v16, %v4188_v62  ;;  %v4196_v42 = vrot.slane %v4147_v39, 3  ;;  %v4192_v20 = vsel %vm1424_vm13, %v4190_v2, %v4191_v32  ;;  %v4195_v13 = vsel %vm1424_vm13, %v4193_v59, %v4194_v8  ;;  %v9148_v59 = vld [vmem:[#allocation2 + $0x9b] ss:$0 sm:$0xff] }
 0x651   :  { %v4197_v40 = vrot.slane %v4148_v63, 3  ;;  %v4217_v9 = vadd.f32 %v4186_v33, %v4116_v23  ;;  %v4218_v27 = vadd.f32 %v4189_v3, %v4117_v43  ;;  %v4240_v61 = vmul.f32 %v9147_v52, %v13190_v48 }
 0x652   :  { %v4241_v31 = vmul.f32 %v9147_v52, %v13204_v46  ;;  %v4242_v7 = vmul.f32 %v9147_v52, %v13191_v0  ;;  %v4243_v50 = vmul.f32 %v9147_v52, %v13205_v49  ;;  %v4244_v18 = vmul.f32 %v9147_v52, %v13248_v51 }
 0x653   :  { %v4245_v4 = vmul.f32 %v9147_v52, %v13249_v10  ;;  %v4246_v21 = vmul.f32 %v9147_v52, %v13250_v6  ;;  %v4247_v29 = vmul.f32 %v9147_v52, %v13251_v36  ;;  %v4248_v30 = vmul.f32 %v9147_v52, %v13231_v60 }
 0x654   :  { %v4249_v38 = vmul.f32 %v9147_v52, %v13232_v58  ;;  %v4285_v23 = vrot.slane %v4240_v61, 4  ;;  %v4286_v43 = vrot.slane %v4241_v31, 4  ;;  %v4288_v5 = vrot.slane %v4242_v7, 4 }
 0x655   :  { %v4289_v28 = vrot.slane %v4243_v50, 4  ;;  %v4291_v14 = vrot.slane %v4244_v18, 4  ;;  %v4219_v34 = vadd.f32 %v4192_v20, %v4118_v55  ;;  %v4292_v41 = vrot.slane %v4245_v4, 4 }
 0x656   :  { %v4294_v11 = vrot.slane %v4246_v21, 4  ;;  %v4295_v24 = vrot.slane %v4247_v29, 4  ;;  %v4198_v57 = vsel %vm1424_vm13, %v4196_v42, %v4197_v40  ;;  %v4220_v17 = vadd.f32 %v4195_v13, %v4119_v45 }
 0x657   :  { %v4222_v47 = vadd.f32 %v4195_v13, %v4121_v19  ;;  %v4223_v39 = vadd.f32 %v4192_v20, %v4122_v15  ;;  %v4221_v63 = vadd.f32 %v4198_v57, %v4120_v35  ;;  %v4224_v22 = vadd.f32 %v4189_v3, %v4123_v12 }
 0x658   :  { %v4287_v1 = vsel %vm1407_vm12, %v4285_v23, %v4286_v43  ;;  %v4297_v16 = vrot.slane %v4248_v30, 4  ;;  %v4290_v62 = vsel %vm1407_vm12, %v4288_v5, %v4289_v28  ;;  %v4293_v2 = vsel %vm1407_vm12, %v4291_v14, %v4292_v41 }
 0x659   :  { %v4298_v32 = vrot.slane %v4249_v38, 4  ;;  %v4343_v55 = vmul.f32 %v9148_v59, %v13191_v0  ;;  %v4296_v8 = vsel %vm1407_vm12, %v4294_v11, %v4295_v24  ;;  %v4318_v56 = vadd.f32 %v4287_v1, %v4217_v9 }
 0x65a   :  { %v4319_v33 = vadd.f32 %v4290_v62, %v4218_v27  ;;  %v4344_v45 = vmul.f32 %v9148_v59, %v13205_v49  ;;  %v4345_v35 = vmul.f32 %v9148_v59, %v13248_v51  ;;  %v4346_v15 = vmul.f32 %v9148_v59, %v13249_v10 }
 0x65b   :  { %v4347_v12 = vmul.f32 %v9148_v59, %v13250_v6  ;;  %v4348_v19 = vmul.f32 %v9148_v59, %v13251_v36  ;;  %v4349_v3 = vmul.f32 %v9148_v59, %v13190_v48  ;;  %v4350_v42 = vmul.f32 %v9148_v59, %v13204_v46 }
 0x65c   :  { %v4351_v20 = vmul.f32 %v9148_v59, %v13231_v60  ;;  %v4352_v13 = vmul.f32 %v9148_v59, %v13232_v58  ;;  %v4299_v40 = vsel %vm1407_vm12, %v4297_v16, %v4298_v32  ;;  %v4353_v9 = vmul.f32 %v9148_v59, %v13233_v54 }
 0x65d   :  { %v4397_v27 = vrot.slane %v4343_v55, 4  ;;  %v4398_v52 = vrot.slane %v4344_v45, 4  ;;  %v4400_v61 = vrot.slane %v4345_v35, 4  ;;  %v4401_v31 = vrot.slane %v4346_v15, 4  ;;  %v9149_v55 = vld [vmem:[#allocation2 + $0xa2] ss:$0 sm:$0xff] }
 0x65e   :  { %v4403_v7 = vrot.slane %v4347_v12, 4  ;;  %v4404_v50 = vrot.slane %v4348_v19, 4  ;;  %v4320_v18 = vadd.f32 %v4293_v2, %v4219_v34  ;;  %v4354_v4 = vmul.f32 %v9148_v59, %v13234_v53 }
 0x65f   :  { %v4406_v21 = vrot.slane %v4349_v3, 4  ;;  %v4407_v29 = vrot.slane %v4350_v42, 4  ;;  %v4321_v30 = vadd.f32 %v4296_v8, %v4220_v17  ;;  %v4322_v38 = vadd.f32 %v4293_v2, %v4221_v63 }
 0x660   :  { %v4409_v23 = vrot.slane %v4351_v20, 4  ;;  %v4410_v43 = vrot.slane %v4352_v13, 4  ;;  %v4323_v5 = vadd.f32 %v4290_v62, %v4222_v47  ;;  %v4324_v28 = vadd.f32 %v4287_v1, %v4223_v39 }
 0x661   :  { %v4325_v14 = vadd.f32 %v4299_v40, %v4224_v22  ;;  %v4399_v41 = vsel %vm1407_vm12, %v4397_v27, %v4398_v52  ;;  %v4402_v11 = vsel %vm1407_vm12, %v4400_v61, %v4401_v31  ;;  %v4405_v24 = vsel %vm1407_vm12, %v4403_v7, %v4404_v50 }
 0x662   :  { %v4408_v57 = vsel %vm1407_vm12, %v4406_v21, %v4407_v29  ;;  %v4412_v34 = vrot.slane %v4353_v9, 4  ;;  %v4413_v16 = vrot.slane %v4354_v4, 4  ;;  %v4435_v32 = vadd.f32 %v4399_v41, %v4318_v56 }
 0x663   :  { %v4436_v59 = vadd.f32 %v4402_v11, %v4319_v33  ;;  %v4462_v17 = vmul.f32 %v9149_v55, %v13248_v51  ;;  %v4411_v63 = vsel %vm1407_vm12, %v4409_v23, %v4410_v43  ;;  %v4463_v47 = vmul.f32 %v9149_v55, %v13249_v10 }
 0x664   :  { %v4464_v39 = vmul.f32 %v9149_v55, %v13250_v6  ;;  %v4465_v22 = vmul.f32 %v9149_v55, %v13251_v36  ;;  %v4466_v1 = vmul.f32 %v9149_v55, %v13191_v0  ;;  %v4467_v62 = vmul.f32 %v9149_v55, %v13205_v49 }
 0x665   :  { %v4468_v2 = vmul.f32 %v9149_v55, %v13190_v48  ;;  %v4469_v8 = vmul.f32 %v9149_v55, %v13204_v46  ;;  %v4437_v56 = vadd.f32 %v4405_v24, %v4320_v18  ;;  %v4470_v33 = vmul.f32 %v9149_v55, %v13231_v60 }
 0x666   :  { %v4471_v45 = vmul.f32 %v9149_v55, %v13232_v58  ;;  %v4472_v35 = vmul.f32 %v9149_v55, %v13233_v54  ;;  %v4473_v15 = vmul.f32 %v9149_v55, %v13234_v53  ;;  %v4474_v12 = vmul.f32 %v9149_v55, %v13236_v25 }
 0x667   :  { %v4525_v19 = vrot.slane %v4462_v17, 4  ;;  %v4526_v3 = vrot.slane %v4463_v47, 4  ;;  %v4528_v42 = vrot.slane %v4464_v39, 4  ;;  %v4529_v20 = vrot.slane %v4465_v22, 4 }
 0x668   :  { %v4531_v13 = vrot.slane %v4466_v1, 4  ;;  %v4532_v40 = vrot.slane %v4467_v62, 4  ;;  %v4475_v9 = vmul.f32 %v9149_v55, %v13237_v44  ;;  %v4534_v27 = vrot.slane %v4468_v2, 4 }
 0x669   :  { %v4535_v52 = vrot.slane %v4469_v8, 4  ;;  %v4537_v61 = vrot.slane %v4470_v33, 4  ;;  %v4414_v31 = vsel %vm1407_vm12, %v4412_v34, %v4413_v16  ;;  %v4438_v7 = vadd.f32 %v4402_v11, %v4321_v30 }
 0x66a   :  { %v4439_v50 = vadd.f32 %v4399_v41, %v4322_v38  ;;  %v4538_v18 = vrot.slane %v4471_v45, 4  ;;  %v4440_v4 = vadd.f32 %v4408_v57, %v4323_v5  ;;  %v4441_v21 = vadd.f32 %v4411_v63, %v4324_v28  ;;  %v9150_v5 = vld [vmem:[#allocation2 + $0xa9] ss:$0 sm:$0xff] }
 0x66b   :  { %v4442_v29 = vadd.f32 %v4414_v31, %v4325_v14  ;;  %v4527_v23 = vsel %vm1407_vm12, %v4525_v19, %v4526_v3  ;;  %v4530_v43 = vsel %vm1407_vm12, %v4528_v42, %v4529_v20  ;;  %v4533_v24 = vsel %vm1407_vm12, %v4531_v13, %v4532_v40 }
 0x66c   :  { %v4536_v17 = vsel %vm1407_vm12, %v4534_v27, %v4535_v52  ;;  %v4540_v55 = vrot.slane %v4472_v35, 4  ;;  %v4539_v47 = vsel %vm1407_vm12, %v4537_v61, %v4538_v18  ;;  %v4541_v39 = vrot.slane %v4473_v15, 4 }
 0x66d   :  { %v4543_v22 = vrot.slane %v4474_v12, 4  ;;  %v4544_v34 = vrot.slane %v4475_v9, 4  ;;  %v4568_v30 = vadd.f32 %v4527_v23, %v4435_v32  ;;  %v4569_v38 = vadd.f32 %v4530_v43, %v4436_v59 }
 0x66e   :  { %v4570_v41 = vadd.f32 %v4527_v23, %v4437_v56  ;;  %v4597_v28 = vmul.f32 %v9150_v5, %v13250_v6  ;;  %v4598_v14 = vmul.f32 %v9150_v5, %v13251_v36  ;;  %v4599_v11 = vmul.f32 %v9150_v5, %v13248_v51 }
 0x66f   :  { %v4600_v57 = vmul.f32 %v9150_v5, %v13249_v10  ;;  %v4601_v16 = vmul.f32 %v9150_v5, %v13191_v0  ;;  %v4602_v63 = vmul.f32 %v9150_v5, %v13205_v49  ;;  %v4603_v1 = vmul.f32 %v9150_v5, %v13190_v48 }
 0x670   :  { %v4604_v62 = vmul.f32 %v9150_v5, %v13204_v46  ;;  %v4605_v32 = vmul.f32 %v9150_v5, %v13231_v60  ;;  %v4542_v59 = vsel %vm1407_vm12, %v4540_v55, %v4541_v39  ;;  %v4545_v2 = vsel %vm1407_vm12, %v4543_v22, %v4544_v34 }
 0x671   :  { %v4606_v8 = vmul.f32 %v9150_v5, %v13232_v58  ;;  %v4607_v56 = vmul.f32 %v9150_v5, %v13233_v54  ;;  %v4608_v33 = vmul.f32 %v9150_v5, %v13234_v53  ;;  %v4609_v45 = vmul.f32 %v9150_v5, %v13236_v25 }
 0x672   :  { %v4610_v35 = vmul.f32 %v9150_v5, %v13237_v44  ;;  %v4669_v15 = vrot.slane %v4597_v28, 4  ;;  %v4670_v12 = vrot.slane %v4598_v14, 4  ;;  %v4672_v19 = vrot.slane %v4599_v11, 4 }
 0x673   :  { %v4673_v3 = vrot.slane %v4600_v57, 4  ;;  %v4675_v42 = vrot.slane %v4601_v16, 4  ;;  %v4676_v20 = vrot.slane %v4602_v63, 4  ;;  %v4678_v13 = vrot.slane %v4603_v1, 4 }
 0x674   :  { %v4679_v40 = vrot.slane %v4604_v62, 4  ;;  %v4681_v9 = vrot.slane %v4605_v32, 4  ;;  %v4611_v27 = vmul.f32 %v9150_v5, %v13239_v26  ;;  %v4612_v52 = vmul.f32 %v9150_v5, %v13240_v37 }
 0x675   :  { %v4682_v61 = vrot.slane %v4606_v8, 4  ;;  %v4684_v31 = vrot.slane %v4607_v56, 4  ;;  %v4571_v18 = vadd.f32 %v4533_v24, %v4438_v7  ;;  %v4572_v23 = vadd.f32 %v4536_v17, %v4439_v50 }
 0x676   :  { %v4573_v43 = vadd.f32 %v4539_v47, %v4440_v4  ;;  %v4685_v55 = vrot.slane %v4608_v33, 4  ;;  %v4574_v39 = vadd.f32 %v4542_v59, %v4441_v21  ;;  %v4575_v22 = vadd.f32 %v4545_v2, %v4442_v29  ;;  %v9151_v29 = vld [vmem:[#allocation2 + $0xb0] ss:$0 sm:$0xff] }
 0x677   :  { %v4671_v34 = vsel %vm1407_vm12, %v4669_v15, %v4670_v12  ;;  %v4674_v28 = vsel %vm1407_vm12, %v4672_v19, %v4673_v3  ;;  %v4677_v14 = vsel %vm1407_vm12, %v4675_v42, %v4676_v20  ;;  %v4680_v11 = vsel %vm1407_vm12, %v4678_v13, %v4679_v40 }
 0x678   :  { %v4683_v57 = vsel %vm1407_vm12, %v4681_v9, %v4682_v61  ;;  %v4687_v16 = vrot.slane %v4609_v45, 4  ;;  %v4686_v5 = vsel %vm1407_vm12, %v4684_v31, %v4685_v55  ;;  %v4688_v63 = vrot.slane %v4610_v35, 4 }
 0x679   :  { %v4690_v7 = vrot.slane %v4611_v27, 4  ;;  %v4691_v50 = vrot.slane %v4612_v52, 4  ;;  %v4717_v4 = vadd.f32 %v4671_v34, %v4568_v30  ;;  %v4718_v24 = vadd.f32 %v4674_v28, %v4569_v38 }
 0x67a   :  { %v4719_v21 = vadd.f32 %v4677_v14, %v4570_v41  ;;  %v4744_v17 = vmul.f32 %v9151_v29, %v13248_v51  ;;  %v4745_v47 = vmul.f32 %v9151_v29, %v13249_v10  ;;  %v4746_v1 = vmul.f32 %v9151_v29, %v13191_v0 }
 0x67b   :  { %v4747_v62 = vmul.f32 %v9151_v29, %v13205_v49  ;;  %v4748_v32 = vmul.f32 %v9151_v29, %v13190_v48  ;;  %v4749_v59 = vmul.f32 %v9151_v29, %v13204_v46  ;;  %v4750_v2 = vmul.f32 %v9151_v29, %v13231_v60 }
 0x67c   :  { %v4751_v8 = vmul.f32 %v9151_v29, %v13232_v58  ;;  %v4752_v30 = vmul.f32 %v9151_v29, %v13233_v54  ;;  %v4689_v38 = vsel %vm1407_vm12, %v4687_v16, %v4688_v63  ;;  %v4753_v41 = vmul.f32 %v9151_v29, %v13234_v53 }
 0x67d   :  { %v4754_v56 = vmul.f32 %v9151_v29, %v13236_v25  ;;  %v4755_v33 = vmul.f32 %v9151_v29, %v13237_v44  ;;  %v4756_v45 = vmul.f32 %v9151_v29, %v13239_v26  ;;  %v4807_v35 = vrot.slane %v4744_v17, 4 }
 0x67e   :  { %v4808_v15 = vrot.slane %v4745_v47, 4  ;;  %v4810_v12 = vrot.slane %v4746_v1, 4  ;;  %v4811_v19 = vrot.slane %v4747_v62, 4  ;;  %v4813_v3 = vrot.slane %v4748_v32, 4 }
 0x67f   :  { %v4814_v42 = vrot.slane %v4749_v59, 4  ;;  %v4816_v20 = vrot.slane %v4750_v2, 4  ;;  %v4757_v13 = vmul.f32 %v9151_v29, %v13240_v37  ;;  %v4817_v40 = vrot.slane %v4751_v8, 4 }
 0x680   :  { %v4819_v9 = vrot.slane %v4752_v30, 4  ;;  %v4820_v27 = vrot.slane %v4753_v41, 4  ;;  %v4692_v52 = vsel %vm1407_vm12, %v4690_v7, %v4691_v50  ;;  %v4720_v61 = vadd.f32 %v4680_v11, %v4571_v18 }
 0x681   :  { %v4822_v31 = vrot.slane %v4754_v56, 4  ;;  %v4823_v55 = vrot.slane %v4755_v33, 4  ;;  %v4721_v34 = vadd.f32 %v4683_v57, %v4572_v23  ;;  %v4722_v28 = vadd.f32 %v4686_v5, %v4573_v43  ;;  %v9152_v23 = vld [vmem:[#allocation2 + $0xb7] ss:$0 sm:$0xff] }
 0x682   :  { %v4723_v14 = vadd.f32 %v4689_v38, %v4574_v39  ;;  %v4724_v16 = vadd.f32 %v4692_v52, %v4575_v22  ;;  %v4809_v63 = vsel %vm1407_vm12, %v4807_v35, %v4808_v15  ;;  %v4812_v17 = vsel %vm1407_vm12, %v4810_v12, %v4811_v19 }
 0x683   :  { %v4815_v47 = vsel %vm1407_vm12, %v4813_v3, %v4814_v42  ;;  %v4818_v29 = vsel %vm1407_vm12, %v4816_v20, %v4817_v40  ;;  %v4821_v1 = vsel %vm1407_vm12, %v4819_v9, %v4820_v27  ;;  %v4824_v62 = vsel %vm1407_vm12, %v4822_v31, %v4823_v55 }
 0x684   :  { %v4825_v7 = vrot.slane %v4756_v45, 4  ;;  %v4826_v18 = vrot.slane %v4757_v13, 4  ;;  %v4850_v11 = vadd.f32 %v4809_v63, %v4717_v4  ;;  %v4851_v50 = vadd.f32 %v4812_v17, %v4718_v24 }
 0x685   :  { %v4875_v43 = vmul.f32 %v9152_v23, %v13191_v0  ;;  %v4876_v39 = vmul.f32 %v9152_v23, %v13205_v49  ;;  %v4877_v22 = vmul.f32 %v9152_v23, %v13190_v48  ;;  %v4878_v57 = vmul.f32 %v9152_v23, %v13204_v46 }
 0x686   :  { %v4879_v5 = vmul.f32 %v9152_v23, %v13231_v60  ;;  %v4880_v32 = vmul.f32 %v9152_v23, %v13232_v58  ;;  %v4881_v59 = vmul.f32 %v9152_v23, %v13233_v54  ;;  %v4882_v2 = vmul.f32 %v9152_v23, %v13234_v53 }
 0x687   :  { %v4883_v4 = vmul.f32 %v9152_v23, %v13236_v25  ;;  %v4884_v24 = vmul.f32 %v9152_v23, %v13237_v44  ;;  %v4852_v8 = vadd.f32 %v4815_v47, %v4719_v21  ;;  %v4885_v30 = vmul.f32 %v9152_v23, %v13239_v26 }
 0x688   :  { %v4929_v38 = vrot.slane %v4875_v43, 4  ;;  %v4930_v41 = vrot.slane %v4876_v39, 4  ;;  %v4932_v56 = vrot.slane %v4877_v22, 4  ;;  %v4933_v33 = vrot.slane %v4878_v57, 4 }
 0x689   :  { %v4935_v45 = vrot.slane %v4879_v5, 4  ;;  %v4936_v35 = vrot.slane %v4880_v32, 4  ;;  %v4827_v15 = vsel %vm1407_vm12, %v4825_v7, %v4826_v18  ;;  %v4886_v12 = vmul.f32 %v9152_v23, %v13240_v37  ;;  %v9153_v23 = vld [vmem:[#allocation2 + $0xbe] ss:$0 sm:$0xff] }
 0x68a   :  { %v4938_v19 = vrot.slane %v4881_v59, 4  ;;  %v4939_v3 = vrot.slane %v4882_v2, 4  ;;  %v4853_v42 = vadd.f32 %v4818_v29, %v4720_v61  ;;  %v4854_v20 = vadd.f32 %v4821_v1, %v4721_v34 }
 0x68b   :  { %v4941_v13 = vrot.slane %v4883_v4, 4  ;;  %v4942_v40 = vrot.slane %v4884_v24, 4  ;;  %v4855_v9 = vadd.f32 %v4824_v62, %v4722_v28  ;;  %v4856_v21 = vadd.f32 %v4827_v15, %v4723_v14 }
 0x68c   :  { %v4857_v27 = vadd.f32 %v4824_v62, %v4724_v16  ;;  %v4931_v52 = vsel %vm1407_vm12, %v4929_v38, %v4930_v41  ;;  %v4934_v31 = vsel %vm1407_vm12, %v4932_v56, %v4933_v33  ;;  %v4937_v55 = vsel %vm1407_vm12, %v4935_v45, %v4936_v35 }
 0x68d   :  { %v4940_v63 = vsel %vm1407_vm12, %v4938_v19, %v4939_v3  ;;  %v4944_v17 = vrot.slane %v4885_v30, 4  ;;  %v4945_v47 = vrot.slane %v4886_v12, 4  ;;  %v4967_v7 = vadd.f32 %v4931_v52, %v4850_v11 }
 0x68e   :  { %v4968_v18 = vadd.f32 %v4934_v31, %v4851_v50  ;;  %v4990_v61 = vmul.f32 %v9153_v23, %v13190_v48  ;;  %v4943_v34 = vsel %vm1407_vm12, %v4941_v13, %v4942_v40  ;;  %v4991_v28 = vmul.f32 %v9153_v23, %v13204_v46  ;;  %v9154_v40 = vld [vmem:[#allocation2 + $0x95] ss:$0 sm:$0xff] }
 0x68f   :  { %v4992_v14 = vmul.f32 %v9153_v23, %v13231_v60  ;;  %v4993_v16 = vmul.f32 %v9153_v23, %v13232_v58  ;;  %v4994_v29 = vmul.f32 %v9153_v23, %v13233_v54  ;;  %v4995_v1 = vmul.f32 %v9153_v23, %v13234_v53 }
 0x690   :  { %v4996_v62 = vmul.f32 %v9153_v23, %v13236_v25  ;;  %v4997_v11 = vmul.f32 %v9153_v23, %v13237_v44  ;;  %v4998_v50 = vmul.f32 %v9153_v23, %v13239_v26  ;;  %v4999_v43 = vmul.f32 %v9153_v23, %v13240_v37 }
 0x691   :  { %v5035_v39 = vrot.slane %v4990_v61, 4  ;;  %v5036_v22 = vrot.slane %v4991_v28, 4  ;;  %v5038_v57 = vrot.slane %v4992_v14, 4  ;;  %v5039_v5 = vrot.slane %v4993_v16, 4 }
 0x692   :  { %v5041_v32 = vrot.slane %v4994_v29, 4  ;;  %v5042_v59 = vrot.slane %v4995_v1, 4  ;;  %v4969_v2 = vadd.f32 %v4937_v55, %v4852_v8  ;;  %v4970_v4 = vadd.f32 %v4940_v63, %v4853_v42 }
 0x693   :  { %v5044_v24 = vrot.slane %v4996_v62, 4  ;;  %v5045_v30 = vrot.slane %v4997_v11, 4  ;;  %v4946_v38 = vsel %vm1407_vm12, %v4944_v17, %v4945_v47  ;;  %v4971_v41 = vadd.f32 %v4943_v34, %v4854_v20 }
 0x694   :  { %v4973_v56 = vadd.f32 %v4943_v34, %v4856_v21  ;;  %v4974_v33 = vadd.f32 %v4940_v63, %v4857_v27  ;;  %v4972_v45 = vadd.f32 %v4946_v38, %v4855_v9  ;;  %v5037_v35 = vsel %vm1407_vm12, %v5035_v39, %v5036_v22 }
 0x695   :  { %v5040_v15 = vsel %vm1407_vm12, %v5038_v57, %v5039_v5  ;;  %v5047_v12 = vrot.slane %v4998_v50, 4  ;;  %v5043_v19 = vsel %vm1407_vm12, %v5041_v32, %v5042_v59  ;;  %v5046_v3 = vsel %vm1407_vm12, %v5044_v24, %v5045_v30  ;;  %v9155_v24 = vld [vmem:[#allocation2 + $0x9c] ss:$0 sm:$0xff] }
 0x696   :  { %v5048_v13 = vrot.slane %v4999_v43, 4  ;;  %v5068_v8 = vadd.f32 %v5037_v35, %v4967_v7  ;;  %v5069_v42 = vadd.f32 %v5040_v15, %v4968_v18  ;;  %v5091_v52 = vmul.f32 %v9154_v40, %v13190_v48 }
 0x697   :  { %v5092_v20 = vmul.f32 %v9154_v40, %v13204_v46  ;;  %v5093_v21 = vmul.f32 %v9154_v40, %v13191_v0  ;;  %v5094_v9 = vmul.f32 %v9154_v40, %v13205_v49  ;;  %v5095_v27 = vmul.f32 %v9154_v40, %v13248_v51 }
 0x698   :  { %v5096_v31 = vmul.f32 %v9154_v40, %v13249_v10  ;;  %v5097_v55 = vmul.f32 %v9154_v40, %v13250_v6  ;;  %v5098_v63 = vmul.f32 %v9154_v40, %v13251_v36  ;;  %v5099_v17 = vmul.f32 %v9154_v40, %v13231_v60 }
 0x699   :  { %v5100_v47 = vmul.f32 %v9154_v40, %v13232_v58  ;;  %v5136_v7 = vrot.slane %v5091_v52, 5  ;;  %v5137_v18 = vrot.slane %v5092_v20, 5  ;;  %v5139_v23 = vrot.slane %v5093_v21, 5 }
 0x69a   :  { %v5140_v61 = vrot.slane %v5094_v9, 5  ;;  %v5142_v34 = vrot.slane %v5095_v27, 5  ;;  %v5070_v28 = vadd.f32 %v5043_v19, %v4969_v2  ;;  %v5143_v14 = vrot.slane %v5096_v31, 5 }
 0x69b   :  { %v5145_v16 = vrot.slane %v5097_v55, 5  ;;  %v5146_v29 = vrot.slane %v5098_v63, 5  ;;  %v5049_v1 = vsel %vm1407_vm12, %v5047_v12, %v5048_v13  ;;  %v5071_v62 = vadd.f32 %v5046_v3, %v4970_v4 }
 0x69c   :  { %v5073_v11 = vadd.f32 %v5046_v3, %v4972_v45  ;;  %v5074_v50 = vadd.f32 %v5043_v19, %v4973_v56  ;;  %v5072_v43 = vadd.f32 %v5049_v1, %v4971_v41  ;;  %v5075_v39 = vadd.f32 %v5040_v15, %v4974_v33 }
 0x69d   :  { %v5138_v22 = vsel %vm1374_vm11, %v5136_v7, %v5137_v18  ;;  %v5148_v57 = vrot.slane %v5099_v17, 5  ;;  %v5141_v5 = vsel %vm1374_vm11, %v5139_v23, %v5140_v61  ;;  %v5144_v32 = vsel %vm1374_vm11, %v5142_v34, %v5143_v14 }
 0x69e   :  { %v5149_v59 = vrot.slane %v5100_v47, 5  ;;  %v5194_v2 = vmul.f32 %v9155_v24, %v13191_v0  ;;  %v5147_v30 = vsel %vm1374_vm11, %v5145_v16, %v5146_v29  ;;  %v5169_v38 = vadd.f32 %v5138_v22, %v5068_v8 }
 0x69f   :  { %v5170_v35 = vadd.f32 %v5141_v5, %v5069_v42  ;;  %v5195_v4 = vmul.f32 %v9155_v24, %v13205_v49  ;;  %v5196_v41 = vmul.f32 %v9155_v24, %v13248_v51  ;;  %v5197_v56 = vmul.f32 %v9155_v24, %v13249_v10 }
 0x6a0   :  { %v5198_v33 = vmul.f32 %v9155_v24, %v13250_v6  ;;  %v5199_v45 = vmul.f32 %v9155_v24, %v13251_v36  ;;  %v5200_v15 = vmul.f32 %v9155_v24, %v13190_v48  ;;  %v5201_v12 = vmul.f32 %v9155_v24, %v13204_v46 }
 0x6a1   :  { %v5202_v19 = vmul.f32 %v9155_v24, %v13231_v60  ;;  %v5203_v3 = vmul.f32 %v9155_v24, %v13232_v58  ;;  %v5150_v13 = vsel %vm1374_vm11, %v5148_v57, %v5149_v59  ;;  %v5204_v8 = vmul.f32 %v9155_v24, %v13233_v54 }
 0x6a2   :  { %v5248_v42 = vrot.slane %v5194_v2, 5  ;;  %v5249_v40 = vrot.slane %v5195_v4, 5  ;;  %v5251_v52 = vrot.slane %v5196_v41, 5  ;;  %v5252_v20 = vrot.slane %v5197_v56, 5  ;;  %v9156_v2 = vld [vmem:[#allocation2 + $0xa3] ss:$0 sm:$0xff] }
 0x6a3   :  { %v5254_v21 = vrot.slane %v5198_v33, 5  ;;  %v5255_v9 = vrot.slane %v5199_v45, 5  ;;  %v5171_v27 = vadd.f32 %v5144_v32, %v5070_v28  ;;  %v5205_v31 = vmul.f32 %v9155_v24, %v13234_v53 }
 0x6a4   :  { %v5257_v55 = vrot.slane %v5200_v15, 5  ;;  %v5258_v63 = vrot.slane %v5201_v12, 5  ;;  %v5172_v17 = vadd.f32 %v5147_v30, %v5071_v62  ;;  %v5173_v47 = vadd.f32 %v5144_v32, %v5072_v43 }
 0x6a5   :  { %v5260_v7 = vrot.slane %v5202_v19, 5  ;;  %v5261_v18 = vrot.slane %v5203_v3, 5  ;;  %v5174_v23 = vadd.f32 %v5141_v5, %v5073_v11  ;;  %v5175_v61 = vadd.f32 %v5138_v22, %v5074_v50 }
 0x6a6   :  { %v5176_v34 = vadd.f32 %v5150_v13, %v5075_v39  ;;  %v5250_v14 = vsel %vm1374_vm11, %v5248_v42, %v5249_v40  ;;  %v5253_v16 = vsel %vm1374_vm11, %v5251_v52, %v5252_v20  ;;  %v5256_v29 = vsel %vm1374_vm11, %v5254_v21, %v5255_v9 }
 0x6a7   :  { %v5259_v1 = vsel %vm1374_vm11, %v5257_v55, %v5258_v63  ;;  %v5263_v28 = vrot.slane %v5204_v8, 5  ;;  %v5264_v57 = vrot.slane %v5205_v31, 5  ;;  %v5286_v59 = vadd.f32 %v5250_v14, %v5169_v38 }
 0x6a8   :  { %v5287_v24 = vadd.f32 %v5253_v16, %v5170_v35  ;;  %v5313_v62 = vmul.f32 %v9156_v2, %v13248_v51  ;;  %v5262_v43 = vsel %vm1374_vm11, %v5260_v7, %v5261_v18  ;;  %v5314_v11 = vmul.f32 %v9156_v2, %v13249_v10 }
 0x6a9   :  { %v5315_v50 = vmul.f32 %v9156_v2, %v13250_v6  ;;  %v5316_v39 = vmul.f32 %v9156_v2, %v13251_v36  ;;  %v5317_v22 = vmul.f32 %v9156_v2, %v13191_v0  ;;  %v5318_v5 = vmul.f32 %v9156_v2, %v13205_v49 }
 0x6aa   :  { %v5319_v32 = vmul.f32 %v9156_v2, %v13190_v48  ;;  %v5320_v30 = vmul.f32 %v9156_v2, %v13204_v46  ;;  %v5288_v38 = vadd.f32 %v5256_v29, %v5171_v27  ;;  %v5321_v35 = vmul.f32 %v9156_v2, %v13231_v60 }
 0x6ab   :  { %v5322_v4 = vmul.f32 %v9156_v2, %v13232_v58  ;;  %v5323_v41 = vmul.f32 %v9156_v2, %v13233_v54  ;;  %v5324_v56 = vmul.f32 %v9156_v2, %v13234_v53  ;;  %v5325_v33 = vmul.f32 %v9156_v2, %v13236_v25 }
 0x6ac   :  { %v5376_v45 = vrot.slane %v5313_v62, 5  ;;  %v5377_v15 = vrot.slane %v5314_v11, 5  ;;  %v5379_v12 = vrot.slane %v5315_v50, 5  ;;  %v5380_v19 = vrot.slane %v5316_v39, 5 }
 0x6ad   :  { %v5382_v3 = vrot.slane %v5317_v22, 5  ;;  %v5383_v13 = vrot.slane %v5318_v5, 5  ;;  %v5326_v8 = vmul.f32 %v9156_v2, %v13237_v44  ;;  %v5385_v42 = vrot.slane %v5319_v32, 5 }
 0x6ae   :  { %v5386_v40 = vrot.slane %v5320_v30, 5  ;;  %v5388_v52 = vrot.slane %v5321_v35, 5  ;;  %v5265_v20 = vsel %vm1374_vm11, %v5263_v28, %v5264_v57  ;;  %v5289_v21 = vadd.f32 %v5253_v16, %v5172_v17 }
 0x6af   :  { %v5290_v9 = vadd.f32 %v5250_v14, %v5173_v47  ;;  %v5389_v27 = vrot.slane %v5322_v4, 5  ;;  %v5291_v31 = vadd.f32 %v5259_v1, %v5174_v23  ;;  %v5292_v55 = vadd.f32 %v5262_v43, %v5175_v61  ;;  %v9157_v23 = vld [vmem:[#allocation2 + $0xaa] ss:$0 sm:$0xff] }
 0x6b0   :  { %v5293_v63 = vadd.f32 %v5265_v20, %v5176_v34  ;;  %v5378_v7 = vsel %vm1374_vm11, %v5376_v45, %v5377_v15  ;;  %v5381_v18 = vsel %vm1374_vm11, %v5379_v12, %v5380_v19  ;;  %v5384_v29 = vsel %vm1374_vm11, %v5382_v3, %v5383_v13 }
 0x6b1   :  { %v5387_v62 = vsel %vm1374_vm11, %v5385_v42, %v5386_v40  ;;  %v5391_v2 = vrot.slane %v5323_v41, 5  ;;  %v5390_v11 = vsel %vm1374_vm11, %v5388_v52, %v5389_v27  ;;  %v5392_v50 = vrot.slane %v5324_v56, 5 }
 0x6b2   :  { %v5394_v39 = vrot.slane %v5325_v33, 5  ;;  %v5395_v28 = vrot.slane %v5326_v8, 5  ;;  %v5419_v17 = vadd.f32 %v5378_v7, %v5286_v59  ;;  %v5420_v47 = vadd.f32 %v5381_v18, %v5287_v24 }
 0x6b3   :  { %v5421_v14 = vadd.f32 %v5378_v7, %v5288_v38  ;;  %v5448_v61 = vmul.f32 %v9157_v23, %v13250_v6  ;;  %v5449_v34 = vmul.f32 %v9157_v23, %v13251_v36  ;;  %v5450_v16 = vmul.f32 %v9157_v23, %v13248_v51 }
 0x6b4   :  { %v5451_v1 = vmul.f32 %v9157_v23, %v13249_v10  ;;  %v5452_v57 = vmul.f32 %v9157_v23, %v13191_v0  ;;  %v5453_v43 = vmul.f32 %v9157_v23, %v13205_v49  ;;  %v5454_v22 = vmul.f32 %v9157_v23, %v13190_v48 }
 0x6b5   :  { %v5455_v5 = vmul.f32 %v9157_v23, %v13204_v46  ;;  %v5456_v59 = vmul.f32 %v9157_v23, %v13231_v60  ;;  %v5393_v24 = vsel %vm1374_vm11, %v5391_v2, %v5392_v50  ;;  %v5396_v32 = vsel %vm1374_vm11, %v5394_v39, %v5395_v28 }
 0x6b6   :  { %v5457_v30 = vmul.f32 %v9157_v23, %v13232_v58  ;;  %v5458_v38 = vmul.f32 %v9157_v23, %v13233_v54  ;;  %v5459_v35 = vmul.f32 %v9157_v23, %v13234_v53  ;;  %v5460_v4 = vmul.f32 %v9157_v23, %v13236_v25 }
 0x6b7   :  { %v5461_v41 = vmul.f32 %v9157_v23, %v13237_v44  ;;  %v5520_v56 = vrot.slane %v5448_v61, 5  ;;  %v5521_v33 = vrot.slane %v5449_v34, 5  ;;  %v5523_v45 = vrot.slane %v5450_v16, 5 }
 0x6b8   :  { %v5524_v15 = vrot.slane %v5451_v1, 5  ;;  %v5526_v12 = vrot.slane %v5452_v57, 5  ;;  %v5527_v19 = vrot.slane %v5453_v43, 5  ;;  %v5529_v3 = vrot.slane %v5454_v22, 5 }
 0x6b9   :  { %v5530_v13 = vrot.slane %v5455_v5, 5  ;;  %v5532_v8 = vrot.slane %v5456_v59, 5  ;;  %v5462_v42 = vmul.f32 %v9157_v23, %v13239_v26  ;;  %v5463_v40 = vmul.f32 %v9157_v23, %v13240_v37 }
 0x6ba   :  { %v5533_v52 = vrot.slane %v5457_v30, 5  ;;  %v5535_v20 = vrot.slane %v5458_v38, 5  ;;  %v5422_v27 = vadd.f32 %v5384_v29, %v5289_v21  ;;  %v5423_v7 = vadd.f32 %v5387_v62, %v5290_v9 }
 0x6bb   :  { %v5424_v18 = vadd.f32 %v5390_v11, %v5291_v31  ;;  %v5536_v2 = vrot.slane %v5459_v35, 5  ;;  %v5425_v50 = vadd.f32 %v5393_v24, %v5292_v55  ;;  %v5426_v39 = vadd.f32 %v5396_v32, %v5293_v63  ;;  %v9158_v63 = vld [vmem:[#allocation2 + $0xb1] ss:$0 sm:$0xff] }
 0x6bc   :  { %v5522_v28 = vsel %vm1374_vm11, %v5520_v56, %v5521_v33  ;;  %v5525_v61 = vsel %vm1374_vm11, %v5523_v45, %v5524_v15  ;;  %v5528_v34 = vsel %vm1374_vm11, %v5526_v12, %v5527_v19  ;;  %v5531_v16 = vsel %vm1374_vm11, %v5529_v3, %v5530_v13 }
 0x6bd   :  { %v5534_v1 = vsel %vm1374_vm11, %v5532_v8, %v5533_v52  ;;  %v5538_v57 = vrot.slane %v5460_v4, 5  ;;  %v5537_v23 = vsel %vm1374_vm11, %v5535_v20, %v5536_v2  ;;  %v5539_v43 = vrot.slane %v5461_v41, 5 }
 0x6be   :  { %v5541_v21 = vrot.slane %v5462_v42, 5  ;;  %v5542_v9 = vrot.slane %v5463_v40, 5  ;;  %v5568_v31 = vadd.f32 %v5522_v28, %v5419_v17  ;;  %v5569_v29 = vadd.f32 %v5525_v61, %v5420_v47 }
 0x6bf   :  { %v5570_v55 = vadd.f32 %v5528_v34, %v5421_v14  ;;  %v5595_v62 = vmul.f32 %v9158_v63, %v13248_v51  ;;  %v5596_v11 = vmul.f32 %v9158_v63, %v13249_v10  ;;  %v5597_v22 = vmul.f32 %v9158_v63, %v13191_v0 }
 0x6c0   :  { %v5598_v5 = vmul.f32 %v9158_v63, %v13205_v49  ;;  %v5599_v59 = vmul.f32 %v9158_v63, %v13190_v48  ;;  %v5600_v24 = vmul.f32 %v9158_v63, %v13204_v46  ;;  %v5601_v32 = vmul.f32 %v9158_v63, %v13231_v60 }
 0x6c1   :  { %v5602_v30 = vmul.f32 %v9158_v63, %v13232_v58  ;;  %v5603_v17 = vmul.f32 %v9158_v63, %v13233_v54  ;;  %v5540_v47 = vsel %vm1374_vm11, %v5538_v57, %v5539_v43  ;;  %v5604_v14 = vmul.f32 %v9158_v63, %v13234_v53 }
 0x6c2   :  { %v5605_v38 = vmul.f32 %v9158_v63, %v13236_v25  ;;  %v5606_v35 = vmul.f32 %v9158_v63, %v13237_v44  ;;  %v5607_v4 = vmul.f32 %v9158_v63, %v13239_v26  ;;  %v5658_v41 = vrot.slane %v5595_v62, 5 }
 0x6c3   :  { %v5659_v56 = vrot.slane %v5596_v11, 5  ;;  %v5661_v33 = vrot.slane %v5597_v22, 5  ;;  %v5662_v45 = vrot.slane %v5598_v5, 5  ;;  %v5664_v15 = vrot.slane %v5599_v59, 5 }
 0x6c4   :  { %v5665_v12 = vrot.slane %v5600_v24, 5  ;;  %v5667_v19 = vrot.slane %v5601_v32, 5  ;;  %v5608_v3 = vmul.f32 %v9158_v63, %v13240_v37  ;;  %v5668_v13 = vrot.slane %v5602_v30, 5 }
 0x6c5   :  { %v5670_v8 = vrot.slane %v5603_v17, 5  ;;  %v5671_v42 = vrot.slane %v5604_v14, 5  ;;  %v5543_v40 = vsel %vm1374_vm11, %v5541_v21, %v5542_v9  ;;  %v5571_v52 = vadd.f32 %v5531_v16, %v5422_v27 }
 0x6c6   :  { %v5673_v20 = vrot.slane %v5605_v38, 5  ;;  %v5674_v2 = vrot.slane %v5606_v35, 5  ;;  %v5572_v28 = vadd.f32 %v5534_v1, %v5423_v7  ;;  %v5573_v61 = vadd.f32 %v5537_v23, %v5424_v18  ;;  %v9159_v7 = vld [vmem:[#allocation2 + $0xb8] ss:$0 sm:$0xff] }
 0x6c7   :  { %v5574_v34 = vadd.f32 %v5540_v47, %v5425_v50  ;;  %v5575_v57 = vadd.f32 %v5543_v40, %v5426_v39  ;;  %v5660_v43 = vsel %vm1374_vm11, %v5658_v41, %v5659_v56  ;;  %v5663_v62 = vsel %vm1374_vm11, %v5661_v33, %v5662_v45 }
 0x6c8   :  { %v5666_v11 = vsel %vm1374_vm11, %v5664_v15, %v5665_v12  ;;  %v5669_v63 = vsel %vm1374_vm11, %v5667_v19, %v5668_v13  ;;  %v5672_v22 = vsel %vm1374_vm11, %v5670_v8, %v5671_v42  ;;  %v5675_v5 = vsel %vm1374_vm11, %v5673_v20, %v5674_v2 }
 0x6c9   :  { %v5676_v21 = vrot.slane %v5607_v4, 5  ;;  %v5677_v27 = vrot.slane %v5608_v3, 5  ;;  %v5701_v16 = vadd.f32 %v5660_v43, %v5568_v31  ;;  %v5702_v9 = vadd.f32 %v5663_v62, %v5569_v29 }
 0x6ca   :  { %v5726_v18 = vmul.f32 %v9159_v7, %v13191_v0  ;;  %v5727_v50 = vmul.f32 %v9159_v7, %v13205_v49  ;;  %v5728_v39 = vmul.f32 %v9159_v7, %v13190_v48  ;;  %v5729_v1 = vmul.f32 %v9159_v7, %v13204_v46 }
 0x6cb   :  { %v5730_v23 = vmul.f32 %v9159_v7, %v13231_v60  ;;  %v5731_v59 = vmul.f32 %v9159_v7, %v13232_v58  ;;  %v5732_v24 = vmul.f32 %v9159_v7, %v13233_v54  ;;  %v5733_v32 = vmul.f32 %v9159_v7, %v13234_v53 }
 0x6cc   :  { %v5734_v31 = vmul.f32 %v9159_v7, %v13236_v25  ;;  %v5735_v29 = vmul.f32 %v9159_v7, %v13237_v44  ;;  %v5703_v30 = vadd.f32 %v5666_v11, %v5570_v55  ;;  %v5736_v17 = vmul.f32 %v9159_v7, %v13239_v26 }
 0x6cd   :  { %v5780_v47 = vrot.slane %v5726_v18, 5  ;;  %v5781_v14 = vrot.slane %v5727_v50, 5  ;;  %v5783_v38 = vrot.slane %v5728_v39, 5  ;;  %v5784_v35 = vrot.slane %v5729_v1, 5 }
 0x6ce   :  { %v5786_v4 = vrot.slane %v5730_v23, 5  ;;  %v5787_v41 = vrot.slane %v5731_v59, 5  ;;  %v5678_v56 = vsel %vm1374_vm11, %v5676_v21, %v5677_v27  ;;  %v5737_v33 = vmul.f32 %v9159_v7, %v13240_v37  ;;  %v9160_v7 = vld [vmem:[#allocation2 + $0xbf] ss:$0 sm:$0xff] }
 0x6cf   :  { %v5789_v45 = vrot.slane %v5732_v24, 5  ;;  %v5790_v15 = vrot.slane %v5733_v32, 5  ;;  %v5704_v12 = vadd.f32 %v5669_v63, %v5571_v52  ;;  %v5705_v19 = vadd.f32 %v5672_v22, %v5572_v28 }
 0x6d0   :  { %v5792_v3 = vrot.slane %v5734_v31, 5  ;;  %v5793_v13 = vrot.slane %v5735_v29, 5  ;;  %v5706_v8 = vadd.f32 %v5675_v5, %v5573_v61  ;;  %v5707_v55 = vadd.f32 %v5678_v56, %v5574_v34 }
 0x6d1   :  { %v5708_v42 = vadd.f32 %v5675_v5, %v5575_v57  ;;  %v5782_v40 = vsel %vm1374_vm11, %v5780_v47, %v5781_v14  ;;  %v5785_v20 = vsel %vm1374_vm11, %v5783_v38, %v5784_v35  ;;  %v5788_v2 = vsel %vm1374_vm11, %v5786_v4, %v5787_v41 }
 0x6d2   :  { %v5791_v43 = vsel %vm1374_vm11, %v5789_v45, %v5790_v15  ;;  %v5795_v62 = vrot.slane %v5736_v17, 5  ;;  %v5796_v11 = vrot.slane %v5737_v33, 5  ;;  %v5818_v21 = vadd.f32 %v5782_v40, %v5701_v16 }
 0x6d3   :  { %v5819_v27 = vadd.f32 %v5785_v20, %v5702_v9  ;;  %v5841_v52 = vmul.f32 %v9160_v7, %v13190_v48  ;;  %v5794_v28 = vsel %vm1374_vm11, %v5792_v3, %v5793_v13  ;;  %v5842_v61 = vmul.f32 %v9160_v7, %v13204_v46  ;;  %v9161_v13 = vld [vmem:[#allocation2 + $0x96] ss:$0 sm:$0xff] }
 0x6d4   :  { %v5843_v34 = vmul.f32 %v9160_v7, %v13231_v60  ;;  %v5844_v57 = vmul.f32 %v9160_v7, %v13232_v58  ;;  %v5845_v63 = vmul.f32 %v9160_v7, %v13233_v54  ;;  %v5846_v22 = vmul.f32 %v9160_v7, %v13234_v53 }
 0x6d5   :  { %v5847_v5 = vmul.f32 %v9160_v7, %v13236_v25  ;;  %v5848_v16 = vmul.f32 %v9160_v7, %v13237_v44  ;;  %v5849_v9 = vmul.f32 %v9160_v7, %v13239_v26  ;;  %v5850_v18 = vmul.f32 %v9160_v7, %v13240_v37 }
 0x6d6   :  { %v5886_v50 = vrot.slane %v5841_v52, 5  ;;  %v5887_v39 = vrot.slane %v5842_v61, 5  ;;  %v5889_v1 = vrot.slane %v5843_v34, 5  ;;  %v5890_v23 = vrot.slane %v5844_v57, 5 }
 0x6d7   :  { %v5892_v59 = vrot.slane %v5845_v63, 5  ;;  %v5893_v24 = vrot.slane %v5846_v22, 5  ;;  %v5820_v32 = vadd.f32 %v5788_v2, %v5703_v30  ;;  %v5821_v31 = vadd.f32 %v5791_v43, %v5704_v12 }
 0x6d8   :  { %v5895_v29 = vrot.slane %v5847_v5, 5  ;;  %v5896_v17 = vrot.slane %v5848_v16, 5  ;;  %v5797_v47 = vsel %vm1374_vm11, %v5795_v62, %v5796_v11  ;;  %v5822_v14 = vadd.f32 %v5794_v28, %v5705_v19 }
 0x6d9   :  { %v5824_v38 = vadd.f32 %v5794_v28, %v5707_v55  ;;  %v5825_v35 = vadd.f32 %v5791_v43, %v5708_v42  ;;  %v5823_v4 = vadd.f32 %v5797_v47, %v5706_v8  ;;  %v5888_v41 = vsel %vm1374_vm11, %v5886_v50, %v5887_v39 }
 0x6da   :  { %v5891_v56 = vsel %vm1374_vm11, %v5889_v1, %v5890_v23  ;;  %v5898_v33 = vrot.slane %v5849_v9, 5  ;;  %v5894_v45 = vsel %vm1374_vm11, %v5892_v59, %v5893_v24  ;;  %v5897_v15 = vsel %vm1374_vm11, %v5895_v29, %v5896_v17  ;;  %v9162_v29 = vld [vmem:[#allocation2 + $0x9d] ss:$0 sm:$0xff] }
 0x6db   :  { %v5899_v3 = vrot.slane %v5850_v18, 5  ;;  %v5919_v30 = vadd.f32 %v5888_v41, %v5818_v21  ;;  %v5920_v12 = vadd.f32 %v5891_v56, %v5819_v27  ;;  %v5942_v40 = vmul.f32 %v9161_v13, %v13190_v48 }
 0x6dc   :  { %v5943_v19 = vmul.f32 %v9161_v13, %v13204_v46  ;;  %v5944_v55 = vmul.f32 %v9161_v13, %v13191_v0  ;;  %v5945_v8 = vmul.f32 %v9161_v13, %v13205_v49  ;;  %v5946_v42 = vmul.f32 %v9161_v13, %v13248_v51 }
 0x6dd   :  { %v5947_v20 = vmul.f32 %v9161_v13, %v13249_v10  ;;  %v5948_v2 = vmul.f32 %v9161_v13, %v13250_v6  ;;  %v5949_v43 = vmul.f32 %v9161_v13, %v13251_v36  ;;  %v5950_v62 = vmul.f32 %v9161_v13, %v13231_v60 }
 0x6de   :  { %v5951_v11 = vmul.f32 %v9161_v13, %v13232_v58  ;;  %v5987_v21 = vrot.slane %v5942_v40, 6  ;;  %v5988_v27 = vrot.slane %v5943_v19, 6  ;;  %v5990_v7 = vrot.slane %v5944_v55, 6 }
 0x6df   :  { %v5991_v52 = vrot.slane %v5945_v8, 6  ;;  %v5993_v28 = vrot.slane %v5946_v42, 6  ;;  %v5921_v61 = vadd.f32 %v5894_v45, %v5820_v32  ;;  %v5994_v34 = vrot.slane %v5947_v20, 6 }
 0x6e0   :  { %v5996_v57 = vrot.slane %v5948_v2, 6  ;;  %v5997_v63 = vrot.slane %v5949_v43, 6  ;;  %v5900_v22 = vsel %vm1374_vm11, %v5898_v33, %v5899_v3  ;;  %v5922_v5 = vadd.f32 %v5897_v15, %v5821_v31 }
 0x6e1   :  { %v5924_v16 = vadd.f32 %v5897_v15, %v5823_v4  ;;  %v5925_v9 = vadd.f32 %v5894_v45, %v5824_v38  ;;  %v5923_v18 = vadd.f32 %v5900_v22, %v5822_v14  ;;  %v5926_v50 = vadd.f32 %v5891_v56, %v5825_v35 }
 0x6e2   :  { %v5989_v39 = vsel %vm1357_vm10, %v5987_v21, %v5988_v27  ;;  %v5999_v1 = vrot.slane %v5950_v62, 6  ;;  %v5992_v23 = vsel %vm1357_vm10, %v5990_v7, %v5991_v52  ;;  %v5995_v59 = vsel %vm1357_vm10, %v5993_v28, %v5994_v34 }
 0x6e3   :  { %v6000_v24 = vrot.slane %v5951_v11, 6  ;;  %v6045_v32 = vmul.f32 %v9162_v29, %v13191_v0  ;;  %v5998_v17 = vsel %vm1357_vm10, %v5996_v57, %v5997_v63  ;;  %v6020_v47 = vadd.f32 %v5989_v39, %v5919_v30 }
 0x6e4   :  { %v6021_v41 = vadd.f32 %v5992_v23, %v5920_v12  ;;  %v6046_v31 = vmul.f32 %v9162_v29, %v13205_v49  ;;  %v6047_v14 = vmul.f32 %v9162_v29, %v13248_v51  ;;  %v6048_v38 = vmul.f32 %v9162_v29, %v13249_v10 }
 0x6e5   :  { %v6049_v35 = vmul.f32 %v9162_v29, %v13250_v6  ;;  %v6050_v4 = vmul.f32 %v9162_v29, %v13251_v36  ;;  %v6051_v56 = vmul.f32 %v9162_v29, %v13190_v48  ;;  %v6052_v33 = vmul.f32 %v9162_v29, %v13204_v46 }
 0x6e6   :  { %v6053_v45 = vmul.f32 %v9162_v29, %v13231_v60  ;;  %v6054_v15 = vmul.f32 %v9162_v29, %v13232_v58  ;;  %v6001_v3 = vsel %vm1357_vm10, %v5999_v1, %v6000_v24  ;;  %v6055_v30 = vmul.f32 %v9162_v29, %v13233_v54 }
 0x6e7   :  { %v6099_v12 = vrot.slane %v6045_v32, 6  ;;  %v6100_v13 = vrot.slane %v6046_v31, 6  ;;  %v6102_v40 = vrot.slane %v6047_v14, 6  ;;  %v6103_v19 = vrot.slane %v6048_v38, 6  ;;  %v9163_v32 = vld [vmem:[#allocation2 + $0xa4] ss:$0 sm:$0xff] }
 0x6e8   :  { %v6105_v55 = vrot.slane %v6049_v35, 6  ;;  %v6106_v8 = vrot.slane %v6050_v4, 6  ;;  %v6022_v42 = vadd.f32 %v5995_v59, %v5921_v61  ;;  %v6056_v20 = vmul.f32 %v9162_v29, %v13234_v53 }
 0x6e9   :  { %v6108_v2 = vrot.slane %v6051_v56, 6  ;;  %v6109_v43 = vrot.slane %v6052_v33, 6  ;;  %v6023_v62 = vadd.f32 %v5998_v17, %v5922_v5  ;;  %v6024_v11 = vadd.f32 %v5995_v59, %v5923_v18 }
 0x6ea   :  { %v6111_v21 = vrot.slane %v6053_v45, 6  ;;  %v6112_v27 = vrot.slane %v6054_v15, 6  ;;  %v6025_v7 = vadd.f32 %v5992_v23, %v5924_v16  ;;  %v6026_v52 = vadd.f32 %v5989_v39, %v5925_v9 }
 0x6eb   :  { %v6027_v28 = vadd.f32 %v6001_v3, %v5926_v50  ;;  %v6101_v34 = vsel %vm1357_vm10, %v6099_v12, %v6100_v13  ;;  %v6104_v57 = vsel %vm1357_vm10, %v6102_v40, %v6103_v19  ;;  %v6107_v63 = vsel %vm1357_vm10, %v6105_v55, %v6106_v8 }
 0x6ec   :  { %v6110_v22 = vsel %vm1357_vm10, %v6108_v2, %v6109_v43  ;;  %v6114_v61 = vrot.slane %v6055_v30, 6  ;;  %v6115_v1 = vrot.slane %v6056_v20, 6  ;;  %v6137_v24 = vadd.f32 %v6101_v34, %v6020_v47 }
 0x6ed   :  { %v6138_v29 = vadd.f32 %v6104_v57, %v6021_v41  ;;  %v6164_v5 = vmul.f32 %v9163_v32, %v13248_v51  ;;  %v6113_v18 = vsel %vm1357_vm10, %v6111_v21, %v6112_v27  ;;  %v6165_v16 = vmul.f32 %v9163_v32, %v13249_v10 }
 0x6ee   :  { %v6166_v9 = vmul.f32 %v9163_v32, %v13250_v6  ;;  %v6167_v50 = vmul.f32 %v9163_v32, %v13251_v36  ;;  %v6168_v39 = vmul.f32 %v9163_v32, %v13191_v0  ;;  %v6169_v23 = vmul.f32 %v9163_v32, %v13205_v49 }
 0x6ef   :  { %v6170_v59 = vmul.f32 %v9163_v32, %v13190_v48  ;;  %v6171_v17 = vmul.f32 %v9163_v32, %v13204_v46  ;;  %v6139_v47 = vadd.f32 %v6107_v63, %v6022_v42  ;;  %v6172_v41 = vmul.f32 %v9163_v32, %v13231_v60 }
 0x6f0   :  { %v6173_v31 = vmul.f32 %v9163_v32, %v13232_v58  ;;  %v6174_v14 = vmul.f32 %v9163_v32, %v13233_v54  ;;  %v6175_v38 = vmul.f32 %v9163_v32, %v13234_v53  ;;  %v6176_v35 = vmul.f32 %v9163_v32, %v13236_v25 }
 0x6f1   :  { %v6227_v4 = vrot.slane %v6164_v5, 6  ;;  %v6228_v56 = vrot.slane %v6165_v16, 6  ;;  %v6230_v33 = vrot.slane %v6166_v9, 6  ;;  %v6231_v45 = vrot.slane %v6167_v50, 6 }
 0x6f2   :  { %v6233_v15 = vrot.slane %v6168_v39, 6  ;;  %v6234_v3 = vrot.slane %v6169_v23, 6  ;;  %v6177_v30 = vmul.f32 %v9163_v32, %v13237_v44  ;;  %v6236_v12 = vrot.slane %v6170_v59, 6 }
 0x6f3   :  { %v6237_v13 = vrot.slane %v6171_v17, 6  ;;  %v6239_v40 = vrot.slane %v6172_v41, 6  ;;  %v6116_v19 = vsel %vm1357_vm10, %v6114_v61, %v6115_v1  ;;  %v6140_v55 = vadd.f32 %v6104_v57, %v6023_v62 }
 0x6f4   :  { %v6141_v8 = vadd.f32 %v6101_v34, %v6024_v11  ;;  %v6240_v42 = vrot.slane %v6173_v31, 6  ;;  %v6142_v20 = vadd.f32 %v6110_v22, %v6025_v7  ;;  %v6143_v2 = vadd.f32 %v6113_v18, %v6026_v52  ;;  %v9164_v7 = vld [vmem:[#allocation2 + $0xab] ss:$0 sm:$0xff] }
 0x6f5   :  { %v6144_v43 = vadd.f32 %v6116_v19, %v6027_v28  ;;  %v6229_v21 = vsel %vm1357_vm10, %v6227_v4, %v6228_v56  ;;  %v6232_v27 = vsel %vm1357_vm10, %v6230_v33, %v6231_v45  ;;  %v6235_v63 = vsel %vm1357_vm10, %v6233_v15, %v6234_v3 }
 0x6f6   :  { %v6238_v5 = vsel %vm1357_vm10, %v6236_v12, %v6237_v13  ;;  %v6242_v32 = vrot.slane %v6174_v14, 6  ;;  %v6241_v16 = vsel %vm1357_vm10, %v6239_v40, %v6240_v42  ;;  %v6243_v9 = vrot.slane %v6175_v38, 6 }
 0x6f7   :  { %v6245_v50 = vrot.slane %v6176_v35, 6  ;;  %v6246_v61 = vrot.slane %v6177_v30, 6  ;;  %v6270_v62 = vadd.f32 %v6229_v21, %v6137_v24  ;;  %v6271_v11 = vadd.f32 %v6232_v27, %v6138_v29 }
 0x6f8   :  { %v6272_v34 = vadd.f32 %v6229_v21, %v6139_v47  ;;  %v6299_v52 = vmul.f32 %v9164_v7, %v13250_v6  ;;  %v6300_v28 = vmul.f32 %v9164_v7, %v13251_v36  ;;  %v6301_v57 = vmul.f32 %v9164_v7, %v13248_v51 }
 0x6f9   :  { %v6302_v22 = vmul.f32 %v9164_v7, %v13249_v10  ;;  %v6303_v1 = vmul.f32 %v9164_v7, %v13191_v0  ;;  %v6304_v18 = vmul.f32 %v9164_v7, %v13205_v49  ;;  %v6305_v39 = vmul.f32 %v9164_v7, %v13190_v48 }
 0x6fa   :  { %v6306_v23 = vmul.f32 %v9164_v7, %v13204_v46  ;;  %v6307_v24 = vmul.f32 %v9164_v7, %v13231_v60  ;;  %v6244_v29 = vsel %vm1357_vm10, %v6242_v32, %v6243_v9  ;;  %v6247_v6 = vsel %vm1357_vm10, %v6245_v50, %v6246_v61 }
 0x6fb   :  { %v6308_v36 = vmul.f32 %v9164_v7, %v13232_v58  ;;  %v6309_v59 = vmul.f32 %v9164_v7, %v13233_v54  ;;  %v6310_v17 = vmul.f32 %v9164_v7, %v13234_v53  ;;  %v6311_v47 = vmul.f32 %v9164_v7, %v13236_v25 }
 0x6fc   :  { %v6312_v41 = vmul.f32 %v9164_v7, %v13237_v44  ;;  %v6371_v31 = vrot.slane %v6299_v52, 6  ;;  %v6372_v14 = vrot.slane %v6300_v28, 6  ;;  %v6374_v38 = vrot.slane %v6301_v57, 6 }
 0x6fd   :  { %v6375_v35 = vrot.slane %v6302_v22, 6  ;;  %v6377_v4 = vrot.slane %v6303_v1, 6  ;;  %v6378_v56 = vrot.slane %v6304_v18, 6  ;;  %v6380_v33 = vrot.slane %v6305_v39, 6 }
 0x6fe   :  { %v6381_v45 = vrot.slane %v6306_v23, 6  ;;  %v6383_v15 = vrot.slane %v6307_v24, 6  ;;  %v6313_v3 = vmul.f32 %v9164_v7, %v13239_v26  ;;  %v6314_v30 = vmul.f32 %v9164_v7, %v13240_v37 }
 0x6ff   :  { %v6384_v12 = vrot.slane %v6308_v36, 6  ;;  %v6386_v13 = vrot.slane %v6309_v59, 6  ;;  %v6273_v40 = vadd.f32 %v6235_v63, %v6140_v55  ;;  %v6274_v19 = vadd.f32 %v6238_v5, %v6141_v8 }
 0x700   :  { %v6275_v42 = vadd.f32 %v6241_v16, %v6142_v20  ;;  %v6387_v21 = vrot.slane %v6310_v17, 6  ;;  %v6276_v27 = vadd.f32 %v6244_v29, %v6143_v2  ;;  %v6277_v32 = vadd.f32 %v6247_v6, %v6144_v43  ;;  %v9165_v43 = vld [vmem:[#allocation2 + $0xb2] ss:$0 sm:$0xff] }
 0x701   :  { %v6373_v9 = vsel %vm1357_vm10, %v6371_v31, %v6372_v14  ;;  %v6376_v50 = vsel %vm1357_vm10, %v6374_v38, %v6375_v35  ;;  %v6379_v61 = vsel %vm1357_vm10, %v6377_v4, %v6378_v56  ;;  %v6382_v52 = vsel %vm1357_vm10, %v6380_v33, %v6381_v45 }
 0x702   :  { %v6385_v28 = vsel %vm1357_vm10, %v6383_v15, %v6384_v12  ;;  %v6389_v57 = vrot.slane %v6311_v47, 6  ;;  %v6388_v7 = vsel %vm1357_vm10, %v6386_v13, %v6387_v21  ;;  %v6390_v22 = vrot.slane %v6312_v41, 6 }
 0x703   :  { %v6392_v55 = vrot.slane %v6313_v3, 6  ;;  %v6393_v8 = vrot.slane %v6314_v30, 6  ;;  %v6419_v20 = vadd.f32 %v6373_v9, %v6270_v62  ;;  %v6420_v63 = vadd.f32 %v6376_v50, %v6271_v11 }
 0x704   :  { %v12340_v2 = vadd.f32 %v6379_v61, %v6272_v34  ;;  %v6446_v5 = vmul.f32 %v9165_v43, %v13248_v51  ;;  %v6447_v16 = vmul.f32 %v9165_v43, %v13249_v10  ;;  %v6448_v1 = vmul.f32 %v9165_v43, %v13191_v0 }
 0x705   :  { %v6449_v18 = vmul.f32 %v9165_v43, %v13205_v49  ;;  %v6450_v39 = vmul.f32 %v9165_v43, %v13190_v48  ;;  %v6451_v23 = vmul.f32 %v9165_v43, %v13204_v46  ;;  %v6452_v24 = vmul.f32 %v9165_v43, %v13231_v60 }
 0x706   :  { %v6453_v62 = vmul.f32 %v9165_v43, %v13232_v58  ;;  %v6454_v11 = vmul.f32 %v9165_v43, %v13233_v54  ;;  %v6391_v34 = vsel %vm1357_vm10, %v6389_v57, %v6390_v22  ;;  %v6455_v51 = vmul.f32 %v9165_v43, %v13234_v53 }
 0x707   :  { %v6456_v10 = vmul.f32 %v9165_v43, %v13236_v25  ;;  %v6457_v29 = vmul.f32 %v9165_v43, %v13237_v44  ;;  %v6458_v6 = vmul.f32 %v9165_v43, %v13239_v26  ;;  %v6509_v36 = vrot.slane %v6446_v5, 6 }
 0x708   :  { %v6510_v59 = vrot.slane %v6447_v16, 6  ;;  %v6512_v17 = vrot.slane %v6448_v1, 6  ;;  %v6513_v47 = vrot.slane %v6449_v18, 6  ;;  %v6515_v41 = vrot.slane %v6450_v39, 6 }
 0x709   :  { %v6516_v31 = vrot.slane %v6451_v23, 6  ;;  %v6518_v14 = vrot.slane %v6452_v24, 6  ;;  %v6459_v38 = vmul.f32 %v9165_v43, %v13240_v37  ;;  %v6519_v35 = vrot.slane %v6453_v62, 6 }
 0x70a   :  { %v6521_v4 = vrot.slane %v6454_v11, 6  ;;  %v6522_v56 = vrot.slane %v6455_v51, 6  ;;  %v6394_v33 = vsel %vm1357_vm10, %v6392_v55, %v6393_v8  ;;  %v6422_v45 = vadd.f32 %v6382_v52, %v6273_v40 }
 0x70b   :  { %v6524_v15 = vrot.slane %v6456_v10, 6  ;;  %v6525_v3 = vrot.slane %v6457_v29, 6  ;;  %v6423_v30 = vadd.f32 %v6385_v28, %v6274_v19  ;;  %v6424_v12 = vadd.f32 %v6388_v7, %v6275_v42  ;;  %v9166_v28 = vld [vmem:[#allocation2 + $0xb9] ss:$0 sm:$0xff] }
 0x70c   :  { %v12358_v13 = vadd.f32 %v6391_v34, %v6276_v27  ;;  %v12360_v21 = vadd.f32 %v6394_v33, %v6277_v32  ;;  %v6511_v9 = vsel %vm1357_vm10, %v6509_v36, %v6510_v59  ;;  %v6514_v50 = vsel %vm1357_vm10, %v6512_v17, %v6513_v47 }
 0x70d   :  { %v6517_v61 = vsel %vm1357_vm10, %v6515_v41, %v6516_v31  ;;  %v6520_v57 = vsel %vm1357_vm10, %v6518_v14, %v6519_v35  ;;  %v6523_v22 = vsel %vm1357_vm10, %v6521_v4, %v6522_v56  ;;  %v12368_v40 = vsel %vm1357_vm10, %v6524_v15, %v6525_v3 }
 0x70e   :  { %v6527_v52 = vrot.slane %v6458_v6, 6  ;;  %v6528_v19 = vrot.slane %v6459_v38, 6  ;;  %v6552_v42 = vadd.f32 %v6511_v9, %v6419_v20  ;;  %v6553_v27 = vadd.f32 %v6514_v50, %v6420_v63 }
 0x70f   :  { %v6577_v32 = vmul.f32 %v9166_v28, %v13191_v0  ;;  %v6578_v7 = vmul.f32 %v9166_v28, %v13205_v49  ;;  %v6579_v55 = vmul.f32 %v9166_v28, %v13190_v48  ;;  %v6580_v8 = vmul.f32 %v9166_v28, %v13204_v46 }
 0x710   :  { %v6581_v43 = vmul.f32 %v9166_v28, %v13231_v60  ;;  %v6582_v5 = vmul.f32 %v9166_v28, %v13232_v58  ;;  %v6583_v16 = vmul.f32 %v9166_v28, %v13233_v54  ;;  %v6584_v1 = vmul.f32 %v9166_v28, %v13234_v53 }
 0x711   :  { %v6585_v20 = vmul.f32 %v9166_v28, %v13236_v25  ;;  %v6586_v63 = vmul.f32 %v9166_v28, %v13237_v44  ;;  %v6587_v0 = vmul.f32 %v9166_v28, %v13239_v26  ;;  %v6588_v49 = vmul.f32 %v9166_v28, %v13240_v37 }
 0x712   :  { %v6631_v18 = vrot.slane %v6577_v32, 6  ;;  %v6632_v39 = vrot.slane %v6578_v7, 6  ;;  %v6634_v23 = vrot.slane %v6579_v55, 6  ;;  %v6635_v24 = vrot.slane %v6580_v8, 6 }
 0x713   :  { %v6637_v62 = vrot.slane %v6581_v43, 6  ;;  %v6638_v11 = vrot.slane %v6582_v5, 6  ;;  %v6554_v34 = vadd.f32 %v6517_v61, %v12340_v2  ;;  %v6640_v51 = vrot.slane %v6583_v16, 6 }
 0x714   :  { %v6641_v10 = vrot.slane %v6584_v1, 6  ;;  %v6643_v29 = vrot.slane %v6585_v20, 6  ;;  %v6529_v6 = vsel %vm1357_vm10, %v6527_v52, %v6528_v19  ;;  %v6555_v36 = vadd.f32 %v6520_v57, %v6422_v45  ;;  %v9167_v45 = vld [vmem:[#allocation2 + $0xc0] ss:$0 sm:$0xff] }
 0x715   :  { %v6556_v59 = vadd.f32 %v6523_v22, %v6423_v30  ;;  %v6644_v17 = vrot.slane %v6586_v63, 6  ;;  %v6557_v47 = vadd.f32 %v12368_v40, %v6424_v12  ;;  %v6633_v41 = vsel %vm1357_vm10, %v6631_v18, %v6632_v39 }
 0x716   :  { %v6636_v31 = vsel %vm1357_vm10, %v6634_v23, %v6635_v24  ;;  %v6639_v14 = vsel %vm1357_vm10, %v6637_v62, %v6638_v11  ;;  %v6642_v38 = vsel %vm1357_vm10, %v6640_v51, %v6641_v10  ;;  %v6646_v35 = vrot.slane %v6587_v0, 6 }
 0x717   :  { %v6647_v2 = vrot.slane %v6588_v49, 6  ;;  %v6669_v4 = vadd.f32 %v6633_v41, %v6552_v42  ;;  %v6645_v56 = vsel %vm1357_vm10, %v6643_v29, %v6644_v17  ;;  %v6670_v33 = vadd.f32 %v6636_v31, %v6553_v27  ;;  %v13252_v49 = vld [vmem:[#allocation24_spill] sm:$0xff] }
 0x718   :  { %v6671_v15 = vadd.f32 %v6639_v14, %v6554_v34  ;;  %v6692_v3 = vmul.f32 %v9167_v45, %v13190_v48  ;;  %v6672_v30 = vadd.f32 %v6642_v38, %v6555_v36  ;;  %v6693_v12 = vmul.f32 %v9167_v45, %v13204_v46 }
 0x719   :  { %v6694_v9 = vmul.f32 %v9167_v45, %v13231_v60  ;;  %v6695_v50 = vmul.f32 %v9167_v45, %v13232_v58  ;;  %v6696_v61 = vmul.f32 %v9167_v45, %v13233_v54  ;;  %v6697_v57 = vmul.f32 %v9167_v45, %v13234_v53 }
 0x71a   :  { %v6698_v22 = vmul.f32 %v9167_v45, %v13236_v25  ;;  %v6699_v52 = vmul.f32 %v9167_v45, %v13237_v44  ;;  %v6700_v19 = vmul.f32 %v9167_v45, %v13239_v26  ;;  %v6701_v42 = vmul.f32 %v9167_v45, %v13240_v37 }
 0x71b   :  { %v6737_v48 = vrot.slane %v6692_v3, 6  ;;  %v6738_v27 = vrot.slane %v6693_v12, 6  ;;  %v6740_v28 = vrot.slane %v6694_v9, 6  ;;  %v6741_v46 = vrot.slane %v6695_v50, 6 }
 0x71c   :  { %v6743_v32 = vrot.slane %v6696_v61, 6  ;;  %v6744_v60 = vrot.slane %v6697_v57, 6  ;;  %v6746_v7 = vrot.slane %v6698_v22, 6  ;;  %v6747_v54 = vrot.slane %v6699_v52, 6 }
 0x71d   :  { %v6739_v58 = vsel %vm1357_vm10, %v6737_v48, %v6738_v27  ;;  %v6749_v55 = vrot.slane %v6700_v19, 6  ;;  %v6742_v53 = vsel %vm1357_vm10, %v6740_v28, %v6741_v46  ;;  %v6750_v44 = vrot.slane %v6701_v42, 6 }
 0x71e   :  { %v6745_v25 = vsel %vm1357_vm10, %v6743_v32, %v6744_v60  ;;  %v6770_v8 = vadd.f32 %v6739_v58, %v6669_v4  ;;  %v6558_v26 = vadd.f32 %v6529_v6, %v12358_v13  ;;  %v6673_v37 = vadd.f32 %v6645_v56, %v6556_v59 }
 0x71f   :  { %v6771_v43 = vadd.f32 %v6742_v53, %v6670_v33  ;;  %v6772_v5 = vadd.f32 %v6745_v25, %v6671_v15  ;;  %v6559_v16 = vadd.f32 %v12368_v40, %v12360_v21  ;;  %v6648_v1 = vsel %vm1357_vm10, %v6646_v35, %v6647_v2 }
 0x720   :  { %v6748_v20 = vsel %vm1357_vm10, %v6746_v7, %v6747_v54  ;;  %v6674_v63 = vadd.f32 %v6648_v1, %v6557_v47  ;;  %v6790_v18 = vadd.f32 %v13252_v49, %v6770_v8  ;;  %v6751_v23 = vsel %vm1357_vm10, %v6749_v55, %v6750_v44 }
 0x721   :  { %v6773_v0 = vadd.f32 %v6748_v20, %v6672_v30  ;;  %v6791_v39 = vadd.f32 %v13252_v49, %v6771_v43  ;;  %v6675_v24 = vadd.f32 %v6645_v56, %v6558_v26  ;;  %v6774_v13 = vadd.f32 %v6751_v23, %v6673_v37 }
 0x722   :  { %v6792_v62 = vadd.f32 %v13252_v49, %v6772_v5  ;;  %v6676_v34 = vadd.f32 %v6642_v38, %v6559_v16  ;;  %v6775_v51 = vadd.f32 %v6748_v20, %v6674_v63  ;;  %vm9195_vm8 = vmmov 0  }
 0x723   :  { %v6811_v11 = vadd.f32 %v6791_v39, %v6790_v18  ;;  %v6793_v21 = vadd.f32 %v13252_v49, %v6773_v0  ;;  %v6776_v10 = vadd.f32 %v6745_v25, %v6675_v24  ;;  %v6794_v29 = vadd.f32 %v13252_v49, %v6774_v13 }
 0x724   :  { %v6777_v36 = vadd.f32 %v6742_v53, %v6676_v34  ;;  %v6795_v59 = vadd.f32 %v13252_v49, %v6775_v51  ;;  %v13254_v51 = vld [vmem:[#allocation31_spill] sm:$0xff]  ;;  %vm7741_vm9 = vcmask 1041409   ;;  %vm8340_vm15 = vcmask 523264  }
 0x725   :  { %v6812_v40 = vadd.f32 %v6811_v11, %v6792_v62  ;;  %v6796_v47 = vadd.f32 %v13252_v49, %v6776_v10 }
 0x726   :  { %v6797_v31 = vadd.f32 %v13252_v49, %v6777_v36 }
 0x727   :  { %v6813_v6 = vadd.f32 %v6812_v40, %v6793_v21 }
 0x729   :  { %v6814_v17 = vadd.f32 %v6813_v6, %v6794_v29 }
 0x72b   :  { %v6815_v41 = vadd.f32 %v6814_v17, %v6795_v59 }
 0x72d   :  { %v6816_v14 = vadd.f32 %v6815_v41, %v6796_v47 }
 0x72f   :  { %v6817_v35 = vadd.f32 %v6816_v14, %v6797_v31 }
 0x731   :  { %v6818_v38 = vrot.slane %v6817_v35, 4 }
 0x733   :  { %v6819_v2 = vadd.f32 %v6818_v38, %v6817_v35 }
 0x735   :  { %v6820_v4 = vrot.slane %v6819_v2, 2 }
 0x737   :  { %v6821_v56 = vadd.f32 %v6820_v4, %v6819_v2 }
 0x739   :  { %v6822_v33 = vrot.slane %v6821_v56, 1 }
 0x73b   :  { %v6823_v15 = vadd.f32 %v6822_v33, %v6821_v56 }
 0x73d   :  { %v6825_v45 = vmul.f32 0.015625, %v6823_v15 }
 0x73f   :  { %v6834_v3 = vsub.f32 %v6790_v18, %v6825_v45  ;;  %v6835_v30 = vsub.f32 %v6791_v39, %v6825_v45  ;;  %v6836_v12 = vsub.f32 %v6792_v62, %v6825_v45  ;;  %v6837_v9 = vsub.f32 %v6793_v21, %v6825_v45  ;;  %v13253_v39 = vld [vmem:[#allocation32_spill] sm:$0xff] }
 0x740   :  { %v6838_v57 = vsub.f32 %v6794_v29, %v6825_v45  ;;  %v6839_v19 = vsub.f32 %v6795_v59, %v6825_v45  ;;  %v6840_v27 = vsub.f32 %v6796_v47, %v6825_v45  ;;  %v6841_v32 = vsub.f32 %v6797_v31, %v6825_v45 }
 0x741   :  { %v6850_v50 = vmul.f32 %v6834_v3, %v6834_v3  ;;  %v6851_v61 = vmul.f32 %v6835_v30, %v6835_v30  ;;  %v6852_v22 = vmul.f32 %v6836_v12, %v6836_v12  ;;  %v6853_v42 = vmul.f32 %v6837_v9, %v6837_v9 }
 0x742   :  { %v6854_v28 = vmul.f32 %v6838_v57, %v6838_v57  ;;  %v6855_v60 = vmul.f32 %v6839_v19, %v6839_v19  ;;  %v6856_v7 = vmul.f32 %v6840_v27, %v6840_v27  ;;  %v6857_v55 = vmul.f32 %v6841_v32, %v6841_v32 }
 0x743   :  { %v6871_v52 = vadd.f32 %v6851_v61, %v6850_v50 }
 0x745   :  { %v6872_v48 = vadd.f32 %v6871_v52, %v6852_v22 }
 0x747   :  { %v6873_v46 = vadd.f32 %v6872_v48, %v6853_v42 }
 0x749   :  { %v6874_v58 = vadd.f32 %v6873_v46, %v6854_v28 }
 0x74b   :  { %v6875_v54 = vadd.f32 %v6874_v58, %v6855_v60 }
 0x74d   :  { %v6876_v53 = vadd.f32 %v6875_v54, %v6856_v7 }
 0x74f   :  { %v6877_v25 = vadd.f32 %v6876_v53, %v6857_v55 }
 0x751   :  { %v6878_v44 = vrot.slane %v6877_v25, 4 }
 0x753   :  { %v6879_v8 = vadd.f32 %v6878_v44, %v6877_v25 }
 0x755   :  { %v6880_v26 = vrot.slane %v6879_v8, 2 }
 0x757   :  { %v6881_v37 = vadd.f32 %v6880_v26, %v6879_v8 }
 0x759   :  { %v6882_v43 = vrot.slane %v6881_v37, 1 }
 0x75b   :  { %v6883_v5 = vadd.f32 %v6882_v43, %v6881_v37 }
 0x75d   :  { %v6885_v16 = vmul.f32 0.015625, %v6883_v5 }
 0x75f   :  { %v6887_v1 = vadd.f32 1e-05, %v6885_v16 }
 0x761   :  { %9072 = vrsqrt.f32 %v6887_v1 }
 0x76e   :  { %v9073_v20 = vpop.eup %9072 }
 0x76f   :  { %v6898_v63 = vmul.f32 %v9073_v20, %v6834_v3  ;;  %v6899_v0 = vmul.f32 %v9073_v20, %v6835_v30  ;;  %v6900_v49 = vmul.f32 %v9073_v20, %v6836_v12  ;;  %v6901_v18 = vmul.f32 %v9073_v20, %v6837_v9 }
 0x770   :  { %v6902_v11 = vmul.f32 %v9073_v20, %v6838_v57  ;;  %v6903_v34 = vmul.f32 %v9073_v20, %v6839_v19  ;;  %v6904_v6 = vmul.f32 %v9073_v20, %v6840_v27  ;;  %v6905_v15 = vmul.f32 %v9073_v20, %v6841_v32 }
 0x771   :  { %v6918_v23 = vmul.f32 %v13253_v39, %v6898_v63  ;;  %v6919_v24 = vmul.f32 %v13253_v39, %v6899_v0  ;;  %v6920_v13 = vmul.f32 %v13253_v39, %v6900_v49  ;;  %v6921_v62 = vmul.f32 %v13253_v39, %v6901_v18 }
 0x772   :  { %v6922_v41 = vmul.f32 %v13253_v39, %v6902_v11  ;;  %v6923_v35 = vmul.f32 %v13253_v39, %v6903_v34  ;;  %v6924_v4 = vmul.f32 %v13253_v39, %v6904_v6  ;;  %v6925_v22 = vmul.f32 %v13253_v39, %v6905_v15 }
 0x773   :  { %v12422_v21 = vadd.f32 %v13254_v51, %v6918_v23  ;;  %v12425_v40 = vadd.f32 %v13254_v51, %v6919_v24  ;;  %v12428_v10 = vadd.f32 %v13254_v51, %v6920_v13  ;;  %v12431_v29 = vadd.f32 %v13254_v51, %v6921_v62 }
 0x774   :  { %v12453_v3 = vadd.f32 %v13254_v51, %v6922_v41  ;;  %v12456_v50 = vadd.f32 %v13254_v51, %v6923_v35  ;;  %v12459_v61 = vadd.f32 %v13254_v51, %v6924_v4  ;;  %v12474_v46 = vadd.f32 %v13254_v51, %v6925_v22 }
 0x775   :  { %v12434_v36 = vmul.f32 0.70710677, %v12422_v21  ;;  %v12437_v59 = vmul.f32 0.70710677, %v12425_v40  ;;  %v12440_v17 = vmul.f32 0.70710677, %v12428_v10 }
 0x776   :  { %v12443_v47 = vmul.f32 0.70710677, %v12431_v29  ;;  %v12463_v52 = vmul.f32 0.70710677, %v12453_v3  ;;  %v12466_v42 = vmul.f32 0.70710677, %v12456_v50 }
 0x777   :  { %v6986_v31 = vand.u32 2147483647, %v12434_v36  ;;  %v6987_v14 = vand.u32 2147483647, %v12437_v59  ;;  %v6988_v38 = vand.u32 2147483647, %v12440_v17 }
 0x778   :  { %v6989_v2 = vand.u32 2147483647, %v12443_v47  ;;  %v6990_v48 = vand.u32 2147483647, %v12463_v52  ;;  %v12470_v27 = vmul.f32 0.70710677, %v12459_v61 }
 0x779   :  { %v7002_v56 = vmul.f32 0.3275911, %v6986_v31  ;;  %v7003_v33 = vmul.f32 0.3275911, %v6987_v14  ;;  %v7004_v45 = vmul.f32 0.3275911, %v6988_v38 }
 0x77a   :  { %v7005_v9 = vmul.f32 0.3275911, %v6989_v2  ;;  %v6991_v28 = vand.u32 2147483647, %v12466_v42  ;;  %v7006_v32 = vmul.f32 0.3275911, %v6990_v48 }
 0x77b   :  { %v7018_v30 = vadd.f32 1.0, %v7002_v56  ;;  %v7019_v12 = vadd.f32 1.0, %v7003_v33  ;;  %v7020_v57 = vadd.f32 1.0, %v7004_v45  ;;  %v6992_v60 = vand.u32 2147483647, %v12470_v27 }
 0x77c   :  { %v7021_v19 = vadd.f32 1.0, %v7005_v9  ;;  %v7210_v58 = vsub.f32 0.0, %v6986_v31  ;;  %v7007_v7 = vmul.f32 0.3275911, %v6991_v28  ;;  %v7211_v54 = vsub.f32 0.0, %v6987_v14 }
 0x77d   :  { %9074 = vrcp.f32 %v7018_v30  ;;  %v7022_v55 = vadd.f32 1.0, %v7006_v32  ;;  %v7008_v53 = vmul.f32 0.3275911, %v6992_v60  ;;  %v12478_v44 = vmul.f32 0.70710677, %v12474_v46 }
 0x77e   :  { %9076 = vrcp.f32 %v7019_v12  ;;  %v7023_v25 = vadd.f32 1.0, %v7007_v7  ;;  %v7212_v8 = vsub.f32 0.0, %v6988_v38  ;;  %v7226_v37 = vmul.f32 %v7210_v58, %v6986_v31 }
 0x77f   :  { %9078 = vrcp.f32 %v7020_v57  ;;  %v7024_v26 = vadd.f32 1.0, %v7008_v53  ;;  %v7213_v43 = vsub.f32 0.0, %v6989_v2  ;;  %v6993_v5 = vand.u32 2147483647, %v12478_v44 }
 0x780   :  { %9080 = vrcp.f32 %v7021_v19  ;;  %v7227_v16 = vmul.f32 %v7211_v54, %v6987_v14  ;;  %v7214_v1 = vsub.f32 0.0, %v6990_v48  ;;  %v7228_v0 = vmul.f32 %v7212_v8, %v6988_v38 }
 0x781   :  { %9082 = vrcp.f32 %v7022_v55  ;;  %v7009_v20 = vmul.f32 0.3275911, %v6993_v5  ;;  %v7215_v49 = vsub.f32 0.0, %v6991_v28  ;;  %v7250_v23 = vmul.f32 1.442695, %v7226_v37 }
 0x782   :  { %9084 = vrcp.f32 %v7023_v25  ;;  %v7229_v24 = vmul.f32 %v7213_v43, %v6989_v2  ;;  %v12487_v62 = vmul.f32 0.5, %v12422_v21  ;;  %v7252_v34 = vmul.f32 1.442695, %v7227_v16 }
 0x783   :  { %9086 = vrcp.f32 %v7024_v26  ;;  %v7025_v13 = vadd.f32 1.0, %v7009_v20  ;;  %v7230_v51 = vmul.f32 %v7214_v1, %v6990_v48  ;;  %v12491_v41 = vmul.f32 0.5, %v12425_v40 }
 0x784   :  { %v12494_v31 = vmul.f32 0.5, %v12428_v10  ;;  %v7254_v38 = vmul.f32 1.442695, %v7228_v0  ;;  %v7231_v2 = vmul.f32 %v7215_v49, %v6991_v28  ;;  %v7216_v4 = vsub.f32 0.0, %v6992_v60 }
 0x785   :  { %9088 = vrcp.f32 %v7025_v13  ;;  %v7256_v33 = vmul.f32 1.442695, %v7229_v24  ;;  %v7258_v10 = vmul.f32 1.442695, %v7230_v51  ;;  %v7217_v45 = vsub.f32 0.0, %v6993_v5 }
 0x786   :  { %9090 = vpow2.f32 %v7250_v23  ;;  %v7260_v22 = vmul.f32 1.442695, %v7231_v2  ;;  %v7232_v19 = vmul.f32 %v7216_v4, %v6992_v60  ;;  %vm7306_vm10 = vcmp.lt.f32.partialorder %v12434_v36, 0.0 }
 0x787   :  { %9092 = vpow2.f32 %v7252_v34  ;;  %v7233_v53 = vmul.f32 %v7217_v45, %v6993_v5  ;;  %vm7307_vm11 = vcmp.lt.f32.partialorder %v12437_v59, 0.0  ;;  %vm7308_vm12 = vcmp.lt.f32.partialorder %v12440_v17, 0.0 }
 0x788   :  { %9094 = vpow2.f32 %v7254_v38  ;;  %v7262_v16 = vmul.f32 1.442695, %v7232_v19  ;;  %vm7309_vm13 = vcmp.lt.f32.partialorder %v12443_v47, 0.0  ;;  %vm7310_vm4 = vcmp.lt.f32.partialorder %v12463_v52, 0.0 }
 0x789   :  { %9096 = vpow2.f32 %v7256_v33  ;;  %v7264_v13 = vmul.f32 1.442695, %v7233_v53  ;;  %vm7311_vm5 = vcmp.lt.f32.partialorder %v12466_v42, 0.0  ;;  %v6958_v47 = vmul.f32 0.5, %v12453_v3 }
 0x78a   :  { %v12481_v63 = vpop.eup %9074  ;;  %9098 = vpow2.f32 %v7258_v10  ;;  %vm7312_vm6 = vcmp.lt.f32.partialorder %v12470_v27, 0.0  ;;  %v6960_v42 = vmul.f32 0.5, %v12459_v61  ;;  %vm7313_vm7 = vcmp.lt.f32.partialorder %v12478_v44, 0.0 }
 0x78b   :  { %v12483_v18 = vpop.eup %9076  ;;  %v7066_v39 = vmul.f32 1.0614054, %v12481_v63  ;;  %9100 = vpow2.f32 %v7260_v22  ;;  %v6961_v27 = vmul.f32 0.5, %v12474_v46 }
 0x78c   :  { %v7067_v11 = vmul.f32 1.0614054, %v12483_v18  ;;  %v12496_v14 = vpop.eup %9078  ;;  %9102 = vpow2.f32 %v7262_v16 }
 0x78d   :  { %v7082_v6 = vadd.f32 -1.4531521, %v7066_v39  ;;  %v7068_v56 = vmul.f32 1.0614054, %v12496_v14  ;;  %v12500_v15 = vpop.eup %9080  ;;  %9104 = vpow2.f32 %v7264_v13 }
 0x78e   :  { %v7083_v35 = vadd.f32 -1.4531521, %v7067_v11  ;;  %v7069_v9 = vmul.f32 1.0614054, %v12500_v15  ;;  %v12504_v48 = vpop.eup %9082 }
 0x78f   :  { %v7098_v21 = vmul.f32 %v12481_v63, %v7082_v6  ;;  %v7084_v12 = vadd.f32 -1.4531521, %v7068_v56  ;;  %v12508_v7 = vpop.eup %9084  ;;  %v7070_v55 = vmul.f32 1.0614054, %v12504_v48 }
 0x790   :  { %v7099_v40 = vmul.f32 %v12483_v18, %v7083_v35  ;;  %v7085_v58 = vadd.f32 -1.4531521, %v7069_v9  ;;  %v7071_v26 = vmul.f32 1.0614054, %v12508_v7  ;;  %v12514_v1 = vpop.eup %9086 }
 0x791   :  { %v7114_v30 = vadd.f32 1.4214138, %v7098_v21  ;;  %v7100_v32 = vmul.f32 %v12496_v14, %v7084_v12  ;;  %v7086_v43 = vadd.f32 -1.4531521, %v7070_v55  ;;  %v7072_v24 = vmul.f32 1.0614054, %v12514_v1 }
 0x792   :  { %v7115_v57 = vadd.f32 1.4214138, %v7099_v40  ;;  %v7101_v60 = vmul.f32 %v12500_v15, %v7085_v58  ;;  %v7087_v39 = vadd.f32 -1.4531521, %v7071_v26  ;;  %v12523_v35 = vpop.eup %9088 }
 0x793   :  { %v7130_v28 = vmul.f32 %v12481_v63, %v7114_v30  ;;  %v7116_v8 = vadd.f32 1.4214138, %v7100_v32  ;;  %v7102_v23 = vmul.f32 %v12504_v48, %v7086_v43  ;;  %v7088_v4 = vadd.f32 -1.4531521, %v7072_v24  ;;  %v9091_v10 = vpop.eup %9090 }
 0x794   :  { %v7131_v54 = vmul.f32 %v12483_v18, %v7115_v57  ;;  %v7117_v49 = vadd.f32 1.4214138, %v7101_v60  ;;  %v7103_v6 = vmul.f32 %v12508_v7, %v7087_v39  ;;  %v7073_v9 = vmul.f32 1.0614054, %v12523_v35  ;;  %v9093_v57 = vpop.eup %9092 }
 0x795   :  { %v7146_v25 = vadd.f32 -0.28449672, %v7130_v28  ;;  %v7132_v0 = vmul.f32 %v12496_v14, %v7116_v8  ;;  %v7118_v2 = vadd.f32 1.4214138, %v7102_v23  ;;  %v7104_v12 = vmul.f32 %v12514_v1, %v7088_v4 }
 0x796   :  { %v7147_v37 = vadd.f32 -0.28449672, %v7131_v54  ;;  %v7133_v51 = vmul.f32 %v12500_v15, %v7117_v49  ;;  %v7119_v40 = vadd.f32 1.4214138, %v7103_v6  ;;  %v7089_v55 = vadd.f32 -1.4531521, %v7073_v9 }
 0x797   :  { %v7162_v20 = vmul.f32 %v12481_v63, %v7146_v25  ;;  %v7148_v34 = vadd.f32 -0.28449672, %v7132_v0  ;;  %v7134_v30 = vmul.f32 %v12504_v48, %v7118_v2  ;;  %v7120_v54 = vadd.f32 1.4214138, %v7104_v12 }
 0x798   :  { %v7163_v5 = vmul.f32 %v12483_v18, %v7147_v37  ;;  %v7149_v33 = vadd.f32 -0.28449672, %v7133_v51  ;;  %v7135_v28 = vmul.f32 %v12508_v7, %v7119_v40 }
 0x799   :  { %v7178_v11 = vadd.f32 0.2548296, %v7162_v20  ;;  %v7164_v56 = vmul.f32 %v12496_v14, %v7148_v34  ;;  %v7150_v58 = vadd.f32 -0.28449672, %v7134_v30  ;;  %v7136_v16 = vmul.f32 %v12514_v1, %v7120_v54 }
 0x79a   :  { %v7179_v38 = vadd.f32 0.2548296, %v7163_v5  ;;  %v7151_v60 = vadd.f32 -0.28449672, %v7135_v28 }
 0x79b   :  { %v7194_v21 = vmul.f32 %v12481_v63, %v7178_v11  ;;  %v7180_v19 = vadd.f32 0.2548296, %v7164_v56  ;;  %v7165_v63 = vmul.f32 %v12500_v15, %v7149_v33  ;;  %v7166_v43 = vmul.f32 %v12504_v48, %v7150_v58 }
 0x79c   :  { %v7195_v45 = vmul.f32 %v12483_v18, %v7179_v38  ;;  %v9095_v18 = vpop.eup %9094  ;;  %v7167_v5 = vmul.f32 %v12508_v7, %v7151_v60  ;;  %v7152_v24 = vadd.f32 -0.28449672, %v7136_v16  ;;  %v7105_v11 = vmul.f32 %v12523_v35, %v7089_v55 }
 0x79d   :  { %v7274_v22 = vmul.f32 %v9091_v10, %v7194_v21  ;;  %v7196_v25 = vmul.f32 %v12496_v14, %v7180_v19  ;;  %v7181_v8 = vadd.f32 0.2548296, %v7165_v63  ;;  %v9097_v26 = vpop.eup %9096  ;;  %v7182_v14 = vadd.f32 0.2548296, %v7166_v43 }
 0x79e   :  { %v7275_v32 = vmul.f32 %v9093_v57, %v7195_v45  ;;  %v9099_v20 = vpop.eup %9098  ;;  %v7183_v2 = vadd.f32 0.2548296, %v7167_v5  ;;  %v7168_v21 = vmul.f32 %v12514_v1, %v7152_v24  ;;  %v7121_v12 = vadd.f32 1.4214138, %v7105_v11 }
 0x79f   :  { %v7290_v53 = vsub.f32 1.0, %v7274_v22  ;;  %v7276_v49 = vmul.f32 %v9095_v18, %v7196_v25  ;;  %v7197_v39 = vmul.f32 %v12500_v15, %v7181_v8  ;;  %v9101_v34 = vpop.eup %9100  ;;  %v7198_v15 = vmul.f32 %v12504_v48, %v7182_v14 }
 0x7a0   :  { %v7291_v37 = vsub.f32 1.0, %v7275_v32  ;;  %v7199_v10 = vmul.f32 %v12508_v7, %v7183_v2  ;;  %v7184_v30 = vadd.f32 0.2548296, %v7168_v21  ;;  %v9103_v9 = vpop.eup %9102  ;;  %v7137_v7 = vmul.f32 %v12523_v35, %v7121_v12 }
 0x7a1   :  { %v7322_v0 = vsub.f32 0.0, %v7290_v53  ;;  %v7292_v6 = vsub.f32 1.0, %v7276_v49  ;;  %v7277_v38 = vmul.f32 %v9097_v26, %v7197_v39  ;;  %v7278_v36 = vmul.f32 %v9099_v20, %v7198_v15 }
 0x7a2   :  { %v7323_v23 = vsub.f32 0.0, %v7291_v37  ;;  %v7279_v48 = vmul.f32 %v9101_v34, %v7199_v10  ;;  %v7200_v28 = vmul.f32 %v12514_v1, %v7184_v30 }
 0x7a3   :  { %v7338_v51 = vsel %vm7306_vm10, %v7322_v0, %v7290_v53  ;;  %v7324_v33 = vsub.f32 0.0, %v7292_v6  ;;  %v7293_v40 = vsub.f32 1.0, %v7277_v38  ;;  %v7294_v63 = vsub.f32 1.0, %v7278_v36  ;;  %v13255_v38 = vld [vmem:[#allocation5_spill] sm:$0xff] }
 0x7a4   :  { %v7354_v13 = vadd.f32 1.0, %v7338_v51  ;;  %v7339_v4 = vsel %vm7307_vm11, %v7323_v23, %v7291_v37  ;;  %v7295_v58 = vsub.f32 1.0, %v7279_v48  ;;  %v7280_v55 = vmul.f32 %v9103_v9, %v7200_v28  ;;  %v8756_v51 = vpop.f32.mrf.mxu0 }
 0x7a5   :  { %v7355_v56 = vadd.f32 1.0, %v7339_v4  ;;  %v7340_v59 = vsel %vm7308_vm12, %v7324_v33, %v7292_v6  ;;  %v7325_v22 = vsub.f32 0.0, %v7293_v40  ;;  %v7326_v54 = vsub.f32 0.0, %v7294_v63 }
 0x7a6   :  { %v7370_v45 = vmul.f32 %v7354_v13, %v12487_v62  ;;  %v7356_v19 = vadd.f32 1.0, %v7340_v59  ;;  %v6957_v62 = vmul.f32 0.5, %v12431_v29  ;;  %v7327_v18 = vsub.f32 0.0, %v7295_v58  ;;  %v9105_v29 = vpop.eup %9104  ;;  %v7464_v6 = vpop.f32.mrf.mxu0 }
 0x7a7   :  { %v7371_v57 = vmul.f32 %v7355_v56, %v12491_v41  ;;  %v7341_v32 = vsel %vm7309_vm13, %v7325_v22, %v7293_v40  ;;  %v7153_v53 = vadd.f32 -0.28449672, %v7137_v7  ;;  %v7342_v25 = vsel %vm7310_vm4, %v7326_v54, %v7294_v63 }
 0x7a8   :  { %8766 = vmatprep.mubr.f32.mxu0 %v7370_v45  ;;  %v7372_v41 = vmul.f32 %v7356_v19, %v12494_v31  ;;  %v7357_v17 = vadd.f32 1.0, %v7341_v32  ;;  %v7296_v8 = vsub.f32 1.0, %v7280_v55  ;;  %v7358_v60 = vadd.f32 1.0, %v7342_v25  ;;  %v8759_v61 = vpop.f32.mrf.mxu0 }
 0x7a9   :  { %8767 = vmatmul.mubr.f32.gmra.mxu0 %v7371_v57  ;;  %v7343_v26 = vsel %vm7311_vm5, %v7327_v18, %v7295_v58  ;;  %v7169_v31 = vmul.f32 %v12523_v35, %v7153_v53  ;;  %v6959_v37 = vmul.f32 0.5, %v12456_v50  ;;  %v13256_v2 = vsub.s32 1, %v13255_v38 }
 0x7aa   :  { %8769 = vmatprep.mubr.f32.mxu0 %v7372_v41  ;;  %v7373_v1 = vmul.f32 %v7357_v17, %v6957_v62  ;;  %v7359_v43 = vadd.f32 1.0, %v7343_v26  ;;  %v7328_v52 = vsub.f32 0.0, %v7296_v8  ;;  %v7374_v16 = vmul.f32 %v7358_v60, %v6958_v47  ;;  %v7474_v44 = vpop.f32.mrf.mxu0  ;;  %v7734_v47 = vld [vmem:[#allocation2 + $0x1c0] sm:$0xff] }
 0x7ab   :  { %v7185_v20 = vadd.f32 0.2548296, %v7169_v31  ;;  %v9194_v26 = vmov 0.0   ;;  %v7733_v31 = vld [vmem:[#allocation2 + $0x1b8] sm:$0xff] }
 0x7ac   :  { %v7375_v0 = vmul.f32 %v7359_v43, %v6959_v37  ;;  %v7344_v49 = vsel %vm7312_vm6, %v7328_v52, %v7296_v8  ;;  %v8762_v21 = vpop.f32.mrf.mxu0  ;;  %8778 = vmatprep.subr.mxu1 %v9194_v26  ;;  %8810 = vmatprep.mubr.msk.f32.mxu1 %vm9195_vm8, %v9194_v26  ;;  %v7732_v52 = vld [vmem:[#allocation2 + $0x1b0] sm:$0xff] }
 0x7ad   :  { %8770 = vmatmul.mubr.f32.gmra.mxu0 %v7373_v1  ;;  %v7360_v39 = vadd.f32 1.0, %v7344_v49  ;;  %v7201_v3 = vmul.f32 %v12523_v35, %v7185_v20  ;;  %v12573_v35 = vld [vmem:[%s12975_s2 + $0x8] sm:$0xff]  ;;  %8779 = vmatpush3.msra.mxu1 %v7734_v47 }
 0x7ae   :  { %8772 = vmatprep.mubr.f32.mxu0 %v7374_v16  ;;  %v12578_v13 = vrot.slane %v12573_v35, %v13256_v2  ;;  %v7484_v40 = vpop.f32.mrf.mxu0  ;;  %8813 = vmatprep.subr.mxu0 %v9194_v26  ;;  %v7731_v20 = vld [vmem:[#allocation2 + $0x1a8] sm:$0xff]  ;;  %v7725_v2 = vld [vmem:[#allocation2 + $0x178] sm:$0xff] }
 0x7af   :  { %v7376_v5 = vmul.f32 %v7360_v39, %v6960_v42  ;;  %v7281_v23 = vmul.f32 %v9105_v29, %v7201_v3  ;;  %8780 = vmatprep.subr.mxu1 %v9194_v26  ;;  %v7730_v42 = vld [vmem:[#allocation2 + $0x1a0] sm:$0xff]  ;;  %v7729_v3 = vld [vmem:[#allocation2 + $0x198] sm:$0xff] }
 0x7b0   :  { %v7465_v4 = vadd.f32 %v7464_v6, %v12578_v13  ;;  %v7470_v46 = vadd.f32 %v8756_v51, %v12578_v13  ;;  %v7475_v15 = vadd.f32 %v7474_v44, %v12578_v13  ;;  %v7480_v10 = vadd.f32 %v8759_v61, %v12578_v13  ;;  %v8765_v30 = vpop.f32.mrf.mxu0  ;;  %8781 = vmatpush3.msra.mxu1 %v7733_v31  ;;  %v7726_v51 = vld [vmem:[#allocation2 + $0x180] sm:$0xff] }
 0x7b1   :  { %8773 = vmatmul.mubr.f32.gmra.mxu0 %v7375_v0  ;;  %v7297_v14 = vsub.f32 1.0, %v7281_v23  ;;  %v7485_v45 = vadd.f32 %v7484_v40, %v12578_v13  ;;  %v7490_v57 = vadd.f32 %v8762_v21, %v12578_v13  ;;  %v7500_v19 = vadd.f32 %v8765_v30, %v12578_v13  ;;  %8782 = vmatprep.subr.mxu1 %v9194_v26  ;;  %v7723_v40 = vld [vmem:[#allocation2 + $0x168] sm:$0xff]  ;;  %v7722_v30 = vld [vmem:[#allocation2 + $0x160] sm:$0xff] }
 0x7b2   :  { %8775 = vmatprep.mubr.f32.mxu0 %v7376_v5  ;;  %v7543_v56 = vadd.f32 %v7470_v46, %v7465_v4  ;;  %v7494_v9 = vpop.f32.mrf.mxu0  ;;  %8783 = vmatpush3.msra.mxu1 %v7732_v52 }
 0x7b3   :  { %v7329_v50 = vsub.f32 0.0, %v7297_v14  ;;  %v7495_v59 = vadd.f32 %v7494_v9, %v12578_v13  ;;  %8784 = vmatprep.subr.mxu1 %v9194_v26 }
 0x7b4   :  { %v7544_v33 = vadd.f32 %v7543_v56, %v7475_v15  ;;  %8785 = vmatpush3.msra.mxu1 %v7731_v20 }
 0x7b5   :  { %v7345_v24 = vsel %vm7313_vm7, %v7329_v50, %v7297_v14  ;;  %8786 = vmatprep.subr.mxu1 %v9194_v26  ;;  %v7728_v14 = vld [vmem:[#allocation2 + $0x190] sm:$0xff] }
 0x7b6   :  { %v7361_v11 = vadd.f32 1.0, %v7345_v24  ;;  %v7545_v36 = vadd.f32 %v7544_v33, %v7480_v10  ;;  %8787 = vmatpush3.msra.mxu1 %v7730_v42  ;;  %v7727_v24 = vld [vmem:[#allocation2 + $0x188] sm:$0xff] }
 0x7b7   :  { %8788 = vmatprep.subr.mxu1 %v9194_v26 }
 0x7b8   :  { %v7377_v34 = vmul.f32 %v7361_v11, %v6961_v27  ;;  %v7546_v12 = vadd.f32 %v7545_v36, %v7485_v45  ;;  %8789 = vmatpush3.msra.mxu1 %v7729_v3 }
 0x7b9   :  { %8790 = vmatprep.subr.mxu1 %v9194_v26 }
 0x7ba   :  { %8776 = vmatmul.mubr.f32.gmra.mxu0 %v7377_v34  ;;  %v7547_v22 = vadd.f32 %v7546_v12, %v7490_v57  ;;  %8791 = vmatpush3.msra.mxu1 %v7728_v14 }
 0x7bb   :  { %8845 = vmatprep.mubr.msk.f32.mxu0 %vm9195_vm8, %v9194_v26  ;;  %8792 = vmatprep.subr.mxu1 %v9194_v26 }
 0x7bc   :  { %v7548_v48 = vadd.f32 %v7547_v22, %v7495_v59  ;;  %8793 = vmatpush3.msra.mxu1 %v7727_v24 }
 0x7bd   :  { %8794 = vmatprep.subr.mxu1 %v9194_v26 }
 0x7be   :  { %v7549_v63 = vadd.f32 %v7548_v48, %v7500_v19  ;;  %8795 = vmatpush3.msra.mxu1 %v7726_v51  ;;  %v7720_v48 = vld [vmem:[#allocation2 + $0x150] sm:$0xff] }
 0x7bf   :  { %8796 = vmatprep.subr.mxu1 %v9194_v26 }
 0x7c0   :  { %v7550_v28 = vrot.slane %v7549_v63, 4  ;;  %8797 = vmatpush3.msra.mxu1 %v7725_v2 }
 0x7c1   :  { %8798 = vmatprep.subr.mxu1 %v9194_v26 }
 0x7c2   :  { %v7551_v7 = vadd.f32 %v7550_v28, %v7549_v63 }
 0x7c4   :  { %v7552_v62 = vrot.slane %v7551_v7, 2 }
 0x7c6   :  { %v7553_v32 = vadd.f32 %v7552_v62, %v7551_v7  ;;  %v7719_v7 = vld [vmem:[#allocation2 + $0x148] sm:$0xff]  ;;  %v12646_v62 = vld [vmem:[%s12976_s3 + $0xf8] sm:$0xff] }
 0x7c8   :  { %v7554_v58 = vrot.slane %v7553_v32, 1 }
 0x7ca   :  { %v7555_v41 = vadd.f32 %v7554_v58, %v7553_v32 }
 0x7cc   :  { %v7569_v17 = vmul.f32 0.015625, %v7555_v41 }
 0x7ce   :  { %v12588_v54 = vsub.f32 %v7465_v4, %v7569_v17  ;;  %v12590_v55 = vsub.f32 %v7470_v46, %v7569_v17  ;;  %v12596_v1 = vsub.f32 %v7475_v15, %v7569_v17  ;;  %v12598_v8 = vsub.f32 %v7480_v10, %v7569_v17  ;;  %v7724_v15 = vld [vmem:[#allocation2 + $0x170] sm:$0xff] }
 0x7cf   :  { %v12605_v37 = vsub.f32 %v7485_v45, %v7569_v17  ;;  %v12612_v0 = vsub.f32 %v7490_v57, %v7569_v17  ;;  %v12618_v5 = vsub.f32 %v7495_v59, %v7569_v17  ;;  %v12624_v11 = vsub.f32 %v7500_v19, %v7569_v17  ;;  %8799 = vmatpush3.msra.mxu1 %v7724_v15  ;;  %v7721_v59 = vld [vmem:[#allocation2 + $0x158] sm:$0xff] }
 0x7d0   :  { %v7587_v18 = vmul.f32 %v12588_v54, %v12588_v54  ;;  %v7588_v53 = vmul.f32 %v12590_v55, %v12590_v55  ;;  %v7589_v29 = vmul.f32 %v12596_v1, %v12596_v1  ;;  %v7590_v43 = vmul.f32 %v12598_v8, %v12598_v8  ;;  %8800 = vmatprep.subr.mxu1 %v9194_v26 }
 0x7d1   :  { %v7591_v49 = vmul.f32 %v12605_v37, %v12605_v37  ;;  %v7592_v23 = vmul.f32 %v12612_v0, %v12612_v0  ;;  %v7593_v34 = vmul.f32 %v12618_v5, %v12618_v5  ;;  %v7594_v4 = vmul.f32 %v12624_v11, %v12624_v11  ;;  %8801 = vmatpush3.msra.mxu1 %v7723_v40 }
 0x7d2   :  { %v7603_v25 = vadd.f32 %v7588_v53, %v7587_v18  ;;  %8802 = vmatprep.subr.mxu1 %v9194_v26 }
 0x7d3   :  { %8803 = vmatpush3.msra.mxu1 %v7722_v30 }
 0x7d4   :  { %v7604_v60 = vadd.f32 %v7603_v25, %v7589_v29  ;;  %8804 = vmatprep.subr.mxu1 %v9194_v26 }
 0x7d5   :  { %8805 = vmatpush3.msra.mxu1 %v7721_v59  ;;  %v13257_v59 = vsub.s32 2, %v13255_v38 }
 0x7d6   :  { %v7605_v16 = vadd.f32 %v7604_v60, %v7590_v43  ;;  %8806 = vmatprep.subr.mxu1 %v9194_v26 }
 0x7d7   :  { %8807 = vmatpush3.msra.mxu1 %v7720_v48 }
 0x7d8   :  { %v7606_v39 = vadd.f32 %v7605_v16, %v7591_v49  ;;  %8808 = vmatprep.subr.mxu1 %v9194_v26 }
 0x7d9   :  { %8809 = vmatpush3.msra.mxu1 %v7719_v7  ;;  %v13258_v7 = vsub.s32 3, %v13255_v38 }
 0x7da   :  { %v7607_v50 = vadd.f32 %v7606_v39, %v7592_v23  ;;  %8848 = vmatprep.subr.mxu1 %v12646_v62 }
 0x7dc   :  { %v7608_v61 = vadd.f32 %v7607_v50, %v7593_v34 }
 0x7de   :  { %v7609_v56 = vadd.f32 %v7608_v61, %v7594_v4 }
 0x7e0   :  { %v7610_v9 = vrot.slane %v7609_v56, 4 }
 0x7e2   :  { %v7611_v28 = vadd.f32 %v7610_v9, %v7609_v56 }
 0x7e4   :  { %v7612_v58 = vrot.slane %v7611_v28, 2 }
 0x7e6   :  { %v7613_v53 = vadd.f32 %v7612_v58, %v7611_v28 }
 0x7e8   :  { %v7614_v31 = vrot.slane %v7613_v53, 1 }
 0x7ea   :  { %v7615_v16 = vadd.f32 %v7614_v31, %v7613_v53 }
 0x7ec   :  { %v7629_v42 = vmul.f32 0.015625, %v7615_v16 }
 0x7ee   :  { %v7631_v23 = vadd.f32 1e-05, %v7629_v42 }
 0x7f0   :  { %9106 = vrsqrt.f32 %v7631_v23 }
 0x869   :  { %v8768_v27 = vpop.f32.mrf.mxu0 }
 0x86a   :  { %v7510_v21 = vadd.f32 %v8768_v27, %v12578_v13 }
 0x86b   :  { %v7504_v6 = vpop.f32.mrf.mxu0 }
 0x86c   :  { %v7505_v44 = vadd.f32 %v7504_v6, %v12578_v13 }
 0x86d   :  { %v8771_v46 = vpop.f32.mrf.mxu0 }
 0x86e   :  { %v7556_v10 = vadd.f32 %v7510_v21, %v7505_v44  ;;  %v7520_v22 = vadd.f32 %v8771_v46, %v12578_v13 }
 0x86f   :  { %v7514_v33 = vpop.f32.mrf.mxu0 }
 0x870   :  { %v7515_v45 = vadd.f32 %v7514_v33, %v12578_v13 }
 0x871   :  { %v8774_v36 = vpop.f32.mrf.mxu0 }
 0x872   :  { %v7557_v12 = vadd.f32 %v7556_v10, %v7515_v45  ;;  %v7530_v41 = vadd.f32 %v8774_v36, %v12578_v13  ;;  %v9107_v36 = vpop.eup %9106 }
 0x873   :  { %v7524_v57 = vpop.f32.mrf.mxu0  ;;  %v7635_v48 = vmul.f32 %v9107_v36, %v12588_v54 }
 0x874   :  { %v7525_v19 = vadd.f32 %v7524_v57, %v12578_v13  ;;  %v7558_v63 = vadd.f32 %v7557_v12, %v7520_v22 }
 0x876   :  { %v7559_v32 = vadd.f32 %v7558_v63, %v7525_v19 }
 0x878   :  { %v7560_v18 = vadd.f32 %v7559_v32, %v7530_v41  ;;  %v12695_v32 = vrot.slane %v12573_v35, %v13258_v7 }
 0x87a   :  { %v8777_v17 = vpop.f32.mrf.mxu0 }
 0x87b   :  { %v7540_v47 = vadd.f32 %v8777_v17, %v12578_v13 }
 0x87c   :  { %v7534_v25 = vpop.f32.mrf.mxu0 }
 0x87d   :  { %v7535_v29 = vadd.f32 %v7534_v25, %v12578_v13 }
 0x87f   :  { %v7561_v60 = vadd.f32 %v7560_v18, %v7535_v29  ;;  %v7637_v18 = vmul.f32 %v9107_v36, %v12596_v1 }
 0x881   :  { %v7562_v43 = vadd.f32 %v7561_v60, %v7540_v47 }
 0x883   :  { %v7563_v52 = vrot.slane %v7562_v43, 4 }
 0x885   :  { %v7564_v20 = vadd.f32 %v7563_v52, %v7562_v43  ;;  %v7639_v52 = vmul.f32 %v9107_v36, %v12605_v37  ;;  %v7641_v37 = vmul.f32 %v9107_v36, %v12618_v5 }
 0x887   :  { %v7565_v49 = vrot.slane %v7564_v20, 2 }
 0x889   :  { %v7566_v39 = vadd.f32 %v7565_v49, %v7564_v20 }
 0x88b   :  { %v7567_v3 = vrot.slane %v7566_v39, 1 }
 0x88d   :  { %v7568_v14 = vadd.f32 %v7567_v3, %v7566_v39 }
 0x88f   :  { %v7570_v50 = vmul.f32 0.015625, %v7568_v14 }
 0x891   :  { %v12653_v24 = vsub.f32 %v7505_v44, %v7570_v50  ;;  %v12655_v27 = vsub.f32 %v7510_v21, %v7570_v50  ;;  %v12657_v34 = vsub.f32 %v7515_v45, %v7570_v50  ;;  %v12659_v13 = vsub.f32 %v7520_v22, %v7570_v50 }
 0x892   :  { %v12665_v61 = vsub.f32 %v7525_v19, %v7570_v50  ;;  %v12669_v44 = vsub.f32 %v7530_v41, %v7570_v50  ;;  %v12673_v21 = vsub.f32 %v7535_v29, %v7570_v50  ;;  %v12677_v40 = vsub.f32 %v7540_v47, %v7570_v50 }
 0x893   :  { %v7595_v51 = vmul.f32 %v12653_v24, %v12653_v24  ;;  %v7596_v6 = vmul.f32 %v12655_v27, %v12655_v27  ;;  %v7597_v2 = vmul.f32 %v12657_v34, %v12657_v34  ;;  %v7598_v46 = vmul.f32 %v12659_v13, %v12659_v13 }
 0x894   :  { %v7599_v56 = vmul.f32 %v12665_v61, %v12665_v61  ;;  %v7600_v10 = vmul.f32 %v12669_v44, %v12669_v44  ;;  %v7601_v30 = vmul.f32 %v12673_v21, %v12673_v21  ;;  %v7602_v9 = vmul.f32 %v12677_v40, %v12677_v40 }
 0x895   :  { %v7616_v4 = vadd.f32 %v7596_v6, %v7595_v51  ;;  %v12688_v22 = vrot.slane %v12573_v35, %v13257_v59  ;;  %v7636_v19 = vmul.f32 %v9107_v36, %v12590_v55  ;;  %v7638_v29 = vmul.f32 %v9107_v36, %v12598_v8 }
 0x896   :  { %v7640_v8 = vmul.f32 %v9107_v36, %v12612_v0  ;;  %v7642_v6 = vmul.f32 %v9107_v36, %v12624_v11 }
 0x897   :  { %v7617_v15 = vadd.f32 %v7616_v4, %v7597_v2  ;;  %v7655_v58 = vmul.f32 %v12688_v22, %v7635_v48  ;;  %v7656_v41 = vmul.f32 %v12688_v22, %v7636_v19  ;;  %v7657_v47 = vmul.f32 %v12688_v22, %v7637_v18 }
 0x898   :  { %v7658_v1 = vmul.f32 %v12688_v22, %v7638_v29  ;;  %v7659_v39 = vmul.f32 %v12688_v22, %v7639_v52  ;;  %v7660_v14 = vmul.f32 %v12688_v22, %v7640_v8  ;;  %v7661_v0 = vmul.f32 %v12688_v22, %v7641_v37 }
 0x899   :  { %v7618_v33 = vadd.f32 %v7617_v15, %v7598_v46  ;;  %v12701_v25 = vadd.f32 %v12695_v32, %v7655_v58  ;;  %v12704_v54 = vadd.f32 %v12695_v32, %v7656_v41  ;;  %v12713_v16 = vadd.f32 %v12695_v32, %v7657_v47 }
 0x89a   :  { %v12719_v3 = vadd.f32 %v12695_v32, %v7658_v1  ;;  %v12725_v50 = vadd.f32 %v12695_v32, %v7659_v39  ;;  %v12731_v2 = vadd.f32 %v12695_v32, %v7660_v14  ;;  %v7662_v46 = vmul.f32 %v12688_v22, %v7642_v6 }
 0x89b   :  { %v7619_v45 = vadd.f32 %v7618_v33, %v7599_v56  ;;  %v7691_v31 = vadd.f32 %v12704_v54, %v12701_v25  ;;  %v12736_v5 = vadd.f32 %v12695_v32, %v7661_v0 }
 0x89c   :  { %v12744_v36 = vadd.f32 %v12695_v32, %v7662_v46  ;;  %v8015_v46 = vld [vmem:[%s12976_s3 + $0xe8] sm:$0xff] }
 0x89d   :  { %v7620_v12 = vadd.f32 %v7619_v45, %v7600_v10  ;;  %v7692_v49 = vadd.f32 %v7691_v31, %v12713_v16 }
 0x89f   :  { %v7621_v57 = vadd.f32 %v7620_v12, %v7601_v30  ;;  %v7693_v23 = vadd.f32 %v7692_v49, %v12719_v3 }
 0x8a1   :  { %v7622_v63 = vadd.f32 %v7621_v57, %v7602_v9  ;;  %v7694_v51 = vadd.f32 %v7693_v23, %v12725_v50 }
 0x8a3   :  { %v7623_v28 = vrot.slane %v7622_v63, 4  ;;  %v7695_v4 = vadd.f32 %v7694_v51, %v12731_v2 }
 0x8a5   :  { %v7624_v17 = vadd.f32 %v7623_v28, %v7622_v63  ;;  %v7696_v56 = vadd.f32 %v7695_v4, %v12736_v5  ;;  %v13259_v4 = vld [vmem:[#allocation7_spill] sm:$0xff] }
 0x8a7   :  { %v7625_v53 = vrot.slane %v7624_v17, 2  ;;  %v7697_v59 = vadd.f32 %v7696_v56, %v12744_v36  ;;  %v8013_v56 = vld [vmem:[%s12976_s3 + $0xd8] sm:$0xff] }
 0x8a9   :  { %v7626_v55 = vadd.f32 %v7625_v53, %v7624_v17  ;;  %v7698_v28 = vrot.slane %v7697_v59, 4 }
 0x8ab   :  { %v7627_v60 = vrot.slane %v7626_v55, 1  ;;  %v7699_v53 = vadd.f32 %v7698_v28, %v7697_v59  ;;  %v8003_v59 = vld [vmem:[%s12976_s3 + $0x88] sm:$0xff]  ;;  %v13264_v28 = vld [vmem:[#allocation12_spill] sm:$0xff] }
 0x8ad   :  { %v7628_v43 = vadd.f32 %v7627_v60, %v7626_v55  ;;  %v7700_v52 = vrot.slane %v7699_v53, 2 }
 0x8af   :  { %v7630_v20 = vmul.f32 0.015625, %v7628_v43 }
 0x8b1   :  { %v7632_v42 = vadd.f32 1e-05, %v7630_v20 }
 0x8b3   :  { %9108 = vrsqrt.f32 %v7632_v42 }
 0x8c0   :  { %v9109_v15 = vpop.eup %9108 }
 0x8c1   :  { %v7643_v33 = vmul.f32 %v9109_v15, %v12653_v24  ;;  %v7644_v10 = vmul.f32 %v9109_v15, %v12655_v27  ;;  %v7645_v11 = vmul.f32 %v9109_v15, %v12657_v34  ;;  %v7646_v45 = vmul.f32 %v9109_v15, %v12659_v13 }
 0x8c2   :  { %v7647_v30 = vmul.f32 %v9109_v15, %v12665_v61  ;;  %v7648_v24 = vmul.f32 %v9109_v15, %v12669_v44  ;;  %v7649_v61 = vmul.f32 %v9109_v15, %v12673_v21  ;;  %v7650_v44 = vmul.f32 %v9109_v15, %v12677_v40  ;;  %v8014_v15 = vld [vmem:[%s12976_s3 + $0xe0] sm:$0xff] }
 0x8c3   :  { %v7663_v12 = vmul.f32 %v12688_v22, %v7643_v33  ;;  %v7664_v9 = vmul.f32 %v12688_v22, %v7644_v10  ;;  %v7665_v57 = vmul.f32 %v12688_v22, %v7645_v11  ;;  %v7666_v27 = vmul.f32 %v12688_v22, %v7646_v45  ;;  %v8011_v33 = vld [vmem:[%s12976_s3 + $0xc8] sm:$0xff]  ;;  %v8010_v10 = vld [vmem:[%s12976_s3 + $0xc0] sm:$0xff]  ;;  %v8009_v11 = vld [vmem:[%s12976_s3 + $0xb8] sm:$0xff] }
 0x8c4   :  { %v7667_v48 = vmul.f32 %v12688_v22, %v7647_v30  ;;  %v7668_v7 = vmul.f32 %v12688_v22, %v7648_v24  ;;  %v7669_v21 = vmul.f32 %v12688_v22, %v7649_v61  ;;  %v7670_v55 = vmul.f32 %v12688_v22, %v7650_v44  ;;  %v8008_v45 = vld [vmem:[%s12976_s3 + $0xb0] sm:$0xff]  ;;  %v8007_v30 = vld [vmem:[%s12976_s3 + $0xa8] sm:$0xff]  ;;  %v8002_v24 = vld [vmem:[%s12976_s3 + $0x80] sm:$0xff] }
 0x8c5   :  { %v12754_v34 = vadd.f32 %v12695_v32, %v7663_v12  ;;  %v12757_v13 = vadd.f32 %v12695_v32, %v7664_v9  ;;  %v12762_v19 = vadd.f32 %v12695_v32, %v7665_v57  ;;  %v12769_v58 = vadd.f32 %v12695_v32, %v7666_v27  ;;  %v8006_v12 = vld [vmem:[%s12976_s3 + $0xa0] sm:$0xff]  ;;  %v8005_v9 = vld [vmem:[%s12976_s3 + $0x98] sm:$0xff]  ;;  %v8004_v57 = vld [vmem:[%s12976_s3 + $0x90] sm:$0xff] }
 0x8c6   :  { %v12774_v17 = vadd.f32 %v12695_v32, %v7667_v48  ;;  %v12779_v29 = vadd.f32 %v12695_v32, %v7668_v7  ;;  %v12783_v47 = vadd.f32 %v12695_v32, %v7669_v21  ;;  %v12787_v31 = vadd.f32 %v12695_v32, %v7670_v55  ;;  %v8016_v32 = vld [vmem:[%s12976_s3 + $0xf0] sm:$0xff]  ;;  %v13260_v27 = vld [vmem:[#allocation8_spill] sm:$0xff]  ;;  %v13261_v61 = vld [vmem:[#allocation9_spill] sm:$0xff] }
 0x8c7   :  { %v7704_v63 = vadd.f32 %v12757_v13, %v12754_v34  ;;  %v7701_v22 = vadd.f32 %v7700_v52, %v7699_v53  ;;  %v13262_v48 = vld [vmem:[#allocation10_spill] sm:$0xff]  ;;  %v13265_v44 = vld [vmem:[#allocation13_spill] sm:$0xff]  ;;  %v13268_v21 = vld [vmem:[#allocation16_spill] sm:$0xff] }
 0x8c8   :  { %v13266_v7 = vld [vmem:[#allocation14_spill] sm:$0xff]  ;;  %v13271_v55 = vld [vmem:[#allocation19_spill] sm:$0xff]  ;;  %v7856_v52 = vld [vmem:[#allocation2 + $0x240] sm:$0xff] }
 0x8c9   :  { %v7705_v41 = vadd.f32 %v7704_v63, %v12762_v19  ;;  %v7702_v42 = vrot.slane %v7701_v22, 1  ;;  %v13263_v63 = vld [vmem:[#allocation11_spill] sm:$0xff]  ;;  %v13270_v53 = vld [vmem:[#allocation18_spill] sm:$0xff]  ;;  %8814 = vmatpush3.msra.mxu0 %v7856_v52 }
 0x8ca   :  { %8815 = vmatprep.subr.mxu0 %v9194_v26  ;;  %v8001_v52 = vld [vmem:[%s12976_s3 + $0x78] sm:$0xff] }
 0x8cb   :  { %v7706_v18 = vadd.f32 %v7705_v41, %v12769_v58  ;;  %v7703_v23 = vadd.f32 %v7702_v42, %v7701_v22  ;;  %v13267_v41 = vld [vmem:[#allocation15_spill] sm:$0xff]  ;;  %v7853_v22 = vld [vmem:[#allocation2 + $0x228] sm:$0xff] }
 0x8cc   :  { %v7851_v42 = vld [vmem:[#allocation2 + $0x218] sm:$0xff] }
 0x8cd   :  { %v7707_v40 = vadd.f32 %v7706_v18, %v12774_v17  ;;  %v7717_v51 = vmul.f32 0.015625, %v7703_v23  ;;  %v13269_v18 = vld [vmem:[#allocation17_spill] sm:$0xff]  ;;  %v7848_v23 = vld [vmem:[#allocation2 + $0x200] sm:$0xff] }
 0x8cf   :  { %v7708_v60 = vadd.f32 %v7707_v40, %v12779_v29  ;;  %v13272_v40 = vld [vmem:[#allocation20_spill] sm:$0xff] }
 0x8d1   :  { %v7709_v43 = vadd.f32 %v7708_v60, %v12783_v47  ;;  %v13273_v60 = vld [vmem:[#allocation21_spill] sm:$0xff] }
 0x8d3   :  { %v7710_v1 = vadd.f32 %v7709_v43, %v12787_v31  ;;  %v13274_v43 = vld [vmem:[#allocation22_spill] sm:$0xff] }
 0x8d5   :  { %v7711_v20 = vrot.slane %v7710_v1, 4 }
 0x8d7   :  { %v7712_v49 = vadd.f32 %v7711_v20, %v7710_v1  ;;  %v7855_v1 = vld [vmem:[#allocation2 + $0x238] sm:$0xff]  ;;  %v7854_v20 = vld [vmem:[#allocation2 + $0x230] sm:$0xff] }
 0x8d8   :  { %8816 = vmatpush3.msra.mxu0 %v7855_v1  ;;  %v8000_v1 = vld [vmem:[%s12976_s3 + $0x70] sm:$0xff] }
 0x8d9   :  { %v7713_v8 = vrot.slane %v7712_v49, 2  ;;  %8817 = vmatprep.subr.mxu0 %v9194_v26 }
 0x8da   :  { %8818 = vmatpush3.msra.mxu0 %v7854_v20  ;;  %v7999_v20 = vld [vmem:[%s12976_s3 + $0x68] sm:$0xff] }
 0x8db   :  { %v7714_v39 = vadd.f32 %v7713_v8, %v7712_v49  ;;  %8819 = vmatprep.subr.mxu0 %v9194_v26  ;;  %v7852_v49 = vld [vmem:[#allocation2 + $0x220] sm:$0xff]  ;;  %v7850_v8 = vld [vmem:[#allocation2 + $0x210] sm:$0xff] }
 0x8dc   :  { %8820 = vmatpush3.msra.mxu0 %v7853_v22  ;;  %v7998_v22 = vld [vmem:[%s12976_s3 + $0x60] sm:$0xff] }
 0x8dd   :  { %v7715_v37 = vrot.slane %v7714_v39, 1  ;;  %8821 = vmatprep.subr.mxu0 %v9194_v26 }
 0x8de   :  { %8822 = vmatpush3.msra.mxu0 %v7852_v49  ;;  %v7997_v49 = vld [vmem:[%s12976_s3 + $0x58] sm:$0xff] }
 0x8df   :  { %v7716_v14 = vadd.f32 %v7715_v37, %v7714_v39  ;;  %8823 = vmatprep.subr.mxu0 %v9194_v26  ;;  %v7849_v39 = vld [vmem:[#allocation2 + $0x208] sm:$0xff]  ;;  %v7847_v37 = vld [vmem:[#allocation2 + $0x1f8] sm:$0xff] }
 0x8e0   :  { %8824 = vmatpush3.msra.mxu0 %v7851_v42  ;;  %v7996_v42 = vld [vmem:[%s12976_s3 + $0x50] sm:$0xff] }
 0x8e1   :  { %v7718_v6 = vmul.f32 0.015625, %v7716_v14  ;;  %8825 = vmatprep.subr.mxu0 %v9194_v26  ;;  %v7846_v14 = vld [vmem:[#allocation2 + $0x1f0] sm:$0xff] }
 0x8e2   :  { %8826 = vmatpush3.msra.mxu0 %v7850_v8  ;;  %v7995_v8 = vld [vmem:[%s12976_s3 + $0x48] sm:$0xff] }
 0x8e3   :  { %v7742_v0 = vsel %vm7741_vm9, %v7718_v6, %v7717_v51  ;;  %8827 = vmatprep.subr.mxu0 %v9194_v26  ;;  %v7845_v51 = vld [vmem:[#allocation2 + $0x1e8] sm:$0xff]  ;;  %v7844_v6 = vld [vmem:[#allocation2 + $0x1e0] sm:$0xff] }
 0x8e4   :  { %8811 = vmatmul.mubr.f32.vlgmr.msra.gmra.mxu1 %v7742_v0  ;;  %8828 = vmatpush3.msra.mxu0 %v7849_v39  ;;  %v7843_v0 = vld [vmem:[#allocation2 + $0x1d8] sm:$0xff]  ;;  %v7994_v39 = vld [vmem:[%s12976_s3 + $0x40] sm:$0xff] }
 0x8e5   :  { %8849 = vmatpush3.msra.mxu1 %v12646_v62  ;;  %8880 = vmatprep.mubr.f32.mxu1 %v13259_v4  ;;  %v8012_v62 = vld [vmem:[%s12976_s3 + $0xd0] sm:$0xff]  ;;  %v7841_v4 = vld [vmem:[#allocation2 + $0x1c8] sm:$0xff] }
 0x8e6   :  { %8850 = vmatprep.subr.mxu1 %v8016_v32  ;;  %8829 = vmatprep.subr.mxu0 %v9194_v26 }
 0x8e7   :  { %8851 = vmatpush3.msra.mxu1 %v8016_v32  ;;  %8830 = vmatpush3.msra.mxu0 %v7848_v23  ;;  %v7842_v32 = vld [vmem:[#allocation2 + $0x1d0] sm:$0xff]  ;;  %v7993_v23 = vld [vmem:[%s12976_s3 + $0x38] sm:$0xff] }
 0x8e8   :  { %8852 = vmatprep.subr.mxu1 %v8015_v46  ;;  %8831 = vmatprep.subr.mxu0 %v9194_v26 }
 0x8e9   :  { %8853 = vmatpush3.msra.mxu1 %v8015_v46  ;;  %8832 = vmatpush3.msra.mxu0 %v7847_v37  ;;  %v13275_v46 = vsub.s32 4, %v13255_v38  ;;  %v7992_v37 = vld [vmem:[%s12976_s3 + $0x30] sm:$0xff] }
 0x8ea   :  { %8854 = vmatprep.subr.mxu1 %v8014_v15  ;;  %8833 = vmatprep.subr.mxu0 %v9194_v26 }
 0x8eb   :  { %8855 = vmatpush3.msra.mxu1 %v8014_v15  ;;  %8834 = vmatpush3.msra.mxu0 %v7846_v14  ;;  %v7738_v15 = vrot.slane %v12573_v35, %v13275_v46  ;;  %v7991_v14 = vld [vmem:[%s12976_s3 + $0x28] sm:$0xff]  ;;  %v13276_v46 = vsub.s32 5, %v13255_v38 }
 0x8ec   :  { %8856 = vmatprep.subr.mxu1 %v8013_v56  ;;  %8835 = vmatprep.subr.mxu0 %v9194_v26 }
 0x8ed   :  { %8857 = vmatpush3.msra.mxu1 %v8013_v56  ;;  %8836 = vmatpush3.msra.mxu0 %v7845_v51  ;;  %v7990_v51 = vld [vmem:[%s12976_s3 + $0x20] sm:$0xff] }
 0x8ee   :  { %8858 = vmatprep.subr.mxu1 %v8012_v62  ;;  %8837 = vmatprep.subr.mxu0 %v9194_v26 }
 0x8ef   :  { %8859 = vmatpush3.msra.mxu1 %v8012_v62  ;;  %8838 = vmatpush3.msra.mxu0 %v7844_v6  ;;  %v7989_v6 = vld [vmem:[%s12976_s3 + $0x18] sm:$0xff] }
 0x8f0   :  { %8860 = vmatprep.subr.mxu1 %v8011_v33  ;;  %8839 = vmatprep.subr.mxu0 %v9194_v26 }
 0x8f1   :  { %8861 = vmatpush3.msra.mxu1 %v8011_v33  ;;  %8840 = vmatpush3.msra.mxu0 %v7843_v0  ;;  %v7988_v0 = vld [vmem:[%s12976_s3 + $0x10] sm:$0xff] }
 0x8f2   :  { %8862 = vmatprep.subr.mxu1 %v8010_v10  ;;  %8841 = vmatprep.subr.mxu0 %v9194_v26 }
 0x8f3   :  { %8863 = vmatpush3.msra.mxu1 %v8010_v10  ;;  %8842 = vmatpush3.msra.mxu0 %v7842_v32  ;;  %v7987_v32 = vld [vmem:[%s12976_s3 + $0x8] sm:$0xff] }
 0x8f4   :  { %8864 = vmatprep.subr.mxu1 %v8009_v11  ;;  %8843 = vmatprep.subr.mxu0 %v9194_v26 }
 0x8f5   :  { %8865 = vmatpush3.msra.mxu1 %v8009_v11  ;;  %8844 = vmatpush3.msra.mxu0 %v7841_v4  ;;  %v7986_v4 = vld [vmem:[%s12976_s3] sm:$0xff] }
 0x8f6   :  { %8866 = vmatprep.subr.mxu1 %v8008_v45  ;;  %8904 = vmatprep.subr.mxu0 %v8001_v52 }
 0x8f7   :  { %8867 = vmatpush3.msra.mxu1 %v8008_v45 }
 0x8f8   :  { %8868 = vmatprep.subr.mxu1 %v8007_v30 }
 0x8f9   :  { %8869 = vmatpush3.msra.mxu1 %v8007_v30 }
 0x8fa   :  { %8870 = vmatprep.subr.mxu1 %v8006_v12 }
 0x8fb   :  { %8871 = vmatpush3.msra.mxu1 %v8006_v12 }
 0x8fc   :  { %8872 = vmatprep.subr.mxu1 %v8005_v9 }
 0x8fd   :  { %8873 = vmatpush3.msra.mxu1 %v8005_v9 }
 0x8fe   :  { %8874 = vmatprep.subr.mxu1 %v8004_v57 }
 0x8ff   :  { %8875 = vmatpush3.msra.mxu1 %v8004_v57 }
 0x900   :  { %8876 = vmatprep.subr.mxu1 %v8003_v59 }
 0x901   :  { %8877 = vmatpush3.msra.mxu1 %v8003_v59 }
 0x902   :  { %8878 = vmatprep.subr.mxu1 %v8002_v24 }
 0x903   :  { %8879 = vmatpush3.msra.mxu1 %v8002_v24 }
 0x904   :  { %8881 = vmatmul.mubr.f32.vlgmr.msra.gmra.mxu1 %v13260_v27 }
 0x905   :  { %8883 = vmatprep.mubr.f32.mxu1 %v13261_v61 }
 0x908   :  { %8884 = vmatmul.mubr.f32.gmra.mxu1 %v13262_v48 }
 0x909   :  { %8886 = vmatprep.mubr.f32.mxu1 %v13263_v63 }
 0x90c   :  { %8887 = vmatmul.mubr.f32.gmra.mxu1 %v13264_v28 }
 0x90d   :  { %8889 = vmatprep.mubr.f32.mxu1 %v13265_v44 }
 0x910   :  { %8890 = vmatmul.mubr.f32.gmra.mxu1 %v13266_v7 }
 0x911   :  { %8892 = vmatprep.mubr.f32.mxu1 %v13267_v41 }
 0x914   :  { %8893 = vmatmul.mubr.f32.gmra.mxu1 %v13268_v21 }
 0x915   :  { %8895 = vmatprep.mubr.f32.mxu1 %v13269_v18 }
 0x918   :  { %8896 = vmatmul.mubr.f32.gmra.mxu1 %v13270_v53 }
 0x919   :  { %8898 = vmatprep.mubr.f32.mxu1 %v13271_v55 }
 0x91c   :  { %8899 = vmatmul.mubr.f32.gmra.mxu1 %v13272_v40 }
 0x91d   :  { %8901 = vmatprep.mubr.f32.mxu1 %v13273_v60 }
 0x920   :  { %8902 = vmatmul.mubr.f32.gmra.mxu1 %v13274_v43 }
 0x9a4   :  { %v7810_v56 = vpop.f32.mrf.mxu1 }
 0x9a5   :  { %v7811_v62 = vadd.f32 %v7810_v56, %v7738_v15  ;;  %v7860_v15 = vrot.slane %v12573_v35, %v13276_v46 }
 0x9a6   :  { %v8812_v33 = vpop.f32.mrf.mxu1 }
 0x9a7   :  { %v7815_v10 = vmul.f32 0.70710677, %v7811_v62  ;;  %v7814_v40 = vmul.f32 0.5, %v7811_v62 }
 0x9a9   :  { %v7816_v11 = vand.u32 2147483647, %v7815_v10  ;;  %vm7836_vm14 = vcmp.lt.f32.partialorder %v7815_v10, 0.0 }
 0x9ab   :  { %v7817_v45 = vmul.f32 0.3275911, %v7816_v11  ;;  %v7830_v12 = vsub.f32 0.0, %v7816_v11 }
 0x9ad   :  { %v7818_v30 = vadd.f32 1.0, %v7817_v45  ;;  %v7831_v9 = vmul.f32 %v7830_v12, %v7816_v11  ;;  %v9196_v12 = vmov 1966171168  }
 0x9af   :  { %9110 = vrcp.f32 %v7818_v30  ;;  %v7832_v24 = vmul.f32 1.442695, %v7831_v9  ;;  %v7939_v9 = vunpack.c.l.s4 %v9196_v12 }
 0x9b1   :  { %9112 = vpow2.f32 %v7832_v24 }
 0x9bc   :  { %v9111_v57 = vpop.eup %9110 }
 0x9bd   :  { %v7821_v59 = vmul.f32 1.0614054, %v9111_v57 }
 0x9be   :  { %v9113_v41 = vpop.eup %9112 }
 0x9bf   :  { %v7822_v27 = vadd.f32 -1.4531521, %v7821_v59 }
 0x9c1   :  { %v7823_v26 = vmul.f32 %v9111_v57, %v7822_v27 }
 0x9c3   :  { %v7824_v61 = vadd.f32 1.4214138, %v7823_v26 }
 0x9c5   :  { %v7825_v48 = vmul.f32 %v9111_v57, %v7824_v61  ;;  %v13277_v61 = vld [vmem:[#allocation6_spill] sm:$0xff] }
 0x9c7   :  { %v7826_v63 = vadd.f32 -0.28449672, %v7825_v48 }
 0x9c9   :  { %v7827_v28 = vmul.f32 %v9111_v57, %v7826_v63 }
 0x9cb   :  { %v7828_v44 = vadd.f32 0.2548296, %v7827_v28 }
 0x9cd   :  { %v7829_v7 = vmul.f32 %v9111_v57, %v7828_v44  ;;  %v7940_v57 = vunpack.c.0.s8 %v7939_v9 }
 0x9cf   :  { %v7834_v21 = vmul.f32 %v9113_v41, %v7829_v7  ;;  %v7943_v59 = vsub.s32 %v7940_v57, %v13255_v38 }
 0x9d1   :  { %v7835_v18 = vsub.f32 1.0, %v7834_v21 }
 0x9d3   :  { %v7837_v53 = vsub.f32 0.0, %v7835_v18 }
 0x9d5   :  { %v7838_v55 = vsel %vm7836_vm14, %v7837_v53, %v7835_v18 }
 0x9d6   :  { %v7839_v60 = vadd.f32 1.0, %v7838_v55 }
 0x9d8   :  { %v7840_v43 = vmul.f32 %v7839_v60, %v7814_v40 }
 0x9da   :  { %8846 = vmatmul.mubr.f32.vlgmr.msra.gmra.mxu0 %v7840_v43 }
 0x9db   :  { %8905 = vmatpush3.msra.mxu0 %v8001_v52 }
 0x9dc   :  { %8906 = vmatprep.subr.mxu0 %v8000_v1 }
 0x9dd   :  { %8907 = vmatpush3.msra.mxu0 %v8000_v1 }
 0x9de   :  { %8908 = vmatprep.subr.mxu0 %v7999_v20 }
 0x9df   :  { %8909 = vmatpush3.msra.mxu0 %v7999_v20 }
 0x9e0   :  { %8910 = vmatprep.subr.mxu0 %v7998_v22 }
 0x9e1   :  { %8911 = vmatpush3.msra.mxu0 %v7998_v22 }
 0x9e2   :  { %8912 = vmatprep.subr.mxu0 %v7997_v49 }
 0x9e3   :  { %8913 = vmatpush3.msra.mxu0 %v7997_v49 }
 0x9e4   :  { %8914 = vmatprep.subr.mxu0 %v7996_v42 }
 0x9e5   :  { %8915 = vmatpush3.msra.mxu0 %v7996_v42 }
 0x9e6   :  { %8916 = vmatprep.subr.mxu0 %v7995_v8 }
 0x9e7   :  { %8917 = vmatpush3.msra.mxu0 %v7995_v8 }
 0x9e8   :  { %8918 = vmatprep.subr.mxu0 %v7994_v39 }
 0x9e9   :  { %8919 = vmatpush3.msra.mxu0 %v7994_v39 }
 0x9ea   :  { %8920 = vmatprep.subr.mxu0 %v7993_v23 }
 0x9eb   :  { %8921 = vmatpush3.msra.mxu0 %v7993_v23 }
 0x9ec   :  { %8922 = vmatprep.subr.mxu0 %v7992_v37 }
 0x9ed   :  { %8923 = vmatpush3.msra.mxu0 %v7992_v37 }
 0x9ee   :  { %8924 = vmatprep.subr.mxu0 %v7991_v14 }
 0x9ef   :  { %8925 = vmatpush3.msra.mxu0 %v7991_v14 }
 0x9f0   :  { %8926 = vmatprep.subr.mxu0 %v7990_v51 }
 0x9f1   :  { %8927 = vmatpush3.msra.mxu0 %v7990_v51 }
 0x9f2   :  { %8928 = vmatprep.subr.mxu0 %v7989_v6 }
 0x9f3   :  { %8929 = vmatpush3.msra.mxu0 %v7989_v6 }
 0x9f4   :  { %8930 = vmatprep.subr.mxu0 %v7988_v0 }
 0x9f5   :  { %8931 = vmatpush3.msra.mxu0 %v7988_v0 }
 0x9f6   :  { %8932 = vmatprep.subr.mxu0 %v7987_v32 }
 0x9f7   :  { %8933 = vmatpush3.msra.mxu0 %v7987_v32 }
 0x9f8   :  { %8934 = vmatprep.subr.mxu0 %v7986_v4 }
 0x9f9   :  { %8935 = vmatpush3.msra.mxu0 %v7986_v4 }
 0xa9a   :  { %v7927_v56 = vpop.f32.mrf.mxu0 }
 0xa9b   :  { %v7928_v62 = vadd.f32 %v7927_v56, %v7860_v15 }
 0xa9c   :  { %v8847_v33 = vpop.f32.mrf.mxu0 }
 0xa9d   :  { %v7931_v10 = vsub.f32 0.0, %v7928_v62 }
 0xa9f   :  { %v7932_v11 = vmul.f32 1.442695, %v7931_v10 }
 0xaa1   :  { %9114 = vpow2.f32 %v7932_v11 }
 0xaae   :  { %v9115_v45 = vpop.eup %9114 }
 0xaaf   :  { %v7934_v30 = vadd.f32 1.0, %v9115_v45 }
 0xab1   :  { %9116 = vrcp.f32 %v7934_v30 }
 0xabe   :  { %v9117_v24 = vpop.eup %9116 }
 0xabf   :  { %v7944_v27 = vrot.slane %v9117_v24, %v7943_v59 }
 0xac1   :  { %v7952_v26 = vrot.slane %v7944_v27, %v7943_v59  ;;  %v7945_v28 = vcombine.high %v7944_v27, %v7944_v27 }
 0xac3   :  { %v7963_v48 = vrot.slane %v7952_v26, %v13277_v61  ;;  %v7959_v41 = vrot.slane %v7945_v28, %v7943_v59 }
 0xac5   :  { %v7970_v35 = vmul.f32 %v7963_v48, %v12701_v25  ;;  %v7971_v63 = vmul.f32 %v7963_v48, %v12704_v54  ;;  %v7972_v44 = vmul.f32 %v7963_v48, %v12713_v16  ;;  %v7973_v7 = vmul.f32 %v7963_v48, %v12719_v3 }
 0xac6   :  { %v7974_v38 = vmul.f32 %v7963_v48, %v12725_v50  ;;  %v7975_v21 = vmul.f32 %v7963_v48, %v12731_v2  ;;  %v7967_v18 = vrot.slane %v7959_v41, %v13277_v61  ;;  %v7976_v25 = vmul.f32 %v7963_v48, %v12736_v5 }
 0xac7   :  { %8936 = vmatprep.mubr.f32.mxu0 %v7970_v35  ;;  %v7977_v54 = vmul.f32 %v7963_v48, %v12744_v36 }
 0xac8   :  { %8937 = vmatmul.mubr.f32.vlgmr.msra.gmra.mxu0 %v7971_v63  ;;  %v7978_v16 = vmul.f32 %v7967_v18, %v12754_v34  ;;  %v7979_v3 = vmul.f32 %v7967_v18, %v12757_v13  ;;  %v7980_v50 = vmul.f32 %v7967_v18, %v12762_v19  ;;  %v7981_v2 = vmul.f32 %v7967_v18, %v12769_v58  ;;  %v8882_v13 = vpop.f32.mrf.mxu1 }
 0xac9   :  { %8939 = vmatprep.mubr.f32.mxu0 %v7972_v44  ;;  %v7982_v53 = vmul.f32 %v7967_v18, %v12774_v17  ;;  %v7983_v5 = vmul.f32 %v7967_v18, %v12779_v29  ;;  %v7984_v36 = vmul.f32 %v7967_v18, %v12783_v47  ;;  %v7985_v34 = vmul.f32 %v7967_v18, %v12787_v31 }
 0xaca   :  { %v8084_v55 = vpop.f32.mrf.mxu1 }
 0xacc   :  { %8940 = vmatmul.mubr.f32.gmra.mxu0 %v7973_v7  ;;  %v8885_v19 = vpop.f32.mrf.mxu1 }
 0xacd   :  { %8942 = vmatprep.mubr.f32.mxu0 %v7974_v38 }
 0xace   :  { %v8094_v40 = vpop.f32.mrf.mxu1 }
 0xad0   :  { %8943 = vmatmul.mubr.f32.gmra.mxu0 %v7975_v21  ;;  %v8888_v60 = vpop.f32.mrf.mxu1 }
 0xad1   :  { %8945 = vmatprep.mubr.f32.mxu0 %v7976_v25 }
 0xad2   :  { %v8104_v58 = vpop.f32.mrf.mxu1 }
 0xad4   :  { %8946 = vmatmul.mubr.f32.gmra.mxu0 %v7977_v54  ;;  %v8891_v20 = vpop.f32.mrf.mxu1 }
 0xad5   :  { %8948 = vmatprep.mubr.f32.mxu0 %v7978_v16 }
 0xad6   :  { %v8114_v49 = vpop.f32.mrf.mxu1 }
 0xad8   :  { %8949 = vmatmul.mubr.f32.gmra.mxu0 %v7979_v3  ;;  %v8894_v39 = vpop.f32.mrf.mxu1 }
 0xad9   :  { %8951 = vmatprep.mubr.f32.mxu0 %v7980_v50 }
 0xada   :  { %v8124_v51 = vpop.f32.mrf.mxu1 }
 0xadc   :  { %8952 = vmatmul.mubr.f32.gmra.mxu0 %v7981_v2  ;;  %v8897_v46 = vpop.f32.mrf.mxu1 }
 0xadd   :  { %8954 = vmatprep.mubr.f32.mxu0 %v7982_v53 }
 0xade   :  { %v8134_v33 = vpop.f32.mrf.mxu1 }
 0xae0   :  { %8955 = vmatmul.mubr.f32.gmra.mxu0 %v7983_v5  ;;  %v8900_v30 = vpop.f32.mrf.mxu1 }
 0xae1   :  { %8957 = vmatprep.mubr.f32.mxu0 %v7984_v36 }
 0xae2   :  { %v8144_v59 = vpop.f32.mrf.mxu1 }
 0xae4   :  { %8958 = vmatmul.mubr.f32.gmra.mxu0 %v7985_v34  ;;  %v8903_v26 = vpop.f32.mrf.mxu1 }
 0xae6   :  { %v8154_v35 = vpop.f32.mrf.mxu1 }
 0xb88   :  { %v8938_v43 = vpop.f32.mrf.mxu0 }
 0xb89   :  { %v8235_v22 = vadd.f32 %v8938_v43, %v8882_v13 }
 0xb8a   :  { %v8229_v52 = vpop.f32.mrf.mxu0 }
 0xb8b   :  { %v8230_v17 = vadd.f32 %v8229_v52, %v8084_v55 }
 0xb8c   :  { %v8941_v1 = vpop.f32.mrf.mxu0 }
 0xb8d   :  { %8308 = vxpose.xlu0.b32.start [1/8] (short) (narrow) %v8230_v17, 32  ;;  %v8245_v37 = vadd.f32 %v8941_v1, %v8885_v19 }
 0xb8e   :  { %v8239_v29 = vpop.f32.mrf.mxu0 }
 0xb8f   :  { %v8240_v31 = vadd.f32 %v8239_v29, %v8094_v40 }
 0xb90   :  { %v8944_v47 = vpop.f32.mrf.mxu0 }
 0xb91   :  { %8309 = vxpose.xlu0.b32.cont [2/8] (short) (narrow) %v8235_v22, 32  ;;  %v8255_v15 = vadd.f32 %v8944_v47, %v8888_v60 }
 0xb92   :  { %v8249_v42 = vpop.f32.mrf.mxu0 }
 0xb93   :  { %v8250_v0 = vadd.f32 %v8249_v42, %v8104_v58 }
 0xb94   :  { %v8947_v8 = vpop.f32.mrf.mxu0 }
 0xb95   :  { %8310 = vxpose.xlu0.b32.cont [3/8] (short) (narrow) %v8240_v31, 32  ;;  %v8265_v12 = vadd.f32 %v8947_v8, %v8891_v20 }
 0xb96   :  { %v8259_v23 = vpop.f32.mrf.mxu0 }
 0xb97   :  { %v8260_v10 = vadd.f32 %v8259_v23, %v8114_v49 }
 0xb98   :  { %v8950_v14 = vpop.f32.mrf.mxu0 }
 0xb99   :  { %8311 = vxpose.xlu0.b32.cont [4/8] (short) (narrow) %v8245_v37, 32  ;;  %v8275_v56 = vadd.f32 %v8950_v14, %v8894_v39 }
 0xb9a   :  { %v8269_v6 = vpop.f32.mrf.mxu0 }
 0xb9b   :  { %v8270_v32 = vadd.f32 %v8269_v6, %v8124_v51 }
 0xb9c   :  { %v8953_v4 = vpop.f32.mrf.mxu0 }
 0xb9d   :  { %8312 = vxpose.xlu0.b32.cont [5/8] (short) (narrow) %v8250_v0, 32  ;;  %8345 = vxpose.xlu1.b32.start [1/8] (short) (narrow) %v8270_v32, 32  ;;  %v8285_v9 = vadd.f32 %v8953_v4, %v8897_v46 }
 0xb9e   :  { %v8279_v62 = vpop.f32.mrf.mxu0 }
 0xb9f   :  { %v8280_v11 = vadd.f32 %v8279_v62, %v8134_v33 }
 0xba0   :  { %v8956_v45 = vpop.f32.mrf.mxu0 }
 0xba1   :  { %8313 = vxpose.xlu0.b32.cont [6/8] (short) (narrow) %v8255_v15, 32  ;;  %8346 = vxpose.xlu1.b32.cont [2/8] (short) (narrow) %v8275_v56, 32  ;;  %v8295_v61 = vadd.f32 %v8956_v45, %v8900_v30 }
 0xba2   :  { %v8289_v57 = vpop.f32.mrf.mxu0 }
 0xba3   :  { %v8290_v24 = vadd.f32 %v8289_v57, %v8144_v59 }
 0xba4   :  { %v8959_v27 = vpop.f32.mrf.mxu0 }
 0xba5   :  { %8314 = vxpose.xlu0.b32.cont [7/8] (short) (narrow) %v8260_v10, 32  ;;  %8347 = vxpose.xlu1.b32.cont [3/8] (short) (narrow) %v8280_v11, 32  ;;  %v8305_v28 = vadd.f32 %v8959_v27, %v8903_v26 }
 0xba6   :  { %v8299_v48 = vpop.f32.mrf.mxu0 }
 0xba7   :  { %v8300_v63 = vadd.f32 %v8299_v48, %v8154_v35 }
 0xba9   :  { %8315 = vxpose.xlu0.b32.end [8/8] (short) (narrow) %v8265_v12, 32  ;;  %8348 = vxpose.xlu1.b32.cont [4/8] (short) (narrow) %v8285_v9, 32 }
 0xbad   :  { %8349 = vxpose.xlu1.b32.cont [5/8] (short) (narrow) %v8290_v24, 32 }
 0xbb1   :  { %8350 = vxpose.xlu1.b32.cont [6/8] (short) (narrow) %v8295_v61, 32 }
 0xbb5   :  { %8351 = vxpose.xlu1.b32.cont [7/8] (short) (narrow) %v8300_v63, 32 }
 0xbb9   :  { %8352 = vxpose.xlu1.b32.end [8/8] (short) (narrow) %v8305_v28, 32 }
 0xc09   :  { %v8324_v44 = vpop.trf.xlu0 }
 0xc0a   :  { %8341 = vst.msk [vmem:[%s12977_s4] sm:$0xff] %vm8340_vm15, %v8324_v44 }
 0xc0d   :  { %v8325_v7 = vpop.trf.xlu0 }
 0xc0e   :  { %8342 = vst.msk [vmem:[%s12977_s4 + $0x8] sm:$0xff] %vm8340_vm15, %v8325_v7 }
 0xc11   :  { %v8326_v41 = vpop.trf.xlu0 }
 0xc12   :  { %8343 = vst.msk [vmem:[%s12977_s4 + $0x10] sm:$0xff] %vm8340_vm15, %v8326_v41 }
 0xc15   :  { %v8327_v38 = vpop.trf.xlu0 }
 0xc16   :  { %8344 = vst.msk [vmem:[%s12977_s4 + $0x18] sm:$0xff] %vm8340_vm15, %v8327_v38 }
 0xc19   :  { %v8361_v21 = vpop.trf.xlu1 }
 0xc1a   :  { %8454 = vst.msk [vmem:[%s12977_s4 + $0x20] sm:$0xff] %vm8340_vm15, %v8361_v21 }
 0xc1d   :  { %v8362_v18 = vpop.trf.xlu1 }
 0xc1e   :  { %8455 = vst.msk [vmem:[%s12977_s4 + $0x28] sm:$0xff] %vm8340_vm15, %v8362_v18 }
 0xc21   :  { %v8363_v25 = vpop.trf.xlu1 }
 0xc22   :  { %8456 = vst.msk [vmem:[%s12977_s4 + $0x30] sm:$0xff] %vm8340_vm15, %v8363_v25 }
 0xc25   :  { %v8364_v54 = vpop.trf.xlu1 }
 0xc26   :  { %8457 = vst.msk [vmem:[%s12977_s4 + $0x38] sm:$0xff] %vm8340_vm15, %v8364_v54 }
 0xc27   :  { %8386 = vsyncpa [#allocation3], 1 }

</bundles_post_ra>
